<compile_context>
chip_gen: v7x
topology: tpu7x:2x2x1
jax: 0.10.0
libtpu: 0.0.40
codegen_flags: <defaults>
</compile_context>

<pallas_src>
import functools

import jax
import jax.numpy as jnp
from jax.experimental import pallas as pl
from jax.experimental.pallas import tpu as pltpu

_COMPUTE_DTYPE = jnp.bfloat16
# 48 MiB scoped VMEM: below v7x's 64 MiB physical, well above default scoped
# limits on v5e/v6e, and ~6x our largest per-call footprint.
_VMEM_LIMIT_BYTES = 48 * 1024 * 1024
# Conservative budget used when deciding whole-K tiles / fused bottleneck tails
# (includes double-buffering); keeps the kernels portable to v7x.
_VMEM_BUDGET_BYTES = 20 * 1024 * 1024


def _rup(n, m):
    return ((n + m - 1) // m) * m


# ----------------------------- Pallas kernels ------------------------------

def _mm_whole_k_kernel(x_ref, w_ref, b_ref, o_ref, *, relu):
    """Single-shot matmul (whole K resident): out = relu?(x @ w + b)."""
    acc = jnp.dot(x_ref[...], w_ref[...], preferred_element_type=jnp.float32)
    acc = acc + b_ref[...].astype(jnp.float32)
    if relu:
        acc = jnp.maximum(acc, 0.0)
    o_ref[...] = acc.astype(o_ref.dtype)


def _mm_split_k_kernel(x_ref, w_ref, b_ref, o_ref, acc_ref, *, relu):
    """K-tiled matmul with f32 accumulator scratch (fallback for huge K)."""
    @pl.when(pl.program_id(2) == 0)
    def _():
        acc_ref[...] = jnp.zeros_like(acc_ref)

    acc_ref[...] += jnp.dot(x_ref[...], w_ref[...],
                            preferred_element_type=jnp.float32)

    @pl.when(pl.program_id(2) == pl.num_programs(2) - 1)
    def _():
        r = acc_ref[...] + b_ref[...].astype(jnp.float32)
        if relu:
            r = jnp.maximum(r, 0.0)
        o_ref[...] = r.astype(o_ref.dtype)


def _bottleneck_tail_kernel(cols_ref, w2_ref, b2_ref, w3_ref, b3_ref,
                            res_ref, o_ref):
    """Fused conv2(3x3, as matmul over im2col cols) + ReLU + conv3(1x1)
    + residual + ReLU.  The conv2 output stays in VMEM/vregs."""
    t = jnp.dot(cols_ref[...], w2_ref[...], preferred_element_type=jnp.float32)
    t = jnp.maximum(t + b2_ref[...].astype(jnp.float32), 0.0)
    o = jnp.dot(t.astype(o_ref.dtype), w3_ref[...],
                preferred_element_type=jnp.float32)
    o = o + b3_ref[...].astype(jnp.float32) + res_ref[...].astype(jnp.float32)
    o_ref[...] = jnp.maximum(o, 0.0).astype(o_ref.dtype)


def _avgpool_kernel(x_ref, o_ref):
    # x: (B, H*W, C) -> (B, C)   (AdaptiveAvgPool2d(1) + squeeze, f32 accumulate)
    inv = 1.0 / x_ref.shape[1]
    o_ref[...] = jnp.sum(x_ref[...].astype(jnp.float32), axis=1) * inv


# ---------------------------- Pallas wrappers -------------------------------

def fused_matmul(x, w, b, relu=True):
    """out = relu?(x @ w + b) on the MXU.

    Whole-K tiles (no K grid axis, no accumulator round-trip) whenever the
    double-buffered footprint fits the VMEM budget; split-K fallback otherwise.
    bf16 inputs, f32 accumulation.  M is padded to sublane-packed tiles and the
    padding is sliced off the result.
    """
    M, K = x.shape
    K2, N = w.shape
    assert K == K2 and b.shape == (1, N)

    x = x.astype(_COMPUTE_DTYPE)
    w = w.astype(_COMPUTE_DTYPE)
    b = b.astype(jnp.float32)

    # bf16 packs 16 rows per vreg -> align tm to 16.
    tm = min(256, _rup(M, 16))
    M_pad = _rup(M, tm)

    # Lane-dense N tiles; all ResNet-50 channel counts are multiples of 64,
    # a 64-wide full-dim block is legal for the layer1 tensors.
    if N % 256 == 0:
        tn = 256
    elif N % 128 == 0:
        tn = 128
    else:
        tn = N

    # v7x megacore: make sure there are >= 2 parallel grid blocks when possible.
    if M_pad // tm == 1 and N // tn == 1:
        if N % 256 == 0:
            tn = 128
        elif M_pad % 32 == 0:
            tm = M_pad // 2

    # Contraction dim: only pad to a sublane multiple (stem 147 -> 152);
    # no 128-padding of channels anywhere.
    K_pad = _rup(K, 8)
    fp_whole = (4 * (tm * K_pad + K_pad * tn)      # x, w double-buffered bf16
                + 8 * tn                           # bias
                + 4 * tm * tn                      # output double-buffered bf16
                + 4 * tm * tn)                     # f32 result value
    whole_k = fp_whole <= _VMEM_BUDGET_BYTES

    tk = None
    if not whole_k:
        K_pad = _rup(K, 128)
        tk = 128
        for cand in (2048, 1024, 512, 256, 128):
            if K_pad % cand == 0 and (4 * (tm * cand + cand * tn) + 8 * tn
                                      + 8 * tm * tn) <= _VMEM_BUDGET_BYTES:
                tk = cand
                break

    if (M_pad, K_pad) != (M, K):
        x = jnp.pad(x, ((0, M_pad - M), (0, K_pad - K)))
    if K_pad != K:
        w = jnp.pad(w, ((0, K_pad - K), (0, 0)))

    cost = pl.CostEstimate(
        flops=2 * M_pad * N * K_pad,
        transcendentals=0,
        bytes_accessed=(x.size + w.size) * 2 + b.size * 4 + M_pad * N * 2)

    if whole_k:
        out = pl.pallas_call(
            functools.partial(_mm_whole_k_kernel, relu=relu),
            out_shape=jax.ShapeDtypeStruct((M_pad, N), _COMPUTE_DTYPE),
            grid_spec=pltpu.PrefetchScalarGridSpec(
                num_scalar_prefetch=0,
                grid=(M_pad // tm, N // tn),
                in_specs=[
                    pl.BlockSpec((tm, K_pad), lambda i, j: (i, 0)),
                    pl.BlockSpec((K_pad, tn), lambda i, j: (0, j)),
                    pl.BlockSpec((1, tn), lambda i, j: (0, j)),
                ],
                out_specs=pl.BlockSpec((tm, tn), lambda i, j: (i, j)),
            ),
            compiler_params=pltpu.CompilerParams(
                dimension_semantics=("parallel", "parallel"),
                vmem_limit_bytes=_VMEM_LIMIT_BYTES,
            ),
            cost_estimate=cost,
        )(x, w, b)
    else:
        out = pl.pallas_call(
            functools.partial(_mm_split_k_kernel, relu=relu),
            out_shape=jax.ShapeDtypeStruct((M_pad, N), _COMPUTE_DTYPE),
            grid_spec=pltpu.PrefetchScalarGridSpec(
                num_scalar_prefetch=0,
                grid=(M_pad // tm, N // tn, K_pad // tk),
                in_specs=[
                    pl.BlockSpec((tm, tk), lambda i, j, k: (i, k)),
                    pl.BlockSpec((tk, tn), lambda i, j, k: (k, j)),
                    pl.BlockSpec((1, tn), lambda i, j, k: (0, j)),
                ],
                out_specs=pl.BlockSpec((tm, tn), lambda i, j, k: (i, j)),
                scratch_shapes=[pltpu.VMEM((tm, tn), jnp.float32)],
            ),
            compiler_params=pltpu.CompilerParams(
                dimension_semantics=("parallel", "parallel", "arbitrary"),
                vmem_limit_bytes=_VMEM_LIMIT_BYTES,
            ),
            cost_estimate=cost,
        )(x, w, b)

    return out[:M] if M_pad != M else out


def bottleneck_tail(cols, w2, b2, w3, b3, residual):
    """relu( relu(cols @ w2 + b2) @ w3 + b3 + residual ) in ONE pallas_call.

    cols: (M, 9*planes) im2col columns of the conv1 output for the 3x3 conv.
    Both weight matrices stay resident in VMEM; the grid is 1-D over rows.
    """
    M, K2 = cols.shape
    P = w2.shape[1]
    N3 = w3.shape[1]
    assert w2.shape == (K2, P) and w3.shape == (P, N3)
    assert b2.shape == (1, P) and b3.shape == (1, N3)
    assert residual.shape == (M, N3)

    tm = min(256, _rup(M, 16))
    M_pad = _rup(M, tm)

    fp = (4 * (tm * K2 + K2 * P + P * N3 + tm * N3)   # double-buffered bf16 inputs
          + 8 * (P + N3)                              # biases
          + 4 * tm * N3                               # double-buffered bf16 output
          + 4 * tm * (P + N3))                        # f32 intermediates
    if fp > _VMEM_BUDGET_BYTES:
        # VMEM guard (never hit for ResNet-50 through layer3): fall back to two
        # tiled matmuls with the residual + ReLU applied at the XLA level.
        t = fused_matmul(cols, w2, b2, relu=True)
        o = fused_matmul(t, w3, b3, relu=False)
        return jnp.maximum(o + residual.astype(o.dtype), 0).astype(_COMPUTE_DTYPE)

    cols = cols.astype(_COMPUTE_DTYPE)
    residual = residual.astype(_COMPUTE_DTYPE)
    if M_pad != M:
        cols = jnp.pad(cols, ((0, M_pad - M), (0, 0)))
        residual = jnp.pad(residual, ((0, M_pad - M), (0, 0)))

    cost = pl.CostEstimate(
        flops=2 * M_pad * (K2 * P + P * N3),
        transcendentals=0,
        bytes_accessed=(cols.size + w2.size + w3.size + residual.size) * 2
                       + (b2.size + b3.size) * 4 + M_pad * N3 * 2)

    out = pl.pallas_call(
        _bottleneck_tail_kernel,
        out_shape=jax.ShapeDtypeStruct((M_pad, N3), _COMPUTE_DTYPE),
        grid_spec=pltpu.PrefetchScalarGridSpec(
            num_scalar_prefetch=0,
            grid=(M_pad // tm,),
            in_specs=[
                pl.BlockSpec((tm, K2), lambda i: (i, 0)),
                pl.BlockSpec((K2, P), lambda i: (0, 0)),
                pl.BlockSpec((1, P), lambda i: (0, 0)),
                pl.BlockSpec((P, N3), lambda i: (0, 0)),
                pl.BlockSpec((1, N3), lambda i: (0, 0)),
                pl.BlockSpec((tm, N3), lambda i: (i, 0)),
            ],
            out_specs=pl.BlockSpec((tm, N3), lambda i: (i, 0)),
        ),
        compiler_params=pltpu.CompilerParams(
            dimension_semantics=("parallel",),
            vmem_limit_bytes=_VMEM_LIMIT_BYTES,
        ),
        cost_estimate=cost,
    )(cols, w2.astype(_COMPUTE_DTYPE), b2.astype(jnp.float32),
      w3.astype(_COMPUTE_DTYPE), b3.astype(jnp.float32), residual)

    return out[:M] if M_pad != M else out


def global_avgpool(x_bhwc):
    """(B, H, W, C) -> (B, C) f32 : AdaptiveAvgPool2d(1) + squeeze, one block."""
    B, H, W, C = x_bhwc.shape
    x = x_bhwc.reshape(B, H * W, C)
    return pl.pallas_call(
        _avgpool_kernel,
        out_shape=jax.ShapeDtypeStruct((B, C), jnp.float32),
        grid_spec=pltpu.PrefetchScalarGridSpec(
            num_scalar_prefetch=0,
            grid=(1,),
            in_specs=[pl.BlockSpec((B, H * W, C), lambda i: (0, 0, 0))],
            out_specs=pl.BlockSpec((B, C), lambda i: (0, 0)),
        ),
        compiler_params=pltpu.CompilerParams(
            dimension_semantics=("arbitrary",),
            vmem_limit_bytes=_VMEM_LIMIT_BYTES,
        ),
    )(x)


# ----------------------------- glue (plain JAX) ------------------------------

def _im2col(x, kh, kw, stride, pad):
    """x: (B,H,W,C) NHWC -> (B*Ho*Wo, kh*kw*C), Ho, Wo  (tap-major, channel-minor)."""
    B, H, W, C = x.shape
    xp = jnp.pad(x, ((0, 0), (pad, pad), (pad, pad), (0, 0)))
    Ho = (H + 2 * pad - kh) // stride + 1
    Wo = (W + 2 * pad - kw) // stride + 1
    cols = []
    for di in range(kh):
        for dj in range(kw):
            cols.append(xp[:, di:di + stride * Ho:stride,
                           dj:dj + stride * Wo:stride, :])
    patches = jnp.stack(cols, axis=3)          # (B, Ho, Wo, kh*kw, C)
    return patches.reshape(B * Ho * Wo, kh * kw * C), Ho, Wo


def conv1x1(x, w, b, stride=1, relu=True):
    """1x1 conv (folded BN) as a single whole-K Pallas matmul."""
    B, H, W, C = x.shape
    xs = x[:, ::stride, ::stride, :] if stride > 1 else x
    Ho, Wo = xs.shape[1], xs.shape[2]
    out = fused_matmul(xs.reshape(B * Ho * Wo, C), w, b, relu=relu)
    return out.reshape(B, Ho, Wo, w.shape[1])


def maxpool_3x3_s2_p1(x):
    """3x3/s2/p1 max-pool as a running max over 9 strided views (XLA-fused,
    no 9x materialized window tensor)."""
    B, H, W, C = x.shape
    neg = float(jnp.finfo(x.dtype).min)
    xp = jnp.pad(x, ((0, 0), (1, 1), (1, 1), (0, 0)), constant_values=neg)
    Ho = (H + 2 - 3) // 2 + 1
    Wo = (W + 2 - 3) // 2 + 1
    out = None
    for di in range(3):
        for dj in range(3):
            v = xp[:, di:di + 2 * Ho:2, dj:dj + 2 * Wo:2, :]
            out = v if out is None else jnp.maximum(out, v)
    return out


# ------------------------- ResNet-50 (through layer3) ------------------------

def _conv_bn_params(key, kh, kw, cin, cout):
    """Synthetic folded conv+BN weights at the REAL channel counts (no padding).

    Returns w: (kh*kw*cin, cout) bf16 (tap-major, channel-minor rows) and
    b: (1, cout) f32.
    """
    k1, k2, k3, k4, k5 = jax.random.split(key, 5)
    fan_in = kh * kw * cin
    w = jax.random.normal(k1, (kh * kw, cin, cout),
                          jnp.float32) * (2.0 / fan_in) ** 0.5
    gamma = 1.0 + 0.01 * jax.random.normal(k2, (cout,), jnp.float32)
    beta = 0.01 * jax.random.normal(k3, (cout,), jnp.float32)
    mean = 0.01 * jax.random.normal(k4, (cout,), jnp.float32)
    var = 1.0 + 0.01 * jnp.abs(jax.random.normal(k5, (cout,), jnp.float32))
    scale = gamma / jnp.sqrt(var + 1e-5)
    w_fold = (w * scale[None, None, :]).reshape(kh * kw * cin, cout)
    b_fold = (beta - mean * scale).reshape(1, cout)
    return w_fold.astype(_COMPUTE_DTYPE), b_fold.astype(jnp.float32)


def make_resnet50_params(seed=0):
    key = jax.random.PRNGKey(seed)

    def nxt():
        nonlocal key
        key, sub = jax.random.split(key)
        return sub

    params = {"stem": _conv_bn_params(nxt(), 7, 7, 3, 64)}
    cin = 64
    cfg = [(3, 64, 1), (4, 128, 2), (6, 256, 2)]      # layer1..layer3
    for li, (blocks, planes, stride) in enumerate(cfg, start=1):
        layer = []
        cout = planes * 4
        for bi in range(blocks):
            s = stride if bi == 0 else 1
            blk = {
                "conv1": _conv_bn_params(nxt(), 1, 1, cin, planes),
                "conv2": _conv_bn_params(nxt(), 3, 3, planes, planes),
                "conv3": _conv_bn_params(nxt(), 1, 1, planes, cout),
                "stride": s,
            }
            if bi == 0 and (s != 1 or cin != cout):
                blk["down"] = _conv_bn_params(nxt(), 1, 1, cin, cout)
            layer.append(blk)
            cin = cout
        params[f"layer{li}"] = layer
    return params


def bottleneck(x, blk):
    s = blk["stride"]
    B = x.shape[0]
    if "down" in blk:
        identity = conv1x1(x, *blk["down"], stride=s, relu=False)
    else:
        identity = x
    # conv1 1x1 + BN + ReLU (one pallas_call)
    out1 = conv1x1(x, *blk["conv1"], stride=1, relu=True)
    # conv2 3x3 + BN + ReLU + conv3 1x1 + BN + residual + ReLU (one pallas_call)
    cols, Ho, Wo = _im2col(out1, 3, 3, s, 1)
    w2, b2 = blk["conv2"]
    w3, b3 = blk["conv3"]
    res2d = identity.reshape(B * Ho * Wo, identity.shape[-1])
    out = bottleneck_tail(cols, w2, b2, w3, b3, res2d)
    return out.reshape(B, Ho, Wo, w3.shape[1])


def timm_cnn_encoder_forward(x_nchw, params):
    """Equivalent of TimmCNNEncoder.forward: returns (B, 1024) float32."""
    x = jnp.transpose(x_nchw, (0, 2, 3, 1)).astype(_COMPUTE_DTYPE)  # NCHW->NHWC
    B = x.shape[0]
    # stem: conv7x7 s2 + BN + ReLU (one pallas_call), maxpool 3x3 s2
    w, b = params["stem"]
    cols, Ho, Wo = _im2col(x, 7, 7, 2, 3)
    x = fused_matmul(cols, w, b, relu=True).reshape(B, Ho, Wo, w.shape[1])
    x = maxpool_3x3_s2_p1(x)
    # layer1..layer3  (features_only, out_indices=(3,) -> layer3 output)
    for li in (1, 2, 3):
        for blk in params[f"layer{li}"]:
            x = bottleneck(x, blk)
    # AdaptiveAvgPool2d(1) + squeeze(-1).squeeze(-1)
    return global_avgpool(x)


# ----------------------------------- main ------------------------------------

if __name__ == "__main__":
    params = make_resnet50_params(seed=0)
    x = jax.random.normal(jax.random.PRNGKey(0), (2, 3, 32, 32), jnp.float32)

    # Single top-level jit; params are closed over so strides / structure stay
    # static and all Pallas calls are dispatched from one XLA program.
    fwd = jax.jit(lambda inp: timm_cnn_encoder_forward(inp, params))
    feats = jax.block_until_ready(fwd(x))

    assert feats.shape == (2, 1024), feats.shape
    assert bool(jnp.all(jnp.isfinite(feats)))
    print("KERNEL_OK")
</pallas_src>

<mosaic_0001>
module attributes {stable_mosaic.version = 11 : i64} {
  func.func @_mm_whole_k_kernel(%arg0: i32, %arg1: i32, %arg2: memref<256x152xbf16, #tpu.memory_space<vmem>>, %arg3: memref<152x64xbf16, #tpu.memory_space<vmem>>, %arg4: memref<1x64xf32, #tpu.memory_space<vmem>>, %arg5: memref<256x64xbf16, #tpu.memory_space<vmem>>) attributes {dimension_semantics = [#tpu.dimension_semantics<parallel>, #tpu.dimension_semantics<parallel>], iteration_bounds = array<i64: 2, 1>, scalar_prefetch = 0 : i64, scratch_operands = 0 : i64, tpu.core_type = #tpu.core_type<tc>, window_params = [{transform_indices = @transform_0, window_bounds = array<i64: 256, 152>}, {transform_indices = @transform_1, window_bounds = array<i64: 152, 64>}, {transform_indices = @transform_2, window_bounds = array<i64: 1, 64>}, {transform_indices = @transform_3, window_bounds = array<i64: 256, 64>}]} {
    %c0 = arith.constant 0 : index
    %c0_0 = arith.constant 0 : index
    %0 = vector.load %arg2[%c0, %c0_0] : memref<256x152xbf16, #tpu.memory_space<vmem>>, vector<256x152xbf16>
    %c0_1 = arith.constant 0 : index
    %c0_2 = arith.constant 0 : index
    %1 = vector.load %arg3[%c0_1, %c0_2] : memref<152x64xbf16, #tpu.memory_space<vmem>>, vector<152x64xbf16>
    %cst = arith.constant dense<0.000000e+00> : vector<256x64xf32>
    %2 = tpu.matmul %0, %1, %cst {dimension_numbers = #tpu.dot_dimension_numbers<[1], [0], [0], [1], [0, 0, 1, 1], [], []>} : vector<256x152xbf16>, vector<152x64xbf16>, vector<256x64xf32> -> vector<256x64xf32>
    %c0_3 = arith.constant 0 : index
    %c0_4 = arith.constant 0 : index
    %3 = vector.load %arg4[%c0_3, %c0_4] : memref<1x64xf32, #tpu.memory_space<vmem>>, vector<1x64xf32>
    %4 = vector.broadcast %3 : vector<1x64xf32> to vector<256x64xf32>
    %5 = arith.addf %2, %4 : vector<256x64xf32>
    %cst_5 = arith.constant 0.000000e+00 : f32
    %6 = vector.broadcast %cst_5 : f32 to vector<256x64xf32>
    %7 = arith.maximumf %5, %6 : vector<256x64xf32>
    %8 = arith.truncf %7 : vector<256x64xf32> to vector<256x64xbf16>
    %c0_6 = arith.constant 0 : index
    %c0_7 = arith.constant 0 : index
    %9 = vector.load %arg5[%c0_6, %c0_7] : memref<256x64xbf16, #tpu.memory_space<vmem>>, vector<256x64xbf16>
    tpu.vector_store %arg5[%c0_6, %c0_7], %8 {strides = array<i32>} : memref<256x64xbf16, #tpu.memory_space<vmem>>, vector<256x64xbf16>,
    return
  }
  func.func @transform_0(%arg0: i32, %arg1: i32) -> (i32, i32) {
    %c0_i32 = arith.constant 0 : i32
    %c0_i32_0 = arith.constant 0 : i32
    return %arg0, %c0_i32 : i32, i32
  }
  func.func @transform_1(%arg0: i32, %arg1: i32) -> (i32, i32) {
    %c0_i32 = arith.constant 0 : i32
    %c0_i32_0 = arith.constant 0 : i32
    return %c0_i32, %arg1 : i32, i32
  }
  func.func @transform_2(%arg0: i32, %arg1: i32) -> (i32, i32) {
    %c0_i32 = arith.constant 0 : i32
    %c0_i32_0 = arith.constant 0 : i32
    return %c0_i32, %arg1 : i32, i32
  }
  func.func @transform_3(%arg0: i32, %arg1: i32) -> (i32, i32) {
    %c0_i32 = arith.constant 0 : i32
    return %arg0, %arg1 : i32, i32
  }
}

module attributes {stable_mosaic.version = 11 : i64} {
  func.func @_mm_whole_k_kernel(%arg0: i32, %arg1: i32, %arg2: memref<64x64xbf16, #tpu.memory_space<vmem>>, %arg3: memref<64x64xbf16, #tpu.memory_space<vmem>>, %arg4: memref<1x64xf32, #tpu.memory_space<vmem>>, %arg5: memref<64x64xbf16, #tpu.memory_space<vmem>>) attributes {dimension_semantics = [#tpu.dimension_semantics<parallel>, #tpu.dimension_semantics<parallel>], iteration_bounds = array<i64: 2, 1>, scalar_prefetch = 0 : i64, scratch_operands = 0 : i64, tpu.core_type = #tpu.core_type<tc>, window_params = [{transform_indices = @transform_0, window_bounds = array<i64: 64, 64>}, {transform_indices = @transform_1, window_bounds = array<i64: 64, 64>}, {transform_indices = @transform_2, window_bounds = array<i64: 1, 64>}, {transform_indices = @transform_3, window_bounds = array<i64: 64, 64>}]} {
    %c0 = arith.constant 0 : index
    %c0_0 = arith.constant 0 : index
    %0 = vector.load %arg2[%c0, %c0_0] : memref<64x64xbf16, #tpu.memory_space<vmem>>, vector<64x64xbf16>
    %c0_1 = arith.constant 0 : index
    %c0_2 = arith.constant 0 : index
    %1 = vector.load %arg3[%c0_1, %c0_2] : memref<64x64xbf16, #tpu.memory_space<vmem>>, vector<64x64xbf16>
    %cst = arith.constant dense<0.000000e+00> : vector<64x64xf32>
    %2 = tpu.matmul %0, %1, %cst {dimension_numbers = #tpu.dot_dimension_numbers<[1], [0], [0], [1], [0, 0, 1, 1], [], []>} : vector<64x64xbf16>, vector<64x64xbf16>, vector<64x64xf32> -> vector<64x64xf32>
    %c0_3 = arith.constant 0 : index
    %c0_4 = arith.constant 0 : index
    %3 = vector.load %arg4[%c0_3, %c0_4] : memref<1x64xf32, #tpu.memory_space<vmem>>, vector<1x64xf32>
    %4 = vector.broadcast %3 : vector<1x64xf32> to vector<64x64xf32>
    %5 = arith.addf %2, %4 : vector<64x64xf32>
    %cst_5 = arith.constant 0.000000e+00 : f32
    %6 = vector.broadcast %cst_5 : f32 to vector<64x64xf32>
    %7 = arith.maximumf %5, %6 : vector<64x64xf32>
    %8 = arith.truncf %7 : vector<64x64xf32> to vector<64x64xbf16>
    %c0_6 = arith.constant 0 : index
    %c0_7 = arith.constant 0 : index
    %9 = vector.load %arg5[%c0_6, %c0_7] : memref<64x64xbf16, #tpu.memory_space<vmem>>, vector<64x64xbf16>
    tpu.vector_store %arg5[%c0_6, %c0_7], %8 {strides = array<i32>} : memref<64x64xbf16, #tpu.memory_space<vmem>>, vector<64x64xbf16>,
    return
  }
  func.func @transform_0(%arg0: i32, %arg1: i32) -> (i32, i32) {
    %c0_i32 = arith.constant 0 : i32
    %c0_i32_0 = arith.constant 0 : i32
    return %arg0, %c0_i32 : i32, i32
  }
  func.func @transform_1(%arg0: i32, %arg1: i32) -> (i32, i32) {
    %c0_i32 = arith.constant 0 : i32
    %c0_i32_0 = arith.constant 0 : i32
    return %c0_i32, %arg1 : i32, i32
  }
  func.func @transform_2(%arg0: i32, %arg1: i32) -> (i32, i32) {
    %c0_i32 = arith.constant 0 : i32
    %c0_i32_0 = arith.constant 0 : i32
    return %c0_i32, %arg1 : i32, i32
  }
  func.func @transform_3(%arg0: i32, %arg1: i32) -> (i32, i32) {
    %c0_i32 = arith.constant 0 : i32
    return %arg0, %arg1 : i32, i32
  }
}

module attributes {stable_mosaic.version = 11 : i64} {
  func.func @_mm_whole_k_kernel(%arg0: i32, %arg1: i32, %arg2: memref<128x64xbf16, #tpu.memory_space<vmem>>, %arg3: memref<64x128xbf16, #tpu.memory_space<vmem>>, %arg4: memref<1x128xf32, #tpu.memory_space<vmem>>, %arg5: memref<128x128xbf16, #tpu.memory_space<vmem>>) attributes {dimension_semantics = [#tpu.dimension_semantics<parallel>, #tpu.dimension_semantics<parallel>], iteration_bounds = array<i64: 1, 2>, scalar_prefetch = 0 : i64, scratch_operands = 0 : i64, tpu.core_type = #tpu.core_type<tc>, window_params = [{transform_indices = @transform_0, window_bounds = array<i64: 128, 64>}, {transform_indices = @transform_1, window_bounds = array<i64: 64, 128>}, {transform_indices = @transform_2, window_bounds = array<i64: 1, 128>}, {transform_indices = @transform_3, window_bounds = array<i64: 128, 128>}]} {
    %c0 = arith.constant 0 : index
    %c0_0 = arith.constant 0 : index
    %0 = vector.load %arg2[%c0, %c0_0] : memref<128x64xbf16, #tpu.memory_space<vmem>>, vector<128x64xbf16>
    %c0_1 = arith.constant 0 : index
    %c0_2 = arith.constant 0 : index
    %1 = vector.load %arg3[%c0_1, %c0_2] : memref<64x128xbf16, #tpu.memory_space<vmem>>, vector<64x128xbf16>
    %cst = arith.constant dense<0.000000e+00> : vector<128x128xf32>
    %2 = tpu.matmul %0, %1, %cst {dimension_numbers = #tpu.dot_dimension_numbers<[1], [0], [0], [1], [0, 0, 1, 1], [], []>} : vector<128x64xbf16>, vector<64x128xbf16>, vector<128x128xf32> -> vector<128x128xf32>
    %c0_3 = arith.constant 0 : index
    %c0_4 = arith.constant 0 : index
    %3 = vector.load %arg4[%c0_3, %c0_4] : memref<1x128xf32, #tpu.memory_space<vmem>>, vector<1x128xf32>
    %4 = vector.broadcast %3 : vector<1x128xf32> to vector<128x128xf32>
    %5 = arith.addf %2, %4 : vector<128x128xf32>
    %6 = arith.truncf %5 : vector<128x128xf32> to vector<128x128xbf16>
    %c0_5 = arith.constant 0 : index
    %c0_6 = arith.constant 0 : index
    %7 = vector.load %arg5[%c0_5, %c0_6] : memref<128x128xbf16, #tpu.memory_space<vmem>>, vector<128x128xbf16>
    tpu.vector_store %arg5[%c0_5, %c0_6], %6 {strides = array<i32>} : memref<128x128xbf16, #tpu.memory_space<vmem>>, vector<128x128xbf16>,
    return
  }
  func.func @transform_0(%arg0: i32, %arg1: i32) -> (i32, i32) {
    %c0_i32 = arith.constant 0 : i32
    %c0_i32_0 = arith.constant 0 : i32
    return %arg0, %c0_i32 : i32, i32
  }
  func.func @transform_1(%arg0: i32, %arg1: i32) -> (i32, i32) {
    %c0_i32 = arith.constant 0 : i32
    %c0_i32_0 = arith.constant 0 : i32
    return %c0_i32, %arg1 : i32, i32
  }
  func.func @transform_2(%arg0: i32, %arg1: i32) -> (i32, i32) {
    %c0_i32 = arith.constant 0 : i32
    %c0_i32_0 = arith.constant 0 : i32
    return %c0_i32, %arg1 : i32, i32
  }
  func.func @transform_3(%arg0: i32, %arg1: i32) -> (i32, i32) {
    %c0_i32 = arith.constant 0 : i32
    return %arg0, %arg1 : i32, i32
  }
}

module attributes {stable_mosaic.version = 11 : i64} {
  func.func @_bottleneck_tail_kernel(%arg0: i32, %arg1: memref<128x576xbf16, #tpu.memory_space<vmem>>, %arg2: memref<576x64xbf16, #tpu.memory_space<vmem>>, %arg3: memref<1x64xf32, #tpu.memory_space<vmem>>, %arg4: memref<64x256xbf16, #tpu.memory_space<vmem>>, %arg5: memref<1x256xf32, #tpu.memory_space<vmem>>, %arg6: memref<128x256xbf16, #tpu.memory_space<vmem>>, %arg7: memref<128x256xbf16, #tpu.memory_space<vmem>>) attributes {dimension_semantics = [#tpu.dimension_semantics<parallel>], iteration_bounds = array<i64: 1>, scalar_prefetch = 0 : i64, scratch_operands = 0 : i64, tpu.core_type = #tpu.core_type<tc>, window_params = [{transform_indices = @transform_0, window_bounds = array<i64: 128, 576>}, {pipeline_mode = #tpu.pipeline_mode<synchronous>, transform_indices = @transform_1, window_bounds = array<i64: 576, 64>}, {pipeline_mode = #tpu.pipeline_mode<synchronous>, transform_indices = @transform_2, window_bounds = array<i64: 1, 64>}, {pipeline_mode = #tpu.pipeline_mode<synchronous>, transform_indices = @transform_3, window_bounds = array<i64: 64, 256>}, {pipeline_mode = #tpu.pipeline_mode<synchronous>, transform_indices = @transform_4, window_bounds = array<i64: 1, 256>}, {transform_indices = @transform_5, window_bounds = array<i64: 128, 256>}, {transform_indices = @transform_6, window_bounds = array<i64: 128, 256>}]} {
    %c0 = arith.constant 0 : index
    %c0_0 = arith.constant 0 : index
    %0 = vector.load %arg1[%c0, %c0_0] : memref<128x576xbf16, #tpu.memory_space<vmem>>, vector<128x576xbf16>
    %c0_1 = arith.constant 0 : index
    %c0_2 = arith.constant 0 : index
    %1 = vector.load %arg2[%c0_1, %c0_2] : memref<576x64xbf16, #tpu.memory_space<vmem>>, vector<576x64xbf16>
    %cst = arith.constant dense<0.000000e+00> : vector<128x64xf32>
    %2 = tpu.matmul %0, %1, %cst {dimension_numbers = #tpu.dot_dimension_numbers<[1], [0], [0], [1], [0, 0, 1, 1], [], []>} : vector<128x576xbf16>, vector<576x64xbf16>, vector<128x64xf32> -> vector<128x64xf32>
    %c0_3 = arith.constant 0 : index
    %c0_4 = arith.constant 0 : index
    %3 = vector.load %arg3[%c0_3, %c0_4] : memref<1x64xf32, #tpu.memory_space<vmem>>, vector<1x64xf32>
    %4 = vector.broadcast %3 : vector<1x64xf32> to vector<128x64xf32>
    %5 = arith.addf %2, %4 : vector<128x64xf32>
    %cst_5 = arith.constant 0.000000e+00 : f32
    %6 = vector.broadcast %cst_5 : f32 to vector<128x64xf32>
    %7 = arith.maximumf %5, %6 : vector<128x64xf32>
    %8 = arith.truncf %7 : vector<128x64xf32> to vector<128x64xbf16>
    %c0_6 = arith.constant 0 : index
    %c0_7 = arith.constant 0 : index
    %9 = vector.load %arg4[%c0_6, %c0_7] : memref<64x256xbf16, #tpu.memory_space<vmem>>, vector<64x256xbf16>
    %cst_8 = arith.constant dense<0.000000e+00> : vector<128x256xf32>
    %10 = tpu.matmul %8, %9, %cst_8 {dimension_numbers = #tpu.dot_dimension_numbers<[1], [0], [0], [1], [0, 0, 1, 1], [], []>} : vector<128x64xbf16>, vector<64x256xbf16>, vector<128x256xf32> -> vector<128x256xf32>
    %c0_9 = arith.constant 0 : index
    %c0_10 = arith.constant 0 : index
    %11 = vector.load %arg5[%c0_9, %c0_10] : memref<1x256xf32, #tpu.memory_space<vmem>>, vector<1x256xf32>
    %12 = vector.broadcast %11 : vector<1x256xf32> to vector<128x256xf32>
    %13 = arith.addf %10, %12 : vector<128x256xf32>
    %c0_11 = arith.constant 0 : index
    %c0_12 = arith.constant 0 : index
    %14 = vector.load %arg6[%c0_11, %c0_12] : memref<128x256xbf16, #tpu.memory_space<vmem>>, vector<128x256xbf16>
    %15 = arith.extf %14 : vector<128x256xbf16> to vector<128x256xf32>
    %16 = arith.addf %13, %15 : vector<128x256xf32>
    %cst_13 = arith.constant 0.000000e+00 : f32
    %17 = vector.broadcast %cst_13 : f32 to vector<128x256xf32>
    %18 = arith.maximumf %16, %17 : vector<128x256xf32>
    %19 = arith.truncf %18 : vector<128x256xf32> to vector<128x256xbf16>
    %c0_14 = arith.constant 0 : index
    %c0_15 = arith.constant 0 : index
    %20 = vector.load %arg7[%c0_14, %c0_15] : memref<128x256xbf16, #tpu.memory_space<vmem>>, vector<128x256xbf16>
    tpu.vector_store %arg7[%c0_14, %c0_15], %19 {strides = array<i32>} : memref<128x256xbf16, #tpu.memory_space<vmem>>, vector<128x256xbf16>,
    return
  }
  func.func @transform_0(%arg0: i32) -> (i32, i32) {
    %c0_i32 = arith.constant 0 : i32
    %c0_i32_0 = arith.constant 0 : i32
    return %arg0, %c0_i32 : i32, i32
  }
  func.func @transform_1(%arg0: i32) -> (i32, i32) {
    %c0_i32 = arith.constant 0 : i32
    %c0_i32_0 = arith.constant 0 : i32
    %c0_i32_1 = arith.constant 0 : i32
    return %c0_i32, %c0_i32_0 : i32, i32
  }
  func.func @transform_2(%arg0: i32) -> (i32, i32) {
    %c0_i32 = arith.constant 0 : i32
    %c0_i32_0 = arith.constant 0 : i32
    %c0_i32_1 = arith.constant 0 : i32
    return %c0_i32, %c0_i32_0 : i32, i32
  }
  func.func @transform_3(%arg0: i32) -> (i32, i32) {
    %c0_i32 = arith.constant 0 : i32
    %c0_i32_0 = arith.constant 0 : i32
    %c0_i32_1 = arith.constant 0 : i32
    return %c0_i32, %c0_i32_0 : i32, i32
  }
  func.func @transform_4(%arg0: i32) -> (i32, i32) {
    %c0_i32 = arith.constant 0 : i32
    %c0_i32_0 = arith.constant 0 : i32
    %c0_i32_1 = arith.constant 0 : i32
    return %c0_i32, %c0_i32_0 : i32, i32
  }
  func.func @transform_5(%arg0: i32) -> (i32, i32) {
    %c0_i32 = arith.constant 0 : i32
    %c0_i32_0 = arith.constant 0 : i32
    return %arg0, %c0_i32 : i32, i32
  }
  func.func @transform_6(%arg0: i32) -> (i32, i32) {
    %c0_i32 = arith.constant 0 : i32
    %c0_i32_0 = arith.constant 0 : i32
    return %arg0, %c0_i32 : i32, i32
  }
}

module attributes {stable_mosaic.version = 11 : i64} {
  func.func @_mm_whole_k_kernel(%arg0: i32, %arg1: i32, %arg2: memref<64x256xbf16, #tpu.memory_space<vmem>>, %arg3: memref<256x64xbf16, #tpu.memory_space<vmem>>, %arg4: memref<1x64xf32, #tpu.memory_space<vmem>>, %arg5: memref<64x64xbf16, #tpu.memory_space<vmem>>) attributes {dimension_semantics = [#tpu.dimension_semantics<parallel>, #tpu.dimension_semantics<parallel>], iteration_bounds = array<i64: 2, 1>, scalar_prefetch = 0 : i64, scratch_operands = 0 : i64, tpu.core_type = #tpu.core_type<tc>, window_params = [{transform_indices = @transform_0, window_bounds = array<i64: 64, 256>}, {transform_indices = @transform_1, window_bounds = array<i64: 256, 64>}, {transform_indices = @transform_2, window_bounds = array<i64: 1, 64>}, {transform_indices = @transform_3, window_bounds = array<i64: 64, 64>}]} {
    %c0 = arith.constant 0 : index
    %c0_0 = arith.constant 0 : index
    %0 = vector.load %arg2[%c0, %c0_0] : memref<64x256xbf16, #tpu.memory_space<vmem>>, vector<64x256xbf16>
    %c0_1 = arith.constant 0 : index
    %c0_2 = arith.constant 0 : index
    %1 = vector.load %arg3[%c0_1, %c0_2] : memref<256x64xbf16, #tpu.memory_space<vmem>>, vector<256x64xbf16>
    %cst = arith.constant dense<0.000000e+00> : vector<64x64xf32>
    %2 = tpu.matmul %0, %1, %cst {dimension_numbers = #tpu.dot_dimension_numbers<[1], [0], [0], [1], [0, 0, 1, 1], [], []>} : vector<64x256xbf16>, vector<256x64xbf16>, vector<64x64xf32> -> vector<64x64xf32>
    %c0_3 = arith.constant 0 : index
    %c0_4 = arith.constant 0 : index
    %3 = vector.load %arg4[%c0_3, %c0_4] : memref<1x64xf32, #tpu.memory_space<vmem>>, vector<1x64xf32>
    %4 = vector.broadcast %3 : vector<1x64xf32> to vector<64x64xf32>
    %5 = arith.addf %2, %4 : vector<64x64xf32>
    %cst_5 = arith.constant 0.000000e+00 : f32
    %6 = vector.broadcast %cst_5 : f32 to vector<64x64xf32>
    %7 = arith.maximumf %5, %6 : vector<64x64xf32>
    %8 = arith.truncf %7 : vector<64x64xf32> to vector<64x64xbf16>
    %c0_6 = arith.constant 0 : index
    %c0_7 = arith.constant 0 : index
    %9 = vector.load %arg5[%c0_6, %c0_7] : memref<64x64xbf16, #tpu.memory_space<vmem>>, vector<64x64xbf16>
    tpu.vector_store %arg5[%c0_6, %c0_7], %8 {strides = array<i32>} : memref<64x64xbf16, #tpu.memory_space<vmem>>, vector<64x64xbf16>,
    return
  }
  func.func @transform_0(%arg0: i32, %arg1: i32) -> (i32, i32) {
    %c0_i32 = arith.constant 0 : i32
    %c0_i32_0 = arith.constant 0 : i32
    return %arg0, %c0_i32 : i32, i32
  }
  func.func @transform_1(%arg0: i32, %arg1: i32) -> (i32, i32) {
    %c0_i32 = arith.constant 0 : i32
    %c0_i32_0 = arith.constant 0 : i32
    return %c0_i32, %arg1 : i32, i32
  }
  func.func @transform_2(%arg0: i32, %arg1: i32) -> (i32, i32) {
    %c0_i32 = arith.constant 0 : i32
    %c0_i32_0 = arith.constant 0 : i32
    return %c0_i32, %arg1 : i32, i32
  }
  func.func @transform_3(%arg0: i32, %arg1: i32) -> (i32, i32) {
    %c0_i32 = arith.constant 0 : i32
    return %arg0, %arg1 : i32, i32
  }
}

module attributes {stable_mosaic.version = 11 : i64} {
  func.func @_mm_whole_k_kernel(%arg0: i32, %arg1: i32, %arg2: memref<64x256xbf16, #tpu.memory_space<vmem>>, %arg3: memref<256x128xbf16, #tpu.memory_space<vmem>>, %arg4: memref<1x128xf32, #tpu.memory_space<vmem>>, %arg5: memref<64x128xbf16, #tpu.memory_space<vmem>>) attributes {dimension_semantics = [#tpu.dimension_semantics<parallel>, #tpu.dimension_semantics<parallel>], iteration_bounds = array<i64: 2, 1>, scalar_prefetch = 0 : i64, scratch_operands = 0 : i64, tpu.core_type = #tpu.core_type<tc>, window_params = [{transform_indices = @transform_0, window_bounds = array<i64: 64, 256>}, {transform_indices = @transform_1, window_bounds = array<i64: 256, 128>}, {transform_indices = @transform_2, window_bounds = array<i64: 1, 128>}, {transform_indices = @transform_3, window_bounds = array<i64: 64, 128>}]} {
    %c0 = arith.constant 0 : index
    %c0_0 = arith.constant 0 : index
    %0 = vector.load %arg2[%c0, %c0_0] : memref<64x256xbf16, #tpu.memory_space<vmem>>, vector<64x256xbf16>
    %c0_1 = arith.constant 0 : index
    %c0_2 = arith.constant 0 : index
    %1 = vector.load %arg3[%c0_1, %c0_2] : memref<256x128xbf16, #tpu.memory_space<vmem>>, vector<256x128xbf16>
    %cst = arith.constant dense<0.000000e+00> : vector<64x128xf32>
    %2 = tpu.matmul %0, %1, %cst {dimension_numbers = #tpu.dot_dimension_numbers<[1], [0], [0], [1], [0, 0, 1, 1], [], []>} : vector<64x256xbf16>, vector<256x128xbf16>, vector<64x128xf32> -> vector<64x128xf32>
    %c0_3 = arith.constant 0 : index
    %c0_4 = arith.constant 0 : index
    %3 = vector.load %arg4[%c0_3, %c0_4] : memref<1x128xf32, #tpu.memory_space<vmem>>, vector<1x128xf32>
    %4 = vector.broadcast %3 : vector<1x128xf32> to vector<64x128xf32>
    %5 = arith.addf %2, %4 : vector<64x128xf32>
    %cst_5 = arith.constant 0.000000e+00 : f32
    %6 = vector.broadcast %cst_5 : f32 to vector<64x128xf32>
    %7 = arith.maximumf %5, %6 : vector<64x128xf32>
    %8 = arith.truncf %7 : vector<64x128xf32> to vector<64x128xbf16>
    %c0_6 = arith.constant 0 : index
    %c0_7 = arith.constant 0 : index
    %9 = vector.load %arg5[%c0_6, %c0_7] : memref<64x128xbf16, #tpu.memory_space<vmem>>, vector<64x128xbf16>
    tpu.vector_store %arg5[%c0_6, %c0_7], %8 {strides = array<i32>} : memref<64x128xbf16, #tpu.memory_space<vmem>>, vector<64x128xbf16>,
    return
  }
  func.func @transform_0(%arg0: i32, %arg1: i32) -> (i32, i32) {
    %c0_i32 = arith.constant 0 : i32
    %c0_i32_0 = arith.constant 0 : i32
    return %arg0, %c0_i32 : i32, i32
  }
  func.func @transform_1(%arg0: i32, %arg1: i32) -> (i32, i32) {
    %c0_i32 = arith.constant 0 : i32
    %c0_i32_0 = arith.constant 0 : i32
    return %c0_i32, %arg1 : i32, i32
  }
  func.func @transform_2(%arg0: i32, %arg1: i32) -> (i32, i32) {
    %c0_i32 = arith.constant 0 : i32
    %c0_i32_0 = arith.constant 0 : i32
    return %c0_i32, %arg1 : i32, i32
  }
  func.func @transform_3(%arg0: i32, %arg1: i32) -> (i32, i32) {
    %c0_i32 = arith.constant 0 : i32
    return %arg0, %arg1 : i32, i32
  }
}

module attributes {stable_mosaic.version = 11 : i64} {
  func.func @_mm_whole_k_kernel(%arg0: i32, %arg1: i32, %arg2: memref<32x256xbf16, #tpu.memory_space<vmem>>, %arg3: memref<256x256xbf16, #tpu.memory_space<vmem>>, %arg4: memref<1x256xf32, #tpu.memory_space<vmem>>, %arg5: memref<32x256xbf16, #tpu.memory_space<vmem>>) attributes {dimension_semantics = [#tpu.dimension_semantics<parallel>, #tpu.dimension_semantics<parallel>], iteration_bounds = array<i64: 1, 2>, scalar_prefetch = 0 : i64, scratch_operands = 0 : i64, tpu.core_type = #tpu.core_type<tc>, window_params = [{transform_indices = @transform_0, window_bounds = array<i64: 32, 256>}, {transform_indices = @transform_1, window_bounds = array<i64: 256, 256>}, {transform_indices = @transform_2, window_bounds = array<i64: 1, 256>}, {transform_indices = @transform_3, window_bounds = array<i64: 32, 256>}]} {
    %c0 = arith.constant 0 : index
    %c0_0 = arith.constant 0 : index
    %0 = vector.load %arg2[%c0, %c0_0] : memref<32x256xbf16, #tpu.memory_space<vmem>>, vector<32x256xbf16>
    %c0_1 = arith.constant 0 : index
    %c0_2 = arith.constant 0 : index
    %1 = vector.load %arg3[%c0_1, %c0_2] : memref<256x256xbf16, #tpu.memory_space<vmem>>, vector<256x256xbf16>
    %cst = arith.constant dense<0.000000e+00> : vector<32x256xf32>
    %2 = tpu.matmul %0, %1, %cst {dimension_numbers = #tpu.dot_dimension_numbers<[1], [0], [0], [1], [0, 0, 1, 1], [], []>} : vector<32x256xbf16>, vector<256x256xbf16>, vector<32x256xf32> -> vector<32x256xf32>
    %c0_3 = arith.constant 0 : index
    %c0_4 = arith.constant 0 : index
    %3 = vector.load %arg4[%c0_3, %c0_4] : memref<1x256xf32, #tpu.memory_space<vmem>>, vector<1x256xf32>
    %4 = vector.broadcast %3 : vector<1x256xf32> to vector<32x256xf32>
    %5 = arith.addf %2, %4 : vector<32x256xf32>
    %6 = arith.truncf %5 : vector<32x256xf32> to vector<32x256xbf16>
    %c0_5 = arith.constant 0 : index
    %c0_6 = arith.constant 0 : index
    %7 = vector.load %arg5[%c0_5, %c0_6] : memref<32x256xbf16, #tpu.memory_space<vmem>>, vector<32x256xbf16>
    tpu.vector_store %arg5[%c0_5, %c0_6], %6 {strides = array<i32>} : memref<32x256xbf16, #tpu.memory_space<vmem>>, vector<32x256xbf16>,
    return
  }
  func.func @transform_0(%arg0: i32, %arg1: i32) -> (i32, i32) {
    %c0_i32 = arith.constant 0 : i32
    %c0_i32_0 = arith.constant 0 : i32
    return %arg0, %c0_i32 : i32, i32
  }
  func.func @transform_1(%arg0: i32, %arg1: i32) -> (i32, i32) {
    %c0_i32 = arith.constant 0 : i32
    %c0_i32_0 = arith.constant 0 : i32
    return %c0_i32, %arg1 : i32, i32
  }
  func.func @transform_2(%arg0: i32, %arg1: i32) -> (i32, i32) {
    %c0_i32 = arith.constant 0 : i32
    %c0_i32_0 = arith.constant 0 : i32
    return %c0_i32, %arg1 : i32, i32
  }
  func.func @transform_3(%arg0: i32, %arg1: i32) -> (i32, i32) {
    %c0_i32 = arith.constant 0 : i32
    return %arg0, %arg1 : i32, i32
  }
}

module attributes {stable_mosaic.version = 11 : i64} {
  func.func @_mm_whole_k_kernel(%arg0: i32, %arg1: i32, %arg2: memref<16x512xbf16, #tpu.memory_space<vmem>>, %arg3: memref<512x128xbf16, #tpu.memory_space<vmem>>, %arg4: memref<1x128xf32, #tpu.memory_space<vmem>>, %arg5: memref<16x128xbf16, #tpu.memory_space<vmem>>) attributes {dimension_semantics = [#tpu.dimension_semantics<parallel>, #tpu.dimension_semantics<parallel>], iteration_bounds = array<i64: 2, 1>, scalar_prefetch = 0 : i64, scratch_operands = 0 : i64, tpu.core_type = #tpu.core_type<tc>, window_params = [{transform_indices = @transform_0, window_bounds = array<i64: 16, 512>}, {transform_indices = @transform_1, window_bounds = array<i64: 512, 128>}, {transform_indices = @transform_2, window_bounds = array<i64: 1, 128>}, {transform_indices = @transform_3, window_bounds = array<i64: 16, 128>}]} {
    %c0 = arith.constant 0 : index
    %c0_0 = arith.constant 0 : index
    %0 = vector.load %arg2[%c0, %c0_0] : memref<16x512xbf16, #tpu.memory_space<vmem>>, vector<16x512xbf16>
    %c0_1 = arith.constant 0 : index
    %c0_2 = arith.constant 0 : index
    %1 = vector.load %arg3[%c0_1, %c0_2] : memref<512x128xbf16, #tpu.memory_space<vmem>>, vector<512x128xbf16>
    %cst = arith.constant dense<0.000000e+00> : vector<16x128xf32>
    %2 = tpu.matmul %0, %1, %cst {dimension_numbers = #tpu.dot_dimension_numbers<[1], [0], [0], [1], [0, 0, 1, 1], [], []>} : vector<16x512xbf16>, vector<512x128xbf16>, vector<16x128xf32> -> vector<16x128xf32>
    %c0_3 = arith.constant 0 : index
    %c0_4 = arith.constant 0 : index
    %3 = vector.load %arg4[%c0_3, %c0_4] : memref<1x128xf32, #tpu.memory_space<vmem>>, vector<1x128xf32>
    %4 = vector.broadcast %3 : vector<1x128xf32> to vector<16x128xf32>
    %5 = arith.addf %2, %4 : vector<16x128xf32>
    %cst_5 = arith.constant 0.000000e+00 : f32
    %6 = vector.broadcast %cst_5 : f32 to vector<16x128xf32>
    %7 = arith.maximumf %5, %6 : vector<16x128xf32>
    %8 = arith.truncf %7 : vector<16x128xf32> to vector<16x128xbf16>
    %c0_6 = arith.constant 0 : index
    %c0_7 = arith.constant 0 : index
    %9 = vector.load %arg5[%c0_6, %c0_7] : memref<16x128xbf16, #tpu.memory_space<vmem>>, vector<16x128xbf16>
    tpu.vector_store %arg5[%c0_6, %c0_7], %8 {strides = array<i32>} : memref<16x128xbf16, #tpu.memory_space<vmem>>, vector<16x128xbf16>,
    return
  }
  func.func @transform_0(%arg0: i32, %arg1: i32) -> (i32, i32) {
    %c0_i32 = arith.constant 0 : i32
    %c0_i32_0 = arith.constant 0 : i32
    return %arg0, %c0_i32 : i32, i32
  }
  func.func @transform_1(%arg0: i32, %arg1: i32) -> (i32, i32) {
    %c0_i32 = arith.constant 0 : i32
    %c0_i32_0 = arith.constant 0 : i32
    return %c0_i32, %arg1 : i32, i32
  }
  func.func @transform_2(%arg0: i32, %arg1: i32) -> (i32, i32) {
    %c0_i32 = arith.constant 0 : i32
    %c0_i32_0 = arith.constant 0 : i32
    return %c0_i32, %arg1 : i32, i32
  }
  func.func @transform_3(%arg0: i32, %arg1: i32) -> (i32, i32) {
    %c0_i32 = arith.constant 0 : i32
    return %arg0, %arg1 : i32, i32
  }
}

module attributes {stable_mosaic.version = 11 : i64} {
  func.func @_bottleneck_tail_kernel(%arg0: i32, %arg1: memref<32x1152xbf16, #tpu.memory_space<vmem>>, %arg2: memref<1152x128xbf16, #tpu.memory_space<vmem>>, %arg3: memref<1x128xf32, #tpu.memory_space<vmem>>, %arg4: memref<128x512xbf16, #tpu.memory_space<vmem>>, %arg5: memref<1x512xf32, #tpu.memory_space<vmem>>, %arg6: memref<32x512xbf16, #tpu.memory_space<vmem>>, %arg7: memref<32x512xbf16, #tpu.memory_space<vmem>>) attributes {dimension_semantics = [#tpu.dimension_semantics<parallel>], iteration_bounds = array<i64: 1>, scalar_prefetch = 0 : i64, scratch_operands = 0 : i64, tpu.core_type = #tpu.core_type<tc>, window_params = [{transform_indices = @transform_0, window_bounds = array<i64: 32, 1152>}, {pipeline_mode = #tpu.pipeline_mode<synchronous>, transform_indices = @transform_1, window_bounds = array<i64: 1152, 128>}, {pipeline_mode = #tpu.pipeline_mode<synchronous>, transform_indices = @transform_2, window_bounds = array<i64: 1, 128>}, {pipeline_mode = #tpu.pipeline_mode<synchronous>, transform_indices = @transform_3, window_bounds = array<i64: 128, 512>}, {pipeline_mode = #tpu.pipeline_mode<synchronous>, transform_indices = @transform_4, window_bounds = array<i64: 1, 512>}, {transform_indices = @transform_5, window_bounds = array<i64: 32, 512>}, {transform_indices = @transform_6, window_bounds = array<i64: 32, 512>}]} {
    %c0 = arith.constant 0 : index
    %c0_0 = arith.constant 0 : index
    %0 = vector.load %arg1[%c0, %c0_0] : memref<32x1152xbf16, #tpu.memory_space<vmem>>, vector<32x1152xbf16>
    %c0_1 = arith.constant 0 : index
    %c0_2 = arith.constant 0 : index
    %1 = vector.load %arg2[%c0_1, %c0_2] : memref<1152x128xbf16, #tpu.memory_space<vmem>>, vector<1152x128xbf16>
    %cst = arith.constant dense<0.000000e+00> : vector<32x128xf32>
    %2 = tpu.matmul %0, %1, %cst {dimension_numbers = #tpu.dot_dimension_numbers<[1], [0], [0], [1], [0, 0, 1, 1], [], []>} : vector<32x1152xbf16>, vector<1152x128xbf16>, vector<32x128xf32> -> vector<32x128xf32>
    %c0_3 = arith.constant 0 : index
    %c0_4 = arith.constant 0 : index
    %3 = vector.load %arg3[%c0_3, %c0_4] : memref<1x128xf32, #tpu.memory_space<vmem>>, vector<1x128xf32>
    %4 = vector.broadcast %3 : vector<1x128xf32> to vector<32x128xf32>
    %5 = arith.addf %2, %4 : vector<32x128xf32>
    %cst_5 = arith.constant 0.000000e+00 : f32
    %6 = vector.broadcast %cst_5 : f32 to vector<32x128xf32>
    %7 = arith.maximumf %5, %6 : vector<32x128xf32>
    %8 = arith.truncf %7 : vector<32x128xf32> to vector<32x128xbf16>
    %c0_6 = arith.constant 0 : index
    %c0_7 = arith.constant 0 : index
    %9 = vector.load %arg4[%c0_6, %c0_7] : memref<128x512xbf16, #tpu.memory_space<vmem>>, vector<128x512xbf16>
    %cst_8 = arith.constant dense<0.000000e+00> : vector<32x512xf32>
    %10 = tpu.matmul %8, %9, %cst_8 {dimension_numbers = #tpu.dot_dimension_numbers<[1], [0], [0], [1], [0, 0, 1, 1], [], []>} : vector<32x128xbf16>, vector<128x512xbf16>, vector<32x512xf32> -> vector<32x512xf32>
    %c0_9 = arith.constant 0 : index
    %c0_10 = arith.constant 0 : index
    %11 = vector.load %arg5[%c0_9, %c0_10] : memref<1x512xf32, #tpu.memory_space<vmem>>, vector<1x512xf32>
    %12 = vector.broadcast %11 : vector<1x512xf32> to vector<32x512xf32>
    %13 = arith.addf %10, %12 : vector<32x512xf32>
    %c0_11 = arith.constant 0 : index
    %c0_12 = arith.constant 0 : index
    %14 = vector.load %arg6[%c0_11, %c0_12] : memref<32x512xbf16, #tpu.memory_space<vmem>>, vector<32x512xbf16>
    %15 = arith.extf %14 : vector<32x512xbf16> to vector<32x512xf32>
    %16 = arith.addf %13, %15 : vector<32x512xf32>
    %cst_13 = arith.constant 0.000000e+00 : f32
    %17 = vector.broadcast %cst_13 : f32 to vector<32x512xf32>
    %18 = arith.maximumf %16, %17 : vector<32x512xf32>
    %19 = arith.truncf %18 : vector<32x512xf32> to vector<32x512xbf16>
    %c0_14 = arith.constant 0 : index
    %c0_15 = arith.constant 0 : index
    %20 = vector.load %arg7[%c0_14, %c0_15] : memref<32x512xbf16, #tpu.memory_space<vmem>>, vector<32x512xbf16>
    tpu.vector_store %arg7[%c0_14, %c0_15], %19 {strides = array<i32>} : memref<32x512xbf16, #tpu.memory_space<vmem>>, vector<32x512xbf16>,
    return
  }
  func.func @transform_0(%arg0: i32) -> (i32, i32) {
    %c0_i32 = arith.constant 0 : i32
    %c0_i32_0 = arith.constant 0 : i32
    return %arg0, %c0_i32 : i32, i32
  }
  func.func @transform_1(%arg0: i32) -> (i32, i32) {
    %c0_i32 = arith.constant 0 : i32
    %c0_i32_0 = arith.constant 0 : i32
    %c0_i32_1 = arith.constant 0 : i32
    return %c0_i32, %c0_i32_0 : i32, i32
  }
  func.func @transform_2(%arg0: i32) -> (i32, i32) {
    %c0_i32 = arith.constant 0 : i32
    %c0_i32_0 = arith.constant 0 : i32
    %c0_i32_1 = arith.constant 0 : i32
    return %c0_i32, %c0_i32_0 : i32, i32
  }
  func.func @transform_3(%arg0: i32) -> (i32, i32) {
    %c0_i32 = arith.constant 0 : i32
    %c0_i32_0 = arith.constant 0 : i32
    %c0_i32_1 = arith.constant 0 : i32
    return %c0_i32, %c0_i32_0 : i32, i32
  }
  func.func @transform_4(%arg0: i32) -> (i32, i32) {
    %c0_i32 = arith.constant 0 : i32
    %c0_i32_0 = arith.constant 0 : i32
    %c0_i32_1 = arith.constant 0 : i32
    return %c0_i32, %c0_i32_0 : i32, i32
  }
  func.func @transform_5(%arg0: i32) -> (i32, i32) {
    %c0_i32 = arith.constant 0 : i32
    %c0_i32_0 = arith.constant 0 : i32
    return %arg0, %c0_i32 : i32, i32
  }
  func.func @transform_6(%arg0: i32) -> (i32, i32) {
    %c0_i32 = arith.constant 0 : i32
    %c0_i32_0 = arith.constant 0 : i32
    return %arg0, %c0_i32 : i32, i32
  }
}

module attributes {stable_mosaic.version = 11 : i64} {
  func.func @_mm_whole_k_kernel(%arg0: i32, %arg1: i32, %arg2: memref<16x512xbf16, #tpu.memory_space<vmem>>, %arg3: memref<512x256xbf16, #tpu.memory_space<vmem>>, %arg4: memref<1x256xf32, #tpu.memory_space<vmem>>, %arg5: memref<16x256xbf16, #tpu.memory_space<vmem>>) attributes {dimension_semantics = [#tpu.dimension_semantics<parallel>, #tpu.dimension_semantics<parallel>], iteration_bounds = array<i64: 1, 4>, scalar_prefetch = 0 : i64, scratch_operands = 0 : i64, tpu.core_type = #tpu.core_type<tc>, window_params = [{transform_indices = @transform_0, window_bounds = array<i64: 16, 512>}, {transform_indices = @transform_1, window_bounds = array<i64: 512, 256>}, {transform_indices = @transform_2, window_bounds = array<i64: 1, 256>}, {transform_indices = @transform_3, window_bounds = array<i64: 16, 256>}]} {
    %c0 = arith.constant 0 : index
    %c0_0 = arith.constant 0 : index
    %0 = vector.load %arg2[%c0, %c0_0] : memref<16x512xbf16, #tpu.memory_space<vmem>>, vector<16x512xbf16>
    %c0_1 = arith.constant 0 : index
    %c0_2 = arith.constant 0 : index
    %1 = vector.load %arg3[%c0_1, %c0_2] : memref<512x256xbf16, #tpu.memory_space<vmem>>, vector<512x256xbf16>
    %cst = arith.constant dense<0.000000e+00> : vector<16x256xf32>
    %2 = tpu.matmul %0, %1, %cst {dimension_numbers = #tpu.dot_dimension_numbers<[1], [0], [0], [1], [0, 0, 1, 1], [], []>} : vector<16x512xbf16>, vector<512x256xbf16>, vector<16x256xf32> -> vector<16x256xf32>
    %c0_3 = arith.constant 0 : index
    %c0_4 = arith.constant 0 : index
    %3 = vector.load %arg4[%c0_3, %c0_4] : memref<1x256xf32, #tpu.memory_space<vmem>>, vector<1x256xf32>
    %4 = vector.broadcast %3 : vector<1x256xf32> to vector<16x256xf32>
    %5 = arith.addf %2, %4 : vector<16x256xf32>
    %6 = arith.truncf %5 : vector<16x256xf32> to vector<16x256xbf16>
    %c0_5 = arith.constant 0 : index
    %c0_6 = arith.constant 0 : index
    %7 = vector.load %arg5[%c0_5, %c0_6] : memref<16x256xbf16, #tpu.memory_space<vmem>>, vector<16x256xbf16>
    tpu.vector_store %arg5[%c0_5, %c0_6], %6 {strides = array<i32>} : memref<16x256xbf16, #tpu.memory_space<vmem>>, vector<16x256xbf16>,
    return
  }
  func.func @transform_0(%arg0: i32, %arg1: i32) -> (i32, i32) {
    %c0_i32 = arith.constant 0 : i32
    %c0_i32_0 = arith.constant 0 : i32
    return %arg0, %c0_i32 : i32, i32
  }
  func.func @transform_1(%arg0: i32, %arg1: i32) -> (i32, i32) {
    %c0_i32 = arith.constant 0 : i32
    %c0_i32_0 = arith.constant 0 : i32
    return %c0_i32, %arg1 : i32, i32
  }
  func.func @transform_2(%arg0: i32, %arg1: i32) -> (i32, i32) {
    %c0_i32 = arith.constant 0 : i32
    %c0_i32_0 = arith.constant 0 : i32
    return %c0_i32, %arg1 : i32, i32
  }
  func.func @transform_3(%arg0: i32, %arg1: i32) -> (i32, i32) {
    %c0_i32 = arith.constant 0 : i32
    return %arg0, %arg1 : i32, i32
  }
}

module attributes {stable_mosaic.version = 11 : i64} {
  func.func @_mm_whole_k_kernel(%arg0: i32, %arg1: i32, %arg2: memref<32x512xbf16, #tpu.memory_space<vmem>>, %arg3: memref<512x128xbf16, #tpu.memory_space<vmem>>, %arg4: memref<1x128xf32, #tpu.memory_space<vmem>>, %arg5: memref<32x128xbf16, #tpu.memory_space<vmem>>) attributes {dimension_semantics = [#tpu.dimension_semantics<parallel>, #tpu.dimension_semantics<parallel>], iteration_bounds = array<i64: 1, 2>, scalar_prefetch = 0 : i64, scratch_operands = 0 : i64, tpu.core_type = #tpu.core_type<tc>, window_params = [{transform_indices = @transform_0, window_bounds = array<i64: 32, 512>}, {transform_indices = @transform_1, window_bounds = array<i64: 512, 128>}, {transform_indices = @transform_2, window_bounds = array<i64: 1, 128>}, {transform_indices = @transform_3, window_bounds = array<i64: 32, 128>}]} {
    %c0 = arith.constant 0 : index
    %c0_0 = arith.constant 0 : index
    %0 = vector.load %arg2[%c0, %c0_0] : memref<32x512xbf16, #tpu.memory_space<vmem>>, vector<32x512xbf16>
    %c0_1 = arith.constant 0 : index
    %c0_2 = arith.constant 0 : index
    %1 = vector.load %arg3[%c0_1, %c0_2] : memref<512x128xbf16, #tpu.memory_space<vmem>>, vector<512x128xbf16>
    %cst = arith.constant dense<0.000000e+00> : vector<32x128xf32>
    %2 = tpu.matmul %0, %1, %cst {dimension_numbers = #tpu.dot_dimension_numbers<[1], [0], [0], [1], [0, 0, 1, 1], [], []>} : vector<32x512xbf16>, vector<512x128xbf16>, vector<32x128xf32> -> vector<32x128xf32>
    %c0_3 = arith.constant 0 : index
    %c0_4 = arith.constant 0 : index
    %3 = vector.load %arg4[%c0_3, %c0_4] : memref<1x128xf32, #tpu.memory_space<vmem>>, vector<1x128xf32>
    %4 = vector.broadcast %3 : vector<1x128xf32> to vector<32x128xf32>
    %5 = arith.addf %2, %4 : vector<32x128xf32>
    %cst_5 = arith.constant 0.000000e+00 : f32
    %6 = vector.broadcast %cst_5 : f32 to vector<32x128xf32>
    %7 = arith.maximumf %5, %6 : vector<32x128xf32>
    %8 = arith.truncf %7 : vector<32x128xf32> to vector<32x128xbf16>
    %c0_6 = arith.constant 0 : index
    %c0_7 = arith.constant 0 : index
    %9 = vector.load %arg5[%c0_6, %c0_7] : memref<32x128xbf16, #tpu.memory_space<vmem>>, vector<32x128xbf16>
    tpu.vector_store %arg5[%c0_6, %c0_7], %8 {strides = array<i32>} : memref<32x128xbf16, #tpu.memory_space<vmem>>, vector<32x128xbf16>,
    return
  }
  func.func @transform_0(%arg0: i32, %arg1: i32) -> (i32, i32) {
    %c0_i32 = arith.constant 0 : i32
    %c0_i32_0 = arith.constant 0 : i32
    return %arg0, %c0_i32 : i32, i32
  }
  func.func @transform_1(%arg0: i32, %arg1: i32) -> (i32, i32) {
    %c0_i32 = arith.constant 0 : i32
    %c0_i32_0 = arith.constant 0 : i32
    return %c0_i32, %arg1 : i32, i32
  }
  func.func @transform_2(%arg0: i32, %arg1: i32) -> (i32, i32) {
    %c0_i32 = arith.constant 0 : i32
    %c0_i32_0 = arith.constant 0 : i32
    return %c0_i32, %arg1 : i32, i32
  }
  func.func @transform_3(%arg0: i32, %arg1: i32) -> (i32, i32) {
    %c0_i32 = arith.constant 0 : i32
    return %arg0, %arg1 : i32, i32
  }
}

module attributes {stable_mosaic.version = 11 : i64} {
  func.func @_bottleneck_tail_kernel(%arg0: i32, %arg1: memref<16x2304xbf16, #tpu.memory_space<vmem>>, %arg2: memref<2304x256xbf16, #tpu.memory_space<vmem>>, %arg3: memref<1x256xf32, #tpu.memory_space<vmem>>, %arg4: memref<256x1024xbf16, #tpu.memory_space<vmem>>, %arg5: memref<1x1024xf32, #tpu.memory_space<vmem>>, %arg6: memref<16x1024xbf16, #tpu.memory_space<vmem>>, %arg7: memref<16x1024xbf16, #tpu.memory_space<vmem>>) attributes {dimension_semantics = [#tpu.dimension_semantics<parallel>], iteration_bounds = array<i64: 1>, scalar_prefetch = 0 : i64, scratch_operands = 0 : i64, tpu.core_type = #tpu.core_type<tc>, window_params = [{transform_indices = @transform_0, window_bounds = array<i64: 16, 2304>}, {pipeline_mode = #tpu.pipeline_mode<synchronous>, transform_indices = @transform_1, window_bounds = array<i64: 2304, 256>}, {pipeline_mode = #tpu.pipeline_mode<synchronous>, transform_indices = @transform_2, window_bounds = array<i64: 1, 256>}, {pipeline_mode = #tpu.pipeline_mode<synchronous>, transform_indices = @transform_3, window_bounds = array<i64: 256, 1024>}, {pipeline_mode = #tpu.pipeline_mode<synchronous>, transform_indices = @transform_4, window_bounds = array<i64: 1, 1024>}, {transform_indices = @transform_5, window_bounds = array<i64: 16, 1024>}, {transform_indices = @transform_6, window_bounds = array<i64: 16, 1024>}]} {
    %c0 = arith.constant 0 : index
    %c0_0 = arith.constant 0 : index
    %0 = vector.load %arg1[%c0, %c0_0] : memref<16x2304xbf16, #tpu.memory_space<vmem>>, vector<16x2304xbf16>
    %c0_1 = arith.constant 0 : index
    %c0_2 = arith.constant 0 : index
    %1 = vector.load %arg2[%c0_1, %c0_2] : memref<2304x256xbf16, #tpu.memory_space<vmem>>, vector<2304x256xbf16>
    %cst = arith.constant dense<0.000000e+00> : vector<16x256xf32>
    %2 = tpu.matmul %0, %1, %cst {dimension_numbers = #tpu.dot_dimension_numbers<[1], [0], [0], [1], [0, 0, 1, 1], [], []>} : vector<16x2304xbf16>, vector<2304x256xbf16>, vector<16x256xf32> -> vector<16x256xf32>
    %c0_3 = arith.constant 0 : index
    %c0_4 = arith.constant 0 : index
    %3 = vector.load %arg3[%c0_3, %c0_4] : memref<1x256xf32, #tpu.memory_space<vmem>>, vector<1x256xf32>
    %4 = vector.broadcast %3 : vector<1x256xf32> to vector<16x256xf32>
    %5 = arith.addf %2, %4 : vector<16x256xf32>
    %cst_5 = arith.constant 0.000000e+00 : f32
    %6 = vector.broadcast %cst_5 : f32 to vector<16x256xf32>
    %7 = arith.maximumf %5, %6 : vector<16x256xf32>
    %8 = arith.truncf %7 : vector<16x256xf32> to vector<16x256xbf16>
    %c0_6 = arith.constant 0 : index
    %c0_7 = arith.constant 0 : index
    %9 = vector.load %arg4[%c0_6, %c0_7] : memref<256x1024xbf16, #tpu.memory_space<vmem>>, vector<256x1024xbf16>
    %cst_8 = arith.constant dense<0.000000e+00> : vector<16x1024xf32>
    %10 = tpu.matmul %8, %9, %cst_8 {dimension_numbers = #tpu.dot_dimension_numbers<[1], [0], [0], [1], [0, 0, 1, 1], [], []>} : vector<16x256xbf16>, vector<256x1024xbf16>, vector<16x1024xf32> -> vector<16x1024xf32>
    %c0_9 = arith.constant 0 : index
    %c0_10 = arith.constant 0 : index
    %11 = vector.load %arg5[%c0_9, %c0_10] : memref<1x1024xf32, #tpu.memory_space<vmem>>, vector<1x1024xf32>
    %12 = vector.broadcast %11 : vector<1x1024xf32> to vector<16x1024xf32>
    %13 = arith.addf %10, %12 : vector<16x1024xf32>
    %c0_11 = arith.constant 0 : index
    %c0_12 = arith.constant 0 : index
    %14 = vector.load %arg6[%c0_11, %c0_12] : memref<16x1024xbf16, #tpu.memory_space<vmem>>, vector<16x1024xbf16>
    %15 = arith.extf %14 : vector<16x1024xbf16> to vector<16x1024xf32>
    %16 = arith.addf %13, %15 : vector<16x1024xf32>
    %cst_13 = arith.constant 0.000000e+00 : f32
    %17 = vector.broadcast %cst_13 : f32 to vector<16x1024xf32>
    %18 = arith.maximumf %16, %17 : vector<16x1024xf32>
    %19 = arith.truncf %18 : vector<16x1024xf32> to vector<16x1024xbf16>
    %c0_14 = arith.constant 0 : index
    %c0_15 = arith.constant 0 : index
    %20 = vector.load %arg7[%c0_14, %c0_15] : memref<16x1024xbf16, #tpu.memory_space<vmem>>, vector<16x1024xbf16>
    tpu.vector_store %arg7[%c0_14, %c0_15], %19 {strides = array<i32>} : memref<16x1024xbf16, #tpu.memory_space<vmem>>, vector<16x1024xbf16>,
    return
  }
  func.func @transform_0(%arg0: i32) -> (i32, i32) {
    %c0_i32 = arith.constant 0 : i32
    %c0_i32_0 = arith.constant 0 : i32
    return %arg0, %c0_i32 : i32, i32
  }
  func.func @transform_1(%arg0: i32) -> (i32, i32) {
    %c0_i32 = arith.constant 0 : i32
    %c0_i32_0 = arith.constant 0 : i32
    %c0_i32_1 = arith.constant 0 : i32
    return %c0_i32, %c0_i32_0 : i32, i32
  }
  func.func @transform_2(%arg0: i32) -> (i32, i32) {
    %c0_i32 = arith.constant 0 : i32
    %c0_i32_0 = arith.constant 0 : i32
    %c0_i32_1 = arith.constant 0 : i32
    return %c0_i32, %c0_i32_0 : i32, i32
  }
  func.func @transform_3(%arg0: i32) -> (i32, i32) {
    %c0_i32 = arith.constant 0 : i32
    %c0_i32_0 = arith.constant 0 : i32
    %c0_i32_1 = arith.constant 0 : i32
    return %c0_i32, %c0_i32_0 : i32, i32
  }
  func.func @transform_4(%arg0: i32) -> (i32, i32) {
    %c0_i32 = arith.constant 0 : i32
    %c0_i32_0 = arith.constant 0 : i32
    %c0_i32_1 = arith.constant 0 : i32
    return %c0_i32, %c0_i32_0 : i32, i32
  }
  func.func @transform_5(%arg0: i32) -> (i32, i32) {
    %c0_i32 = arith.constant 0 : i32
    %c0_i32_0 = arith.constant 0 : i32
    return %arg0, %c0_i32 : i32, i32
  }
  func.func @transform_6(%arg0: i32) -> (i32, i32) {
    %c0_i32 = arith.constant 0 : i32
    %c0_i32_0 = arith.constant 0 : i32
    return %arg0, %c0_i32 : i32, i32
  }
}

module attributes {stable_mosaic.version = 11 : i64} {
  func.func @_mm_whole_k_kernel(%arg0: i32, %arg1: i32, %arg2: memref<16x1024xbf16, #tpu.memory_space<vmem>>, %arg3: memref<1024x128xbf16, #tpu.memory_space<vmem>>, %arg4: memref<1x128xf32, #tpu.memory_space<vmem>>, %arg5: memref<16x128xbf16, #tpu.memory_space<vmem>>) attributes {dimension_semantics = [#tpu.dimension_semantics<parallel>, #tpu.dimension_semantics<parallel>], iteration_bounds = array<i64: 1, 2>, scalar_prefetch = 0 : i64, scratch_operands = 0 : i64, tpu.core_type = #tpu.core_type<tc>, window_params = [{transform_indices = @transform_0, window_bounds = array<i64: 16, 1024>}, {transform_indices = @transform_1, window_bounds = array<i64: 1024, 128>}, {transform_indices = @transform_2, window_bounds = array<i64: 1, 128>}, {transform_indices = @transform_3, window_bounds = array<i64: 16, 128>}]} {
    %c0 = arith.constant 0 : index
    %c0_0 = arith.constant 0 : index
    %0 = vector.load %arg2[%c0, %c0_0] : memref<16x1024xbf16, #tpu.memory_space<vmem>>, vector<16x1024xbf16>
    %c0_1 = arith.constant 0 : index
    %c0_2 = arith.constant 0 : index
    %1 = vector.load %arg3[%c0_1, %c0_2] : memref<1024x128xbf16, #tpu.memory_space<vmem>>, vector<1024x128xbf16>
    %cst = arith.constant dense<0.000000e+00> : vector<16x128xf32>
    %2 = tpu.matmul %0, %1, %cst {dimension_numbers = #tpu.dot_dimension_numbers<[1], [0], [0], [1], [0, 0, 1, 1], [], []>} : vector<16x1024xbf16>, vector<1024x128xbf16>, vector<16x128xf32> -> vector<16x128xf32>
    %c0_3 = arith.constant 0 : index
    %c0_4 = arith.constant 0 : index
    %3 = vector.load %arg4[%c0_3, %c0_4] : memref<1x128xf32, #tpu.memory_space<vmem>>, vector<1x128xf32>
    %4 = vector.broadcast %3 : vector<1x128xf32> to vector<16x128xf32>
    %5 = arith.addf %2, %4 : vector<16x128xf32>
    %cst_5 = arith.constant 0.000000e+00 : f32
    %6 = vector.broadcast %cst_5 : f32 to vector<16x128xf32>
    %7 = arith.maximumf %5, %6 : vector<16x128xf32>
    %8 = arith.truncf %7 : vector<16x128xf32> to vector<16x128xbf16>
    %c0_6 = arith.constant 0 : index
    %c0_7 = arith.constant 0 : index
    %9 = vector.load %arg5[%c0_6, %c0_7] : memref<16x128xbf16, #tpu.memory_space<vmem>>, vector<16x128xbf16>
    tpu.vector_store %arg5[%c0_6, %c0_7], %8 {strides = array<i32>} : memref<16x128xbf16, #tpu.memory_space<vmem>>, vector<16x128xbf16>,
    return
  }
  func.func @transform_0(%arg0: i32, %arg1: i32) -> (i32, i32) {
    %c0_i32 = arith.constant 0 : i32
    %c0_i32_0 = arith.constant 0 : i32
    return %arg0, %c0_i32 : i32, i32
  }
  func.func @transform_1(%arg0: i32, %arg1: i32) -> (i32, i32) {
    %c0_i32 = arith.constant 0 : i32
    %c0_i32_0 = arith.constant 0 : i32
    return %c0_i32, %arg1 : i32, i32
  }
  func.func @transform_2(%arg0: i32, %arg1: i32) -> (i32, i32) {
    %c0_i32 = arith.constant 0 : i32
    %c0_i32_0 = arith.constant 0 : i32
    return %c0_i32, %arg1 : i32, i32
  }
  func.func @transform_3(%arg0: i32, %arg1: i32) -> (i32, i32) {
    %c0_i32 = arith.constant 0 : i32
    return %arg0, %arg1 : i32, i32
  }
}

module attributes {stable_mosaic.version = 11 : i64} {
  func.func @_avgpool_kernel(%arg0: i32, %arg1: memref<2x4x1024xbf16, #tpu.memory_space<vmem>>, %arg2: memref<2x1024xf32, #tpu.memory_space<vmem>>) attributes {dimension_semantics = [#tpu.dimension_semantics<arbitrary>], iteration_bounds = array<i64: 1>, scalar_prefetch = 0 : i64, scratch_operands = 0 : i64, tpu.core_type = #tpu.core_type<tc>, window_params = [{pipeline_mode = #tpu.pipeline_mode<synchronous>, transform_indices = @transform_0, window_bounds = array<i64: 2, 4, 1024>}, {pipeline_mode = #tpu.pipeline_mode<synchronous>, transform_indices = @transform_1, window_bounds = array<i64: 2, 1024>}]} {
    %c0 = arith.constant 0 : index
    %c0_0 = arith.constant 0 : index
    %c0_1 = arith.constant 0 : index
    %0 = vector.load %arg1[%c0, %c0_0, %c0_1] : memref<2x4x1024xbf16, #tpu.memory_space<vmem>>, vector<2x4x1024xbf16>
    %1 = arith.extf %0 : vector<2x4x1024xbf16> to vector<2x4x1024xf32>
    %cst = arith.constant dense<0.000000e+00> : vector<2x1024xf32>
    %2 = vector.multi_reduction <add>, %1, %cst [1] : vector<2x4x1024xf32> to vector<2x1024xf32>
    %cst_2 = arith.constant 2.500000e-01 : f32
    %3 = vector.broadcast %cst_2 : f32 to vector<2x1024xf32>
    %4 = arith.mulf %2, %3 : vector<2x1024xf32>
    %c0_3 = arith.constant 0 : index
    %c0_4 = arith.constant 0 : index
    %5 = vector.load %arg2[%c0_3, %c0_4] : memref<2x1024xf32, #tpu.memory_space<vmem>>, vector<2x1024xf32>
    tpu.vector_store %arg2[%c0_3, %c0_4], %4 {strides = array<i32>} : memref<2x1024xf32, #tpu.memory_space<vmem>>, vector<2x1024xf32>,
    return
  }
  func.func @transform_0(%arg0: i32) -> (i32, i32, i32) {
    %c0_i32 = arith.constant 0 : i32
    %c0_i32_0 = arith.constant 0 : i32
    %c0_i32_1 = arith.constant 0 : i32
    %c0_i32_2 = arith.constant 0 : i32
    return %c0_i32, %c0_i32_0, %c0_i32_1 : i32, i32, i32
  }
  func.func @transform_1(%arg0: i32) -> (i32, i32) {
    %c0_i32 = arith.constant 0 : i32
    %c0_i32_0 = arith.constant 0 : i32
    %c0_i32_1 = arith.constant 0 : i32
    return %c0_i32, %c0_i32_0 : i32, i32
  }
}

</mosaic_0001>

<bundles_post_ra>
// kernel: _lambda_.31
= control target key start
LH: loop header
LB: loop body
LE: loop exit
PB: predicated region body
PF: predicated region fallthrough
CT: control target
= control target key end

     0   :  { %s1283_s12 = smov 0   ;;  %s1285_s13 = smov 0   ;;  %s1503_s0 = inlined_call_operand.vmem [shape: bf16[512,152], index: 0, kind: input, shape index: {}]   ;;  %s1504_s1 = inlined_call_operand.vmem [shape: bf16[152,64], index: 1, kind: input, shape index: {}]   ;;  %s1505_s2 = inlined_call_operand.vmem [shape: f32[1,64], index: 2, kind: input, shape index: {}]   ;;  %s1506_s3 = inlined_call_operand.vmem [shape: bf16[512,64], index: 3, kind: output, shape index: {}]  }
   0x1   :  { %s1287_s14 = smov 0  }
   0x2 LB: > { %s25_s15 = sadd.s32 1, %s1256_s13  ;;  %p1003_p0 = scmp.ge.s32.totalorder %s1260_s14, 1  ;;  %s1260_s14 = sphi %s1287_s14, %s13_s14   ;;  %s1256_s13 = sphi %s1285_s13, %s1508_s13   ;;  %s1252_s12 = sphi %s1283_s12, %s1507_s12  }
   0x3   : > { %p27_p1 = scmp.ge.s32.totalorder %s25_s15, 2  ;;  %p170_p2 = scmp.lt.s32.totalorder %s1260_s14, 3 }
   0x5   : > { %s1510_s15 = smov (%p27_p1, %s25_s15), 0  ;;  %p171_p3 = pnand %p1003_p0, %p170_p2 }
   0x6   : > { %v1180_v0 = vld [vmem:[%s1504_s1] sm:$0xff] (!%p171_p3)   ;;  %v1262_v1 = vmov (!%p171_p3), 0   ;;  %v1181_v2 = vld [vmem:[%s1504_s1 + $0x8] sm:$0xff] (!%p171_p3)   ;;  %s1004_s20 = sshll.u32 (!%p171_p3), %s1252_s12, 5  ;;  %v1182_v3 = vld [vmem:[%s1504_s1 + $0x10] sm:$0xff] (!%p171_p3)   ;;  %vm488_vm0 = vcmask (!%p171_p3), 195584  }
   0x7   : > { %174 = sbr.rel (%p171_p3) target bundleno = 324 (0x144), region = 32  ;;  %541 = vmatprep.subr.bf16.mxu0 (!%p171_p3), %v1262_v1  ;;  %1135 = vmatprep.subr.bf16.mxu1 (!%p171_p3), %v1262_v1  ;;  %p206_p4 = scmp.lt.s32.totalorder (!%p171_p3), %s1004_s20, 63  ;;  %v1183_v4 = vld [vmem:[%s1504_s1 + $0x18] sm:$0xff] (!%p171_p3)   ;;  %v1184_v7 = vld [vmem:[%s1504_s1 + $0x20] sm:$0xff] (!%p171_p3)   ;;  %v1185_v8 = vld [vmem:[%s1504_s1 + $0x28] sm:$0xff] (!%p171_p3)   ;;  %vm537_vm1 = vcmask (!%p171_p3), 1043456  }
   0x8   : > { %542 = vmatpush1.bf16.msra.mxu0 (!%p171_p3), %v1180_v0  ;;  %1145 = vmatpush1.bf16.msra.mxu1 (!%p171_p3), %v1180_v0  ;;  %v1186_v9 = vld [vmem:[%s1504_s1 + $0x30] sm:$0xff] (!%p171_p3)   ;;  %v1187_v10 = vld [vmem:[%s1504_s1 + $0x38] sm:$0xff] (!%p171_p3)   ;;  %v1188_v11 = vld [vmem:[%s1504_s1 + $0x40] sm:$0xff] (!%p171_p3)   ;;  %vm862_vm2 = vcmask (!%p171_p3), 519168  }
   0x9   : > { %543 = vmatprep.subr.bf16.mxu0 (!%p171_p3), %v1262_v1  ;;  %1136 = vmatprep.subr.bf16.mxu1 (!%p171_p3), %v1262_v1  ;;  %v1189_v12 = vld [vmem:[%s1504_s1 + $0x48] ss:$0 sps:$4 sm:$0xff] (!%p171_p3)   ;;  %v1390_v44 = vld [vmem:[%s1505_s2] ss:$0 sm:$0xff] (!%p171_p3) }
   0xa   : > { %v539_v13 = vsel (!%p171_p3), %vm537_vm1, %v1189_v12, 0 }
   0xc   : > { %544 = vmatpush1.bf16.msra.mxu0 (!%p171_p3), %v1181_v2  ;;  %1146 = vmatpush1.bf16.msra.mxu1 (!%p171_p3), %v1181_v2 }
   0xd   : > { %545 = vmatprep.subr.bf16.mxu0 (!%p171_p3), %v1262_v1  ;;  %1137 = vmatprep.subr.bf16.mxu1 (!%p171_p3), %v1262_v1 }
   0xe   : > { %s1512_s20 = smov (!%p206_p4, %s1004_s20), 63 }
   0xf   : > { %s1102_s23 = sshll.u32 %s1512_s20, 3  ;;  %s1008_s19 = sshll.u32 %s1512_s20, 2 }
  0x10   : > { %s1316_s26 = scalar_lea.vmem %s1503_s0, %s1102_s23  ;;  %546 = vmatpush1.bf16.msra.mxu0 %v1182_v3  ;;  %1147 = vmatpush1.bf16.msra.mxu1 %v1182_v3  ;;  %s1400_s20 = scalar_lea.vmem %s1506_s3, %s1008_s19 }
  0x11   : > { %v1192_v5 = vld [vmem:[%s1316_s26 + $0x4] ss:$8 sps:$4 sm:$0xff]   ;;  %547 = vmatprep.subr.bf16.mxu0 %v1262_v1  ;;  %1138 = vmatprep.subr.bf16.mxu1 %v1262_v1  ;;  %v1190_v14 = vld [vmem:[%s1316_s26] ss:$8 sps:$4 sm:$0xff]   ;;  %v1196_v16 = vld [vmem:[%s1316_s26 + $0x14] ss:$8 sps:$4 sm:$0xff]  }
  0x12   : > { %1052 = vmatprep.mubr.msk.bf16.mxu0 %vm488_vm0, %v1192_v5  ;;  %v1195_v6 = vld [vmem:[%s1316_s26 + $0x84] ss:$8 sps:$4 sm:$0xff]   ;;  %v1193_v15 = vld [vmem:[%s1316_s26 + $0x80] ss:$8 sps:$4 sm:$0xff]   ;;  %v1198_v17 = vld [vmem:[%s1316_s26 + $0x94] ss:$8 sps:$4 sm:$0xff]  }
  0x13   : > { %1060 = vmatprep.mubr.msk.bf16.mxu1 %vm488_vm0, %v1195_v6  ;;  %v1200_v18 = vld [vmem:[%s1316_s26 + $0x10] ss:$8 sps:$4 sm:$0xff]   ;;  %v1202_v20 = vld [vmem:[%s1316_s26 + $0x24] ss:$8 sps:$4 sm:$0xff]   ;;  %v1206_v22 = vld [vmem:[%s1316_s26 + $0x20] ss:$8 sps:$4 sm:$0xff]  }
  0x14   : > { %548 = vmatpush1.bf16.msra.mxu0 %v1183_v4  ;;  %1148 = vmatpush1.bf16.msra.mxu1 %v1183_v4  ;;  %v1201_v19 = vld [vmem:[%s1316_s26 + $0x90] ss:$8 sps:$4 sm:$0xff]   ;;  %v1204_v21 = vld [vmem:[%s1316_s26 + $0xa4] ss:$8 sps:$4 sm:$0xff]   ;;  %v1207_v23 = vld [vmem:[%s1316_s26 + $0xa0] ss:$8 sps:$4 sm:$0xff]  }
  0x15   : > { %549 = vmatprep.subr.bf16.mxu0 %v1262_v1  ;;  %1139 = vmatprep.subr.bf16.mxu1 %v1262_v1  ;;  %v1208_v24 = vld [vmem:[%s1316_s26 + $0x34] ss:$8 sps:$4 sm:$0xff]   ;;  %v1212_v26 = vld [vmem:[%s1316_s26 + $0x30] ss:$8 sps:$4 sm:$0xff]   ;;  %v1214_v28 = vld [vmem:[%s1316_s26 + $0x44] ss:$8 sps:$4 sm:$0xff]  }
  0x16   : > { %v1210_v25 = vld [vmem:[%s1316_s26 + $0xb4] ss:$8 sps:$4 sm:$0xff]   ;;  %v1213_v27 = vld [vmem:[%s1316_s26 + $0xb0] ss:$8 sps:$4 sm:$0xff]   ;;  %v1216_v29 = vld [vmem:[%s1316_s26 + $0xc4] ss:$8 sps:$4 sm:$0xff]  }
  0x17   : > { %v1218_v30 = vld [vmem:[%s1316_s26 + $0x40] ss:$8 sps:$4 sm:$0xff]   ;;  %v1220_v32 = vld [vmem:[%s1316_s26 + $0x54] ss:$8 sps:$4 sm:$0xff]   ;;  %v1224_v34 = vld [vmem:[%s1316_s26 + $0x50] ss:$8 sps:$4 sm:$0xff]  }
  0x18   : > { %550 = vmatpush1.bf16.msra.mxu0 %v1184_v7  ;;  %1149 = vmatpush1.bf16.msra.mxu1 %v1184_v7  ;;  %v1219_v31 = vld [vmem:[%s1316_s26 + $0xc0] ss:$8 sps:$4 sm:$0xff]   ;;  %v1222_v33 = vld [vmem:[%s1316_s26 + $0xd4] ss:$8 sps:$4 sm:$0xff]   ;;  %v1225_v35 = vld [vmem:[%s1316_s26 + $0xd0] ss:$8 sps:$4 sm:$0xff]  }
  0x19   : > { %551 = vmatprep.subr.bf16.mxu0 %v1262_v1  ;;  %1140 = vmatprep.subr.bf16.mxu1 %v1262_v1  ;;  %v1226_v36 = vld [vmem:[%s1316_s26 + $0x64] ss:$8 sps:$4 sm:$0xff]   ;;  %v1230_v38 = vld [vmem:[%s1316_s26 + $0x60] ss:$8 sps:$4 sm:$0xff]   ;;  %v1232_v40 = vld [vmem:[%s1316_s26 + $0x74] ss:$8 sps:$4 sm:$0xff]  }
  0x1a   : > { %v1228_v37 = vld [vmem:[%s1316_s26 + $0xe4] ss:$8 sps:$4 sm:$0xff]   ;;  %v1231_v39 = vld [vmem:[%s1316_s26 + $0xe0] ss:$8 sps:$4 sm:$0xff]   ;;  %v1234_v41 = vld [vmem:[%s1316_s26 + $0xf4] ss:$8 sps:$4 sm:$0xff]  }
  0x1b   : > { %v1236_v42 = vld [vmem:[%s1316_s26 + $0x70] ss:$8 sps:$4 sm:$0xff]  }
  0x1c   : > { %552 = vmatpush1.bf16.msra.mxu0 %v1185_v8  ;;  %1150 = vmatpush1.bf16.msra.mxu1 %v1185_v8  ;;  %v1237_v43 = vld [vmem:[%s1316_s26 + $0xf0] ss:$8 sps:$4 sm:$0xff]  }
  0x1d   : > { %553 = vmatprep.subr.bf16.mxu0 %v1262_v1  ;;  %1141 = vmatprep.subr.bf16.mxu1 %v1262_v1 }
  0x20   : > { %554 = vmatpush1.bf16.msra.mxu0 %v1186_v9  ;;  %1151 = vmatpush1.bf16.msra.mxu1 %v1186_v9 }
  0x21   : > { %555 = vmatprep.subr.bf16.mxu0 %v1262_v1  ;;  %1142 = vmatprep.subr.bf16.mxu1 %v1262_v1 }
  0x24   : > { %556 = vmatpush1.bf16.msra.mxu0 %v1187_v10  ;;  %1152 = vmatpush1.bf16.msra.mxu1 %v1187_v10 }
  0x25   : > { %557 = vmatprep.subr.bf16.mxu0 %v1262_v1  ;;  %1143 = vmatprep.subr.bf16.mxu1 %v1262_v1 }
  0x28   : > { %558 = vmatpush1.bf16.msra.mxu0 %v1188_v11  ;;  %1153 = vmatpush1.bf16.msra.mxu1 %v1188_v11 }
  0x29   : > { %559 = vmatprep.subr.bf16.mxu0 %v1262_v1  ;;  %1144 = vmatprep.subr.bf16.mxu1 %v1262_v1 }
  0x2c   : > { %560 = vmatpush1.bf16.msra.mxu0 %v539_v13  ;;  %1154 = vmatpush1.bf16.msra.mxu1 %v539_v13 }
  0x2f   : > { %574 = vmatmul.mubr.bf16.vlgmr.msra.gmra.mrb[0].mxu0 %v1190_v14  ;;  %638 = vmatmul.mubr.bf16.vlgmr.msra.gmra.mrb[0].mxu1 %v1193_v15 }
  0x30   : > { %1053 = vmatprep.mubr.msk.bf16.mxu0 %vm488_vm0, %v1196_v16  ;;  %1061 = vmatprep.mubr.msk.bf16.mxu1 %vm488_vm0, %v1198_v17 }
  0x37   : > { %582 = vmatmul.mubr.bf16.gmra.mrb[4].mxu0 %v1200_v18  ;;  %646 = vmatmul.mubr.bf16.gmra.mrb[4].mxu1 %v1201_v19 }
  0x38   : > { %1054 = vmatprep.mubr.msk.bf16.mxu0 %vm488_vm0, %v1202_v20  ;;  %1062 = vmatprep.mubr.msk.bf16.mxu1 %vm488_vm0, %v1204_v21 }
  0x3f   : > { %590 = vmatmul.mubr.bf16.gmra.mrb[8].mxu0 %v1206_v22  ;;  %654 = vmatmul.mubr.bf16.gmra.mrb[8].mxu1 %v1207_v23 }
  0x40   : > { %1055 = vmatprep.mubr.msk.bf16.mxu0 %vm488_vm0, %v1208_v24  ;;  %1063 = vmatprep.mubr.msk.bf16.mxu1 %vm488_vm0, %v1210_v25 }
  0x47   : > { %598 = vmatmul.mubr.bf16.gmra.mrb[12].mxu0 %v1212_v26  ;;  %662 = vmatmul.mubr.bf16.gmra.mrb[12].mxu1 %v1213_v27 }
  0x48   : > { %1056 = vmatprep.mubr.msk.bf16.mxu0 %vm488_vm0, %v1214_v28  ;;  %1064 = vmatprep.mubr.msk.bf16.mxu1 %vm488_vm0, %v1216_v29 }
  0x4f   : > { %606 = vmatmul.mubr.bf16.gmra.mrb[16].mxu0 %v1218_v30  ;;  %670 = vmatmul.mubr.bf16.gmra.mrb[16].mxu1 %v1219_v31 }
  0x50   : > { %1057 = vmatprep.mubr.msk.bf16.mxu0 %vm488_vm0, %v1220_v32  ;;  %1065 = vmatprep.mubr.msk.bf16.mxu1 %vm488_vm0, %v1222_v33 }
  0x57   : > { %614 = vmatmul.mubr.bf16.gmra.mrb[20].mxu0 %v1224_v34  ;;  %678 = vmatmul.mubr.bf16.gmra.mrb[20].mxu1 %v1225_v35 }
  0x58   : > { %1058 = vmatprep.mubr.msk.bf16.mxu0 %vm488_vm0, %v1226_v36  ;;  %1066 = vmatprep.mubr.msk.bf16.mxu1 %vm488_vm0, %v1228_v37 }
  0x5f   : > { %622 = vmatmul.mubr.bf16.gmra.mrb[24].mxu0 %v1230_v38  ;;  %686 = vmatmul.mubr.bf16.gmra.mrb[24].mxu1 %v1231_v39 }
  0x60   : > { %1059 = vmatprep.mubr.msk.bf16.mxu0 %vm488_vm0, %v1232_v40  ;;  %1067 = vmatprep.mubr.msk.bf16.mxu1 %vm488_vm0, %v1234_v41 }
  0x67   : > { %630 = vmatmul.mubr.bf16.gmra.mrb[28].mxu0 %v1236_v42  ;;  %694 = vmatmul.mubr.bf16.gmra.mrb[28].mxu1 %v1237_v43 }
 0x102   : > { %v575_v45 = vpop.f32.mrb[0].mxu0  ;;  %v639_v46 = vpop.f32.mrb[0].mxu1 }
 0x103   : > { %v576_v47 = vadd.f32 %v1390_v44, %v575_v45  ;;  %v640_v48 = vadd.f32 %v1390_v44, %v639_v46  ;;  %v577_v49 = vpop.f32.mrb[1].mxu0  ;;  %v641_v50 = vpop.f32.mrb[1].mxu1 }
 0x104   : > { %v578_v51 = vpop.f32.mrb[2].mxu0  ;;  %v642_v52 = vpop.f32.mrb[2].mxu1 }
 0x105   : > { %v702_v53 = vmax.f32 %v576_v47, 0.0  ;;  %v718_v54 = vmax.f32 %v640_v48, 0.0  ;;  %v579_v55 = vadd.f32 %v1390_v44, %v578_v51  ;;  %v643_v56 = vadd.f32 %v1390_v44, %v642_v52  ;;  %v580_v57 = vpop.f32.mrb[3].mxu0  ;;  %v644_v58 = vpop.f32.mrb[3].mxu1 }
 0x107   : > { %v1103_v59 = vpack.c.bf16 %v702_v53, %v702_v53  ;;  %v1119_v60 = vpack.c.bf16 %v718_v54, %v718_v54  ;;  %v703_v61 = vmax.f32 %v579_v55, 0.0  ;;  %v719_v62 = vmax.f32 %v643_v56, 0.0 }
 0x109   : > { %863 = vst.msk [vmem:[%s1400_s20] sm:$0xf] %vm862_vm2, %v1103_v59  ;;  %879 = vst.msk [vmem:[%s1400_s20 + $0x40] sm:$0xf] %vm862_vm2, %v1119_v60  ;;  %v1104_v63 = vpack.c.bf16 %v703_v61, %v703_v61  ;;  %v1120_v0 = vpack.c.bf16 %v719_v62, %v719_v62 }
 0x10a   : > { %v583_v1 = vpop.f32.mrb[4].mxu0  ;;  %v647_v2 = vpop.f32.mrb[4].mxu1 }
 0x10b   : > { %864 = vst.msk [vmem:[%s1400_s20 + $0x4] sm:$0xf] %vm862_vm2, %v1104_v63  ;;  %880 = vst.msk [vmem:[%s1400_s20 + $0x44] sm:$0xf] %vm862_vm2, %v1120_v0  ;;  %v584_v3 = vadd.f32 %v1390_v44, %v583_v1  ;;  %v648_v4 = vadd.f32 %v1390_v44, %v647_v2  ;;  %v585_v5 = vpop.f32.mrb[5].mxu0  ;;  %v649_v6 = vpop.f32.mrb[5].mxu1 }
 0x10c   : > { %v586_v7 = vpop.f32.mrb[6].mxu0  ;;  %v650_v8 = vpop.f32.mrb[6].mxu1 }
 0x10d   : > { %v704_v9 = vmax.f32 %v584_v3, 0.0  ;;  %v720_v10 = vmax.f32 %v648_v4, 0.0  ;;  %v587_v11 = vadd.f32 %v1390_v44, %v586_v7  ;;  %v651_v12 = vadd.f32 %v1390_v44, %v650_v8  ;;  %v588_v13 = vpop.f32.mrb[7].mxu0  ;;  %v652_v14 = vpop.f32.mrb[7].mxu1 }
 0x10f   : > { %v1105_v15 = vpack.c.bf16 %v704_v9, %v704_v9  ;;  %v1121_v16 = vpack.c.bf16 %v720_v10, %v720_v10  ;;  %v705_v17 = vmax.f32 %v587_v11, 0.0  ;;  %v721_v18 = vmax.f32 %v651_v12, 0.0 }
 0x111   : > { %865 = vst.msk [vmem:[%s1400_s20 + $0x8] sm:$0xf] %vm862_vm2, %v1105_v15  ;;  %881 = vst.msk [vmem:[%s1400_s20 + $0x48] sm:$0xf] %vm862_vm2, %v1121_v16  ;;  %v1106_v19 = vpack.c.bf16 %v705_v17, %v705_v17  ;;  %v1122_v20 = vpack.c.bf16 %v721_v18, %v721_v18 }
 0x112   : > { %v591_v21 = vpop.f32.mrb[8].mxu0  ;;  %v655_v22 = vpop.f32.mrb[8].mxu1 }
 0x113   : > { %866 = vst.msk [vmem:[%s1400_s20 + $0xc] sm:$0xf] %vm862_vm2, %v1106_v19  ;;  %882 = vst.msk [vmem:[%s1400_s20 + $0x4c] sm:$0xf] %vm862_vm2, %v1122_v20  ;;  %v592_v23 = vadd.f32 %v1390_v44, %v591_v21  ;;  %v656_v24 = vadd.f32 %v1390_v44, %v655_v22  ;;  %v593_v25 = vpop.f32.mrb[9].mxu0  ;;  %v657_v26 = vpop.f32.mrb[9].mxu1 }
 0x114   : > { %v594_v27 = vpop.f32.mrb[10].mxu0  ;;  %v658_v28 = vpop.f32.mrb[10].mxu1 }
 0x115   : > { %v706_v29 = vmax.f32 %v592_v23, 0.0  ;;  %v722_v30 = vmax.f32 %v656_v24, 0.0  ;;  %v595_v31 = vadd.f32 %v1390_v44, %v594_v27  ;;  %v659_v32 = vadd.f32 %v1390_v44, %v658_v28  ;;  %v596_v33 = vpop.f32.mrb[11].mxu0  ;;  %v660_v34 = vpop.f32.mrb[11].mxu1 }
 0x117   : > { %v1107_v35 = vpack.c.bf16 %v706_v29, %v706_v29  ;;  %v1123_v36 = vpack.c.bf16 %v722_v30, %v722_v30  ;;  %v707_v37 = vmax.f32 %v595_v31, 0.0  ;;  %v723_v38 = vmax.f32 %v659_v32, 0.0 }
 0x119   : > { %867 = vst.msk [vmem:[%s1400_s20 + $0x10] sm:$0xf] %vm862_vm2, %v1107_v35  ;;  %883 = vst.msk [vmem:[%s1400_s20 + $0x50] sm:$0xf] %vm862_vm2, %v1123_v36  ;;  %v1108_v39 = vpack.c.bf16 %v707_v37, %v707_v37  ;;  %v1124_v40 = vpack.c.bf16 %v723_v38, %v723_v38 }
 0x11a   : > { %v599_v41 = vpop.f32.mrb[12].mxu0  ;;  %v663_v42 = vpop.f32.mrb[12].mxu1 }
 0x11b   : > { %868 = vst.msk [vmem:[%s1400_s20 + $0x14] sm:$0xf] %vm862_vm2, %v1108_v39  ;;  %884 = vst.msk [vmem:[%s1400_s20 + $0x54] sm:$0xf] %vm862_vm2, %v1124_v40  ;;  %v600_v43 = vadd.f32 %v1390_v44, %v599_v41  ;;  %v664_v45 = vadd.f32 %v1390_v44, %v663_v42  ;;  %v601_v46 = vpop.f32.mrb[13].mxu0  ;;  %v665_v47 = vpop.f32.mrb[13].mxu1 }
 0x11c   : > { %v602_v48 = vpop.f32.mrb[14].mxu0  ;;  %v666_v49 = vpop.f32.mrb[14].mxu1 }
 0x11d   : > { %v708_v50 = vmax.f32 %v600_v43, 0.0  ;;  %v724_v51 = vmax.f32 %v664_v45, 0.0  ;;  %v603_v52 = vadd.f32 %v1390_v44, %v602_v48  ;;  %v667_v53 = vadd.f32 %v1390_v44, %v666_v49  ;;  %v604_v54 = vpop.f32.mrb[15].mxu0  ;;  %v668_v55 = vpop.f32.mrb[15].mxu1 }
 0x11f   : > { %v1109_v56 = vpack.c.bf16 %v708_v50, %v708_v50  ;;  %v1125_v57 = vpack.c.bf16 %v724_v51, %v724_v51  ;;  %v709_v58 = vmax.f32 %v603_v52, 0.0  ;;  %v725_v59 = vmax.f32 %v667_v53, 0.0 }
 0x121   : > { %869 = vst.msk [vmem:[%s1400_s20 + $0x18] sm:$0xf] %vm862_vm2, %v1109_v56  ;;  %885 = vst.msk [vmem:[%s1400_s20 + $0x58] sm:$0xf] %vm862_vm2, %v1125_v57  ;;  %v1110_v60 = vpack.c.bf16 %v709_v58, %v709_v58  ;;  %v1126_v61 = vpack.c.bf16 %v725_v59, %v725_v59 }
 0x122   : > { %v607_v62 = vpop.f32.mrb[16].mxu0  ;;  %v671_v63 = vpop.f32.mrb[16].mxu1 }
 0x123   : > { %870 = vst.msk [vmem:[%s1400_s20 + $0x1c] sm:$0xf] %vm862_vm2, %v1110_v60  ;;  %886 = vst.msk [vmem:[%s1400_s20 + $0x5c] sm:$0xf] %vm862_vm2, %v1126_v61  ;;  %v608_v0 = vadd.f32 %v1390_v44, %v607_v62  ;;  %v672_v1 = vadd.f32 %v1390_v44, %v671_v63  ;;  %v609_v2 = vpop.f32.mrb[17].mxu0  ;;  %v673_v3 = vpop.f32.mrb[17].mxu1 }
 0x124   : > { %v610_v4 = vpop.f32.mrb[18].mxu0  ;;  %v674_v5 = vpop.f32.mrb[18].mxu1 }
 0x125   : > { %v710_v6 = vmax.f32 %v608_v0, 0.0  ;;  %v726_v7 = vmax.f32 %v672_v1, 0.0  ;;  %v611_v8 = vadd.f32 %v1390_v44, %v610_v4  ;;  %v675_v9 = vadd.f32 %v1390_v44, %v674_v5  ;;  %v612_v10 = vpop.f32.mrb[19].mxu0  ;;  %v676_v11 = vpop.f32.mrb[19].mxu1 }
 0x127   : > { %v1111_v12 = vpack.c.bf16 %v710_v6, %v710_v6  ;;  %v1127_v13 = vpack.c.bf16 %v726_v7, %v726_v7  ;;  %v711_v14 = vmax.f32 %v611_v8, 0.0  ;;  %v727_v15 = vmax.f32 %v675_v9, 0.0 }
 0x129   : > { %871 = vst.msk [vmem:[%s1400_s20 + $0x20] sm:$0xf] %vm862_vm2, %v1111_v12  ;;  %887 = vst.msk [vmem:[%s1400_s20 + $0x60] sm:$0xf] %vm862_vm2, %v1127_v13  ;;  %v1112_v16 = vpack.c.bf16 %v711_v14, %v711_v14  ;;  %v1128_v17 = vpack.c.bf16 %v727_v15, %v727_v15 }
 0x12a   : > { %v615_v18 = vpop.f32.mrb[20].mxu0  ;;  %v679_v19 = vpop.f32.mrb[20].mxu1 }
 0x12b   : > { %872 = vst.msk [vmem:[%s1400_s20 + $0x24] sm:$0xf] %vm862_vm2, %v1112_v16  ;;  %888 = vst.msk [vmem:[%s1400_s20 + $0x64] sm:$0xf] %vm862_vm2, %v1128_v17  ;;  %v616_v20 = vadd.f32 %v1390_v44, %v615_v18  ;;  %v680_v21 = vadd.f32 %v1390_v44, %v679_v19  ;;  %v617_v22 = vpop.f32.mrb[21].mxu0  ;;  %v681_v23 = vpop.f32.mrb[21].mxu1 }
 0x12c   : > { %v618_v24 = vpop.f32.mrb[22].mxu0  ;;  %v682_v25 = vpop.f32.mrb[22].mxu1 }
 0x12d   : > { %v712_v26 = vmax.f32 %v616_v20, 0.0  ;;  %v728_v27 = vmax.f32 %v680_v21, 0.0  ;;  %v619_v28 = vadd.f32 %v1390_v44, %v618_v24  ;;  %v683_v29 = vadd.f32 %v1390_v44, %v682_v25  ;;  %v620_v30 = vpop.f32.mrb[23].mxu0  ;;  %v684_v31 = vpop.f32.mrb[23].mxu1 }
 0x12f   : > { %v1113_v32 = vpack.c.bf16 %v712_v26, %v712_v26  ;;  %v1129_v33 = vpack.c.bf16 %v728_v27, %v728_v27  ;;  %v713_v34 = vmax.f32 %v619_v28, 0.0  ;;  %v729_v35 = vmax.f32 %v683_v29, 0.0 }
 0x131   : > { %873 = vst.msk [vmem:[%s1400_s20 + $0x28] sm:$0xf] %vm862_vm2, %v1113_v32  ;;  %889 = vst.msk [vmem:[%s1400_s20 + $0x68] sm:$0xf] %vm862_vm2, %v1129_v33  ;;  %v1114_v36 = vpack.c.bf16 %v713_v34, %v713_v34  ;;  %v1130_v37 = vpack.c.bf16 %v729_v35, %v729_v35 }
 0x132   : > { %v623_v38 = vpop.f32.mrb[24].mxu0  ;;  %v687_v39 = vpop.f32.mrb[24].mxu1 }
 0x133   : > { %874 = vst.msk [vmem:[%s1400_s20 + $0x2c] sm:$0xf] %vm862_vm2, %v1114_v36  ;;  %890 = vst.msk [vmem:[%s1400_s20 + $0x6c] sm:$0xf] %vm862_vm2, %v1130_v37  ;;  %v624_v40 = vadd.f32 %v1390_v44, %v623_v38  ;;  %v688_v41 = vadd.f32 %v1390_v44, %v687_v39  ;;  %v625_v42 = vpop.f32.mrb[25].mxu0  ;;  %v689_v43 = vpop.f32.mrb[25].mxu1 }
 0x134   : > { %v626_v45 = vpop.f32.mrb[26].mxu0  ;;  %v690_v46 = vpop.f32.mrb[26].mxu1 }
 0x135   : > { %v714_v47 = vmax.f32 %v624_v40, 0.0  ;;  %v730_v48 = vmax.f32 %v688_v41, 0.0  ;;  %v627_v49 = vadd.f32 %v1390_v44, %v626_v45  ;;  %v691_v50 = vadd.f32 %v1390_v44, %v690_v46  ;;  %v628_v51 = vpop.f32.mrb[27].mxu0  ;;  %v692_v52 = vpop.f32.mrb[27].mxu1 }
 0x137   : > { %v1115_v53 = vpack.c.bf16 %v714_v47, %v714_v47  ;;  %v1131_v54 = vpack.c.bf16 %v730_v48, %v730_v48  ;;  %v715_v55 = vmax.f32 %v627_v49, 0.0  ;;  %v731_v56 = vmax.f32 %v691_v50, 0.0 }
 0x139   : > { %875 = vst.msk [vmem:[%s1400_s20 + $0x30] sm:$0xf] %vm862_vm2, %v1115_v53  ;;  %891 = vst.msk [vmem:[%s1400_s20 + $0x70] sm:$0xf] %vm862_vm2, %v1131_v54  ;;  %v1116_v57 = vpack.c.bf16 %v715_v55, %v715_v55  ;;  %v1132_v58 = vpack.c.bf16 %v731_v56, %v731_v56 }
 0x13a   : > { %v631_v59 = vpop.f32.mrb[28].mxu0  ;;  %v695_v60 = vpop.f32.mrb[28].mxu1 }
 0x13b   : > { %876 = vst.msk [vmem:[%s1400_s20 + $0x34] sm:$0xf] %vm862_vm2, %v1116_v57  ;;  %892 = vst.msk [vmem:[%s1400_s20 + $0x74] sm:$0xf] %vm862_vm2, %v1132_v58  ;;  %v632_v61 = vadd.f32 %v1390_v44, %v631_v59  ;;  %v696_v62 = vadd.f32 %v1390_v44, %v695_v60  ;;  %v633_v63 = vpop.f32.mrb[29].mxu0  ;;  %v697_v0 = vpop.f32.mrb[29].mxu1 }
 0x13c   : > { %v634_v1 = vpop.f32.mrb[30].mxu0  ;;  %v698_v2 = vpop.f32.mrb[30].mxu1 }
 0x13d   : > { %v716_v3 = vmax.f32 %v632_v61, 0.0  ;;  %v732_v4 = vmax.f32 %v696_v62, 0.0  ;;  %v635_v5 = vadd.f32 %v1390_v44, %v634_v1  ;;  %v699_v6 = vadd.f32 %v1390_v44, %v698_v2  ;;  %v636_v7 = vpop.f32.mrb[31].mxu0  ;;  %v700_v8 = vpop.f32.mrb[31].mxu1 }
 0x13f   : > { %v1117_v9 = vpack.c.bf16 %v716_v3, %v716_v3  ;;  %v1133_v10 = vpack.c.bf16 %v732_v4, %v732_v4  ;;  %v717_v11 = vmax.f32 %v635_v5, 0.0  ;;  %v733_v12 = vmax.f32 %v699_v6, 0.0 }
 0x141   : > { %877 = vst.msk [vmem:[%s1400_s20 + $0x38] sm:$0xf] %vm862_vm2, %v1117_v9  ;;  %893 = vst.msk [vmem:[%s1400_s20 + $0x78] sm:$0xf] %vm862_vm2, %v1133_v10  ;;  %v1118_v13 = vpack.c.bf16 %v717_v11, %v717_v11  ;;  %v1134_v14 = vpack.c.bf16 %v733_v12, %v733_v12 }
 0x143   : > { %878 = vst.msk [vmem:[%s1400_s20 + $0x3c] sm:$0xf] %vm862_vm2, %v1118_v13  ;;  %894 = vst.msk [vmem:[%s1400_s20 + $0x7c] sm:$0xf] %vm862_vm2, %v1134_v14 }
 0x144 PF: > { %s13_s14 = sadd.s32 1, %s1260_s14   ;;  %s1507_s12 = smov %s1256_s13 }
 0x145   : > { %p10_p5 = scmp.ge.s32.totalorder %s13_s14, 4   ;;  %s1508_s13 = smov %s1510_s15 }
 0x147   :  { %12 = sbr.rel (!%p10_p5) target bundleno = 2 (0x2), region = 68 }

// kernel: _lambda_.33
= control target key start
LH: loop header
LB: loop body
LE: loop exit
PB: predicated region body
PF: predicated region fallthrough
CT: control target
= control target key end

     0   :  { %s672_s12 = smov 0   ;;  %s674_s13 = smov 0   ;;  %s739_s0 = inlined_call_operand.vmem [shape: bf16[128,64], index: 0, kind: input, shape index: {}]   ;;  %s740_s1 = inlined_call_operand.vmem [shape: bf16[64,64], index: 1, kind: input, shape index: {}]   ;;  %s741_s2 = inlined_call_operand.vmem [shape: f32[1,64], index: 2, kind: input, shape index: {}]   ;;  %s742_s3 = inlined_call_operand.vmem [shape: bf16[128,64], index: 3, kind: output, shape index: {}]  }
   0x1   :  { %s676_s14 = smov 0  }
   0x2 LB: > { %s25_s15 = sadd.s32 1, %s646_s13  ;;  %p528_p0 = scmp.ge.s32.totalorder %s650_s14, 1  ;;  %s650_s14 = sphi %s676_s14, %s13_s14   ;;  %s646_s13 = sphi %s674_s13, %s744_s13   ;;  %s642_s12 = sphi %s672_s12, %s743_s12  }
   0x3   : > { %p27_p1 = scmp.ge.s32.totalorder %s25_s15, 2  ;;  %p169_p2 = scmp.lt.s32.totalorder %s650_s14, 3 }
   0x5   : > { %s746_s15 = smov (%p27_p1, %s25_s15), 0  ;;  %p170_p3 = pnand %p528_p0, %p169_p2 }
   0x6   : > { %v620_v0 = vld [vmem:[%s740_s1] sm:$0xff] (!%p170_p3)   ;;  %s529_s18 = sshll.u32 (!%p170_p3), %s642_s12, 3  ;;  %v621_v1 = vld [vmem:[%s740_s1 + $0x8] sm:$0xff] (!%p170_p3)   ;;  %v622_v2 = vld [vmem:[%s740_s1 + $0x10] sm:$0xff] (!%p170_p3)   ;;  %vm293_vm0 = vcmask (!%p170_p3), 523264   ;;  %vm411_vm1 = vcmask (!%p170_p3), 519168  }
   0x7   : > { %173 = sbr.rel (%p170_p3) target bundleno = 245 (0xf5), region = 32  ;;  %p204_p4 = scmp.lt.s32.totalorder (!%p170_p3), %s529_s18, 15  ;;  %572 = vmatprep.subr.bf16.mxu0 (!%p170_p3), %v620_v0  ;;  %588 = vmatprep.subr.bf16.mxu1 (!%p170_p3), %v620_v0  ;;  %v623_v3 = vld [vmem:[%s740_s1 + $0x18] sm:$0xff] (!%p170_p3)   ;;  %v533_v8 = vld [vmem:[%s741_s2] ss:$0 sm:$0xff] (!%p170_p3) }
   0x8   : > { %573 = vmatpush3.bf16.msra.mxu0 (!%p170_p3), %v620_v0  ;;  %592 = vmatpush3.bf16.msra.mxu1 (!%p170_p3), %v620_v0 }
   0x9   : > { %574 = vmatprep.subr.bf16.mxu0 (!%p170_p3), %v621_v1  ;;  %589 = vmatprep.subr.bf16.mxu1 (!%p170_p3), %v621_v1 }
   0xc   : > { %575 = vmatpush3.bf16.msra.mxu0 (!%p170_p3), %v621_v1  ;;  %593 = vmatpush3.bf16.msra.mxu1 (!%p170_p3), %v621_v1 }
   0xd   : > { %576 = vmatprep.subr.bf16.mxu0 (!%p170_p3), %v622_v2  ;;  %590 = vmatprep.subr.bf16.mxu1 (!%p170_p3), %v622_v2 }
   0xe   : > { %s748_s18 = smov (!%p204_p4, %s529_s18), 15 }
   0xf   : > { %s530_s23 = sshll.u32 %s748_s18, 2 }
  0x10   : > { %s207_s28 = scalar_lea.vmem %s739_s0, %s530_s23  ;;  %577 = vmatpush3.bf16.msra.mxu0 %v622_v2  ;;  %594 = vmatpush3.bf16.msra.mxu1 %v622_v2  ;;  %s223_s6 = scalar_lea.vmem %s742_s3, %s530_s23 }
  0x11   : > { %v624_v4 = vld [vmem:[%s207_s28] sm:$0xff]   ;;  %v625_v5 = vld [vmem:[%s207_s28 + $0x10] sm:$0xff]   ;;  %578 = vmatprep.subr.bf16.mxu0 %v623_v3  ;;  %591 = vmatprep.subr.bf16.mxu1 %v623_v3  ;;  %v626_v6 = vld [vmem:[%s207_s28 + $0x8] sm:$0xff]  }
  0x12   : > { %580 = vmatprep.mubr.msk.bf16.mxu0 %vm293_vm0, %v624_v4  ;;  %584 = vmatprep.mubr.msk.bf16.mxu1 %vm293_vm0, %v625_v5  ;;  %v627_v7 = vld [vmem:[%s207_s28 + $0x18] sm:$0xff]  }
  0x14   : > { %579 = vmatpush3.bf16.msra.mxu0 %v623_v3  ;;  %595 = vmatpush3.bf16.msra.mxu1 %v623_v3 }
  0x17   : > { %581 = vmatmul.mubr.msk.bf16.vlgmr.msra.gmra.mrb[0].mxu0 %vm293_vm0, %v626_v6  ;;  %585 = vmatmul.mubr.msk.bf16.vlgmr.msra.gmra.mrb[0].mxu1 %vm293_vm0, %v627_v7 }
  0xea   : > { %v582_v9 = vpop.f32.mrb[0].mxu0  ;;  %v586_v10 = vpop.f32.mrb[0].mxu1 }
  0xeb   : > { %v349_v11 = vadd.f32 %v582_v9, %v533_v8  ;;  %v365_v12 = vadd.f32 %v586_v10, %v533_v8  ;;  %v340_v13 = vpop.f32.mrb[1].mxu0  ;;  %v356_v14 = vpop.f32.mrb[1].mxu1 }
  0xec   : > { %v341_v15 = vadd.f32 %v533_v8, %v340_v13  ;;  %v357_v16 = vadd.f32 %v533_v8, %v356_v14  ;;  %v583_v17 = vpop.f32.mrb[2].mxu0  ;;  %v587_v18 = vpop.f32.mrb[2].mxu1 }
  0xed   : > { %v373_v19 = vmax.f32 %v349_v11, 0.0  ;;  %v377_v20 = vmax.f32 %v365_v12, 0.0  ;;  %v352_v21 = vadd.f32 %v583_v17, %v533_v8  ;;  %v368_v22 = vadd.f32 %v587_v18, %v533_v8  ;;  %v343_v23 = vpop.f32.mrb[3].mxu0  ;;  %v359_v24 = vpop.f32.mrb[3].mxu1 }
  0xee   : > { %v371_v25 = vmax.f32 %v341_v15, 0.0  ;;  %v375_v26 = vmax.f32 %v357_v16, 0.0  ;;  %v344_v27 = vadd.f32 %v533_v8, %v343_v23  ;;  %v360_v28 = vadd.f32 %v533_v8, %v359_v24 }
  0xef   : > { %v558_v29 = vpack.c.bf16 %v373_v19, %v373_v19  ;;  %v562_v30 = vpack.c.bf16 %v377_v20, %v377_v20  ;;  %v374_v31 = vmax.f32 %v352_v21, 0.0  ;;  %v378_v32 = vmax.f32 %v368_v22, 0.0 }
  0xf0   : > { %v556_v33 = vpack.c.bf16 %v371_v25, %v371_v25  ;;  %v560_v34 = vpack.c.bf16 %v375_v26, %v375_v26  ;;  %v372_v35 = vmax.f32 %v344_v27, 0.0  ;;  %v376_v36 = vmax.f32 %v360_v28, 0.0 }
  0xf1   : > { %414 = vst.msk [vmem:[%s223_s6 + $0x8] sm:$0xf] %vm411_vm1, %v558_v29  ;;  %418 = vst.msk [vmem:[%s223_s6 + $0x18] sm:$0xf] %vm411_vm1, %v562_v30  ;;  %v559_v37 = vpack.c.bf16 %v374_v31, %v374_v31  ;;  %v563_v38 = vpack.c.bf16 %v378_v32, %v378_v32 }
  0xf2   : > { %412 = vst.msk [vmem:[%s223_s6] sm:$0xf] %vm411_vm1, %v556_v33  ;;  %416 = vst.msk [vmem:[%s223_s6 + $0x10] sm:$0xf] %vm411_vm1, %v560_v34  ;;  %v557_v39 = vpack.c.bf16 %v372_v35, %v372_v35  ;;  %v561_v40 = vpack.c.bf16 %v376_v36, %v376_v36 }
  0xf3   : > { %415 = vst.msk [vmem:[%s223_s6 + $0xc] sm:$0xf] %vm411_vm1, %v559_v37  ;;  %419 = vst.msk [vmem:[%s223_s6 + $0x1c] sm:$0xf] %vm411_vm1, %v563_v38 }
  0xf4   : > { %413 = vst.msk [vmem:[%s223_s6 + $0x4] sm:$0xf] %vm411_vm1, %v557_v39  ;;  %417 = vst.msk [vmem:[%s223_s6 + $0x14] sm:$0xf] %vm411_vm1, %v561_v40 }
  0xf5 PF: > { %s13_s14 = sadd.s32 1, %s650_s14   ;;  %s743_s12 = smov %s646_s13 }
  0xf6   : > { %p10_p5 = scmp.ge.s32.totalorder %s13_s14, 4   ;;  %s744_s13 = smov %s746_s15 }
  0xf8   :  { %12 = sbr.rel (!%p10_p5) target bundleno = 2 (0x2), region = 68 }

// kernel: _lambda_.32
= control target key start
LH: loop header
LB: loop body
LE: loop exit
PB: predicated region body
PF: predicated region fallthrough
CT: control target
= control target key end

     0   :  { %s1055_s12 = smov 0   ;;  %s1057_s13 = smov 0   ;;  %s1194_s0 = inlined_call_operand.vmem [shape: bf16[128,64], index: 0, kind: input, shape index: {}]   ;;  %s1195_s1 = inlined_call_operand.vmem [shape: bf16[64,256], index: 1, kind: input, shape index: {}]   ;;  %s1196_s2 = inlined_call_operand.vmem [shape: f32[1,256], index: 2, kind: input, shape index: {}]   ;;  %s1197_s3 = inlined_call_operand.vmem [shape: bf16[128,256], index: 3, kind: output, shape index: {}]  }
   0x1   :  { %s1059_s14 = smov 0   ;;  %s1061_s15 = smov 0  }
   0x2   :  { %s1063_s16 = smov 0  }
   0x3 LB: > { %s22_s17 = sadd.s32 1, %s1029_s15  ;;  %s785_s18 = sadd.s32 4294967295, %s1033_s16   ;;  %s1033_s16 = sphi %s1063_s16, %s13_s16   ;;  %s1029_s15 = sphi %s1061_s15, %s1202_s15   ;;  %s1025_s14 = sphi %s1059_s14, %s1201_s14   ;;  %s1021_s13 = sphi %s1057_s13, %s1200_s13   ;;  %s1017_s12 = sphi %s1055_s12, %s1199_s12  }
   0x4   : > { %p23_p0 = scmp.ge.s32.totalorder %s22_s17, 2  ;;  %p65_p1 = scmp.ne.s32.totalorder %s1021_s13, %s1017_s12 }
   0x5   : > { %p66_p2 = scmp.eq.s32.totalorder %s1033_s16, 0  ;;  %p123_p4 = scmp.eq.s32.totalorder %s785_s18, 1 }
   0x6   : > { %s1204_s17 = smov (%p23_p0, %s22_s17), 0  ;;  %s58_s20 = sadd.s32 1, %s1021_s13 }
   0x7   : > { %p67_p3 = por %p66_p2, %p65_p1  ;;  %s55_s19 = ssub.s32 %s1029_s15, %s1204_s17 }
   0x8   : > { %p56_p5 = scmp.eq.s32.totalorder %s55_s19, 0  ;;  %p1090_p6 = por %p123_p4, %p65_p1 }
   0x9   : > { %p789_p7 = scmp.ge.s32.totalorder %s1033_s16, 2 }
   0xa   : > { %s1095_s22 = scalar_select %p56_p5, %s1021_s13, %s58_s20  }
   0xb   : > { %154 = sbr.rel (%p789_p7) target bundleno = 27 (0x1b), region = 20 }
  0x12   : > { %157 = sbr.rel (!%p67_p3) target bundleno = 27 (0x1b), region = 24  ;;  %s159_s23 = sand.u32 (%p67_p3), 1, %s1021_s13  }
  0x13   : > { %s791_s24 = sshll.u32 (%p67_p3), %s1029_s15, 2  ;;  %s790_s25 = sshll.u32 (%p67_p3), %s159_s23, 5 }
  0x14   : > { %s163_s28 = scalar_lea.vmem (%p67_p3), %s1195_s1, %s791_s24  ;;  %s161_s29 = scalar_lea.vmem (%p67_p3), [#allocation2], %s790_s25 }
  0x15   : > { %v179_v0 = vld [vmem:[%s163_s28] sm:$0xf] (%p67_p3)  ;;  %v181_v1 = vld [vmem:[%s163_s28 + $0x8] sm:$0xf] (%p67_p3)  ;;  %v183_v2 = vld [vmem:[%s163_s28 + $0x10] sm:$0xf] (%p67_p3) }
  0x16   : > { %180 = vst [vmem:[%s161_s29] sm:$0xf] (%p67_p3), %v179_v0  ;;  %182 = vst [vmem:[%s161_s29 + $0x4] sm:$0xf] (%p67_p3), %v181_v1  ;;  %v185_v3 = vld [vmem:[%s163_s28 + $0x18] sm:$0xf] (%p67_p3) }
  0x17   : > { %v187_v4 = vld [vmem:[%s163_s28 + $0x20] sm:$0xf] (%p67_p3)  ;;  %184 = vst [vmem:[%s161_s29 + $0x8] sm:$0xf] (%p67_p3), %v183_v2  ;;  %186 = vst [vmem:[%s161_s29 + $0xc] sm:$0xf] (%p67_p3), %v185_v3 }
  0x18   : > { %188 = vst [vmem:[%s161_s29 + $0x10] sm:$0xf] (%p67_p3), %v187_v4  ;;  %v189_v5 = vld [vmem:[%s163_s28 + $0x28] sm:$0xf] (%p67_p3)  ;;  %v191_v6 = vld [vmem:[%s163_s28 + $0x30] sm:$0xf] (%p67_p3) }
  0x19   : > { %v193_v7 = vld [vmem:[%s163_s28 + $0x38] sm:$0xf]  ;;  %190 = vst [vmem:[%s161_s29 + $0x14] sm:$0xf] %v189_v5  ;;  %192 = vst [vmem:[%s161_s29 + $0x18] sm:$0xf] %v191_v6 }
  0x1a   : > { %194 = vst [vmem:[%s161_s29 + $0x1c] sm:$0xf] %v193_v7 }
  0x1b PF: > { %p792_p8 = scmp.ge.s32.totalorder %s1033_s16, 1  ;;  %p238_p9 = scmp.lt.s32.totalorder %s1033_s16, 3 }
  0x1d   : > { %p239_p10 = pnand %p792_p8, %p238_p9 }
  0x1e   : > { %s245_s30 = sand.u32 (!%p239_p10), 1, %s1017_s12   ;;  %v987_v8 = vld [vmem:[%s1194_s0] sm:$0xff] (!%p239_p10)   ;;  %vm381_vm0 = vcmask (!%p239_p10), 523264   ;;  %v989_v14 = vld [vmem:[%s1194_s0 + $0x8] sm:$0xff] (!%p239_p10)   ;;  %v991_v16 = vld [vmem:[%s1194_s0 + $0x10] sm:$0xff] (!%p239_p10)   ;;  %p281_p11 = scmp.lt.s32.totalorder (!%p239_p10), %s1025_s14, 1 }
  0x1f   : > { %242 = sbr.rel (%p239_p10) target bundleno = 289 (0x121), region = 69  ;;  %s793_s6 = sshll.u32 (!%p239_p10), %s245_s30, 5  ;;  %919 = vmatprep.mubr.msk.bf16.mxu0 (!%p239_p10), %vm381_vm0, %v987_v8  ;;  %v988_v9 = vld [vmem:[%s1194_s0 + $0x20] sm:$0xff] (!%p239_p10)   ;;  %v990_v15 = vld [vmem:[%s1194_s0 + $0x28] sm:$0xff] (!%p239_p10)   ;;  %v992_v17 = vld [vmem:[%s1194_s0 + $0x30] sm:$0xff] (!%p239_p10)  }
  0x20   : > { %s247_s9 = scalar_lea.vmem (!%p239_p10), [#allocation2], %s793_s6  ;;  %927 = vmatprep.mubr.msk.bf16.mxu1 (!%p239_p10), %vm381_vm0, %v988_v9  ;;  %v993_v18 = vld [vmem:[%s1194_s0 + $0x18] sm:$0xff] (!%p239_p10)   ;;  %s794_s8 = sshll.u32 (!%p239_p10), %s245_s30, 6 }
  0x21   : > { %v983_v10 = vld [vmem:[%s247_s9] sm:$0xff] (!%p239_p10)   ;;  %v984_v11 = vld [vmem:[%s247_s9 + $0x8] sm:$0xff] (!%p239_p10)   ;;  %v985_v12 = vld [vmem:[%s247_s9 + $0x10] sm:$0xff] (!%p239_p10)  }
  0x22   : > { %911 = vmatprep.subr.bf16.mxu0 (!%p239_p10), %v983_v10  ;;  %935 = vmatprep.subr.bf16.mxu1 (!%p239_p10), %v983_v10  ;;  %v986_v13 = vld [vmem:[%s247_s9 + $0x18] sm:$0xff] (!%p239_p10)   ;;  %s1147_s9 = scalar_lea.vmem (!%p239_p10), [#allocation3], %s794_s8 }
  0x23   : > { %912 = vmatpush3.bf16.msra.mxu0 (!%p239_p10), %v983_v10  ;;  %939 = vmatpush3.bf16.msra.mxu1 (!%p239_p10), %v983_v10  ;;  %v994_v19 = vld [vmem:[%s1194_s0 + $0x38] sm:$0xff] (!%p239_p10)  }
  0x24   : > { %913 = vmatprep.subr.bf16.mxu0 (!%p239_p10), %v984_v11  ;;  %936 = vmatprep.subr.bf16.mxu1 (!%p239_p10), %v984_v11 }
  0x26   : > { %s282_s4 = scalar_select %p281_p11, %s1025_s14, 1 }
  0x27   : > { %914 = vmatpush3.bf16.msra.mxu0 %v984_v11  ;;  %940 = vmatpush3.bf16.msra.mxu1 %v984_v11  ;;  %s833_s12 = sshll.u32 (%p1090_p6), %s1025_s14, 2 }
  0x28   : > { %915 = vmatprep.subr.bf16.mxu0 %v985_v12  ;;  %937 = vmatprep.subr.bf16.mxu1 %v985_v12  ;;  %s283_s7 = scalar_lea.vmem %s1196_s2, %s282_s4  ;;  %s594_s11 = scalar_lea.vmem (%p1090_p6), %s1197_s3, %s833_s12 }
  0x29   : > { %v795_v21 = vld [vmem:[%s283_s7] ss:$0 sm:$0xff] }
  0x2b   : > { %916 = vmatpush3.bf16.msra.mxu0 %v985_v12  ;;  %941 = vmatpush3.bf16.msra.mxu1 %v985_v12 }
  0x2c   : > { %917 = vmatprep.subr.bf16.mxu0 %v986_v13  ;;  %938 = vmatprep.subr.bf16.mxu1 %v986_v13 }
  0x2f   : > { %918 = vmatpush3.bf16.msra.mxu0 %v986_v13  ;;  %942 = vmatpush3.bf16.msra.mxu1 %v986_v13 }
  0x32   : > { %920 = vmatmul.mubr.msk.bf16.vlgmr.msra.gmra.mrb[0].mxu0 %vm381_vm0, %v989_v14  ;;  %928 = vmatmul.mubr.msk.bf16.vlgmr.msra.gmra.mrb[0].mxu1 %vm381_vm0, %v990_v15 }
  0x33   : > { %923 = vmatprep.mubr.msk.bf16.mxu0 %vm381_vm0, %v991_v16  ;;  %931 = vmatprep.mubr.msk.bf16.mxu1 %vm381_vm0, %v992_v17 }
  0x3a   : > { %924 = vmatmul.mubr.msk.bf16.gmra.mrb[4].mxu0 %vm381_vm0, %v993_v18  ;;  %932 = vmatmul.mubr.msk.bf16.gmra.mrb[4].mxu1 %vm381_vm0, %v994_v19 }
 0x105   : > { %v921_v20 = vpop.f32.mrb[0].mxu0  ;;  %v929_v22 = vpop.f32.mrb[0].mxu1 }
 0x106   : > { %v440_v23 = vpop.f32.mrb[1].mxu0  ;;  %v472_v24 = vpop.f32.mrb[1].mxu1  ;;  %v449_v27 = vadd.f32 %v921_v20, %v795_v21  ;;  %v481_v28 = vadd.f32 %v929_v22, %v795_v21 }
 0x107   : > { %v922_v25 = vpop.f32.mrb[2].mxu0  ;;  %v930_v26 = vpop.f32.mrb[2].mxu1  ;;  %v441_v33 = vadd.f32 %v795_v21, %v440_v23  ;;  %v473_v34 = vadd.f32 %v795_v21, %v472_v24 }
 0x108   : > { %v452_v29 = vadd.f32 %v922_v25, %v795_v21  ;;  %v484_v30 = vadd.f32 %v930_v26, %v795_v21  ;;  %v443_v31 = vpop.f32.mrb[3].mxu0  ;;  %v475_v32 = vpop.f32.mrb[3].mxu1 }
 0x109   : > { %v444_v35 = vadd.f32 %v795_v21, %v443_v31  ;;  %v476_v36 = vadd.f32 %v795_v21, %v475_v32 }
 0x10a   : > { %v860_v37 = vpack.c.bf16 %v452_v29, %v449_v27  ;;  %v880_v38 = vpack.c.bf16 %v484_v30, %v481_v28 }
 0x10b   : > { %v855_v39 = vpack.c.bf16 %v444_v35, %v441_v33  ;;  %v875_v40 = vpack.c.bf16 %v476_v36, %v473_v34 }
 0x10c   : > { %892 = vst [vmem:[%s1147_s9 + $0x8] sm:$0xff] %v860_v37   ;;  %896 = vst [vmem:[%s1147_s9 + $0x28] sm:$0xff] %v880_v38  }
 0x10d   : > { %856 = vst [vmem:[%s1147_s9] sm:$0xff] %v855_v39   ;;  %895 = vst [vmem:[%s1147_s9 + $0x20] sm:$0xff] %v875_v40   ;;  %v925_v41 = vpop.f32.mrb[4].mxu0  ;;  %v933_v42 = vpop.f32.mrb[4].mxu1 }
 0x10e   : > { %v456_v43 = vpop.f32.mrb[5].mxu0  ;;  %v488_v44 = vpop.f32.mrb[5].mxu1  ;;  %v465_v47 = vadd.f32 %v925_v41, %v795_v21  ;;  %v497_v48 = vadd.f32 %v933_v42, %v795_v21 }
 0x10f   : > { %v926_v45 = vpop.f32.mrb[6].mxu0  ;;  %v934_v46 = vpop.f32.mrb[6].mxu1  ;;  %v457_v53 = vadd.f32 %v795_v21, %v456_v43  ;;  %v489_v54 = vadd.f32 %v795_v21, %v488_v44  ;;  %589 = sbr.rel (!%p1090_p6) target bundleno = 289 (0x121), region = 77 }
 0x110   : > { %v468_v49 = vadd.f32 %v926_v45, %v795_v21  ;;  %v500_v50 = vadd.f32 %v934_v46, %v795_v21  ;;  %v459_v51 = vpop.f32.mrb[7].mxu0  ;;  %v491_v52 = vpop.f32.mrb[7].mxu1 }
 0x111   : > { %v460_v55 = vadd.f32 %v795_v21, %v459_v51  ;;  %v492_v56 = vadd.f32 %v795_v21, %v491_v52 }
 0x112   : > { %v870_v57 = vpack.c.bf16 %v468_v49, %v465_v47  ;;  %v890_v58 = vpack.c.bf16 %v500_v50, %v497_v48 }
 0x113   : > { %v865_v59 = vpack.c.bf16 %v460_v55, %v457_v53  ;;  %v885_v60 = vpack.c.bf16 %v492_v56, %v489_v54  ;;  %v614_v63 = vld [vmem:[%s1147_s9 + $0x8] sm:$0xf] (%p1090_p6)  ;;  %v616_v0 = vld [vmem:[%s1147_s9 + $0xc] sm:$0xf] (%p1090_p6) }
 0x114   : > { %894 = vst [vmem:[%s1147_s9 + $0x18] sm:$0xff] %v870_v57   ;;  %898 = vst [vmem:[%s1147_s9 + $0x38] sm:$0xff] %v890_v58   ;;  %v610_v61 = vld [vmem:[%s1147_s9] sm:$0xf] (%p1090_p6)  ;;  %v612_v62 = vld [vmem:[%s1147_s9 + $0x4] sm:$0xf] (%p1090_p6) }
 0x115   : > { %893 = vst [vmem:[%s1147_s9 + $0x10] sm:$0xff] %v865_v59   ;;  %897 = vst [vmem:[%s1147_s9 + $0x30] sm:$0xff] %v885_v60   ;;  %v626_v5 = vld [vmem:[%s1147_s9 + $0x20] sm:$0xf] (%p1090_p6)  ;;  %v628_v6 = vld [vmem:[%s1147_s9 + $0x24] sm:$0xf] (%p1090_p6) }
 0x116   : > { %611 = vst [vmem:[%s594_s11] sm:$0xf] %v610_v61  ;;  %613 = vst [vmem:[%s594_s11 + $0x8] sm:$0xf] %v612_v62  ;;  %v630_v7 = vld [vmem:[%s1147_s9 + $0x28] sm:$0xf] }
 0x117   : > { %615 = vst [vmem:[%s594_s11 + $0x10] sm:$0xf] %v614_v63  ;;  %617 = vst [vmem:[%s594_s11 + $0x18] sm:$0xf] %v616_v0  ;;  %v632_v8 = vld [vmem:[%s1147_s9 + $0x2c] sm:$0xf] }
 0x118   : > { %627 = vst [vmem:[%s594_s11 + $0x40] sm:$0xf] %v626_v5  ;;  %629 = vst [vmem:[%s594_s11 + $0x48] sm:$0xf] %v628_v6 }
 0x119   : > { %631 = vst [vmem:[%s594_s11 + $0x50] sm:$0xf] %v630_v7  ;;  %633 = vst [vmem:[%s594_s11 + $0x58] sm:$0xf] %v632_v8 }
 0x11b   : > { %v622_v3 = vld [vmem:[%s1147_s9 + $0x18] sm:$0xf]  ;;  %v624_v4 = vld [vmem:[%s1147_s9 + $0x1c] sm:$0xf] }
 0x11c   : > { %v618_v1 = vld [vmem:[%s1147_s9 + $0x10] sm:$0xf]  ;;  %v620_v2 = vld [vmem:[%s1147_s9 + $0x14] sm:$0xf]  ;;  %623 = vst [vmem:[%s594_s11 + $0x30] sm:$0xf] %v622_v3 }
 0x11d   : > { %619 = vst [vmem:[%s594_s11 + $0x20] sm:$0xf] %v618_v1  ;;  %621 = vst [vmem:[%s594_s11 + $0x28] sm:$0xf] %v620_v2  ;;  %v634_v9 = vld [vmem:[%s1147_s9 + $0x30] sm:$0xf] }
 0x11e   : > { %625 = vst [vmem:[%s594_s11 + $0x38] sm:$0xf] %v624_v4  ;;  %v636_v10 = vld [vmem:[%s1147_s9 + $0x34] sm:$0xf]  ;;  %635 = vst [vmem:[%s594_s11 + $0x60] sm:$0xf] %v634_v9 }
 0x11f   : > { %637 = vst [vmem:[%s594_s11 + $0x68] sm:$0xf] %v636_v10  ;;  %v638_v11 = vld [vmem:[%s1147_s9 + $0x38] sm:$0xf]  ;;  %v640_v12 = vld [vmem:[%s1147_s9 + $0x3c] sm:$0xf] }
 0x120   : > { %639 = vst [vmem:[%s594_s11 + $0x70] sm:$0xf] %v638_v11  ;;  %641 = vst [vmem:[%s594_s11 + $0x78] sm:$0xf] %v640_v12 }
 0x121 PF: > { %s13_s16 = sadd.s32 1, %s1033_s16   ;;  %s1199_s12 = smov %s1021_s13 }
 0x122   : > { %p10_p12 = scmp.ge.s32.totalorder %s13_s16, 4   ;;  %s1200_s13 = smov %s1095_s22 }
 0x123   : > { %s1201_s14 = smov %s1029_s15  ;;  %s1202_s15 = smov %s1204_s17 }
 0x124   :  { %12 = sbr.rel (!%p10_p12) target bundleno = 3 (0x3), region = 155 }

// kernel: _lambda_.34
= control target key start
LH: loop header
LB: loop body
LE: loop exit
PB: predicated region body
PF: predicated region fallthrough
CT: control target
= control target key end

     0   :  { %vm567_vm0 = vcmask 523264   ;;  %s2266_s1 = inlined_call_operand.vmem [shape: bf16[576,64], index: 1, kind: input, shape index: {}]   ;;  %s2267_s0 = inlined_call_operand.vmem [shape: bf16[128,576], index: 0, kind: input, shape index: {}]   ;;  %s2268_s3 = inlined_call_operand.vmem [shape: bf16[64,256], index: 3, kind: input, shape index: {}]   ;;  %s2269_s2 = inlined_call_operand.vmem [shape: f32[1,64], index: 2, kind: input, shape index: {}]   ;;  %s2270_s4 = inlined_call_operand.vmem [shape: f32[1,256], index: 4, kind: input, shape index: {}]   ;;  %s2271_s5 = inlined_call_operand.vmem [shape: bf16[128,256], index: 5, kind: input, shape index: {}]   ;;  %s2272_s6 = inlined_call_operand.vmem [shape: bf16[128,256], index: 6, kind: output, shape index: {}]  }
   0x1   :  { %v1646_v0 = vld [vmem:[%s2266_s1 + $0x40] sm:$0xff]   ;;  %v1648_v2 = vld [vmem:[%s2266_s1 + $0x48] sm:$0xff]   ;;  %v1650_v4 = vld [vmem:[%s2266_s1 + $0x50] sm:$0xff]  }
   0x2   :  { %v1647_v1 = vld [vmem:[%s2266_s1] sm:$0xff]   ;;  %1465 = vmatprep.subr.bf16.mxu0 %v1646_v0  ;;  %v1649_v3 = vld [vmem:[%s2266_s1 + $0x8] sm:$0xff]   ;;  %v1651_v5 = vld [vmem:[%s2266_s1 + $0x10] sm:$0xff]  }
   0x3   :  { %1466 = vmatpush3.bf16.msra.mxu0 %v1647_v1  ;;  %v1652_v6 = vld [vmem:[%s2266_s1 + $0x58] sm:$0xff]   ;;  %v1656_v8 = vld [vmem:[%s2266_s1 + $0xc0] sm:$0xff]   ;;  %v1660_v12 = vld [vmem:[%s2266_s1 + $0xc8] sm:$0xff]  }
   0x4   :  { %1467 = vmatprep.subr.bf16.mxu0 %v1648_v2  ;;  %v1653_v7 = vld [vmem:[%s2266_s1 + $0x18] sm:$0xff]   ;;  %v1657_v9 = vld [vmem:[%s2266_s1 + $0x80] sm:$0xff]   ;;  %1629 = vmatprep.subr.bf16.mxu1 %v1656_v8  ;;  %v1661_v13 = vld [vmem:[%s2266_s1 + $0x88] sm:$0xff]  }
   0x5   :  { %v1654_v10 = vld [vmem:[%s2266_s1 + $0x60] sm:$0xff]   ;;  %1637 = vmatpush3.bf16.msra.mxu1 %v1657_v9  ;;  %v1658_v14 = vld [vmem:[%s2266_s1 + $0x68] sm:$0xff]   ;;  %v1664_v16 = vld [vmem:[%s2266_s1 + $0xd0] sm:$0xff]  }
   0x6   :  { %v1655_v11 = vld [vmem:[%s2266_s1 + $0x20] sm:$0xff]   ;;  %1630 = vmatprep.subr.bf16.mxu1 %v1660_v12  ;;  %v1659_v15 = vld [vmem:[%s2266_s1 + $0x28] sm:$0xff]   ;;  %v1665_v17 = vld [vmem:[%s2266_s1 + $0x90] sm:$0xff]  }
   0x7   :  { %1468 = vmatpush3.bf16.msra.mxu0 %v1649_v3  ;;  %v1662_v18 = vld [vmem:[%s2266_s1 + $0x70] sm:$0xff]   ;;  %v1668_v20 = vld [vmem:[%s2266_s1 + $0xd8] sm:$0xff]   ;;  %v1673_v25 = vld [vmem:[%s2266_s1 + $0xe0] sm:$0xff]  }
   0x8   :  { %1469 = vmatprep.subr.bf16.mxu0 %v1650_v4  ;;  %v1663_v19 = vld [vmem:[%s2266_s1 + $0x30] sm:$0xff]   ;;  %v1666_v21 = vld [vmem:[%s2266_s1 + $0x78] sm:$0xff]   ;;  %v1674_v26 = vld [vmem:[%s2266_s1 + $0xa0] sm:$0xff]  }
   0x9   :  { %1638 = vmatpush3.bf16.msra.mxu1 %v1661_v13  ;;  %v1671_v22 = vld [vmem:[%s2267_s0 + $0x4] ss:$20 sps:$4 sm:$0xff]   ;;  %v1675_v27 = vld [vmem:[%s2266_s1 + $0xe8] sm:$0xff]   ;;  %v1669_v28 = vld [vmem:[%s2267_s0] ss:$20 sps:$4 sm:$0xff]  }
   0xa   :  { %1631 = vmatprep.subr.bf16.mxu1 %v1664_v16  ;;  %v1667_v23 = vld [vmem:[%s2266_s1 + $0x38] sm:$0xff]   ;;  %624 = vmatprep.mubr.bf16.mxu0 %v1671_v22  ;;  %v1676_v29 = vld [vmem:[%s2267_s0 + $0x2c] ss:$20 sps:$4 sm:$0xff]   ;;  %v1680_v31 = vld [vmem:[%s2266_s1 + $0xf0] sm:$0xff]  }
   0xb   :  { %1470 = vmatpush3.bf16.msra.mxu0 %v1651_v5  ;;  %v1672_v24 = vld [vmem:[%s2266_s1 + $0x98] sm:$0xff]   ;;  %v1678_v30 = vld [vmem:[%s2266_s1 + $0xa8] sm:$0xff]   ;;  %v1681_v32 = vld [vmem:[%s2266_s1 + $0xb0] sm:$0xff]  }
   0xc   :  { %1471 = vmatprep.subr.bf16.mxu0 %v1652_v6  ;;  %v1682_v33 = vld [vmem:[%s2266_s1 + $0xf8] sm:$0xff]   ;;  %v1683_v36 = vld [vmem:[%s2267_s0 + $0x54] ss:$20 sps:$4 sm:$0xff]   ;;  %v1686_v40 = vld [vmem:[%s2267_s0 + $0x50] ss:$20 sps:$4 sm:$0xff]  }
   0xd   :  { %1639 = vmatpush3.bf16.msra.mxu1 %v1665_v17  ;;  %v1689_v34 = vld [vmem:[%s2267_s0 + $0x5c] ss:$20 sps:$4 sm:$0xff]   ;;  %v1687_v38 = vld [vmem:[%s2267_s0 + $0x58] ss:$20 sps:$4 sm:$0xff]   ;;  %v1695_v42 = vld [vmem:[%s2267_s0 + $0x80] ss:$20 sps:$4 sm:$0xff]  }
   0xe   :  { %1632 = vmatprep.subr.bf16.mxu1 %v1668_v20  ;;  %v1679_v35 = vld [vmem:[%s2267_s0 + $0x28] ss:$20 sps:$4 sm:$0xff]   ;;  %737 = vmatprep.mubr.bf16.mxu1 %v1689_v34  ;;  %v1693_v39 = vld [vmem:[%s2267_s0 + $0x84] ss:$20 sps:$4 sm:$0xff]   ;;  %v1699_v43 = vld [vmem:[%s2267_s0 + $0xac] ss:$20 sps:$4 sm:$0xff]  }
   0xf   :  { %1472 = vmatpush3.bf16.msra.mxu0 %v1653_v7  ;;  %v1685_v37 = vld [vmem:[%s2266_s1 + $0xb8] sm:$0xff]   ;;  %v1705_v47 = vld [vmem:[%s2267_s0 + $0xd4] ss:$20 sps:$4 sm:$0xff]   ;;  %v1723_v48 = vld [vmem:[%s2266_s1 + $0x100] sm:$0xff]  }
  0x10   :  { %1473 = vmatprep.subr.bf16.mxu0 %v1654_v10  ;;  %v1690_v41 = vld [vmem:[%s2267_s0 + $0x7c] ss:$20 sps:$4 sm:$0xff]   ;;  %v1692_v44 = vld [vmem:[%s2267_s0 + $0x78] ss:$20 sps:$4 sm:$0xff]   ;;  %v1698_v49 = vld [vmem:[%s2267_s0 + $0xa0] ss:$20 sps:$4 sm:$0xff]  }
  0x11   :  { %1640 = vmatpush3.bf16.msra.mxu1 %v1672_v24  ;;  %v1696_v45 = vld [vmem:[%s2267_s0 + $0xa4] ss:$20 sps:$4 sm:$0xff]   ;;  %v1701_v46 = vld [vmem:[%s2267_s0 + $0xa8] ss:$20 sps:$4 sm:$0xff]   ;;  %v1702_v50 = vld [vmem:[%s2267_s0 + $0xcc] ss:$20 sps:$4 sm:$0xff]  }
  0x12   :  { %1633 = vmatprep.subr.bf16.mxu1 %v1673_v25  ;;  %v1707_v51 = vld [vmem:[%s2267_s0 + $0xd0] ss:$20 sps:$4 sm:$0xff]   ;;  %v1704_v53 = vld [vmem:[%s2267_s0 + $0xc8] ss:$20 sps:$4 sm:$0xff]   ;;  %v1713_v55 = vld [vmem:[%s2267_s0 + $0xf8] ss:$20 sps:$4 sm:$0xff]  }
  0x13   :  { %1474 = vmatpush3.bf16.msra.mxu0 %v1655_v11  ;;  %v1711_v52 = vld [vmem:[%s2267_s0 + $0xfc] ss:$20 sps:$4 sm:$0xff]   ;;  %v1708_v54 = vld [vmem:[%s2267_s0 + $0xf4] ss:$20 sps:$4 sm:$0xff]   ;;  %v1717_v56 = vld [vmem:[%s2267_s0 + $0x124] ss:$20 sps:$4 sm:$0xff]  }
  0x14   :  { %1475 = vmatprep.subr.bf16.mxu0 %v1658_v14  ;;  %v1710_v57 = vld [vmem:[%s2267_s0 + $0xf0] ss:$20 sps:$4 sm:$0xff]   ;;  %v1719_v59 = vld [vmem:[%s2267_s0 + $0x120] ss:$20 sps:$4 sm:$0xff]   ;;  %v1716_v60 = vld [vmem:[%s2267_s0 + $0x118] ss:$20 sps:$4 sm:$0xff]  }
  0x15   :  { %1641 = vmatpush3.bf16.msra.mxu1 %v1674_v26  ;;  %v1714_v58 = vld [vmem:[%s2267_s0 + $0x11c] ss:$20 sps:$4 sm:$0xff]   ;;  %v1722_v61 = vld [vmem:[%s2267_s0 + $0xc] ss:$20 sps:$4 sm:$0xff]   ;;  %v1725_v63 = vld [vmem:[%s2267_s0 + $0x34] ss:$20 sps:$4 sm:$0xff]  }
  0x16   :  { %1634 = vmatprep.subr.bf16.mxu1 %v1675_v27  ;;  %v1720_v62 = vld [vmem:[%s2267_s0 + $0x8] ss:$20 sps:$4 sm:$0xff]   ;;  %v1728_v1 = vld [vmem:[%s2266_s1 + $0x110] sm:$0xff]   ;;  %v1731_v5 = vld [vmem:[%s2267_s0 + $0x38] ss:$20 sps:$4 sm:$0xff]  }
  0x17   :  { %1476 = vmatpush3.bf16.msra.mxu0 %v1659_v15  ;;  %v1724_v0 = vld [vmem:[%s2266_s1 + $0x108] sm:$0xff]   ;;  %v1727_v2 = vld [vmem:[%s2267_s0 + $0x30] ss:$20 sps:$4 sm:$0xff]   ;;  %v1729_v4 = vld [vmem:[%s2266_s1 + $0x118] sm:$0xff]  }
  0x18   :  { %1477 = vmatprep.subr.bf16.mxu0 %v1662_v18  ;;  %v1730_v3 = vld [vmem:[%s2267_s0 + $0x10] ss:$20 sps:$4 sm:$0xff]   ;;  %v1732_v6 = vld [vmem:[%s2267_s0 + $0x60] ss:$20 sps:$4 sm:$0xff]   ;;  %v1733_v7 = vld [vmem:[%s2267_s0 + $0x88] ss:$20 sps:$4 sm:$0xff]  }
  0x19   :  { %1642 = vmatpush3.bf16.msra.mxu1 %v1678_v30  ;;  %v1736_v10 = vld [vmem:[%s2267_s0 + $0x100] ss:$20 sps:$4 sm:$0xff]   ;;  %v1737_v11 = vld [vmem:[%s2267_s0 + $0x128] ss:$20 sps:$4 sm:$0xff]   ;;  %v1741_v14 = vld [vmem:[%s2268_s3 + $0x10] ss:$8 sps:$4 sm:$0xff]  }
  0x1a   :  { %1635 = vmatprep.subr.bf16.mxu1 %v1680_v31  ;;  %v1743_v15 = vld [vmem:[%s2268_s3 + $0x14] ss:$8 sps:$4 sm:$0xff]   ;;  %v1747_v18 = vld [vmem:[%s2268_s3 + $0x30] ss:$8 sps:$4 sm:$0xff]  }
  0x1b   :  { %1478 = vmatpush3.bf16.msra.mxu0 %v1663_v19  ;;  %v1749_v19 = vld [vmem:[%s2268_s3 + $0x34] ss:$8 sps:$4 sm:$0xff]  }
  0x1c   :  { %1479 = vmatprep.subr.bf16.mxu0 %v1666_v21 }
  0x1d   :  { %1643 = vmatpush3.bf16.msra.mxu1 %v1681_v32 }
  0x1e   :  { %1636 = vmatprep.subr.bf16.mxu1 %v1682_v33 }
  0x1f   :  { %1480 = vmatpush3.bf16.msra.mxu0 %v1667_v23 }
  0x20   :  { %1529 = vmatprep.subr.bf16.mxu0 %v1656_v8  ;;  %v1734_v8 = vld [vmem:[%s2267_s0 + $0xb0] ss:$20 sps:$4 sm:$0xff]  }
  0x21   :  { %1644 = vmatpush3.bf16.msra.mxu1 %v1685_v37 }
  0x22   :  { %625 = vmatmul.mubr.bf16.vlgmr.msra.gmra.mrb[0].mxu0 %v1669_v28 }
  0x23   :  { %1530 = vmatpush3.bf16.msra.mxu0 %v1657_v9  ;;  %632 = vmatprep.mubr.bf16.mxu0 %v1676_v29  ;;  %v1735_v9 = vld [vmem:[%s2267_s0 + $0xd8] ss:$20 sps:$4 sm:$0xff]  }
  0x24   :  { %1531 = vmatprep.subr.bf16.mxu0 %v1660_v12  ;;  %738 = vmatmul.mubr.bf16.vlgmr.msra.gmra.mrb[0].mxu1 %v1687_v38  ;;  %v1738_v12 = vld [vmem:[%s2268_s3] ss:$8 sps:$4 sm:$0xff]  }
  0x25   :  { %745 = vmatprep.mubr.bf16.mxu1 %v1693_v39 }
  0x27   :  { %1532 = vmatpush3.bf16.msra.mxu0 %v1661_v13  ;;  %v1740_v13 = vld [vmem:[%s2268_s3 + $0x4] ss:$8 sps:$4 sm:$0xff]  }
  0x28   :  { %1533 = vmatprep.subr.bf16.mxu0 %v1664_v16  ;;  %991 = vmatprep.subr.bf16.mxu1 %v1740_v13  ;;  %v1744_v16 = vld [vmem:[%s2268_s3 + $0x20] ss:$8 sps:$4 sm:$0xff]  }
  0x29   :  { %992 = vmatpush1.bf16.msra.mxu1 %v1738_v12 }
  0x2a   :  { %633 = vmatmul.mubr.bf16.gmra.mrb[4].mxu0 %v1679_v35  ;;  %993 = vmatprep.subr.bf16.mxu1 %v1743_v15 }
  0x2b   :  { %640 = vmatprep.mubr.bf16.mxu0 %v1683_v36  ;;  %1534 = vmatpush3.bf16.msra.mxu0 %v1665_v17  ;;  %v1746_v17 = vld [vmem:[%s2268_s3 + $0x24] ss:$8 sps:$4 sm:$0xff]  }
  0x2c   :  { %1535 = vmatprep.subr.bf16.mxu0 %v1668_v20  ;;  %746 = vmatmul.mubr.bf16.gmra.mrb[4].mxu1 %v1695_v42  ;;  %v1750_v20 = vmov 0  }
  0x2d   :  { %753 = vmatprep.mubr.bf16.mxu1 %v1699_v43  ;;  %994 = vmatpush1.bf16.msra.mxu1 %v1741_v14  ;;  %v2058_v43 = vld [vmem:[%s2269_s2] ss:$0 sm:$0xff] }
  0x2e   :  { %995 = vmatprep.subr.bf16.mxu1 %v1746_v17 }
  0x2f   :  { %1536 = vmatpush3.bf16.msra.mxu0 %v1672_v24 }
  0x30   :  { %1537 = vmatprep.subr.bf16.mxu0 %v1673_v25 }
  0x31   :  { %996 = vmatpush1.bf16.msra.mxu1 %v1744_v16 }
  0x32   :  { %641 = vmatmul.mubr.bf16.gmra.mrb[8].mxu0 %v1686_v40  ;;  %997 = vmatprep.subr.bf16.mxu1 %v1749_v19 }
  0x33   :  { %648 = vmatprep.mubr.bf16.mxu0 %v1690_v41  ;;  %1538 = vmatpush3.bf16.msra.mxu0 %v1674_v26 }
  0x34   :  { %1539 = vmatprep.subr.bf16.mxu0 %v1675_v27  ;;  %754 = vmatmul.mubr.bf16.gmra.mrb[8].mxu1 %v1701_v46 }
  0x35   :  { %761 = vmatprep.mubr.bf16.mxu1 %v1705_v47  ;;  %998 = vmatpush1.bf16.msra.mxu1 %v1747_v18 }
  0x37   :  { %1540 = vmatpush3.bf16.msra.mxu0 %v1678_v30 }
  0x38   :  { %1541 = vmatprep.subr.bf16.mxu0 %v1680_v31 }
  0x3a   :  { %649 = vmatmul.mubr.bf16.gmra.mrb[12].mxu0 %v1692_v44 }
  0x3b   :  { %656 = vmatprep.mubr.bf16.mxu0 %v1696_v45  ;;  %1542 = vmatpush3.bf16.msra.mxu0 %v1681_v32 }
  0x3c   :  { %1543 = vmatprep.subr.bf16.mxu0 %v1682_v33  ;;  %762 = vmatmul.mubr.bf16.gmra.mrb[12].mxu1 %v1707_v51 }
  0x3d   :  { %769 = vmatprep.mubr.bf16.mxu1 %v1711_v52 }
  0x3f   :  { %1544 = vmatpush3.bf16.msra.mxu0 %v1685_v37 }
  0x40   :  { %1605 = vmatprep.subr.bf16.mxu0 %v1723_v48 }
  0x42   :  { %657 = vmatmul.mubr.bf16.gmra.mrb[16].mxu0 %v1698_v49 }
  0x43   :  { %664 = vmatprep.mubr.bf16.mxu0 %v1702_v50 }
  0x44   :  { %770 = vmatmul.mubr.bf16.gmra.mrb[16].mxu1 %v1713_v55 }
  0x45   :  { %777 = vmatprep.mubr.bf16.mxu1 %v1717_v56 }
  0x4a   :  { %665 = vmatmul.mubr.bf16.gmra.mrb[20].mxu0 %v1704_v53 }
  0x4b   :  { %672 = vmatprep.mubr.bf16.mxu0 %v1708_v54 }
  0x4c   :  { %778 = vmatmul.mubr.bf16.gmra.mrb[20].mxu1 %v1719_v59 }
  0x4d   :  { %1023 = vmatprep.mubr.bf16.mxu1 %v1750_v20 }
  0x52   :  { %673 = vmatmul.mubr.bf16.gmra.mrb[24].mxu0 %v1710_v57 }
  0x53   :  { %680 = vmatprep.mubr.bf16.mxu0 %v1714_v58 }
  0x5a   :  { %681 = vmatmul.mubr.bf16.gmra.mrb[28].mxu0 %v1716_v60 }
  0x5b   :  { %721 = vmatprep.mubr.bf16.mxu0 %v1722_v61 }
  0x62   :  { %722 = vmatmul.mubr.bf16.vlgmr.msra.gmra.mrb[32].mxu0 %v1720_v62 }
  0x63   :  { %1606 = vmatpush3.bf16.msra.mxu0 %v1723_v48  ;;  %729 = vmatprep.mubr.bf16.mxu0 %v1725_v63 }
  0x64   :  { %1607 = vmatprep.subr.bf16.mxu0 %v1724_v0 }
  0x67   :  { %1608 = vmatpush3.bf16.msra.mxu0 %v1724_v0 }
  0x68   :  { %1609 = vmatprep.subr.bf16.mxu0 %v1728_v1 }
  0x6a   :  { %730 = vmatmul.mubr.bf16.gmra.mrb[36].mxu0 %v1727_v2 }
  0x6b   :  { %1610 = vmatpush3.bf16.msra.mxu0 %v1728_v1  ;;  %1613 = vmatprep.mubr.msk.bf16.mxu0 %vm567_vm0, %v1730_v3 }
  0x6c   :  { %1611 = vmatprep.subr.bf16.mxu0 %v1729_v4 }
  0x6f   :  { %1612 = vmatpush3.bf16.msra.mxu0 %v1729_v4 }
  0x72   :  { %1614 = vmatmul.mubr.msk.bf16.vlgmr.msra.gmra.mrb[40].mxu0 %vm567_vm0, %v1731_v5 }
  0x73   :  { %1617 = vmatprep.mubr.msk.bf16.mxu0 %vm567_vm0, %v1732_v6 }
  0x7a   :  { %1618 = vmatmul.mubr.msk.bf16.gmra.mrb[44].mxu0 %vm567_vm0, %v1733_v7 }
  0x7b   :  { %1621 = vmatprep.mubr.msk.bf16.mxu0 %vm567_vm0, %v1734_v8 }
  0x82   :  { %1622 = vmatmul.mubr.msk.bf16.gmra.mrb[48].mxu0 %vm567_vm0, %v1735_v9 }
  0x83   :  { %1625 = vmatprep.mubr.msk.bf16.mxu0 %vm567_vm0, %v1736_v10 }
  0x8a   :  { %1626 = vmatmul.mubr.msk.bf16.gmra.mrb[52].mxu0 %vm567_vm0, %v1737_v11 }
  0xf5   :  { %v1481_v21 = vpop.f32.mrb[0].mxu0 }
  0xf6   :  { %v1482_v22 = vpop.f32.mrb[1].mxu0 }
  0xf7   :  { %v2047_v23 = vadd.f32 %v1482_v22, %v1481_v21  ;;  %v1484_v24 = vpop.f32.mrb[2].mxu0  ;;  %v1557_v33 = vpop.f32.mrb[0].mxu1 }
  0xf8   :  { %v1485_v25 = vpop.f32.mrb[3].mxu0  ;;  %v1558_v34 = vpop.f32.mrb[1].mxu1 }
  0xf9   :  { %v2049_v26 = vadd.f32 %v1485_v25, %v1484_v24  ;;  %v1559_v35 = vadd.f32 %v1558_v34, %v1557_v33  ;;  %v1560_v36 = vpop.f32.mrb[2].mxu1 }
  0xfa   :  { %v1561_v38 = vpop.f32.mrb[3].mxu1 }
  0xfb   :  { %v1562_v40 = vadd.f32 %v1561_v38, %v1560_v36 }
  0xfd   :  { %v1487_v27 = vpop.f32.mrb[4].mxu0 }
  0xfe   :  { %v1488_v28 = vpop.f32.mrb[5].mxu0 }
  0xff   :  { %v2051_v29 = vadd.f32 %v1488_v28, %v1487_v27  ;;  %v1490_v30 = vpop.f32.mrb[6].mxu0  ;;  %v1563_v47 = vpop.f32.mrb[4].mxu1 }
 0x100   :  { %v1491_v31 = vpop.f32.mrb[7].mxu0  ;;  %v1564_v49 = vpop.f32.mrb[5].mxu1 }
 0x101   :  { %v2053_v32 = vadd.f32 %v1491_v31, %v1490_v30  ;;  %v1565_v51 = vadd.f32 %v1564_v49, %v1563_v47  ;;  %v1566_v52 = vpop.f32.mrb[6].mxu1 }
 0x102   :  { %v1567_v54 = vpop.f32.mrb[7].mxu1 }
 0x103   :  { %v1568_v57 = vadd.f32 %v1567_v54, %v1566_v52 }
 0x105   :  { %v1493_v37 = vpop.f32.mrb[8].mxu0 }
 0x106   :  { %v1494_v39 = vpop.f32.mrb[9].mxu0 }
 0x107   :  { %v1495_v41 = vadd.f32 %v1494_v39, %v1493_v37  ;;  %v1496_v42 = vpop.f32.mrb[10].mxu0  ;;  %v1569_v63 = vpop.f32.mrb[8].mxu1 }
 0x108   :  { %v1497_v44 = vpop.f32.mrb[11].mxu0  ;;  %v1570_v1 = vpop.f32.mrb[9].mxu1 }
 0x109   :  { %v643_v45 = vadd.f32 %v1495_v41, %v2058_v43  ;;  %v1498_v46 = vadd.f32 %v1497_v44, %v1496_v42  ;;  %v1571_v3 = vadd.f32 %v1570_v1, %v1569_v63  ;;  %v1572_v4 = vpop.f32.mrb[10].mxu1 }
 0x10a   :  { %v1573_v6 = vpop.f32.mrb[11].mxu1 }
 0x10b   :  { %v646_v48 = vadd.f32 %v1498_v46, %v2058_v43  ;;  %v2062_v50 = vadd.f32 %v1559_v35, %v643_v45  ;;  %v1574_v9 = vadd.f32 %v1573_v6, %v1572_v4 }
 0x10d   :  { %v1499_v53 = vpop.f32.mrb[12].mxu0  ;;  %v2064_v55 = vadd.f32 %v1562_v40, %v646_v48 }
 0x10e   :  { %v1500_v56 = vpop.f32.mrb[13].mxu0 }
 0x10f   :  { %v1501_v58 = vadd.f32 %v1500_v56, %v1499_v53  ;;  %v1502_v59 = vpop.f32.mrb[14].mxu0  ;;  %v1575_v15 = vpop.f32.mrb[12].mxu1 }
 0x110   :  { %v1503_v60 = vpop.f32.mrb[15].mxu0  ;;  %v1576_v17 = vpop.f32.mrb[13].mxu1 }
 0x111   :  { %v651_v61 = vadd.f32 %v1501_v58, %v2058_v43  ;;  %v1504_v62 = vadd.f32 %v1503_v60, %v1502_v59  ;;  %v1577_v19 = vadd.f32 %v1576_v17, %v1575_v15  ;;  %v1578_v21 = vpop.f32.mrb[14].mxu1 }
 0x112   :  { %v1579_v24 = vpop.f32.mrb[15].mxu1 }
 0x113   :  { %v654_v0 = vadd.f32 %v1504_v62, %v2058_v43  ;;  %v2068_v2 = vadd.f32 %v1565_v51, %v651_v61  ;;  %v1580_v28 = vadd.f32 %v1579_v24, %v1578_v21 }
 0x115   :  { %v1505_v5 = vpop.f32.mrb[16].mxu0  ;;  %v2070_v7 = vadd.f32 %v1568_v57, %v654_v0 }
 0x116   :  { %v1506_v8 = vpop.f32.mrb[17].mxu0 }
 0x117   :  { %v1507_v10 = vadd.f32 %v1506_v8, %v1505_v5  ;;  %v1508_v11 = vpop.f32.mrb[18].mxu0  ;;  %v1581_v36 = vpop.f32.mrb[16].mxu1 }
 0x118   :  { %v1509_v12 = vpop.f32.mrb[19].mxu0  ;;  %v1582_v38 = vpop.f32.mrb[17].mxu1 }
 0x119   :  { %v659_v13 = vadd.f32 %v1507_v10, %v2058_v43  ;;  %v1510_v14 = vadd.f32 %v1509_v12, %v1508_v11  ;;  %v1583_v40 = vadd.f32 %v1582_v38, %v1581_v36  ;;  %v1584_v41 = vpop.f32.mrb[18].mxu1 }
 0x11a   :  { %v1585_v44 = vpop.f32.mrb[19].mxu1 }
 0x11b   :  { %v662_v16 = vadd.f32 %v1510_v14, %v2058_v43  ;;  %v2074_v18 = vadd.f32 %v1571_v3, %v659_v13  ;;  %v1586_v47 = vadd.f32 %v1585_v44, %v1584_v41  ;;  %v627_v14 = vadd.f32 %v2047_v23, %v2058_v43 }
 0x11c   :  { %v638_v23 = vadd.f32 %v2053_v32, %v2058_v43 }
 0x11d   :  { %v1511_v22 = vpop.f32.mrb[20].mxu0  ;;  %v2076_v25 = vadd.f32 %v1574_v9, %v662_v16 }
 0x11e   :  { %v1512_v27 = vpop.f32.mrb[21].mxu0 }
 0x11f   :  { %v1513_v30 = vadd.f32 %v1512_v27, %v1511_v22  ;;  %v1514_v31 = vpop.f32.mrb[22].mxu0  ;;  %v1587_v54 = vpop.f32.mrb[20].mxu1 }
 0x120   :  { %v1515_v33 = vpop.f32.mrb[23].mxu0  ;;  %v1588_v57 = vpop.f32.mrb[21].mxu1 }
 0x121   :  { %v667_v34 = vadd.f32 %v1513_v30, %v2058_v43  ;;  %v1516_v35 = vadd.f32 %v1515_v33, %v1514_v31  ;;  %v1589_v59 = vadd.f32 %v1588_v57, %v1587_v54  ;;  %v1590_v60 = vpop.f32.mrb[22].mxu1  ;;  %v635_v30 = vadd.f32 %v2051_v29, %v2058_v43 }
 0x122   :  { %v1591_v62 = vpop.f32.mrb[23].mxu1 }
 0x123   :  { %v670_v37 = vadd.f32 %v1516_v35, %v2058_v43  ;;  %v2080_v39 = vadd.f32 %v1577_v19, %v667_v34  ;;  %v1592_v1 = vadd.f32 %v1591_v62, %v1590_v60  ;;  %v630_v19 = vadd.f32 %v2049_v26, %v2058_v43 }
 0x125   :  { %v1517_v42 = vpop.f32.mrb[24].mxu0  ;;  %v2082_v45 = vadd.f32 %v1580_v28, %v670_v37 }
 0x126   :  { %v1518_v46 = vpop.f32.mrb[25].mxu0 }
 0x127   :  { %v1519_v48 = vadd.f32 %v1518_v46, %v1517_v42  ;;  %v1520_v49 = vpop.f32.mrb[26].mxu0 }
 0x128   :  { %v1521_v51 = vpop.f32.mrb[27].mxu0 }
 0x129   :  { %v675_v52 = vadd.f32 %v1519_v48, %v2058_v43  ;;  %v1522_v53 = vadd.f32 %v1521_v51, %v1520_v49 }
 0x12b   :  { %v678_v56 = vadd.f32 %v1522_v53, %v2058_v43  ;;  %v2086_v58 = vadd.f32 %v1583_v40, %v675_v52 }
 0x12d   :  { %v1523_v61 = vpop.f32.mrb[28].mxu0  ;;  %v2088_v63 = vadd.f32 %v1586_v47, %v678_v56 }
 0x12e   :  { %v1524_v0 = vpop.f32.mrb[29].mxu0 }
 0x12f   :  { %v1525_v3 = vadd.f32 %v1524_v0, %v1523_v61  ;;  %v1526_v4 = vpop.f32.mrb[30].mxu0 }
 0x130   :  { %v1527_v5 = vpop.f32.mrb[31].mxu0 }
 0x131   :  { %v683_v6 = vadd.f32 %v1525_v3, %v2058_v43  ;;  %v1528_v8 = vadd.f32 %v1527_v5, %v1526_v4 }
 0x133   :  { %v686_v9 = vadd.f32 %v1528_v8, %v2058_v43  ;;  %v2092_v10 = vadd.f32 %v1589_v59, %v683_v6 }
 0x135   :  { %v1545_v11 = vpop.f32.mrb[32].mxu0  ;;  %v2094_v12 = vadd.f32 %v1592_v1, %v686_v9 }
 0x136   :  { %v1546_v13 = vpop.f32.mrb[33].mxu0 }
 0x137   :  { %v1547_v15 = vadd.f32 %v1546_v13, %v1545_v11  ;;  %v1548_v16 = vpop.f32.mrb[34].mxu0 }
 0x138   :  { %v1549_v17 = vpop.f32.mrb[35].mxu0 }
 0x139   :  { %v1550_v21 = vadd.f32 %v1549_v17, %v1548_v16  ;;  %v724_v22 = vadd.f32 %v1547_v15, %v627_v14 }
 0x13b   :  { %v727_v24 = vadd.f32 %v1550_v21, %v630_v19 }
 0x13d   :  { %v1551_v27 = vpop.f32.mrb[36].mxu0 }
 0x13e   :  { %v1552_v28 = vpop.f32.mrb[37].mxu0 }
 0x13f   :  { %v1553_v31 = vadd.f32 %v1552_v28, %v1551_v27  ;;  %v1554_v33 = vpop.f32.mrb[38].mxu0 }
 0x140   :  { %v1555_v34 = vpop.f32.mrb[39].mxu0 }
 0x141   :  { %v1556_v35 = vadd.f32 %v1555_v34, %v1554_v33  ;;  %v732_v36 = vadd.f32 %v1553_v31, %v635_v30 }
 0x143   :  { %v735_v37 = vadd.f32 %v1556_v35, %v638_v23 }
 0x145   :  { %v1615_v38 = vpop.f32.mrb[40].mxu0 }
 0x146   :  { %v829_v40 = vadd.f32 %v1615_v38, %v732_v36  ;;  %v820_v26 = vpop.f32.mrb[41].mxu0  ;;  %v1104_v36 = vld [vmem:[%s2271_s5] sm:$0xff] }
 0x147   :  { %v821_v41 = vadd.f32 %v820_v26, %v724_v22  ;;  %v1616_v42 = vpop.f32.mrb[42].mxu0 }
 0x148   :  { %v832_v44 = vadd.f32 %v1616_v42, %v735_v37  ;;  %v823_v46 = vpop.f32.mrb[43].mxu0  ;;  %v885_v48 = vmax.f32 %v829_v40, 0.0  ;;  %v1120_v40 = vunpack.c.l.bf16 %v1104_v36 }
 0x149   :  { %v824_v47 = vadd.f32 %v823_v46, %v727_v24  ;;  %v883_v29 = vmax.f32 %v821_v41, 0.0  ;;  %v1121_v41 = vunpack.c.h.bf16 %v1104_v36 }
 0x14a   :  { %v886_v49 = vmax.f32 %v832_v44, 0.0 }
 0x14b   :  { %v884_v51 = vmax.f32 %v824_v47, 0.0 }
 0x14c   :  { %v900_v52 = vpack.c.bf16 %v886_v49, %v885_v48 }
 0x14d   :  { %v899_v53 = vpack.c.bf16 %v884_v51, %v883_v29  ;;  %v1619_v54 = vpop.f32.mrb[44].mxu0 }
 0x14e   :  { %v845_v32 = vadd.f32 %v1619_v54, %v2068_v2  ;;  %v836_v43 = vpop.f32.mrb[45].mxu0 }
 0x14f   :  { %v837_v56 = vadd.f32 %v836_v43, %v2062_v50  ;;  %v1620_v57 = vpop.f32.mrb[46].mxu0  ;;  %1425 = vmatmul.mubr.msk.bf16.vlgmr.msra.gmra.mrb[24].mxu1 %vm567_vm0, %v899_v53 }
 0x150   :  { %v848_v59 = vadd.f32 %v1620_v57, %v2070_v7  ;;  %v839_v60 = vpop.f32.mrb[47].mxu0  ;;  %1033 = vmatprep.mubr.bf16.mxu1 %v1750_v20  ;;  %v889_v62 = vmax.f32 %v845_v32, 0.0  ;;  %v1106_v32 = vld [vmem:[%s2271_s5 + $0x10] sm:$0xff] }
 0x151   :  { %v840_v61 = vadd.f32 %v839_v60, %v2064_v55  ;;  %v887_v1 = vmax.f32 %v837_v56, 0.0  ;;  %v1107_v60 = vld [vmem:[%s2271_s5 + $0x18] sm:$0xff] }
 0x152   :  { %v890_v0 = vmax.f32 %v848_v59, 0.0 }
 0x153   :  { %v888_v3 = vmax.f32 %v840_v61, 0.0 }
 0x154   :  { %v902_v4 = vpack.c.bf16 %v890_v0, %v889_v62  ;;  %v1124_v62 = vunpack.c.l.bf16 %v1106_v32 }
 0x155   :  { %v901_v5 = vpack.c.bf16 %v888_v3, %v887_v1  ;;  %v1623_v2 = vpop.f32.mrb[48].mxu0 }
 0x156   :  { %v861_v6 = vadd.f32 %v1623_v2, %v2080_v39  ;;  %v852_v50 = vpop.f32.mrb[49].mxu0 }
 0x157   :  { %v853_v8 = vadd.f32 %v852_v50, %v2074_v18  ;;  %v1624_v9 = vpop.f32.mrb[50].mxu0  ;;  %1426 = vmatmul.mubr.msk.bf16.gmra.mrb[28].mxu1 %vm567_vm0, %v900_v52 }
 0x158   :  { %v864_v7 = vadd.f32 %v1624_v9, %v2082_v45  ;;  %v855_v11 = vpop.f32.mrb[51].mxu0  ;;  %1043 = vmatprep.mubr.bf16.mxu1 %v1750_v20  ;;  %v893_v13 = vmax.f32 %v861_v6, 0.0  ;;  %v1126_v6 = vunpack.c.l.bf16 %v1107_v60 }
 0x159   :  { %v856_v55 = vadd.f32 %v855_v11, %v2076_v25  ;;  %v891_v15 = vmax.f32 %v853_v8, 0.0 }
 0x15a   :  { %v894_v14 = vmax.f32 %v864_v7, 0.0  ;;  %v1127_v7 = vunpack.c.h.bf16 %v1107_v60 }
 0x15b   :  { %v892_v16 = vmax.f32 %v856_v55, 0.0 }
 0x15c   :  { %v904_v17 = vpack.c.bf16 %v894_v14, %v893_v13 }
 0x15d   :  { %v903_v19 = vpack.c.bf16 %v892_v16, %v891_v15  ;;  %v1627_v39 = vpop.f32.mrb[52].mxu0  ;;  %v1108_v16 = vld [vmem:[%s2271_s5 + $0x20] sm:$0xff] }
 0x15e   :  { %v877_v21 = vadd.f32 %v1627_v39, %v2092_v10  ;;  %v868_v18 = vpop.f32.mrb[53].mxu0 }
 0x15f   :  { %v869_v22 = vadd.f32 %v868_v18, %v2086_v58  ;;  %v1628_v24 = vpop.f32.mrb[54].mxu0  ;;  %1427 = vmatmul.mubr.msk.bf16.gmra.mrb[32].mxu1 %vm567_vm0, %v901_v5  ;;  %v917_v58 = vlaneseq  ;;  %v1109_v18 = vld [vmem:[%s2271_s5 + $0x28] sm:$0xff] }
 0x160   :  { %v880_v45 = vadd.f32 %v1628_v24, %v2094_v12  ;;  %v871_v27 = vpop.f32.mrb[55].mxu0  ;;  %1053 = vmatprep.mubr.bf16.mxu1 %v1750_v20  ;;  %v897_v28 = vmax.f32 %v877_v21, 0.0  ;;  %v915_v12 = vld [vmem:[%s2270_s4] sm:$0x3]  ;;  %v1128_v24 = vunpack.c.l.bf16 %v1108_v16 }
 0x161   :  { %v872_v25 = vadd.f32 %v871_v27, %v2088_v63  ;;  %v895_v31 = vmax.f32 %v869_v22, 0.0  ;;  %v918_v63 = vshrl.u32 %v917_v58, 7 }
 0x162   :  { %v898_v30 = vmax.f32 %v880_v45, 0.0 }
 0x163   :  { %v896_v33 = vmax.f32 %v872_v25, 0.0  ;;  %v919_v10 = vsub.s32 0, %v918_v63  ;;  %v923_v35 = vsub.s32 1, %v918_v63  ;;  %v1131_v63 = vunpack.c.h.bf16 %v1109_v18 }
 0x164   :  { %v906_v34 = vpack.c.bf16 %v898_v30, %v897_v28  ;;  %v1129_v28 = vunpack.c.h.bf16 %v1108_v16 }
 0x165   :  { %v905_v23 = vpack.c.bf16 %v896_v33, %v895_v31  ;;  %v2137_v37 = vrot.slane %v915_v12, %v919_v10  ;;  %v2139_v38 = vrot.slane %v915_v12, %v923_v35  ;;  %v1130_v33 = vunpack.c.l.bf16 %v1109_v18 }
 0x167   :  { %1428 = vmatmul.mubr.msk.bf16.gmra.mrb[36].mxu1 %vm567_vm0, %v902_v4  ;;  %v1125_v4 = vunpack.c.h.bf16 %v1106_v32 }
 0x168   :  { %1063 = vmatprep.mubr.bf16.mxu1 %v1750_v20 }
 0x16f   :  { %1429 = vmatmul.mubr.msk.bf16.gmra.mrb[40].mxu1 %vm567_vm0, %v903_v19 }
 0x170   :  { %1073 = vmatprep.mubr.bf16.mxu1 %v1750_v20 }
 0x177   :  { %1430 = vmatmul.mubr.msk.bf16.gmra.mrb[44].mxu1 %vm567_vm0, %v904_v17 }
 0x178   :  { %1083 = vmatprep.mubr.bf16.mxu1 %v1750_v20 }
 0x17f   :  { %1431 = vmatmul.mubr.msk.bf16.gmra.mrb[48].mxu1 %vm567_vm0, %v905_v23 }
 0x180   :  { %1093 = vmatprep.mubr.bf16.mxu1 %v1750_v20  ;;  %v1105_v20 = vld [vmem:[%s2271_s5 + $0x8] sm:$0xff] }
 0x181   :  { %v1122_v46 = vunpack.c.l.bf16 %v1105_v20  ;;  %v1123_v49 = vunpack.c.h.bf16 %v1105_v20 }
 0x187   :  { %1432 = vmatmul.mubr.msk.bf16.gmra.mrb[52].mxu1 %vm567_vm0, %v906_v34 }
 0x222   :  { %v1025_v26 = vpop.f32.mrb[24].mxu1 }
 0x223   :  { %v1026_v42 = vadd.f32 %v1025_v26, %v2137_v37  ;;  %v1027_v44 = vpop.f32.mrb[25].mxu1 }
 0x224   :  { %v1028_v47 = vadd.f32 %v1027_v44, %v2139_v38  ;;  %v1029_v48 = vpop.f32.mrb[26].mxu1 }
 0x225   :  { %v1152_v29 = vadd.f32 %v1120_v40, %v1026_v42  ;;  %v1030_v51 = vadd.f32 %v1029_v48, %v2137_v37  ;;  %v1031_v52 = vpop.f32.mrb[27].mxu1  ;;  %v1110_v40 = vld [vmem:[%s2271_s5 + $0x30] sm:$0xff] }
 0x226   :  { %v1153_v53 = vadd.f32 %v1121_v41, %v1028_v47  ;;  %v1032_v54 = vadd.f32 %v1031_v52, %v2139_v38  ;;  %v1132_v48 = vunpack.c.l.bf16 %v1110_v40  ;;  %v1133_v52 = vunpack.c.h.bf16 %v1110_v40 }
 0x227   :  { %v1184_v43 = vmax.f32 %v1152_v29, 0.0  ;;  %v1154_v56 = vadd.f32 %v1122_v46, %v1030_v51  ;;  %v1111_v46 = vld [vmem:[%s2271_s5 + $0x38] sm:$0xff] }
 0x228   :  { %v1185_v57 = vmax.f32 %v1153_v53, 0.0  ;;  %v1155_v59 = vadd.f32 %v1123_v49, %v1032_v54  ;;  %v1134_v32 = vunpack.c.l.bf16 %v1111_v46 }
 0x229   :  { %v1186_v61 = vmax.f32 %v1154_v56, 0.0 }
 0x22a   :  { %v1449_v0 = vpack.c.bf16 %v1185_v57, %v1184_v43  ;;  %v1187_v1 = vmax.f32 %v1155_v59, 0.0  ;;  %v1035_v3 = vpop.f32.mrb[28].mxu1  ;;  %v1135_v59 = vunpack.c.h.bf16 %v1111_v46 }
 0x22b   :  { %v1036_v5 = vadd.f32 %v1035_v3, %v2137_v37  ;;  %v1037_v2 = vpop.f32.mrb[29].mxu1  ;;  %v1112_v3 = vld [vmem:[%s2271_s5 + $0x40] sm:$0xff] }
 0x22c   :  { %1312 = vst [vmem:[%s2272_s6] sm:$0xff] %v1449_v0  ;;  %v1450_v50 = vpack.c.bf16 %v1187_v1, %v1186_v61  ;;  %v1038_v8 = vadd.f32 %v1037_v2, %v2139_v38  ;;  %v1039_v9 = vpop.f32.mrb[30].mxu1 }
 0x22d   :  { %v1156_v11 = vadd.f32 %v1124_v62, %v1036_v5  ;;  %v1040_v55 = vadd.f32 %v1039_v9, %v2137_v37  ;;  %v1041_v13 = vpop.f32.mrb[31].mxu1  ;;  %v1136_v9 = vunpack.c.l.bf16 %v1112_v3 }
 0x22e   :  { %1313 = vst [vmem:[%s2272_s6 + $0x8] sm:$0xff] %v1450_v50  ;;  %v1157_v14 = vadd.f32 %v1125_v4, %v1038_v8  ;;  %v1042_v15 = vadd.f32 %v1041_v13, %v2139_v38  ;;  %v1113_v50 = vld [vmem:[%s2271_s5 + $0x48] sm:$0xff]  ;;  %v1137_v13 = vunpack.c.h.bf16 %v1112_v3 }
 0x22f   :  { %v1188_v17 = vmax.f32 %v1156_v11, 0.0  ;;  %v1158_v19 = vadd.f32 %v1126_v6, %v1040_v55  ;;  %v1138_v16 = vunpack.c.l.bf16 %v1113_v50 }
 0x230   :  { %v1189_v39 = vmax.f32 %v1157_v14, 0.0  ;;  %v1159_v21 = vadd.f32 %v1127_v7, %v1042_v15 }
 0x231   :  { %v1190_v22 = vmax.f32 %v1158_v19, 0.0 }
 0x232   :  { %v1451_v45 = vpack.c.bf16 %v1189_v39, %v1188_v17  ;;  %v1191_v27 = vmax.f32 %v1159_v21, 0.0  ;;  %v1045_v25 = vpop.f32.mrb[32].mxu1  ;;  %v1139_v21 = vunpack.c.h.bf16 %v1113_v50 }
 0x233   :  { %v1046_v30 = vadd.f32 %v1045_v25, %v2137_v37  ;;  %v1047_v31 = vpop.f32.mrb[33].mxu1  ;;  %v1114_v25 = vld [vmem:[%s2271_s5 + $0x50] sm:$0xff] }
 0x234   :  { %1314 = vst [vmem:[%s2272_s6 + $0x10] sm:$0xff] %v1451_v45  ;;  %v1452_v34 = vpack.c.bf16 %v1191_v27, %v1190_v22  ;;  %v1048_v23 = vadd.f32 %v1047_v31, %v2139_v38  ;;  %v1049_v58 = vpop.f32.mrb[34].mxu1 }
 0x235   :  { %v1160_v10 = vadd.f32 %v1128_v24, %v1046_v30  ;;  %v1050_v12 = vadd.f32 %v1049_v58, %v2137_v37  ;;  %v1051_v35 = vpop.f32.mrb[35].mxu1  ;;  %v1140_v58 = vunpack.c.l.bf16 %v1114_v25 }
 0x236   :  { %1315 = vst [vmem:[%s2272_s6 + $0x18] sm:$0xff] %v1452_v34  ;;  %v1161_v36 = vadd.f32 %v1129_v28, %v1048_v23  ;;  %v1052_v20 = vadd.f32 %v1051_v35, %v2139_v38  ;;  %v1115_v34 = vld [vmem:[%s2271_s5 + $0x58] sm:$0xff]  ;;  %v1141_v35 = vunpack.c.h.bf16 %v1114_v25 }
 0x237   :  { %v1192_v26 = vmax.f32 %v1160_v10, 0.0  ;;  %v1162_v41 = vadd.f32 %v1130_v33, %v1050_v12  ;;  %v1142_v40 = vunpack.c.l.bf16 %v1115_v34 }
 0x238   :  { %v1193_v42 = vmax.f32 %v1161_v36, 0.0  ;;  %v1163_v44 = vadd.f32 %v1131_v63, %v1052_v20 }
 0x239   :  { %v1194_v47 = vmax.f32 %v1162_v41, 0.0 }
 0x23a   :  { %v1453_v49 = vpack.c.bf16 %v1193_v42, %v1192_v26  ;;  %v1195_v29 = vmax.f32 %v1163_v44, 0.0  ;;  %v1055_v51 = vpop.f32.mrb[36].mxu1  ;;  %v1143_v44 = vunpack.c.h.bf16 %v1115_v34 }
 0x23b   :  { %v1056_v53 = vadd.f32 %v1055_v51, %v2137_v37  ;;  %v1057_v54 = vpop.f32.mrb[37].mxu1  ;;  %v1116_v51 = vld [vmem:[%s2271_s5 + $0x60] sm:$0xff] }
 0x23c   :  { %1316 = vst [vmem:[%s2272_s6 + $0x20] sm:$0xff] %v1453_v49  ;;  %v1454_v43 = vpack.c.bf16 %v1195_v29, %v1194_v47  ;;  %v1058_v56 = vadd.f32 %v1057_v54, %v2139_v38  ;;  %v1059_v57 = vpop.f32.mrb[38].mxu1 }
 0x23d   :  { %v1164_v60 = vadd.f32 %v1132_v48, %v1056_v53  ;;  %v1060_v61 = vadd.f32 %v1059_v57, %v2137_v37  ;;  %v1061_v62 = vpop.f32.mrb[39].mxu1  ;;  %v1144_v57 = vunpack.c.l.bf16 %v1116_v51 }
 0x23e   :  { %1317 = vst [vmem:[%s2272_s6 + $0x28] sm:$0xff] %v1454_v43  ;;  %v1165_v0 = vadd.f32 %v1133_v52, %v1058_v56  ;;  %v1062_v1 = vadd.f32 %v1061_v62, %v2139_v38  ;;  %v1117_v43 = vld [vmem:[%s2271_s5 + $0x68] sm:$0xff]  ;;  %v1145_v62 = vunpack.c.h.bf16 %v1116_v51 }
 0x23f   :  { %v1196_v4 = vmax.f32 %v1164_v60, 0.0  ;;  %v1166_v5 = vadd.f32 %v1134_v32, %v1060_v61  ;;  %v1146_v3 = vunpack.c.l.bf16 %v1117_v43 }
 0x240   :  { %v1197_v2 = vmax.f32 %v1165_v0, 0.0  ;;  %v1167_v6 = vadd.f32 %v1135_v59, %v1062_v1 }
 0x241   :  { %v1198_v8 = vmax.f32 %v1166_v5, 0.0 }
 0x242   :  { %v1455_v7 = vpack.c.bf16 %v1197_v2, %v1196_v4  ;;  %v1199_v11 = vmax.f32 %v1167_v6, 0.0  ;;  %v1065_v55 = vpop.f32.mrb[40].mxu1  ;;  %v1147_v6 = vunpack.c.h.bf16 %v1117_v43 }
 0x243   :  { %v1066_v14 = vadd.f32 %v1065_v55, %v2137_v37  ;;  %v1067_v15 = vpop.f32.mrb[41].mxu1  ;;  %v1118_v55 = vld [vmem:[%s2271_s5 + $0x70] sm:$0xff] }
 0x244   :  { %1318 = vst [vmem:[%s2272_s6 + $0x30] sm:$0xff] %v1455_v7  ;;  %v1456_v17 = vpack.c.bf16 %v1199_v11, %v1198_v8  ;;  %v1068_v19 = vadd.f32 %v1067_v15, %v2139_v38  ;;  %v1069_v39 = vpop.f32.mrb[42].mxu1 }
 0x245   :  { %v1168_v18 = vadd.f32 %v1136_v9, %v1066_v14  ;;  %v1070_v22 = vadd.f32 %v1069_v39, %v2137_v37  ;;  %v1071_v24 = vpop.f32.mrb[43].mxu1  ;;  %v1148_v39 = vunpack.c.l.bf16 %v1118_v55 }
 0x246   :  { %1319 = vst [vmem:[%s2272_s6 + $0x38] sm:$0xff] %v1456_v17  ;;  %v1169_v45 = vadd.f32 %v1137_v13, %v1068_v19  ;;  %v1072_v27 = vadd.f32 %v1071_v24, %v2139_v38  ;;  %v1119_v17 = vld [vmem:[%s2271_s5 + $0x78] sm:$0xff]  ;;  %v1149_v24 = vunpack.c.h.bf16 %v1118_v55 }
 0x247   :  { %v1200_v28 = vmax.f32 %v1168_v18, 0.0  ;;  %v1170_v30 = vadd.f32 %v1138_v16, %v1070_v22  ;;  %v1150_v25 = vunpack.c.l.bf16 %v1119_v17 }
 0x248   :  { %v1201_v31 = vmax.f32 %v1169_v45, 0.0  ;;  %v1171_v33 = vadd.f32 %v1139_v21, %v1072_v27 }
 0x249   :  { %v1202_v23 = vmax.f32 %v1170_v30, 0.0 }
 0x24a   :  { %v1457_v63 = vpack.c.bf16 %v1201_v31, %v1200_v28  ;;  %v1203_v10 = vmax.f32 %v1171_v33, 0.0  ;;  %v1075_v12 = vpop.f32.mrb[44].mxu1  ;;  %v1151_v33 = vunpack.c.h.bf16 %v1119_v17 }
 0x24b   :  { %v1076_v36 = vadd.f32 %v1075_v12, %v2137_v37  ;;  %v1077_v20 = vpop.f32.mrb[45].mxu1 }
 0x24c   :  { %1320 = vst [vmem:[%s2272_s6 + $0x40] sm:$0xff] %v1457_v63  ;;  %v1458_v26 = vpack.c.bf16 %v1203_v10, %v1202_v23  ;;  %v1078_v41 = vadd.f32 %v1077_v20, %v2139_v38  ;;  %v1079_v42 = vpop.f32.mrb[46].mxu1 }
 0x24d   :  { %v1172_v46 = vadd.f32 %v1140_v58, %v1076_v36  ;;  %v1080_v47 = vadd.f32 %v1079_v42, %v2137_v37  ;;  %v1081_v48 = vpop.f32.mrb[47].mxu1 }
 0x24e   :  { %1321 = vst [vmem:[%s2272_s6 + $0x48] sm:$0xff] %v1458_v26  ;;  %v1173_v49 = vadd.f32 %v1141_v35, %v1078_v41  ;;  %v1082_v29 = vadd.f32 %v1081_v48, %v2139_v38 }
 0x24f   :  { %v1204_v52 = vmax.f32 %v1172_v46, 0.0  ;;  %v1174_v53 = vadd.f32 %v1142_v40, %v1080_v47 }
 0x250   :  { %v1205_v54 = vmax.f32 %v1173_v49, 0.0  ;;  %v1175_v32 = vadd.f32 %v1143_v44, %v1082_v29 }
 0x251   :  { %v1206_v56 = vmax.f32 %v1174_v53, 0.0 }
 0x252   :  { %v1459_v59 = vpack.c.bf16 %v1205_v54, %v1204_v52  ;;  %v1207_v60 = vmax.f32 %v1175_v32, 0.0  ;;  %v1085_v61 = vpop.f32.mrb[48].mxu1 }
 0x253   :  { %v1086_v0 = vadd.f32 %v1085_v61, %v2137_v37  ;;  %v1087_v1 = vpop.f32.mrb[49].mxu1 }
 0x254   :  { %1322 = vst [vmem:[%s2272_s6 + $0x50] sm:$0xff] %v1459_v59  ;;  %v1460_v4 = vpack.c.bf16 %v1207_v60, %v1206_v56  ;;  %v1088_v5 = vadd.f32 %v1087_v1, %v2139_v38  ;;  %v1089_v2 = vpop.f32.mrb[50].mxu1 }
 0x255   :  { %v1176_v50 = vadd.f32 %v1144_v57, %v1086_v0  ;;  %v1090_v8 = vadd.f32 %v1089_v2, %v2137_v37  ;;  %v1091_v9 = vpop.f32.mrb[51].mxu1 }
 0x256   :  { %1323 = vst [vmem:[%s2272_s6 + $0x58] sm:$0xff] %v1460_v4  ;;  %v1177_v7 = vadd.f32 %v1145_v62, %v1088_v5  ;;  %v1092_v11 = vadd.f32 %v1091_v9, %v2139_v38 }
 0x257   :  { %v1208_v13 = vmax.f32 %v1176_v50, 0.0  ;;  %v1178_v14 = vadd.f32 %v1146_v3, %v1090_v8 }
 0x258   :  { %v1209_v15 = vmax.f32 %v1177_v7, 0.0  ;;  %v1179_v16 = vadd.f32 %v1147_v6, %v1092_v11 }
 0x259   :  { %v1210_v19 = vmax.f32 %v1178_v14, 0.0 }
 0x25a   :  { %v1461_v21 = vpack.c.bf16 %v1209_v15, %v1208_v13  ;;  %v1211_v18 = vmax.f32 %v1179_v16, 0.0  ;;  %v1095_v22 = vpop.f32.mrb[52].mxu1 }
 0x25b   :  { %v1096_v45 = vadd.f32 %v1095_v22, %v2137_v37  ;;  %v1097_v27 = vpop.f32.mrb[53].mxu1 }
 0x25c   :  { %1324 = vst [vmem:[%s2272_s6 + $0x60] sm:$0xff] %v1461_v21  ;;  %v1462_v28 = vpack.c.bf16 %v1211_v18, %v1210_v19  ;;  %v1098_v30 = vadd.f32 %v1097_v27, %v2139_v38  ;;  %v1099_v31 = vpop.f32.mrb[54].mxu1 }
 0x25d   :  { %v1180_v34 = vadd.f32 %v1148_v39, %v1096_v45  ;;  %v1100_v23 = vadd.f32 %v1099_v31, %v2137_v37  ;;  %v1101_v58 = vpop.f32.mrb[55].mxu1 }
 0x25e   :  { %1325 = vst [vmem:[%s2272_s6 + $0x68] sm:$0xff] %v1462_v28  ;;  %v1181_v63 = vadd.f32 %v1149_v24, %v1098_v30  ;;  %v1102_v10 = vadd.f32 %v1101_v58, %v2139_v38 }
 0x25f   :  { %v1212_v12 = vmax.f32 %v1180_v34, 0.0  ;;  %v1182_v35 = vadd.f32 %v1150_v25, %v1100_v23 }
 0x260   :  { %v1213_v36 = vmax.f32 %v1181_v63, 0.0  ;;  %v1183_v20 = vadd.f32 %v1151_v33, %v1102_v10 }
 0x261   :  { %v1214_v40 = vmax.f32 %v1182_v35, 0.0 }
 0x262   :  { %v1463_v26 = vpack.c.bf16 %v1213_v36, %v1212_v12  ;;  %v1215_v41 = vmax.f32 %v1183_v20, 0.0 }
 0x264   :  { %1326 = vst [vmem:[%s2272_s6 + $0x70] sm:$0xff] %v1463_v26  ;;  %v1464_v37 = vpack.c.bf16 %v1215_v41, %v1214_v40 }
 0x266   :  { %1327 = vst [vmem:[%s2272_s6 + $0x78] sm:$0xff] %v1464_v37 }

// kernel: _lambda_.35
= control target key start
LH: loop header
LB: loop body
LE: loop exit
PB: predicated region body
PF: predicated region fallthrough
CT: control target
= control target key end

     0   :  { %s836_s12 = smov 0   ;;  %s838_s13 = smov 0   ;;  %s952_s0 = inlined_call_operand.vmem [shape: bf16[128,256], index: 0, kind: input, shape index: {}]   ;;  %s953_s1 = inlined_call_operand.vmem [shape: bf16[256,64], index: 1, kind: input, shape index: {}]   ;;  %s954_s2 = inlined_call_operand.vmem [shape: f32[1,64], index: 2, kind: input, shape index: {}]   ;;  %s955_s3 = inlined_call_operand.vmem [shape: bf16[128,64], index: 3, kind: output, shape index: {}]  }
   0x1   :  { %s840_s14 = smov 0  }
   0x2 LB: > { %s25_s15 = sadd.s32 1, %s810_s13  ;;  %p634_p0 = scmp.ge.s32.totalorder %s814_s14, 1  ;;  %s814_s14 = sphi %s840_s14, %s13_s14   ;;  %s810_s13 = sphi %s838_s13, %s957_s13   ;;  %s806_s12 = sphi %s836_s12, %s956_s12  }
   0x3   : > { %p27_p1 = scmp.ge.s32.totalorder %s25_s15, 2  ;;  %p170_p2 = scmp.lt.s32.totalorder %s814_s14, 3 }
   0x5   : > { %s959_s15 = smov (%p27_p1, %s25_s15), 0  ;;  %p171_p3 = pnand %p634_p0, %p170_p2 }
   0x6   : > { %v764_v0 = vld [vmem:[%s953_s1 + $0x40] sm:$0xff] (!%p171_p3)   ;;  %s635_s18 = sshll.u32 (!%p171_p3), %s806_s12, 3  ;;  %v766_v2 = vld [vmem:[%s953_s1 + $0x48] sm:$0xff] (!%p171_p3)   ;;  %v768_v4 = vld [vmem:[%s953_s1 + $0x50] sm:$0xff] (!%p171_p3)   ;;  %vm517_vm0 = vcmask (!%p171_p3), 519168  }
   0x7   : > { %174 = sbr.rel (%p171_p3) target bundleno = 271 (0x10f), region = 32  ;;  %v765_v1 = vld [vmem:[%s953_s1] sm:$0xff] (!%p171_p3)   ;;  %684 = vmatprep.subr.bf16.mxu0 (!%p171_p3), %v764_v0  ;;  %724 = vmatprep.subr.bf16.mxu1 (!%p171_p3), %v764_v0  ;;  %v767_v3 = vld [vmem:[%s953_s1 + $0x8] sm:$0xff] (!%p171_p3)   ;;  %p206_p4 = scmp.lt.s32.totalorder (!%p171_p3), %s635_s18, 15  ;;  %v769_v5 = vld [vmem:[%s953_s1 + $0x10] sm:$0xff] (!%p171_p3)  }
   0x8   : > { %685 = vmatpush3.bf16.msra.mxu0 (!%p171_p3), %v765_v1  ;;  %732 = vmatpush3.bf16.msra.mxu1 (!%p171_p3), %v765_v1  ;;  %v770_v6 = vld [vmem:[%s953_s1 + $0x58] sm:$0xff] (!%p171_p3)   ;;  %v772_v8 = vld [vmem:[%s953_s1 + $0x60] sm:$0xff] (!%p171_p3)   ;;  %v774_v10 = vld [vmem:[%s953_s1 + $0x68] sm:$0xff] (!%p171_p3)  }
   0x9   : > { %686 = vmatprep.subr.bf16.mxu0 (!%p171_p3), %v766_v2  ;;  %725 = vmatprep.subr.bf16.mxu1 (!%p171_p3), %v766_v2  ;;  %v771_v7 = vld [vmem:[%s953_s1 + $0x18] sm:$0xff] (!%p171_p3)   ;;  %v773_v9 = vld [vmem:[%s953_s1 + $0x20] sm:$0xff] (!%p171_p3)   ;;  %v775_v13 = vld [vmem:[%s953_s1 + $0x28] sm:$0xff] (!%p171_p3)  }
   0xa   : > { %v776_v14 = vld [vmem:[%s953_s1 + $0x70] sm:$0xff] (!%p171_p3)   ;;  %v778_v16 = vld [vmem:[%s953_s1 + $0x78] sm:$0xff] (!%p171_p3)   ;;  %v640_v26 = vld [vmem:[%s954_s2] ss:$0 sm:$0xff] (!%p171_p3) }
   0xb   : > { %v777_v15 = vld [vmem:[%s953_s1 + $0x30] sm:$0xff] (!%p171_p3)   ;;  %v779_v17 = vld [vmem:[%s953_s1 + $0x38] sm:$0xff] (!%p171_p3)  }
   0xc   : > { %687 = vmatpush3.bf16.msra.mxu0 (!%p171_p3), %v767_v3  ;;  %733 = vmatpush3.bf16.msra.mxu1 (!%p171_p3), %v767_v3 }
   0xd   : > { %688 = vmatprep.subr.bf16.mxu0 (!%p171_p3), %v768_v4  ;;  %726 = vmatprep.subr.bf16.mxu1 (!%p171_p3), %v768_v4 }
   0xe   : > { %s961_s18 = smov (!%p206_p4, %s635_s18), 15 }
   0xf   : > { %s675_s6 = sshll.u32 %s961_s18, 3  ;;  %s639_s5 = sshll.u32 %s961_s18, 2 }
  0x10   : > { %689 = vmatpush3.bf16.msra.mxu0 %v769_v5  ;;  %734 = vmatpush3.bf16.msra.mxu1 %v769_v5  ;;  %s887_s11 = scalar_lea.vmem %s952_s0, %s675_s6  ;;  %s925_s8 = scalar_lea.vmem %s955_s3, %s639_s5 }
  0x11   : > { %690 = vmatprep.subr.bf16.mxu0 %v770_v6  ;;  %727 = vmatprep.subr.bf16.mxu1 %v770_v6  ;;  %v782_v11 = vld [vmem:[%s887_s11 + $0x4] ss:$8 sps:$4 sm:$0xff]   ;;  %v780_v18 = vld [vmem:[%s887_s11] ss:$8 sps:$4 sm:$0xff]   ;;  %v786_v20 = vld [vmem:[%s887_s11 + $0x14] ss:$8 sps:$4 sm:$0xff]  }
  0x12   : > { %v785_v12 = vld [vmem:[%s887_s11 + $0x24] ss:$8 sps:$4 sm:$0xff]   ;;  %444 = vmatprep.mubr.bf16.mxu0 %v782_v11  ;;  %v783_v19 = vld [vmem:[%s887_s11 + $0x20] ss:$8 sps:$4 sm:$0xff]   ;;  %v788_v21 = vld [vmem:[%s887_s11 + $0x34] ss:$8 sps:$4 sm:$0xff]  }
  0x13   : > { %460 = vmatprep.mubr.bf16.mxu1 %v785_v12  ;;  %v790_v22 = vld [vmem:[%s887_s11 + $0x10] ss:$8 sps:$4 sm:$0xff]  }
  0x14   : > { %691 = vmatpush3.bf16.msra.mxu0 %v771_v7  ;;  %735 = vmatpush3.bf16.msra.mxu1 %v771_v7  ;;  %v791_v23 = vld [vmem:[%s887_s11 + $0x30] ss:$8 sps:$4 sm:$0xff]  }
  0x15   : > { %692 = vmatprep.subr.bf16.mxu0 %v772_v8  ;;  %728 = vmatprep.subr.bf16.mxu1 %v772_v8 }
  0x18   : > { %693 = vmatpush3.bf16.msra.mxu0 %v773_v9  ;;  %736 = vmatpush3.bf16.msra.mxu1 %v773_v9 }
  0x19   : > { %694 = vmatprep.subr.bf16.mxu0 %v774_v10  ;;  %729 = vmatprep.subr.bf16.mxu1 %v774_v10 }
  0x1c   : > { %695 = vmatpush3.bf16.msra.mxu0 %v775_v13  ;;  %737 = vmatpush3.bf16.msra.mxu1 %v775_v13 }
  0x1d   : > { %696 = vmatprep.subr.bf16.mxu0 %v776_v14  ;;  %730 = vmatprep.subr.bf16.mxu1 %v776_v14 }
  0x20   : > { %697 = vmatpush3.bf16.msra.mxu0 %v777_v15  ;;  %738 = vmatpush3.bf16.msra.mxu1 %v777_v15 }
  0x21   : > { %698 = vmatprep.subr.bf16.mxu0 %v778_v16  ;;  %731 = vmatprep.subr.bf16.mxu1 %v778_v16 }
  0x24   : > { %699 = vmatpush3.bf16.msra.mxu0 %v779_v17  ;;  %739 = vmatpush3.bf16.msra.mxu1 %v779_v17 }
  0x27   : > { %445 = vmatmul.mubr.bf16.vlgmr.msra.gmra.mrb[0].mxu0 %v780_v18  ;;  %461 = vmatmul.mubr.bf16.vlgmr.msra.gmra.mrb[0].mxu1 %v783_v19 }
  0x28   : > { %452 = vmatprep.mubr.bf16.mxu0 %v786_v20  ;;  %468 = vmatprep.mubr.bf16.mxu1 %v788_v21 }
  0x2f   : > { %453 = vmatmul.mubr.bf16.gmra.mrb[4].mxu0 %v790_v22  ;;  %469 = vmatmul.mubr.bf16.gmra.mrb[4].mxu1 %v791_v23 }
  0xfa   : > { %v700_v24 = vpop.f32.mrb[0].mxu0  ;;  %v712_v25 = vpop.f32.mrb[0].mxu1 }
  0xfb   : > { %v701_v27 = vpop.f32.mrb[1].mxu0  ;;  %v713_v28 = vpop.f32.mrb[1].mxu1 }
  0xfc   : > { %v702_v29 = vadd.f32 %v701_v27, %v700_v24  ;;  %v714_v30 = vadd.f32 %v713_v28, %v712_v25  ;;  %v703_v31 = vpop.f32.mrb[2].mxu0  ;;  %v715_v32 = vpop.f32.mrb[2].mxu1 }
  0xfd   : > { %v704_v33 = vpop.f32.mrb[3].mxu0  ;;  %v716_v34 = vpop.f32.mrb[3].mxu1 }
  0xfe   : > { %v447_v35 = vadd.f32 %v702_v29, %v640_v26  ;;  %v463_v36 = vadd.f32 %v714_v30, %v640_v26  ;;  %v705_v37 = vadd.f32 %v704_v33, %v703_v31  ;;  %v717_v38 = vadd.f32 %v716_v34, %v715_v32 }
 0x100   : > { %v477_v39 = vmax.f32 %v447_v35, 0.0  ;;  %v481_v40 = vmax.f32 %v463_v36, 0.0  ;;  %v450_v41 = vadd.f32 %v705_v37, %v640_v26  ;;  %v466_v42 = vadd.f32 %v717_v38, %v640_v26 }
 0x102   : > { %v676_v43 = vpack.c.bf16 %v477_v39, %v477_v39  ;;  %v680_v44 = vpack.c.bf16 %v481_v40, %v481_v40  ;;  %v478_v45 = vmax.f32 %v450_v41, 0.0  ;;  %v482_v46 = vmax.f32 %v466_v42, 0.0  ;;  %v706_v47 = vpop.f32.mrb[4].mxu0  ;;  %v718_v48 = vpop.f32.mrb[4].mxu1 }
 0x103   : > { %v707_v49 = vpop.f32.mrb[5].mxu0  ;;  %v719_v50 = vpop.f32.mrb[5].mxu1 }
 0x104   : > { %518 = vst.msk [vmem:[%s925_s8] sm:$0xf] %vm517_vm0, %v676_v43  ;;  %522 = vst.msk [vmem:[%s925_s8 + $0x10] sm:$0xf] %vm517_vm0, %v680_v44  ;;  %v677_v51 = vpack.c.bf16 %v478_v45, %v478_v45  ;;  %v681_v52 = vpack.c.bf16 %v482_v46, %v482_v46  ;;  %v708_v53 = vadd.f32 %v707_v49, %v706_v47  ;;  %v709_v55 = vpop.f32.mrb[6].mxu0  ;;  %v721_v56 = vpop.f32.mrb[6].mxu1 }
 0x105   : > { %v720_v54 = vadd.f32 %v719_v50, %v718_v48  ;;  %v710_v57 = vpop.f32.mrb[7].mxu0  ;;  %v722_v58 = vpop.f32.mrb[7].mxu1 }
 0x106   : > { %519 = vst.msk [vmem:[%s925_s8 + $0x4] sm:$0xf] %vm517_vm0, %v677_v51  ;;  %523 = vst.msk [vmem:[%s925_s8 + $0x14] sm:$0xf] %vm517_vm0, %v681_v52  ;;  %v455_v59 = vadd.f32 %v708_v53, %v640_v26  ;;  %v711_v61 = vadd.f32 %v710_v57, %v709_v55  ;;  %v723_v62 = vadd.f32 %v722_v58, %v721_v56 }
 0x107   : > { %v471_v60 = vadd.f32 %v720_v54, %v640_v26 }
 0x108   : > { %v479_v63 = vmax.f32 %v455_v59, 0.0  ;;  %v458_v1 = vadd.f32 %v711_v61, %v640_v26  ;;  %v474_v2 = vadd.f32 %v723_v62, %v640_v26 }
 0x109   : > { %v483_v0 = vmax.f32 %v471_v60, 0.0 }
 0x10a   : > { %v678_v3 = vpack.c.bf16 %v479_v63, %v479_v63  ;;  %v480_v5 = vmax.f32 %v458_v1, 0.0  ;;  %v484_v6 = vmax.f32 %v474_v2, 0.0 }
 0x10b   : > { %v682_v4 = vpack.c.bf16 %v483_v0, %v483_v0 }
 0x10c   : > { %520 = vst.msk [vmem:[%s925_s8 + $0x8] sm:$0xf] %vm517_vm0, %v678_v3  ;;  %v679_v7 = vpack.c.bf16 %v480_v5, %v480_v5  ;;  %v683_v8 = vpack.c.bf16 %v484_v6, %v484_v6 }
 0x10d   : > { %524 = vst.msk [vmem:[%s925_s8 + $0x18] sm:$0xf] %vm517_vm0, %v682_v4 }
 0x10e   : > { %521 = vst.msk [vmem:[%s925_s8 + $0xc] sm:$0xf] %vm517_vm0, %v679_v7  ;;  %525 = vst.msk [vmem:[%s925_s8 + $0x1c] sm:$0xf] %vm517_vm0, %v683_v8 }
 0x10f PF: > { %s13_s14 = sadd.s32 1, %s814_s14   ;;  %s956_s12 = smov %s810_s13 }
 0x110   : > { %p10_p5 = scmp.ge.s32.totalorder %s13_s14, 4   ;;  %s957_s13 = smov %s959_s15 }
 0x112   :  { %12 = sbr.rel (!%p10_p5) target bundleno = 2 (0x2), region = 68 }

// kernel: _lambda_.40
= control target key start
LH: loop header
LB: loop body
LE: loop exit
PB: predicated region body
PF: predicated region fallthrough
CT: control target
= control target key end

     0   :  { %s858_s12 = smov 0   ;;  %s860_s13 = smov 0   ;;  %s956_s0 = inlined_call_operand.vmem [shape: bf16[128,256], index: 0, kind: input, shape index: {}]   ;;  %s957_s1 = inlined_call_operand.vmem [shape: bf16[256,128], index: 1, kind: input, shape index: {}]   ;;  %s958_s2 = inlined_call_operand.vmem [shape: f32[1,128], index: 2, kind: input, shape index: {}]   ;;  %s959_s3 = inlined_call_operand.vmem [shape: bf16[128,128], index: 3, kind: output, shape index: {}]  }
   0x1   :  { %s862_s14 = smov 0  }
   0x2 LB: > { %s25_s15 = sadd.s32 1, %s832_s13  ;;  %p633_p0 = scmp.ge.s32.totalorder %s836_s14, 1  ;;  %s836_s14 = sphi %s862_s14, %s13_s14   ;;  %s832_s13 = sphi %s860_s13, %s961_s13   ;;  %s828_s12 = sphi %s858_s12, %s960_s12  }
   0x3   : > { %p27_p1 = scmp.ge.s32.totalorder %s25_s15, 2  ;;  %p170_p2 = scmp.lt.s32.totalorder %s836_s14, 3 }
   0x5   : > { %s963_s15 = smov (%p27_p1, %s25_s15), 0  ;;  %p171_p3 = pnand %p633_p0, %p170_p2 }
   0x6   : > { %v786_v0 = vld [vmem:[%s957_s1 + $0x40] sm:$0xff] (!%p171_p3)   ;;  %s634_s18 = sshll.u32 (!%p171_p3), %s828_s12, 3  ;;  %v788_v2 = vld [vmem:[%s957_s1 + $0x48] sm:$0xff] (!%p171_p3)   ;;  %v790_v4 = vld [vmem:[%s957_s1 + $0x50] sm:$0xff] (!%p171_p3)  }
   0x7   : > { %174 = sbr.rel (%p171_p3) target bundleno = 272 (0x110), region = 32  ;;  %v787_v1 = vld [vmem:[%s957_s1] sm:$0xff] (!%p171_p3)   ;;  %706 = vmatprep.subr.bf16.mxu0 (!%p171_p3), %v786_v0  ;;  %746 = vmatprep.subr.bf16.mxu1 (!%p171_p3), %v786_v0  ;;  %v789_v3 = vld [vmem:[%s957_s1 + $0x8] sm:$0xff] (!%p171_p3)   ;;  %p206_p4 = scmp.lt.s32.totalorder (!%p171_p3), %s634_s18, 15  ;;  %v791_v5 = vld [vmem:[%s957_s1 + $0x10] sm:$0xff] (!%p171_p3)  }
   0x8   : > { %707 = vmatpush3.bf16.msra.mxu0 (!%p171_p3), %v787_v1  ;;  %754 = vmatpush3.bf16.msra.mxu1 (!%p171_p3), %v787_v1  ;;  %v792_v6 = vld [vmem:[%s957_s1 + $0x58] sm:$0xff] (!%p171_p3)   ;;  %v794_v8 = vld [vmem:[%s957_s1 + $0x60] sm:$0xff] (!%p171_p3)   ;;  %v796_v10 = vld [vmem:[%s957_s1 + $0x68] sm:$0xff] (!%p171_p3)  }
   0x9   : > { %708 = vmatprep.subr.bf16.mxu0 (!%p171_p3), %v788_v2  ;;  %747 = vmatprep.subr.bf16.mxu1 (!%p171_p3), %v788_v2  ;;  %v793_v7 = vld [vmem:[%s957_s1 + $0x18] sm:$0xff] (!%p171_p3)   ;;  %v795_v9 = vld [vmem:[%s957_s1 + $0x20] sm:$0xff] (!%p171_p3)   ;;  %v797_v13 = vld [vmem:[%s957_s1 + $0x28] sm:$0xff] (!%p171_p3)  }
   0xa   : > { %v798_v14 = vld [vmem:[%s957_s1 + $0x70] sm:$0xff] (!%p171_p3)   ;;  %v800_v16 = vld [vmem:[%s957_s1 + $0x78] sm:$0xff] (!%p171_p3)   ;;  %v639_v26 = vld [vmem:[%s958_s2] ss:$0 sm:$0xff] (!%p171_p3) }
   0xb   : > { %v799_v15 = vld [vmem:[%s957_s1 + $0x30] sm:$0xff] (!%p171_p3)   ;;  %v801_v17 = vld [vmem:[%s957_s1 + $0x38] sm:$0xff] (!%p171_p3)  }
   0xc   : > { %709 = vmatpush3.bf16.msra.mxu0 (!%p171_p3), %v789_v3  ;;  %755 = vmatpush3.bf16.msra.mxu1 (!%p171_p3), %v789_v3 }
   0xd   : > { %710 = vmatprep.subr.bf16.mxu0 (!%p171_p3), %v790_v4  ;;  %748 = vmatprep.subr.bf16.mxu1 (!%p171_p3), %v790_v4 }
   0xe   : > { %s965_s18 = smov (!%p206_p4, %s634_s18), 15 }
   0xf   : > { %s674_s6 = sshll.u32 %s965_s18, 3  ;;  %s638_s5 = sshll.u32 %s965_s18, 2 }
  0x10   : > { %711 = vmatpush3.bf16.msra.mxu0 %v791_v5  ;;  %756 = vmatpush3.bf16.msra.mxu1 %v791_v5  ;;  %s909_s11 = scalar_lea.vmem %s956_s0, %s674_s6  ;;  %s226_s8 = scalar_lea.vmem %s959_s3, %s638_s5 }
  0x11   : > { %712 = vmatprep.subr.bf16.mxu0 %v792_v6  ;;  %749 = vmatprep.subr.bf16.mxu1 %v792_v6  ;;  %v804_v11 = vld [vmem:[%s909_s11 + $0x4] ss:$8 sps:$4 sm:$0xff]   ;;  %v802_v18 = vld [vmem:[%s909_s11] ss:$8 sps:$4 sm:$0xff]   ;;  %v808_v20 = vld [vmem:[%s909_s11 + $0x14] ss:$8 sps:$4 sm:$0xff]  }
  0x12   : > { %v807_v12 = vld [vmem:[%s909_s11 + $0x24] ss:$8 sps:$4 sm:$0xff]   ;;  %444 = vmatprep.mubr.bf16.mxu0 %v804_v11  ;;  %v805_v19 = vld [vmem:[%s909_s11 + $0x20] ss:$8 sps:$4 sm:$0xff]   ;;  %v810_v21 = vld [vmem:[%s909_s11 + $0x34] ss:$8 sps:$4 sm:$0xff]  }
  0x13   : > { %460 = vmatprep.mubr.bf16.mxu1 %v807_v12  ;;  %v812_v22 = vld [vmem:[%s909_s11 + $0x10] ss:$8 sps:$4 sm:$0xff]  }
  0x14   : > { %713 = vmatpush3.bf16.msra.mxu0 %v793_v7  ;;  %757 = vmatpush3.bf16.msra.mxu1 %v793_v7  ;;  %v813_v23 = vld [vmem:[%s909_s11 + $0x30] ss:$8 sps:$4 sm:$0xff]  }
  0x15   : > { %714 = vmatprep.subr.bf16.mxu0 %v794_v8  ;;  %750 = vmatprep.subr.bf16.mxu1 %v794_v8 }
  0x18   : > { %715 = vmatpush3.bf16.msra.mxu0 %v795_v9  ;;  %758 = vmatpush3.bf16.msra.mxu1 %v795_v9 }
  0x19   : > { %716 = vmatprep.subr.bf16.mxu0 %v796_v10  ;;  %751 = vmatprep.subr.bf16.mxu1 %v796_v10 }
  0x1c   : > { %717 = vmatpush3.bf16.msra.mxu0 %v797_v13  ;;  %759 = vmatpush3.bf16.msra.mxu1 %v797_v13 }
  0x1d   : > { %718 = vmatprep.subr.bf16.mxu0 %v798_v14  ;;  %752 = vmatprep.subr.bf16.mxu1 %v798_v14 }
  0x20   : > { %719 = vmatpush3.bf16.msra.mxu0 %v799_v15  ;;  %760 = vmatpush3.bf16.msra.mxu1 %v799_v15 }
  0x21   : > { %720 = vmatprep.subr.bf16.mxu0 %v800_v16  ;;  %753 = vmatprep.subr.bf16.mxu1 %v800_v16 }
  0x24   : > { %721 = vmatpush3.bf16.msra.mxu0 %v801_v17  ;;  %761 = vmatpush3.bf16.msra.mxu1 %v801_v17 }
  0x27   : > { %445 = vmatmul.mubr.bf16.vlgmr.msra.gmra.mrb[0].mxu0 %v802_v18  ;;  %461 = vmatmul.mubr.bf16.vlgmr.msra.gmra.mrb[0].mxu1 %v805_v19 }
  0x28   : > { %452 = vmatprep.mubr.bf16.mxu0 %v808_v20  ;;  %468 = vmatprep.mubr.bf16.mxu1 %v810_v21 }
  0x2f   : > { %453 = vmatmul.mubr.bf16.gmra.mrb[4].mxu0 %v812_v22  ;;  %469 = vmatmul.mubr.bf16.gmra.mrb[4].mxu1 %v813_v23 }
  0xfa   : > { %v722_v24 = vpop.f32.mrb[0].mxu0  ;;  %v734_v25 = vpop.f32.mrb[0].mxu1 }
  0xfb   : > { %v723_v27 = vpop.f32.mrb[1].mxu0  ;;  %v735_v28 = vpop.f32.mrb[1].mxu1 }
  0xfc   : > { %v724_v29 = vadd.f32 %v723_v27, %v722_v24  ;;  %v736_v30 = vadd.f32 %v735_v28, %v734_v25  ;;  %v725_v31 = vpop.f32.mrb[2].mxu0  ;;  %v737_v32 = vpop.f32.mrb[2].mxu1 }
  0xfd   : > { %v726_v33 = vpop.f32.mrb[3].mxu0  ;;  %v738_v34 = vpop.f32.mrb[3].mxu1 }
  0xfe   : > { %v447_v35 = vadd.f32 %v724_v29, %v639_v26  ;;  %v463_v36 = vadd.f32 %v736_v30, %v639_v26  ;;  %v727_v37 = vadd.f32 %v726_v33, %v725_v31  ;;  %v739_v38 = vadd.f32 %v738_v34, %v737_v32 }
 0x100   : > { %v450_v39 = vadd.f32 %v727_v37, %v639_v26  ;;  %v466_v40 = vadd.f32 %v739_v38, %v639_v26  ;;  %v477_v41 = vmax.f32 %v447_v35, 0.0  ;;  %v481_v42 = vmax.f32 %v463_v36, 0.0 }
 0x102   : > { %v478_v43 = vmax.f32 %v450_v39, 0.0  ;;  %v482_v44 = vmax.f32 %v466_v40, 0.0  ;;  %v728_v45 = vpop.f32.mrb[4].mxu0  ;;  %v740_v46 = vpop.f32.mrb[4].mxu1 }
 0x103   : > { %v729_v47 = vpop.f32.mrb[5].mxu0  ;;  %v741_v48 = vpop.f32.mrb[5].mxu1 }
 0x104   : > { %v686_v49 = vpack.c.bf16 %v478_v43, %v477_v41  ;;  %v696_v50 = vpack.c.bf16 %v482_v44, %v481_v42  ;;  %v730_v51 = vadd.f32 %v729_v47, %v728_v45  ;;  %v742_v52 = vadd.f32 %v741_v48, %v740_v46  ;;  %v731_v53 = vpop.f32.mrb[6].mxu0  ;;  %v743_v54 = vpop.f32.mrb[6].mxu1 }
 0x105   : > { %v732_v55 = vpop.f32.mrb[7].mxu0  ;;  %v744_v56 = vpop.f32.mrb[7].mxu1 }
 0x106   : > { %687 = vst [vmem:[%s226_s8] sm:$0xff] %v686_v49   ;;  %704 = vst [vmem:[%s226_s8 + $0x10] sm:$0xff] %v696_v50   ;;  %v455_v57 = vadd.f32 %v730_v51, %v639_v26  ;;  %v471_v58 = vadd.f32 %v742_v52, %v639_v26  ;;  %v733_v59 = vadd.f32 %v732_v55, %v731_v53 }
 0x107   : > { %v745_v60 = vadd.f32 %v744_v56, %v743_v54 }
 0x108   : > { %v458_v61 = vadd.f32 %v733_v59, %v639_v26  ;;  %v479_v63 = vmax.f32 %v455_v57, 0.0  ;;  %v483_v0 = vmax.f32 %v471_v58, 0.0 }
 0x109   : > { %v474_v62 = vadd.f32 %v745_v60, %v639_v26 }
 0x10a   : > { %v480_v1 = vmax.f32 %v458_v61, 0.0 }
 0x10b   : > { %v484_v2 = vmax.f32 %v474_v62, 0.0 }
 0x10c   : > { %v691_v3 = vpack.c.bf16 %v480_v1, %v479_v63 }
 0x10d   : > { %v701_v4 = vpack.c.bf16 %v484_v2, %v483_v0 }
 0x10e   : > { %703 = vst [vmem:[%s226_s8 + $0x8] sm:$0xff] %v691_v3  }
 0x10f   : > { %705 = vst [vmem:[%s226_s8 + $0x18] sm:$0xff] %v701_v4  }
 0x110 PF: > { %s13_s14 = sadd.s32 1, %s836_s14   ;;  %s960_s12 = smov %s832_s13 }
 0x111   : > { %p10_p5 = scmp.ge.s32.totalorder %s13_s14, 4   ;;  %s961_s13 = smov %s963_s15 }
 0x113   :  { %12 = sbr.rel (!%p10_p5) target bundleno = 2 (0x2), region = 68 }

// kernel: _lambda_.39
= control target key start
LH: loop header
LB: loop body
LE: loop exit
PB: predicated region body
PF: predicated region fallthrough
CT: control target
= control target key end

     0   :  { %s1092_s12 = smov 0   ;;  %s1094_s13 = smov 0   ;;  %s1286_s0 = inlined_call_operand.vmem [shape: bf16[32,256], index: 0, kind: input, shape index: {}]   ;;  %s1287_s1 = inlined_call_operand.vmem [shape: bf16[256,512], index: 1, kind: input, shape index: {}]   ;;  %s1288_s2 = inlined_call_operand.vmem [shape: f32[1,512], index: 2, kind: input, shape index: {}]   ;;  %s1289_s3 = inlined_call_operand.vmem [shape: bf16[32,512], index: 3, kind: output, shape index: {}]  }
   0x1   :  { %s1096_s14 = smov 0   ;;  %s1098_s15 = smov 0  }
   0x2   :  { %s1100_s16 = smov 0  }
   0x3 LB: > { %s22_s17 = sadd.s32 1, %s1066_s15  ;;  %s843_s18 = sadd.s32 4294967295, %s1070_s16   ;;  %s1070_s16 = sphi %s1100_s16, %s13_s16   ;;  %s1066_s15 = sphi %s1098_s15, %s1294_s15   ;;  %s1062_s14 = sphi %s1096_s14, %s1293_s14   ;;  %s1058_s13 = sphi %s1094_s13, %s1292_s13   ;;  %s1054_s12 = sphi %s1092_s12, %s1291_s12  }
   0x4   : > { %p23_p0 = scmp.ge.s32.totalorder %s22_s17, 2  ;;  %p65_p1 = scmp.ne.s32.totalorder %s1058_s13, %s1054_s12 }
   0x5   : > { %p66_p2 = scmp.eq.s32.totalorder %s1070_s16, 0  ;;  %p123_p4 = scmp.eq.s32.totalorder %s843_s18, 1 }
   0x6   : > { %s1296_s17 = smov (%p23_p0, %s22_s17), 0  ;;  %s58_s20 = sadd.s32 1, %s1058_s13 }
   0x7   : > { %p67_p3 = por %p66_p2, %p65_p1  ;;  %s55_s19 = ssub.s32 %s1066_s15, %s1296_s17 }
   0x8   : > { %p56_p5 = scmp.eq.s32.totalorder %s55_s19, 0  ;;  %p1127_p6 = por %p123_p4, %p65_p1 }
   0x9   : > { %p847_p7 = scmp.ge.s32.totalorder %s1070_s16, 2 }
   0xa   : > { %s1132_s22 = scalar_select %p56_p5, %s1058_s13, %s58_s20  }
   0xb   : > { %155 = sbr.rel (%p847_p7) target bundleno = 38 (0x26), region = 20 }
  0x12   : > { %158 = sbr.rel (!%p67_p3) target bundleno = 38 (0x26), region = 24  ;;  %s160_s23 = sand.u32 (%p67_p3), 1, %s1058_s13  }
  0x13   : > { %s900_s24 = sshll.u32 (%p67_p3), %s1066_s15, 3  ;;  %s848_s25 = sshll.u32 (%p67_p3), %s160_s23, 8 }
  0x14   : > { %s1140_s28 = scalar_lea.vmem (%p67_p3), %s1287_s1, %s900_s24  ;;  %s1145_s29 = scalar_lea.vmem (%p67_p3), [#allocation2], %s848_s25 }
  0x15   : > { %v255_v0 = vld [vmem:[%s1140_s28] sm:$0xff] (%p67_p3)  ;;  %v257_v1 = vld [vmem:[%s1140_s28 + $0x10] sm:$0xff] (%p67_p3) }
  0x16   : > { %v259_v2 = vld [vmem:[%s1140_s28 + $0x20] sm:$0xff] (%p67_p3)  ;;  %256 = vst [vmem:[%s1145_s29] sm:$0xff] (%p67_p3), %v255_v0  ;;  %258 = vst [vmem:[%s1145_s29 + $0x8] sm:$0xff] (%p67_p3), %v257_v1  ;;  %v261_v3 = vld [vmem:[%s1140_s28 + $0x30] sm:$0xff] (%p67_p3) }
  0x17   : > { %260 = vst [vmem:[%s1145_s29 + $0x10] sm:$0xff] (%p67_p3), %v259_v2  ;;  %v263_v4 = vld [vmem:[%s1140_s28 + $0x40] sm:$0xff] (%p67_p3)  ;;  %v265_v5 = vld [vmem:[%s1140_s28 + $0x50] sm:$0xff] (%p67_p3)  ;;  %262 = vst [vmem:[%s1145_s29 + $0x18] sm:$0xff] (%p67_p3), %v261_v3 }
  0x18   : > { %264 = vst [vmem:[%s1145_s29 + $0x20] sm:$0xff] (%p67_p3), %v263_v4  ;;  %266 = vst [vmem:[%s1145_s29 + $0x28] sm:$0xff] (%p67_p3), %v265_v5  ;;  %v267_v6 = vld [vmem:[%s1140_s28 + $0x60] sm:$0xff] (%p67_p3)  ;;  %v269_v7 = vld [vmem:[%s1140_s28 + $0x70] sm:$0xff] (%p67_p3) }
  0x19   : > { %v271_v8 = vld [vmem:[%s1140_s28 + $0x80] sm:$0xff]  ;;  %268 = vst [vmem:[%s1145_s29 + $0x30] sm:$0xff] %v267_v6  ;;  %270 = vst [vmem:[%s1145_s29 + $0x38] sm:$0xff] %v269_v7  ;;  %v273_v9 = vld [vmem:[%s1140_s28 + $0x90] sm:$0xff] }
  0x1a   : > { %272 = vst [vmem:[%s1145_s29 + $0x40] sm:$0xff] %v271_v8  ;;  %v275_v10 = vld [vmem:[%s1140_s28 + $0xa0] sm:$0xff]  ;;  %v277_v11 = vld [vmem:[%s1140_s28 + $0xb0] sm:$0xff]  ;;  %274 = vst [vmem:[%s1145_s29 + $0x48] sm:$0xff] %v273_v9 }
  0x1b   : > { %276 = vst [vmem:[%s1145_s29 + $0x50] sm:$0xff] %v275_v10  ;;  %278 = vst [vmem:[%s1145_s29 + $0x58] sm:$0xff] %v277_v11  ;;  %v279_v12 = vld [vmem:[%s1140_s28 + $0xc0] sm:$0xff]  ;;  %v281_v13 = vld [vmem:[%s1140_s28 + $0xd0] sm:$0xff] }
  0x1c   : > { %v283_v14 = vld [vmem:[%s1140_s28 + $0xe0] sm:$0xff]  ;;  %280 = vst [vmem:[%s1145_s29 + $0x60] sm:$0xff] %v279_v12  ;;  %282 = vst [vmem:[%s1145_s29 + $0x68] sm:$0xff] %v281_v13  ;;  %v285_v15 = vld [vmem:[%s1140_s28 + $0xf0] sm:$0xff] }
  0x1d   : > { %284 = vst [vmem:[%s1145_s29 + $0x70] sm:$0xff] %v283_v14  ;;  %v287_v16 = vld [vmem:[%s1140_s28 + $0x100] sm:$0xff]  ;;  %v289_v17 = vld [vmem:[%s1140_s28 + $0x110] sm:$0xff]  ;;  %286 = vst [vmem:[%s1145_s29 + $0x78] sm:$0xff] %v285_v15 }
  0x1e   : > { %288 = vst [vmem:[%s1145_s29 + $0x80] sm:$0xff] %v287_v16  ;;  %290 = vst [vmem:[%s1145_s29 + $0x88] sm:$0xff] %v289_v17  ;;  %v291_v18 = vld [vmem:[%s1140_s28 + $0x120] sm:$0xff]  ;;  %v293_v19 = vld [vmem:[%s1140_s28 + $0x130] sm:$0xff] }
  0x1f   : > { %v295_v20 = vld [vmem:[%s1140_s28 + $0x140] sm:$0xff]  ;;  %292 = vst [vmem:[%s1145_s29 + $0x90] sm:$0xff] %v291_v18  ;;  %294 = vst [vmem:[%s1145_s29 + $0x98] sm:$0xff] %v293_v19  ;;  %v297_v21 = vld [vmem:[%s1140_s28 + $0x150] sm:$0xff] }
  0x20   : > { %296 = vst [vmem:[%s1145_s29 + $0xa0] sm:$0xff] %v295_v20  ;;  %v299_v22 = vld [vmem:[%s1140_s28 + $0x160] sm:$0xff]  ;;  %v301_v23 = vld [vmem:[%s1140_s28 + $0x170] sm:$0xff]  ;;  %298 = vst [vmem:[%s1145_s29 + $0xa8] sm:$0xff] %v297_v21 }
  0x21   : > { %300 = vst [vmem:[%s1145_s29 + $0xb0] sm:$0xff] %v299_v22  ;;  %302 = vst [vmem:[%s1145_s29 + $0xb8] sm:$0xff] %v301_v23  ;;  %v303_v24 = vld [vmem:[%s1140_s28 + $0x180] sm:$0xff]  ;;  %v305_v25 = vld [vmem:[%s1140_s28 + $0x190] sm:$0xff] }
  0x22   : > { %v307_v26 = vld [vmem:[%s1140_s28 + $0x1a0] sm:$0xff]  ;;  %304 = vst [vmem:[%s1145_s29 + $0xc0] sm:$0xff] %v303_v24  ;;  %306 = vst [vmem:[%s1145_s29 + $0xc8] sm:$0xff] %v305_v25  ;;  %v309_v27 = vld [vmem:[%s1140_s28 + $0x1b0] sm:$0xff] }
  0x23   : > { %308 = vst [vmem:[%s1145_s29 + $0xd0] sm:$0xff] %v307_v26  ;;  %v311_v28 = vld [vmem:[%s1140_s28 + $0x1c0] sm:$0xff]  ;;  %v313_v29 = vld [vmem:[%s1140_s28 + $0x1d0] sm:$0xff]  ;;  %310 = vst [vmem:[%s1145_s29 + $0xd8] sm:$0xff] %v309_v27 }
  0x24   : > { %312 = vst [vmem:[%s1145_s29 + $0xe0] sm:$0xff] %v311_v28  ;;  %314 = vst [vmem:[%s1145_s29 + $0xe8] sm:$0xff] %v313_v29  ;;  %v315_v30 = vld [vmem:[%s1140_s28 + $0x1e0] sm:$0xff]  ;;  %v317_v31 = vld [vmem:[%s1140_s28 + $0x1f0] sm:$0xff] }
  0x25   : > { %316 = vst [vmem:[%s1145_s29 + $0xf0] sm:$0xff] %v315_v30  ;;  %318 = vst [vmem:[%s1145_s29 + $0xf8] sm:$0xff] %v317_v31 }
  0x26 PF: > { %p851_p8 = scmp.ge.s32.totalorder %s1070_s16, 1  ;;  %p331_p9 = scmp.lt.s32.totalorder %s1070_s16, 3 }
  0x28   : > { %p332_p10 = pnand %p851_p8, %p331_p9 }
  0x29   : > { %s338_s30 = sand.u32 (!%p332_p10), 1, %s1054_s12   ;;  %v1028_v32 = vld [vmem:[%s1286_s0 + $0x4] ss:$8 sps:$4 sm:$0xff] (!%p332_p10)   ;;  %v1031_v33 = vld [vmem:[%s1286_s0 + $0x14] ss:$8 sps:$4 sm:$0xff] (!%p332_p10)   ;;  %s854_s20 = sshll.u32 (!%p332_p10), %s1062_s14, 1  ;;  %v423_v4 = vlaneseq (!%p332_p10) }
  0x2a   : > { %335 = sbr.rel (%p332_p10) target bundleno = 337 (0x151), region = 66  ;;  %s852_s4 = sshll.u32 (!%p332_p10), %s338_s30, 8  ;;  %645 = vmatprep.mubr.bf16.mxu0 (!%p332_p10), %v1028_v32  ;;  %655 = vmatprep.mubr.bf16.mxu1 (!%p332_p10), %v1031_v33  ;;  %v1026_v2 = vld [vmem:[%s1286_s0] ss:$8 sps:$4 sm:$0xff] (!%p332_p10)   ;;  %v1029_v3 = vld [vmem:[%s1286_s0 + $0x10] ss:$8 sps:$4 sm:$0xff] (!%p332_p10)  }
  0x2b   : > { %s1219_s9 = scalar_lea.vmem (!%p332_p10), [#allocation2], %s852_s4  ;;  %p379_p11 = scmp.lt.s32.totalorder (!%p332_p10), %s854_s20, 3  ;;  %v424_v5 = vshrl.u32 (!%p332_p10), %v423_v4, 7 }
  0x2c   : > { %v978_v34 = vld [vmem:[%s1219_s9 + $0x4] ss:$8 sps:$4 sm:$0xff] (!%p332_p10)   ;;  %v980_v35 = vld [vmem:[%s1219_s9] ss:$8 sps:$4 sm:$0xff] (!%p332_p10)   ;;  %v981_v36 = vld [vmem:[%s1219_s9 + $0x14] ss:$8 sps:$4 sm:$0xff] (!%p332_p10)  }
  0x2d   : > { %613 = vmatprep.subr.bf16.mxu0 (!%p332_p10), %v978_v34  ;;  %906 = vmatprep.subr.bf16.mxu1 (!%p332_p10), %v978_v34  ;;  %v983_v37 = vld [vmem:[%s1219_s9 + $0x10] ss:$8 sps:$4 sm:$0xff] (!%p332_p10)   ;;  %v984_v38 = vld [vmem:[%s1219_s9 + $0x24] ss:$8 sps:$4 sm:$0xff] (!%p332_p10)   ;;  %v986_v39 = vld [vmem:[%s1219_s9 + $0x20] ss:$8 sps:$4 sm:$0xff] (!%p332_p10)  }
  0x2e   : > { %614 = vmatpush1.bf16.msra.mxu0 (!%p332_p10), %v980_v35  ;;  %922 = vmatpush1.bf16.msra.mxu1 (!%p332_p10), %v980_v35  ;;  %v987_v40 = vld [vmem:[%s1219_s9 + $0x34] ss:$8 sps:$4 sm:$0xff] (!%p332_p10)   ;;  %v989_v41 = vld [vmem:[%s1219_s9 + $0x30] ss:$8 sps:$4 sm:$0xff] (!%p332_p10)   ;;  %v990_v42 = vld [vmem:[%s1219_s9 + $0x44] ss:$8 sps:$4 sm:$0xff] (!%p332_p10)  }
  0x2f   : > { %615 = vmatprep.subr.bf16.mxu0 (!%p332_p10), %v981_v36  ;;  %907 = vmatprep.subr.bf16.mxu1 (!%p332_p10), %v981_v36  ;;  %v992_v43 = vld [vmem:[%s1219_s9 + $0x40] ss:$8 sps:$4 sm:$0xff] (!%p332_p10)   ;;  %v993_v44 = vld [vmem:[%s1219_s9 + $0x54] ss:$8 sps:$4 sm:$0xff] (!%p332_p10)   ;;  %v995_v45 = vld [vmem:[%s1219_s9 + $0x50] ss:$8 sps:$4 sm:$0xff] (!%p332_p10)  }
  0x30   : > { %v996_v46 = vld [vmem:[%s1219_s9 + $0x64] ss:$8 sps:$4 sm:$0xff] (!%p332_p10)   ;;  %v998_v47 = vld [vmem:[%s1219_s9 + $0x60] ss:$8 sps:$4 sm:$0xff] (!%p332_p10)   ;;  %v999_v48 = vld [vmem:[%s1219_s9 + $0x74] ss:$8 sps:$4 sm:$0xff] (!%p332_p10)  }
  0x31   : > { %v1001_v49 = vld [vmem:[%s1219_s9 + $0x70] ss:$8 sps:$4 sm:$0xff]   ;;  %v1002_v50 = vld [vmem:[%s1219_s9 + $0x84] ss:$8 sps:$4 sm:$0xff]   ;;  %v1004_v51 = vld [vmem:[%s1219_s9 + $0x80] ss:$8 sps:$4 sm:$0xff]  }
  0x32   : > { %616 = vmatpush1.bf16.msra.mxu0 %v983_v37  ;;  %923 = vmatpush1.bf16.msra.mxu1 %v983_v37  ;;  %v1005_v52 = vld [vmem:[%s1219_s9 + $0x94] ss:$8 sps:$4 sm:$0xff]   ;;  %v1007_v53 = vld [vmem:[%s1219_s9 + $0x90] ss:$8 sps:$4 sm:$0xff]   ;;  %v1008_v54 = vld [vmem:[%s1219_s9 + $0xa4] ss:$8 sps:$4 sm:$0xff]  }
  0x33   : > { %617 = vmatprep.subr.bf16.mxu0 %v984_v38  ;;  %908 = vmatprep.subr.bf16.mxu1 %v984_v38  ;;  %v1010_v55 = vld [vmem:[%s1219_s9 + $0xa0] ss:$8 sps:$4 sm:$0xff]   ;;  %v1011_v56 = vld [vmem:[%s1219_s9 + $0xb4] ss:$8 sps:$4 sm:$0xff]   ;;  %v1013_v57 = vld [vmem:[%s1219_s9 + $0xb0] ss:$8 sps:$4 sm:$0xff]  }
  0x34   : > { %v1014_v58 = vld [vmem:[%s1219_s9 + $0xc4] ss:$8 sps:$4 sm:$0xff]   ;;  %v1016_v59 = vld [vmem:[%s1219_s9 + $0xc0] ss:$8 sps:$4 sm:$0xff]   ;;  %v1017_v60 = vld [vmem:[%s1219_s9 + $0xd4] ss:$8 sps:$4 sm:$0xff]  }
  0x35   : > { %v1019_v61 = vld [vmem:[%s1219_s9 + $0xd0] ss:$8 sps:$4 sm:$0xff]   ;;  %v1020_v62 = vld [vmem:[%s1219_s9 + $0xe4] ss:$8 sps:$4 sm:$0xff]   ;;  %v1022_v63 = vld [vmem:[%s1219_s9 + $0xe0] ss:$8 sps:$4 sm:$0xff]  }
  0x36   : > { %618 = vmatpush1.bf16.msra.mxu0 %v986_v39  ;;  %924 = vmatpush1.bf16.msra.mxu1 %v986_v39  ;;  %v1023_v0 = vld [vmem:[%s1219_s9 + $0xf4] ss:$8 sps:$4 sm:$0xff]   ;;  %v1025_v1 = vld [vmem:[%s1219_s9 + $0xf0] ss:$8 sps:$4 sm:$0xff]   ;;  %s1298_s20 = smov (!%p379_p11, %s854_s20), 3  ;;  %v425_v6 = vsub.s32 0, %v424_v5 }
  0x37   : > { %619 = vmatprep.subr.bf16.mxu0 %v987_v40  ;;  %909 = vmatprep.subr.bf16.mxu1 %v987_v40  ;;  %s381_s25 = scalar_lea.vmem %s1288_s2, %s1298_s20  ;;  %v429_v8 = vsub.s32 1, %v424_v5  ;;  %s853_s26 = sshll.u32 %s338_s30, 5 }
  0x38   : > { %v421_v7 = vld [vmem:[%s381_s25] sm:$0x3]  ;;  %s369_s27 = scalar_lea.vmem [#allocation3], %s853_s26  ;;  %s905_s12 = sshll.u32 (%p1127_p6), %s1062_s14, 3 }
  0x39   : > { %v426_v9 = vrot.slane %v421_v7, %v425_v6  ;;  %v430_v10 = vrot.slane %v421_v7, %v429_v8  ;;  %s706_s30 = scalar_lea.vmem (%p1127_p6), %s1289_s3, %s905_s12 }
  0x3a   : > { %620 = vmatpush1.bf16.msra.mxu0 %v989_v41  ;;  %925 = vmatpush1.bf16.msra.mxu1 %v989_v41 }
  0x3b   : > { %621 = vmatprep.subr.bf16.mxu0 %v990_v42  ;;  %910 = vmatprep.subr.bf16.mxu1 %v990_v42 }
  0x3e   : > { %622 = vmatpush1.bf16.msra.mxu0 %v992_v43  ;;  %926 = vmatpush1.bf16.msra.mxu1 %v992_v43 }
  0x3f   : > { %623 = vmatprep.subr.bf16.mxu0 %v993_v44  ;;  %911 = vmatprep.subr.bf16.mxu1 %v993_v44 }
  0x42   : > { %624 = vmatpush1.bf16.msra.mxu0 %v995_v45  ;;  %927 = vmatpush1.bf16.msra.mxu1 %v995_v45 }
  0x43   : > { %625 = vmatprep.subr.bf16.mxu0 %v996_v46  ;;  %912 = vmatprep.subr.bf16.mxu1 %v996_v46 }
  0x46   : > { %626 = vmatpush1.bf16.msra.mxu0 %v998_v47  ;;  %928 = vmatpush1.bf16.msra.mxu1 %v998_v47 }
  0x47   : > { %627 = vmatprep.subr.bf16.mxu0 %v999_v48  ;;  %913 = vmatprep.subr.bf16.mxu1 %v999_v48 }
  0x4a   : > { %628 = vmatpush1.bf16.msra.mxu0 %v1001_v49  ;;  %929 = vmatpush1.bf16.msra.mxu1 %v1001_v49 }
  0x4b   : > { %629 = vmatprep.subr.bf16.mxu0 %v1002_v50  ;;  %914 = vmatprep.subr.bf16.mxu1 %v1002_v50 }
  0x4e   : > { %630 = vmatpush1.bf16.msra.mxu0 %v1004_v51  ;;  %930 = vmatpush1.bf16.msra.mxu1 %v1004_v51 }
  0x4f   : > { %631 = vmatprep.subr.bf16.mxu0 %v1005_v52  ;;  %915 = vmatprep.subr.bf16.mxu1 %v1005_v52 }
  0x52   : > { %632 = vmatpush1.bf16.msra.mxu0 %v1007_v53  ;;  %931 = vmatpush1.bf16.msra.mxu1 %v1007_v53 }
  0x53   : > { %633 = vmatprep.subr.bf16.mxu0 %v1008_v54  ;;  %916 = vmatprep.subr.bf16.mxu1 %v1008_v54 }
  0x56   : > { %634 = vmatpush1.bf16.msra.mxu0 %v1010_v55  ;;  %932 = vmatpush1.bf16.msra.mxu1 %v1010_v55 }
  0x57   : > { %635 = vmatprep.subr.bf16.mxu0 %v1011_v56  ;;  %917 = vmatprep.subr.bf16.mxu1 %v1011_v56 }
  0x5a   : > { %636 = vmatpush1.bf16.msra.mxu0 %v1013_v57  ;;  %933 = vmatpush1.bf16.msra.mxu1 %v1013_v57 }
  0x5b   : > { %637 = vmatprep.subr.bf16.mxu0 %v1014_v58  ;;  %918 = vmatprep.subr.bf16.mxu1 %v1014_v58 }
  0x5e   : > { %638 = vmatpush1.bf16.msra.mxu0 %v1016_v59  ;;  %934 = vmatpush1.bf16.msra.mxu1 %v1016_v59 }
  0x5f   : > { %639 = vmatprep.subr.bf16.mxu0 %v1017_v60  ;;  %919 = vmatprep.subr.bf16.mxu1 %v1017_v60 }
  0x62   : > { %640 = vmatpush1.bf16.msra.mxu0 %v1019_v61  ;;  %935 = vmatpush1.bf16.msra.mxu1 %v1019_v61 }
  0x63   : > { %641 = vmatprep.subr.bf16.mxu0 %v1020_v62  ;;  %920 = vmatprep.subr.bf16.mxu1 %v1020_v62 }
  0x66   : > { %642 = vmatpush1.bf16.msra.mxu0 %v1022_v63  ;;  %936 = vmatpush1.bf16.msra.mxu1 %v1022_v63 }
  0x67   : > { %643 = vmatprep.subr.bf16.mxu0 %v1023_v0  ;;  %921 = vmatprep.subr.bf16.mxu1 %v1023_v0 }
  0x6a   : > { %644 = vmatpush1.bf16.msra.mxu0 %v1025_v1  ;;  %937 = vmatpush1.bf16.msra.mxu1 %v1025_v1 }
  0x6d   : > { %646 = vmatmul.mubr.bf16.vlgmr.msra.gmra.mrb[0].mxu0 %v1026_v2  ;;  %656 = vmatmul.mubr.bf16.vlgmr.msra.gmra.mrb[0].mxu1 %v1029_v3 }
 0x140   : > { %v647_v11 = vpop.f32.mrb[0].mxu0  ;;  %v657_v12 = vpop.f32.mrb[0].mxu1 }
 0x141   : > { %v648_v13 = vadd.f32 %v647_v11, %v426_v9  ;;  %v658_v14 = vadd.f32 %v657_v12, %v426_v9  ;;  %v649_v15 = vpop.f32.mrb[1].mxu0  ;;  %v659_v16 = vpop.f32.mrb[1].mxu1 }
 0x142   : > { %v650_v17 = vadd.f32 %v649_v15, %v430_v10  ;;  %v660_v18 = vadd.f32 %v659_v16, %v430_v10  ;;  %v651_v19 = vpop.f32.mrb[2].mxu0  ;;  %v661_v20 = vpop.f32.mrb[2].mxu1  ;;  %700 = sbr.rel (!%p1127_p6) target bundleno = 337 (0x151), region = 74 }
 0x143   : > { %v652_v21 = vadd.f32 %v651_v19, %v426_v9  ;;  %v662_v22 = vadd.f32 %v661_v20, %v426_v9  ;;  %v653_v23 = vpop.f32.mrb[3].mxu0  ;;  %v663_v24 = vpop.f32.mrb[3].mxu1 }
 0x144   : > { %v901_v25 = vpack.c.bf16 %v650_v17, %v648_v13  ;;  %v903_v26 = vpack.c.bf16 %v660_v18, %v658_v14  ;;  %v654_v27 = vadd.f32 %v653_v23, %v430_v10  ;;  %v664_v28 = vadd.f32 %v663_v24, %v430_v10 }
 0x146   : > { %690 = vst [vmem:[%s369_s27] sm:$0xff] %v901_v25  ;;  %692 = vst [vmem:[%s369_s27 + $0x10] sm:$0xff] %v903_v26  ;;  %v902_v29 = vpack.c.bf16 %v654_v27, %v652_v21  ;;  %v904_v30 = vpack.c.bf16 %v664_v28, %v662_v22 }
 0x148   : > { %691 = vst [vmem:[%s369_s27 + $0x8] sm:$0xff] %v902_v29  ;;  %693 = vst [vmem:[%s369_s27 + $0x18] sm:$0xff] %v904_v30 }
 0x14d   : > { %v740_v31 = vld [vmem:[%s369_s27] sm:$0xff]  ;;  %v744_v33 = vld [vmem:[%s369_s27 + $0x10] sm:$0xff] }
 0x14e   : > { %741 = vst [vmem:[%s706_s30] sm:$0xff] %v740_v31  ;;  %745 = vst [vmem:[%s706_s30 + $0x20] sm:$0xff] %v744_v33 }
 0x14f   : > { %v742_v32 = vld [vmem:[%s369_s27 + $0x8] sm:$0xff]  ;;  %v746_v34 = vld [vmem:[%s369_s27 + $0x18] sm:$0xff] }
 0x150   : > { %743 = vst [vmem:[%s706_s30 + $0x10] sm:$0xff] %v742_v32  ;;  %747 = vst [vmem:[%s706_s30 + $0x30] sm:$0xff] %v746_v34 }
 0x151 PF: > { %s13_s16 = sadd.s32 1, %s1070_s16   ;;  %s1291_s12 = smov %s1058_s13 }
 0x152   : > { %p10_p12 = scmp.ge.s32.totalorder %s13_s16, 4   ;;  %s1292_s13 = smov %s1132_s22 }
 0x153   : > { %s1293_s14 = smov %s1066_s15  ;;  %s1294_s15 = smov %s1296_s17 }
 0x154   :  { %12 = sbr.rel (!%p10_p12) target bundleno = 3 (0x3), region = 149 }

// kernel: _lambda_.42
= control target key start
LH: loop header
LB: loop body
LE: loop exit
PB: predicated region body
PF: predicated region fallthrough
CT: control target
= control target key end

     0   :  { %s923_s12 = smov 0   ;;  %s925_s13 = smov 0   ;;  %s1062_s0 = inlined_call_operand.vmem [shape: bf16[32,512], index: 0, kind: input, shape index: {}]   ;;  %s1063_s1 = inlined_call_operand.vmem [shape: bf16[512,128], index: 1, kind: input, shape index: {}]   ;;  %s1064_s2 = inlined_call_operand.vmem [shape: f32[1,128], index: 2, kind: input, shape index: {}]   ;;  %s1065_s3 = inlined_call_operand.vmem [shape: bf16[32,128], index: 3, kind: output, shape index: {}]  }
   0x1   :  { %s927_s14 = smov 0  }
   0x2 LB: > { %s25_s15 = sadd.s32 1, %s897_s13  ;;  %p718_p0 = scmp.ge.s32.totalorder %s901_s14, 1  ;;  %s901_s14 = sphi %s927_s14, %s13_s14   ;;  %s897_s13 = sphi %s925_s13, %s1067_s13   ;;  %s893_s12 = sphi %s923_s12, %s1066_s12  }
   0x3   : > { %p27_p1 = scmp.ge.s32.totalorder %s25_s15, 2  ;;  %p170_p2 = scmp.lt.s32.totalorder %s901_s14, 3 }
   0x5   : > { %s1069_s15 = smov (%p27_p1, %s25_s15), 0  ;;  %p171_p3 = pnand %p718_p0, %p170_p2 }
   0x6   : > { %v841_v0 = vld [vmem:[%s1063_s1 + $0x40] sm:$0xff] (!%p171_p3)   ;;  %v845_v4 = vld [vmem:[%s1063_s1 + $0x48] sm:$0xff] (!%p171_p3)   ;;  %v849_v8 = vld [vmem:[%s1063_s1 + $0x50] sm:$0xff] (!%p171_p3)   ;;  %s719_s25 = sshll.u32 (!%p171_p3), %s893_s12, 1 }
   0x7   : > { %174 = sbr.rel (%p171_p3) target bundleno = 266 (0x10a), region = 32  ;;  %v842_v1 = vld [vmem:[%s1063_s1 + $0xc0] sm:$0xff] (!%p171_p3)   ;;  %773 = vmatprep.subr.bf16.mxu0 (!%p171_p3), %v841_v0  ;;  %v846_v5 = vld [vmem:[%s1063_s1 + $0xc8] sm:$0xff] (!%p171_p3)   ;;  %v850_v9 = vld [vmem:[%s1063_s1 + $0xd0] sm:$0xff] (!%p171_p3)   ;;  %p206_p4 = scmp.lt.s32.totalorder (!%p171_p3), %s719_s25, 3 }
   0x8   : > { %v843_v2 = vld [vmem:[%s1063_s1] sm:$0xff] (!%p171_p3)   ;;  %795 = vmatprep.subr.bf16.mxu1 (!%p171_p3), %v842_v1  ;;  %v847_v6 = vld [vmem:[%s1063_s1 + $0x8] sm:$0xff] (!%p171_p3)   ;;  %v851_v10 = vld [vmem:[%s1063_s1 + $0x10] sm:$0xff] (!%p171_p3)  }
   0x9   : > { %v844_v3 = vld [vmem:[%s1063_s1 + $0x80] sm:$0xff] (!%p171_p3)   ;;  %774 = vmatpush3.bf16.msra.mxu0 (!%p171_p3), %v843_v2  ;;  %v848_v7 = vld [vmem:[%s1063_s1 + $0x88] sm:$0xff] (!%p171_p3)   ;;  %v852_v11 = vld [vmem:[%s1063_s1 + $0x90] sm:$0xff] (!%p171_p3)  }
   0xa   : > { %796 = vmatpush3.bf16.msra.mxu1 (!%p171_p3), %v844_v3  ;;  %775 = vmatprep.subr.bf16.mxu0 (!%p171_p3), %v845_v4  ;;  %v853_v12 = vld [vmem:[%s1063_s1 + $0x58] sm:$0xff] (!%p171_p3)   ;;  %v857_v16 = vld [vmem:[%s1063_s1 + $0x60] sm:$0xff] (!%p171_p3)   ;;  %v861_v20 = vld [vmem:[%s1063_s1 + $0x68] sm:$0xff] (!%p171_p3)  }
   0xb   : > { %797 = vmatprep.subr.bf16.mxu1 (!%p171_p3), %v846_v5  ;;  %v854_v13 = vld [vmem:[%s1063_s1 + $0xd8] sm:$0xff] (!%p171_p3)   ;;  %v858_v17 = vld [vmem:[%s1063_s1 + $0xe0] sm:$0xff] (!%p171_p3)   ;;  %v862_v21 = vld [vmem:[%s1063_s1 + $0xe8] sm:$0xff] (!%p171_p3)  }
   0xc   : > { %v855_v14 = vld [vmem:[%s1063_s1 + $0x18] sm:$0xff] (!%p171_p3)   ;;  %v859_v18 = vld [vmem:[%s1063_s1 + $0x20] sm:$0xff] (!%p171_p3)   ;;  %v863_v22 = vld [vmem:[%s1063_s1 + $0x28] sm:$0xff] (!%p171_p3)  }
   0xd   : > { %776 = vmatpush3.bf16.msra.mxu0 (!%p171_p3), %v847_v6  ;;  %v856_v15 = vld [vmem:[%s1063_s1 + $0x98] sm:$0xff] (!%p171_p3)   ;;  %v860_v19 = vld [vmem:[%s1063_s1 + $0xa0] sm:$0xff] (!%p171_p3)   ;;  %v864_v23 = vld [vmem:[%s1063_s1 + $0xa8] sm:$0xff] (!%p171_p3)  }
   0xe   : > { %798 = vmatpush3.bf16.msra.mxu1 %v848_v7  ;;  %777 = vmatprep.subr.bf16.mxu0 %v849_v8  ;;  %s1071_s25 = smov (!%p206_p4, %s719_s25), 3  ;;  %v865_v24 = vld [vmem:[%s1063_s1 + $0x70] sm:$0xff]   ;;  %v869_v28 = vld [vmem:[%s1063_s1 + $0x78] sm:$0xff]   ;;  %v724_v38 = vld [vmem:[%s1064_s2] ss:$0 sm:$0xff] }
   0xf   : > { %799 = vmatprep.subr.bf16.mxu1 %v850_v9  ;;  %v866_v25 = vld [vmem:[%s1063_s1 + $0xf0] sm:$0xff]   ;;  %s765_s24 = sshll.u32 %s1071_s25, 4  ;;  %v870_v29 = vld [vmem:[%s1063_s1 + $0xf8] sm:$0xff]   ;;  %s723_s17 = sshll.u32 %s1071_s25, 2 }
  0x10   : > { %v867_v26 = vld [vmem:[%s1063_s1 + $0x30] sm:$0xff]   ;;  %s210_s12 = scalar_lea.vmem %s1062_s0, %s765_s24  ;;  %v871_v30 = vld [vmem:[%s1063_s1 + $0x38] sm:$0xff]   ;;  %s226_s20 = scalar_lea.vmem %s1065_s3, %s723_s17 }
  0x11   : > { %778 = vmatpush3.bf16.msra.mxu0 %v851_v10  ;;  %v868_v27 = vld [vmem:[%s1063_s1 + $0xb0] sm:$0xff]   ;;  %v872_v31 = vld [vmem:[%s1063_s1 + $0xb8] sm:$0xff]  }
  0x12   : > { %800 = vmatpush3.bf16.msra.mxu1 %v852_v11  ;;  %779 = vmatprep.subr.bf16.mxu0 %v853_v12  ;;  %v873_v32 = vld [vmem:[%s210_s12] ss:$16 sps:$4 sm:$0xff]   ;;  %v875_v33 = vld [vmem:[%s210_s12 + $0x4] ss:$16 sps:$4 sm:$0xff]   ;;  %v876_v34 = vld [vmem:[%s210_s12 + $0x8] ss:$16 sps:$4 sm:$0xff]  }
  0x13   : > { %801 = vmatprep.subr.bf16.mxu1 %v854_v13  ;;  %v878_v35 = vld [vmem:[%s210_s12 + $0xc] ss:$16 sps:$4 sm:$0xff]   ;;  %548 = vmatprep.mubr.bf16.mxu0 %v875_v33 }
  0x14   : > { %589 = vmatprep.mubr.bf16.mxu1 %v878_v35 }
  0x15   : > { %780 = vmatpush3.bf16.msra.mxu0 %v855_v14 }
  0x16   : > { %802 = vmatpush3.bf16.msra.mxu1 %v856_v15  ;;  %781 = vmatprep.subr.bf16.mxu0 %v857_v16 }
  0x17   : > { %803 = vmatprep.subr.bf16.mxu1 %v858_v17 }
  0x19   : > { %782 = vmatpush3.bf16.msra.mxu0 %v859_v18 }
  0x1a   : > { %804 = vmatpush3.bf16.msra.mxu1 %v860_v19  ;;  %783 = vmatprep.subr.bf16.mxu0 %v861_v20 }
  0x1b   : > { %805 = vmatprep.subr.bf16.mxu1 %v862_v21 }
  0x1d   : > { %784 = vmatpush3.bf16.msra.mxu0 %v863_v22 }
  0x1e   : > { %806 = vmatpush3.bf16.msra.mxu1 %v864_v23  ;;  %785 = vmatprep.subr.bf16.mxu0 %v865_v24 }
  0x1f   : > { %807 = vmatprep.subr.bf16.mxu1 %v866_v25 }
  0x21   : > { %786 = vmatpush3.bf16.msra.mxu0 %v867_v26 }
  0x22   : > { %808 = vmatpush3.bf16.msra.mxu1 %v868_v27  ;;  %787 = vmatprep.subr.bf16.mxu0 %v869_v28 }
  0x23   : > { %809 = vmatprep.subr.bf16.mxu1 %v870_v29 }
  0x25   : > { %788 = vmatpush3.bf16.msra.mxu0 %v871_v30 }
  0x26   : > { %810 = vmatpush3.bf16.msra.mxu1 %v872_v31 }
  0x28   : > { %549 = vmatmul.mubr.bf16.vlgmr.msra.gmra.mrb[0].mxu0 %v873_v32 }
  0x29   : > { %590 = vmatmul.mubr.bf16.vlgmr.msra.gmra.mrb[0].mxu1 %v876_v34 }
  0xfb   : > { %v789_v36 = vpop.f32.mrb[0].mxu0 }
  0xfc   : > { %v811_v37 = vpop.f32.mrb[0].mxu1  ;;  %v790_v39 = vpop.f32.mrb[1].mxu0 }
  0xfd   : > { %v791_v40 = vadd.f32 %v790_v39, %v789_v36  ;;  %v812_v41 = vpop.f32.mrb[1].mxu1  ;;  %v792_v42 = vpop.f32.mrb[2].mxu0 }
  0xfe   : > { %v813_v43 = vadd.f32 %v812_v41, %v811_v37  ;;  %v814_v44 = vpop.f32.mrb[2].mxu1  ;;  %v793_v45 = vpop.f32.mrb[3].mxu0 }
  0xff   : > { %v551_v46 = vadd.f32 %v791_v40, %v724_v38  ;;  %v794_v47 = vadd.f32 %v793_v45, %v792_v42  ;;  %v815_v48 = vpop.f32.mrb[3].mxu1 }
 0x100   : > { %v816_v49 = vadd.f32 %v815_v48, %v814_v44 }
 0x101   : > { %v592_v50 = vadd.f32 %v813_v43, %v551_v46  ;;  %v554_v51 = vadd.f32 %v794_v47, %v724_v38 }
 0x103   : > { %v595_v52 = vadd.f32 %v816_v49, %v554_v51  ;;  %v598_v53 = vmax.f32 %v592_v50, 0.0 }
 0x105   : > { %v599_v54 = vmax.f32 %v595_v52, 0.0 }
 0x107   : > { %v771_v55 = vpack.c.bf16 %v599_v54, %v598_v53 }
 0x109   : > { %772 = vst [vmem:[%s226_s20] sm:$0xff] %v771_v55  }
 0x10a PF: > { %s13_s14 = sadd.s32 1, %s901_s14   ;;  %s1066_s12 = smov %s897_s13 }
 0x10b   : > { %p10_p5 = scmp.ge.s32.totalorder %s13_s14, 4   ;;  %s1067_s13 = smov %s1069_s15 }
 0x10d   :  { %12 = sbr.rel (!%p10_p5) target bundleno = 2 (0x2), region = 68 }

// kernel: _lambda_.41
= control target key start
LH: loop header
LB: loop body
LE: loop exit
PB: predicated region body
PF: predicated region fallthrough
CT: control target
= control target key end

     0   :  { %s2394_s1 = inlined_call_operand.vmem [shape: bf16[1152,128], index: 1, kind: input, shape index: {}]   ;;  %s2395_s0 = inlined_call_operand.vmem [shape: bf16[32,1152], index: 0, kind: input, shape index: {}]   ;;  %s2396_s3 = inlined_call_operand.vmem [shape: bf16[128,512], index: 3, kind: input, shape index: {}]   ;;  %s2397_s2 = inlined_call_operand.vmem [shape: f32[1,128], index: 2, kind: input, shape index: {}]   ;;  %s2398_s4 = inlined_call_operand.vmem [shape: f32[1,512], index: 4, kind: input, shape index: {}]   ;;  %s2399_s5 = inlined_call_operand.vmem [shape: bf16[32,512], index: 5, kind: input, shape index: {}]   ;;  %s2400_s6 = inlined_call_operand.vmem [shape: bf16[32,512], index: 6, kind: output, shape index: {}]  }
   0x1   :  { %v1704_v0 = vld [vmem:[%s2394_s1 + $0x40] sm:$0xff]   ;;  %v1708_v4 = vld [vmem:[%s2394_s1 + $0x48] sm:$0xff]   ;;  %v1712_v8 = vld [vmem:[%s2394_s1 + $0x50] sm:$0xff]  }
   0x2   :  { %v1705_v1 = vld [vmem:[%s2394_s1] sm:$0xff]   ;;  %1545 = vmatprep.subr.bf16.mxu0 %v1704_v0  ;;  %v1709_v5 = vld [vmem:[%s2394_s1 + $0x8] sm:$0xff]   ;;  %v1713_v9 = vld [vmem:[%s2394_s1 + $0x10] sm:$0xff]  }
   0x3   :  { %v1706_v2 = vld [vmem:[%s2394_s1 + $0xc0] sm:$0xff]   ;;  %1546 = vmatpush3.bf16.msra.mxu0 %v1705_v1  ;;  %v1710_v6 = vld [vmem:[%s2394_s1 + $0xc8] sm:$0xff]   ;;  %v1714_v10 = vld [vmem:[%s2394_s1 + $0xd0] sm:$0xff]  }
   0x4   :  { %v1707_v3 = vld [vmem:[%s2394_s1 + $0x80] sm:$0xff]   ;;  %1573 = vmatprep.subr.bf16.mxu1 %v1706_v2  ;;  %1547 = vmatprep.subr.bf16.mxu0 %v1708_v4  ;;  %v1711_v7 = vld [vmem:[%s2394_s1 + $0x88] sm:$0xff]   ;;  %v1715_v11 = vld [vmem:[%s2394_s1 + $0x90] sm:$0xff]  }
   0x5   :  { %1574 = vmatpush3.bf16.msra.mxu1 %v1707_v3  ;;  %v1716_v12 = vld [vmem:[%s2394_s1 + $0x58] sm:$0xff]   ;;  %v1720_v16 = vld [vmem:[%s2394_s1 + $0x60] sm:$0xff]   ;;  %v1724_v20 = vld [vmem:[%s2394_s1 + $0x68] sm:$0xff]  }
   0x6   :  { %1575 = vmatprep.subr.bf16.mxu1 %v1710_v6  ;;  %v1717_v13 = vld [vmem:[%s2394_s1 + $0x18] sm:$0xff]   ;;  %v1721_v17 = vld [vmem:[%s2394_s1 + $0x20] sm:$0xff]   ;;  %v1725_v21 = vld [vmem:[%s2394_s1 + $0x28] sm:$0xff]  }
   0x7   :  { %1548 = vmatpush3.bf16.msra.mxu0 %v1709_v5  ;;  %v1718_v14 = vld [vmem:[%s2394_s1 + $0xd8] sm:$0xff]   ;;  %v1722_v18 = vld [vmem:[%s2394_s1 + $0xe0] sm:$0xff]   ;;  %v1726_v22 = vld [vmem:[%s2394_s1 + $0xe8] sm:$0xff]  }
   0x8   :  { %1549 = vmatprep.subr.bf16.mxu0 %v1712_v8  ;;  %v1719_v15 = vld [vmem:[%s2394_s1 + $0x98] sm:$0xff]   ;;  %v1723_v19 = vld [vmem:[%s2394_s1 + $0xa0] sm:$0xff]   ;;  %v1727_v23 = vld [vmem:[%s2394_s1 + $0xa8] sm:$0xff]  }
   0x9   :  { %1576 = vmatpush3.bf16.msra.mxu1 %v1711_v7  ;;  %v1728_v24 = vld [vmem:[%s2394_s1 + $0x70] sm:$0xff]   ;;  %v1732_v28 = vld [vmem:[%s2394_s1 + $0x78] sm:$0xff]   ;;  %v1735_v31 = vld [vmem:[%s2395_s0] ss:$36 sps:$4 sm:$0xff]  }
   0xa   :  { %1577 = vmatprep.subr.bf16.mxu1 %v1714_v10  ;;  %v1729_v25 = vld [vmem:[%s2394_s1 + $0x30] sm:$0xff]   ;;  %v1733_v29 = vld [vmem:[%s2394_s1 + $0x38] sm:$0xff]   ;;  %v1737_v32 = vld [vmem:[%s2395_s0 + $0x4] ss:$36 sps:$4 sm:$0xff]  }
   0xb   :  { %1550 = vmatpush3.bf16.msra.mxu0 %v1713_v9  ;;  %v1730_v26 = vld [vmem:[%s2394_s1 + $0xf0] sm:$0xff]   ;;  %v1734_v30 = vld [vmem:[%s2394_s1 + $0xf8] sm:$0xff]   ;;  %751 = vmatprep.mubr.bf16.mxu0 %v1737_v32  ;;  %v1739_v34 = vld [vmem:[%s2394_s1 + $0x140] sm:$0xff]  }
   0xc   :  { %1551 = vmatprep.subr.bf16.mxu0 %v1716_v12  ;;  %v1731_v27 = vld [vmem:[%s2394_s1 + $0xb0] sm:$0xff]   ;;  %v1738_v33 = vld [vmem:[%s2394_s1 + $0xb8] sm:$0xff]   ;;  %v1740_v35 = vld [vmem:[%s2395_s0 + $0x8] ss:$36 sps:$4 sm:$0xff]  }
   0xd   :  { %1578 = vmatpush3.bf16.msra.mxu1 %v1715_v11  ;;  %v1742_v36 = vld [vmem:[%s2395_s0 + $0xc] ss:$36 sps:$4 sm:$0xff]   ;;  %v1743_v37 = vld [vmem:[%s2394_s1 + $0x100] sm:$0xff]   ;;  %v1754_v48 = vld [vmem:[%s2394_s1 + $0x158] sm:$0xff]  }
   0xe   :  { %1579 = vmatprep.subr.bf16.mxu1 %v1718_v14  ;;  %800 = vmatprep.mubr.bf16.mxu1 %v1742_v36  ;;  %v1744_v38 = vld [vmem:[%s2394_s1 + $0x1c0] sm:$0xff]   ;;  %v1746_v40 = vld [vmem:[%s2394_s1 + $0x148] sm:$0xff]   ;;  %v1750_v44 = vld [vmem:[%s2394_s1 + $0x150] sm:$0xff]  }
   0xf   :  { %1552 = vmatpush3.bf16.msra.mxu0 %v1717_v13  ;;  %v1745_v39 = vld [vmem:[%s2394_s1 + $0x180] sm:$0xff]   ;;  %v1747_v41 = vld [vmem:[%s2394_s1 + $0x108] sm:$0xff]   ;;  %v1751_v45 = vld [vmem:[%s2394_s1 + $0x110] sm:$0xff]  }
  0x10   :  { %1553 = vmatprep.subr.bf16.mxu0 %v1720_v16  ;;  %v1748_v42 = vld [vmem:[%s2394_s1 + $0x1c8] sm:$0xff]   ;;  %v1752_v46 = vld [vmem:[%s2394_s1 + $0x1d0] sm:$0xff]   ;;  %v1755_v49 = vld [vmem:[%s2394_s1 + $0x118] sm:$0xff]  }
  0x11   :  { %1580 = vmatpush3.bf16.msra.mxu1 %v1719_v15  ;;  %v1749_v43 = vld [vmem:[%s2394_s1 + $0x188] sm:$0xff]   ;;  %v1753_v47 = vld [vmem:[%s2394_s1 + $0x190] sm:$0xff]   ;;  %v1756_v50 = vld [vmem:[%s2394_s1 + $0x1d8] sm:$0xff]  }
  0x12   :  { %1581 = vmatprep.subr.bf16.mxu1 %v1722_v18  ;;  %v1757_v51 = vld [vmem:[%s2394_s1 + $0x198] sm:$0xff]   ;;  %v1758_v52 = vld [vmem:[%s2394_s1 + $0x160] sm:$0xff]   ;;  %v1762_v56 = vld [vmem:[%s2394_s1 + $0x168] sm:$0xff]  }
  0x13   :  { %1554 = vmatpush3.bf16.msra.mxu0 %v1721_v17  ;;  %v1759_v53 = vld [vmem:[%s2394_s1 + $0x120] sm:$0xff]   ;;  %v1763_v57 = vld [vmem:[%s2395_s0 + $0x4c] ss:$36 sps:$4 sm:$0xff]   ;;  %v1768_v61 = vld [vmem:[%s2395_s0 + $0x54] ss:$36 sps:$4 sm:$0xff]  }
  0x14   :  { %1555 = vmatprep.subr.bf16.mxu0 %v1724_v20  ;;  %v1760_v54 = vld [vmem:[%s2394_s1 + $0x1e0] sm:$0xff]   ;;  %v1765_v58 = vld [vmem:[%s2394_s1 + $0x128] sm:$0xff]   ;;  %v1771_v63 = vld [vmem:[%s2395_s0 + $0x50] ss:$36 sps:$4 sm:$0xff]  }
  0x15   :  { %1582 = vmatpush3.bf16.msra.mxu1 %v1723_v19  ;;  %v1761_v55 = vld [vmem:[%s2394_s1 + $0x1a0] sm:$0xff]   ;;  %v1766_v59 = vld [vmem:[%s2395_s0 + $0x48] ss:$36 sps:$4 sm:$0xff]   ;;  %v1772_v0 = vld [vmem:[%s2394_s1 + $0x170] sm:$0xff]  }
  0x16   :  { %1583 = vmatprep.subr.bf16.mxu1 %v1726_v22  ;;  %v1767_v60 = vld [vmem:[%s2394_s1 + $0x1e8] sm:$0xff]   ;;  %v1773_v1 = vld [vmem:[%s2394_s1 + $0x130] sm:$0xff]   ;;  %v1776_v4 = vld [vmem:[%s2394_s1 + $0x178] sm:$0xff]  }
  0x17   :  { %1556 = vmatpush3.bf16.msra.mxu0 %v1725_v21  ;;  %v1770_v62 = vld [vmem:[%s2394_s1 + $0x1a8] sm:$0xff]   ;;  %v1774_v2 = vld [vmem:[%s2394_s1 + $0x1f0] sm:$0xff]   ;;  %v1777_v5 = vld [vmem:[%s2394_s1 + $0x138] sm:$0xff]  }
  0x18   :  { %1557 = vmatprep.subr.bf16.mxu0 %v1728_v24  ;;  %v1775_v3 = vld [vmem:[%s2394_s1 + $0x1b0] sm:$0xff]   ;;  %v1778_v6 = vld [vmem:[%s2394_s1 + $0x1f8] sm:$0xff]   ;;  %v1783_v10 = vld [vmem:[%s2394_s1 + $0x200] sm:$0xff]  }
  0x19   :  { %1584 = vmatpush3.bf16.msra.mxu1 %v1727_v23  ;;  %v1779_v7 = vld [vmem:[%s2395_s0 + $0x10] ss:$36 sps:$4 sm:$0xff]   ;;  %v1782_v9 = vld [vmem:[%s2394_s1 + $0x1b8] sm:$0xff]   ;;  %v1787_v13 = vld [vmem:[%s2394_s1 + $0x208] sm:$0xff]  }
  0x1a   :  { %1585 = vmatprep.subr.bf16.mxu1 %v1730_v26  ;;  %v1781_v8 = vld [vmem:[%s2395_s0 + $0x14] ss:$36 sps:$4 sm:$0xff]   ;;  %v1786_v12 = vld [vmem:[%s2395_s0 + $0x1c] ss:$36 sps:$4 sm:$0xff]   ;;  %v1792_v17 = vld [vmem:[%s2395_s0 + $0x64] ss:$36 sps:$4 sm:$0xff]  }
  0x1b   :  { %1558 = vmatpush3.bf16.msra.mxu0 %v1729_v25  ;;  %v1784_v11 = vld [vmem:[%s2395_s0 + $0x18] ss:$36 sps:$4 sm:$0xff]   ;;  %v1791_v16 = vld [vmem:[%s2394_s1 + $0x210] sm:$0xff]   ;;  %v1794_v18 = vld [vmem:[%s2395_s0 + $0x60] ss:$36 sps:$4 sm:$0xff]  }
  0x1c   :  { %1559 = vmatprep.subr.bf16.mxu0 %v1732_v28  ;;  %v1788_v14 = vld [vmem:[%s2395_s0 + $0x5c] ss:$36 sps:$4 sm:$0xff]   ;;  %v1797_v22 = vld [vmem:[%s2394_s1 + $0x228] sm:$0xff]   ;;  %v1798_v23 = vld [vmem:[%s2394_s1 + $0x230] sm:$0xff]  }
  0x1d   :  { %1586 = vmatpush3.bf16.msra.mxu1 %v1731_v27  ;;  %v1790_v15 = vld [vmem:[%s2395_s0 + $0x58] ss:$36 sps:$4 sm:$0xff]   ;;  %v1796_v20 = vld [vmem:[%s2394_s1 + $0x220] sm:$0xff]   ;;  %v1801_v25 = vld [vmem:[%s2395_s0 + $0x68] ss:$36 sps:$4 sm:$0xff]  }
  0x1e   :  { %1587 = vmatprep.subr.bf16.mxu1 %v1734_v30  ;;  %v1795_v19 = vld [vmem:[%s2394_s1 + $0x218] sm:$0xff]   ;;  %v1800_v21 = vld [vmem:[%s2395_s0 + $0x20] ss:$36 sps:$4 sm:$0xff]  }
  0x1f   :  { %1560 = vmatpush3.bf16.msra.mxu0 %v1733_v29  ;;  %v1799_v24 = vld [vmem:[%s2394_s1 + $0x238] sm:$0xff]   ;;  %v1804_v26 = vld [vmem:[%s2396_s3 + $0x4] ss:$16 sps:$4 sm:$0xff]   ;;  %v1802_v27 = vld [vmem:[%s2396_s3] ss:$16 sps:$4 sm:$0xff]  }
  0x20   :  { %1601 = vmatprep.subr.bf16.mxu0 %v1739_v34  ;;  %v2165_v28 = vld [vmem:[%s2396_s3 + $0x8] ss:$16 sps:$4 sm:$0xff]   ;;  %v1807_v29 = vld [vmem:[%s2396_s3 + $0xc] ss:$16 sps:$4 sm:$0xff]   ;;  %v1810_v30 = vld [vmem:[%s2396_s3 + $0x24] ss:$16 sps:$4 sm:$0xff]  }
  0x21   :  { %1588 = vmatpush3.bf16.msra.mxu1 %v1738_v33  ;;  %v2180_v32 = vld [vmem:[%s2396_s3 + $0x2c] ss:$16 sps:$4 sm:$0xff]   ;;  %v2185_v33 = vld [vmem:[%s2396_s3 + $0x28] ss:$16 sps:$4 sm:$0xff]   ;;  %v1814_v34 = vld [vmem:[%s2396_s3 + $0x40] ss:$16 sps:$4 sm:$0xff]  }
  0x22   :  { %752 = vmatmul.mubr.bf16.vlgmr.msra.gmra.mrb[0].mxu0 %v1735_v31  ;;  %1629 = vmatprep.subr.bf16.mxu1 %v1744_v38  ;;  %v1808_v31 = vld [vmem:[%s2396_s3 + $0x20] ss:$16 sps:$4 sm:$0xff]   ;;  %v2197_v36 = vld [vmem:[%s2396_s3 + $0x48] ss:$16 sps:$4 sm:$0xff]   ;;  %v1822_v38 = vld [vmem:[%s2396_s3 + $0x64] ss:$16 sps:$4 sm:$0xff]  }
  0x23   :  { %1602 = vmatpush3.bf16.msra.mxu0 %v1743_v37  ;;  %759 = vmatprep.mubr.bf16.mxu0 %v1763_v57  ;;  %v2202_v37 = vld [vmem:[%s2396_s3 + $0x4c] ss:$16 sps:$4 sm:$0xff]   ;;  %v2293_v57 = vld [vmem:[%s2396_s3 + $0xe8] ss:$16 sps:$4 sm:$0xff]  }
  0x24   :  { %801 = vmatmul.mubr.bf16.vlgmr.msra.gmra.mrb[0].mxu1 %v1740_v35  ;;  %1603 = vmatprep.subr.bf16.mxu0 %v1746_v40  ;;  %v1816_v35 = vld [vmem:[%s2396_s3 + $0x44] ss:$16 sps:$4 sm:$0xff]   ;;  %v1820_v40 = vld [vmem:[%s2396_s3 + $0x60] ss:$16 sps:$4 sm:$0xff]  }
  0x25   :  { %1630 = vmatpush3.bf16.msra.mxu1 %v1745_v39  ;;  %808 = vmatprep.mubr.bf16.mxu1 %v1768_v61  ;;  %v2212_v39 = vld [vmem:[%s2396_s3 + $0x6c] ss:$16 sps:$4 sm:$0xff]  }
  0x26   :  { %1631 = vmatprep.subr.bf16.mxu1 %v1748_v42  ;;  %v2224_v42 = vld [vmem:[%s2396_s3 + $0x68] ss:$16 sps:$4 sm:$0xff]  }
  0x27   :  { %1604 = vmatpush3.bf16.msra.mxu0 %v1747_v41  ;;  %v1828_v41 = vld [vmem:[%s2396_s3 + $0x84] ss:$16 sps:$4 sm:$0xff]  }
  0x28   :  { %1605 = vmatprep.subr.bf16.mxu0 %v1750_v44  ;;  %v2233_v44 = vld [vmem:[%s2396_s3 + $0x8c] ss:$16 sps:$4 sm:$0xff]  }
  0x29   :  { %1632 = vmatpush3.bf16.msra.mxu1 %v1749_v43  ;;  %v1826_v43 = vld [vmem:[%s2396_s3 + $0x80] ss:$16 sps:$4 sm:$0xff]  }
  0x2a   :  { %1633 = vmatprep.subr.bf16.mxu1 %v1752_v46  ;;  %760 = vmatmul.mubr.bf16.gmra.mrb[4].mxu0 %v1766_v59  ;;  %v1834_v46 = vld [vmem:[%s2396_s3 + $0xa4] ss:$16 sps:$4 sm:$0xff]  }
  0x2b   :  { %1606 = vmatpush3.bf16.msra.mxu0 %v1751_v45  ;;  %849 = vmatprep.mubr.bf16.mxu0 %v1781_v8  ;;  %v2238_v45 = vld [vmem:[%s2396_s3 + $0x88] ss:$16 sps:$4 sm:$0xff]  }
  0x2c   :  { %1607 = vmatprep.subr.bf16.mxu0 %v1754_v48  ;;  %809 = vmatmul.mubr.bf16.gmra.mrb[4].mxu1 %v1771_v63  ;;  %v1832_v48 = vld [vmem:[%s2396_s3 + $0xa0] ss:$16 sps:$4 sm:$0xff]  }
  0x2d   :  { %1634 = vmatpush3.bf16.msra.mxu1 %v1753_v47  ;;  %898 = vmatprep.mubr.bf16.mxu1 %v1786_v12  ;;  %v2248_v47 = vld [vmem:[%s2396_s3 + $0xac] ss:$16 sps:$4 sm:$0xff]  }
  0x2e   :  { %1635 = vmatprep.subr.bf16.mxu1 %v1756_v50  ;;  %v1840_v50 = vld [vmem:[%s2396_s3 + $0xc4] ss:$16 sps:$4 sm:$0xff]  }
  0x2f   :  { %1608 = vmatpush3.bf16.msra.mxu0 %v1755_v49  ;;  %v2257_v49 = vld [vmem:[%s2396_s3 + $0xa8] ss:$16 sps:$4 sm:$0xff]  }
  0x30   :  { %1609 = vmatprep.subr.bf16.mxu0 %v1758_v52  ;;  %v2270_v52 = vld [vmem:[%s2396_s3 + $0xcc] ss:$16 sps:$4 sm:$0xff]  }
  0x31   :  { %1636 = vmatpush3.bf16.msra.mxu1 %v1757_v51  ;;  %v1838_v51 = vld [vmem:[%s2396_s3 + $0xc0] ss:$16 sps:$4 sm:$0xff]  }
  0x32   :  { %1637 = vmatprep.subr.bf16.mxu1 %v1760_v54  ;;  %v1846_v54 = vld [vmem:[%s2396_s3 + $0xe4] ss:$16 sps:$4 sm:$0xff]  }
  0x33   :  { %1610 = vmatpush3.bf16.msra.mxu0 %v1759_v53  ;;  %v2275_v53 = vld [vmem:[%s2396_s3 + $0xc8] ss:$16 sps:$4 sm:$0xff]  }
  0x34   :  { %1611 = vmatprep.subr.bf16.mxu0 %v1762_v56  ;;  %v2288_v56 = vld [vmem:[%s2396_s3 + $0xec] ss:$16 sps:$4 sm:$0xff]  }
  0x35   :  { %1638 = vmatpush3.bf16.msra.mxu1 %v1761_v55  ;;  %v1844_v55 = vld [vmem:[%s2396_s3 + $0xe0] ss:$16 sps:$4 sm:$0xff]  }
  0x36   :  { %1639 = vmatprep.subr.bf16.mxu1 %v1767_v60  ;;  %v1406_v60 = vld [vmem:[%s2397_s2] ss:$0 sm:$0xff] }
  0x37   :  { %1612 = vmatpush3.bf16.msra.mxu0 %v1765_v58  ;;  %v1850_v58 = vmov 0  }
  0x38   :  { %1613 = vmatprep.subr.bf16.mxu0 %v1772_v0 }
  0x39   :  { %1640 = vmatpush3.bf16.msra.mxu1 %v1770_v62 }
  0x3a   :  { %1641 = vmatprep.subr.bf16.mxu1 %v1774_v2 }
  0x3b   :  { %1614 = vmatpush3.bf16.msra.mxu0 %v1773_v1 }
  0x3c   :  { %1615 = vmatprep.subr.bf16.mxu0 %v1776_v4 }
  0x3d   :  { %1642 = vmatpush3.bf16.msra.mxu1 %v1775_v3 }
  0x3e   :  { %1643 = vmatprep.subr.bf16.mxu1 %v1778_v6 }
  0x3f   :  { %1616 = vmatpush3.bf16.msra.mxu0 %v1777_v5 }
  0x40   :  { %1667 = vmatprep.subr.bf16.mxu0 %v1783_v10 }
  0x41   :  { %1644 = vmatpush3.bf16.msra.mxu1 %v1782_v9 }
  0x42   :  { %850 = vmatmul.mubr.bf16.vlgmr.msra.gmra.mrb[8].mxu0 %v1779_v7  ;;  %1184 = vmatprep.subr.bf16.mxu1 %v1804_v26 }
  0x43   :  { %1668 = vmatpush3.bf16.msra.mxu0 %v1783_v10  ;;  %857 = vmatprep.mubr.bf16.mxu0 %v1788_v14 }
  0x44   :  { %899 = vmatmul.mubr.bf16.vlgmr.msra.gmra.mrb[8].mxu1 %v1784_v11  ;;  %1669 = vmatprep.subr.bf16.mxu0 %v1787_v13 }
  0x45   :  { %906 = vmatprep.mubr.bf16.mxu1 %v1792_v17  ;;  %1185 = vmatpush1.bf16.msra.mxu1 %v1802_v27 }
  0x46   :  { %1186 = vmatprep.subr.bf16.mxu1 %v1810_v30 }
  0x47   :  { %1670 = vmatpush3.bf16.msra.mxu0 %v1787_v13 }
  0x48   :  { %1671 = vmatprep.subr.bf16.mxu0 %v1791_v16 }
  0x49   :  { %1187 = vmatpush1.bf16.msra.mxu1 %v1808_v31 }
  0x4a   :  { %858 = vmatmul.mubr.bf16.gmra.mrb[12].mxu0 %v1790_v15  ;;  %1188 = vmatprep.subr.bf16.mxu1 %v1816_v35 }
  0x4b   :  { %1672 = vmatpush3.bf16.msra.mxu0 %v1791_v16  ;;  %1683 = vmatprep.mubr.bf16.mxu0 %v1800_v21 }
  0x4c   :  { %907 = vmatmul.mubr.bf16.gmra.mrb[12].mxu1 %v1794_v18  ;;  %1673 = vmatprep.subr.bf16.mxu0 %v1795_v19 }
  0x4d   :  { %1189 = vmatpush1.bf16.msra.mxu1 %v1814_v34  ;;  %1216 = vmatprep.mubr.bf16.mxu1 %v1850_v58 }
  0x4e   :  { %1190 = vmatprep.subr.bf16.mxu1 %v1822_v38 }
  0x4f   :  { %1674 = vmatpush3.bf16.msra.mxu0 %v1795_v19 }
  0x50   :  { %1675 = vmatprep.subr.bf16.mxu0 %v1796_v20 }
  0x51   :  { %1191 = vmatpush1.bf16.msra.mxu1 %v1820_v40 }
  0x52   :  { %1192 = vmatprep.subr.bf16.mxu1 %v1828_v41 }
  0x53   :  { %1676 = vmatpush3.bf16.msra.mxu0 %v1796_v20 }
  0x54   :  { %1677 = vmatprep.subr.bf16.mxu0 %v1797_v22 }
  0x55   :  { %1193 = vmatpush1.bf16.msra.mxu1 %v1826_v43 }
  0x56   :  { %1194 = vmatprep.subr.bf16.mxu1 %v1834_v46 }
  0x57   :  { %1678 = vmatpush3.bf16.msra.mxu0 %v1797_v22 }
  0x58   :  { %1679 = vmatprep.subr.bf16.mxu0 %v1798_v23 }
  0x59   :  { %1195 = vmatpush1.bf16.msra.mxu1 %v1832_v48 }
  0x5a   :  { %1196 = vmatprep.subr.bf16.mxu1 %v1840_v50 }
  0x5b   :  { %1680 = vmatpush3.bf16.msra.mxu0 %v1798_v23 }
  0x5c   :  { %1681 = vmatprep.subr.bf16.mxu0 %v1799_v24 }
  0x5d   :  { %1197 = vmatpush1.bf16.msra.mxu1 %v1838_v51 }
  0x5e   :  { %1198 = vmatprep.subr.bf16.mxu1 %v1846_v54 }
  0x5f   :  { %1682 = vmatpush3.bf16.msra.mxu0 %v1799_v24 }
  0x60   :  { %1237 = vmatprep.subr.bf16.mxu0 %v1807_v29 }
  0x61   :  { %1199 = vmatpush1.bf16.msra.mxu1 %v1844_v55 }
  0x62   :  { %1684 = vmatmul.mubr.bf16.vlgmr.msra.gmra.mrb[16].mxu0 %v1801_v25  ;;  %1687 = vmatprep.subr.bf16.mxu1 %v1807_v29 }
  0x63   :  { %1238 = vmatpush1.bf16.msra.mxu0 %v2165_v28  ;;  %1269 = vmatprep.mubr.bf16.mxu0 %v1850_v58 }
  0x64   :  { %1239 = vmatprep.subr.bf16.mxu0 %v2180_v32 }
  0x67   :  { %1240 = vmatpush1.bf16.msra.mxu0 %v2185_v33 }
  0x68   :  { %1241 = vmatprep.subr.bf16.mxu0 %v2202_v37 }
  0x6b   :  { %1242 = vmatpush1.bf16.msra.mxu0 %v2197_v36 }
  0x6c   :  { %1243 = vmatprep.subr.bf16.mxu0 %v2212_v39 }
  0x6f   :  { %1244 = vmatpush1.bf16.msra.mxu0 %v2224_v42 }
  0x70   :  { %1245 = vmatprep.subr.bf16.mxu0 %v2233_v44 }
  0x73   :  { %1246 = vmatpush1.bf16.msra.mxu0 %v2238_v45 }
  0x74   :  { %1247 = vmatprep.subr.bf16.mxu0 %v2248_v47 }
  0x77   :  { %1248 = vmatpush1.bf16.msra.mxu0 %v2257_v49 }
  0x78   :  { %1249 = vmatprep.subr.bf16.mxu0 %v2270_v52 }
  0x7b   :  { %1250 = vmatpush1.bf16.msra.mxu0 %v2275_v53 }
  0x7c   :  { %1251 = vmatprep.subr.bf16.mxu0 %v2288_v56 }
  0x7f   :  { %1252 = vmatpush1.bf16.msra.mxu0 %v2293_v57 }
  0xf5   :  { %v1561_v59 = vpop.f32.mrb[0].mxu0 }
  0xf6   :  { %v1562_v61 = vpop.f32.mrb[1].mxu0 }
  0xf7   :  { %v1563_v62 = vadd.f32 %v1562_v61, %v1561_v59  ;;  %v1564_v63 = vpop.f32.mrb[2].mxu0  ;;  %v1589_v0 = vpop.f32.mrb[0].mxu1 }
  0xf8   :  { %v1565_v1 = vpop.f32.mrb[3].mxu0  ;;  %v1590_v4 = vpop.f32.mrb[1].mxu1 }
  0xf9   :  { %v754_v2 = vadd.f32 %v1563_v62, %v1406_v60  ;;  %v1566_v3 = vadd.f32 %v1565_v1, %v1564_v63  ;;  %v1591_v5 = vadd.f32 %v1590_v4, %v1589_v0  ;;  %v1592_v6 = vpop.f32.mrb[2].mxu1 }
  0xfa   :  { %v1593_v8 = vpop.f32.mrb[3].mxu1 }
  0xfb   :  { %v757_v7 = vadd.f32 %v1566_v3, %v1406_v60  ;;  %v803_v9 = vadd.f32 %v1591_v5, %v754_v2  ;;  %v1594_v10 = vadd.f32 %v1593_v8, %v1592_v6 }
  0xfd   :  { %v806_v11 = vadd.f32 %v1594_v10, %v757_v7  ;;  %v1567_v12 = vpop.f32.mrb[4].mxu0 }
  0xfe   :  { %v1568_v13 = vpop.f32.mrb[5].mxu0 }
  0xff   :  { %v1569_v14 = vadd.f32 %v1568_v13, %v1567_v12  ;;  %v1570_v15 = vpop.f32.mrb[6].mxu0  ;;  %v1595_v16 = vpop.f32.mrb[4].mxu1 }
 0x100   :  { %v1571_v17 = vpop.f32.mrb[7].mxu0  ;;  %v1596_v20 = vpop.f32.mrb[5].mxu1 }
 0x101   :  { %v762_v18 = vadd.f32 %v1569_v14, %v1406_v60  ;;  %v1572_v19 = vadd.f32 %v1571_v17, %v1570_v15  ;;  %v1597_v21 = vadd.f32 %v1596_v20, %v1595_v16  ;;  %v1598_v22 = vpop.f32.mrb[6].mxu1 }
 0x102   :  { %v1599_v24 = vpop.f32.mrb[7].mxu1 }
 0x103   :  { %v765_v23 = vadd.f32 %v1572_v19, %v1406_v60  ;;  %v811_v25 = vadd.f32 %v1597_v21, %v762_v18  ;;  %v1600_v26 = vadd.f32 %v1599_v24, %v1598_v22 }
 0x105   :  { %v814_v27 = vadd.f32 %v1600_v26, %v765_v23 }
 0x115   :  { %v1617_v29 = vpop.f32.mrb[8].mxu0 }
 0x116   :  { %v1618_v30 = vpop.f32.mrb[9].mxu0 }
 0x117   :  { %v1619_v31 = vadd.f32 %v1618_v30, %v1617_v29  ;;  %v1620_v34 = vpop.f32.mrb[10].mxu0  ;;  %v1645_v35 = vpop.f32.mrb[8].mxu1 }
 0x118   :  { %v1621_v38 = vpop.f32.mrb[11].mxu0  ;;  %v1646_v43 = vpop.f32.mrb[9].mxu1 }
 0x119   :  { %v852_v40 = vadd.f32 %v1619_v31, %v803_v9  ;;  %v1622_v41 = vadd.f32 %v1621_v38, %v1620_v34  ;;  %v1647_v46 = vadd.f32 %v1646_v43, %v1645_v35  ;;  %v1648_v48 = vpop.f32.mrb[10].mxu1 }
 0x11a   :  { %v1649_v51 = vpop.f32.mrb[11].mxu1 }
 0x11b   :  { %v855_v50 = vadd.f32 %v1622_v41, %v806_v11  ;;  %v1650_v54 = vadd.f32 %v1649_v51, %v1648_v48  ;;  %v901_v55 = vadd.f32 %v1647_v46, %v852_v40 }
 0x11d   :  { %v1623_v59 = vpop.f32.mrb[12].mxu0  ;;  %v904_v61 = vadd.f32 %v1650_v54, %v855_v50 }
 0x11e   :  { %v1624_v60 = vpop.f32.mrb[13].mxu0 }
 0x11f   :  { %v1625_v62 = vadd.f32 %v1624_v60, %v1623_v59  ;;  %v1626_v63 = vpop.f32.mrb[14].mxu0  ;;  %v1651_v0 = vpop.f32.mrb[12].mxu1 }
 0x120   :  { %v1627_v1 = vpop.f32.mrb[15].mxu0  ;;  %v1652_v4 = vpop.f32.mrb[13].mxu1 }
 0x121   :  { %v860_v2 = vadd.f32 %v1625_v62, %v811_v25  ;;  %v1628_v3 = vadd.f32 %v1627_v1, %v1626_v63  ;;  %v1653_v5 = vadd.f32 %v1652_v4, %v1651_v0  ;;  %v1654_v6 = vpop.f32.mrb[14].mxu1 }
 0x122   :  { %v1655_v8 = vpop.f32.mrb[15].mxu1 }
 0x123   :  { %v863_v7 = vadd.f32 %v1628_v3, %v814_v27  ;;  %v1656_v9 = vadd.f32 %v1655_v8, %v1654_v6  ;;  %v909_v10 = vadd.f32 %v1653_v5, %v860_v2  ;;  %v1294_v5 = vld [vmem:[%s2399_s5 + $0x20] sm:$0xff] }
 0x125   :  { %v912_v11 = vadd.f32 %v1656_v9, %v863_v7 }
 0x135   :  { %v1685_v12 = vpop.f32.mrb[16].mxu0 }
 0x136   :  { %v958_v13 = vadd.f32 %v1685_v12, %v909_v10  ;;  %v949_v14 = vpop.f32.mrb[17].mxu0 }
 0x137   :  { %v950_v15 = vadd.f32 %v949_v14, %v901_v55  ;;  %v1686_v16 = vpop.f32.mrb[18].mxu0  ;;  %v1296_v14 = vld [vmem:[%s2399_s5 + $0x30] sm:$0xff] }
 0x138   :  { %v961_v17 = vadd.f32 %v1686_v16, %v912_v11  ;;  %v952_v18 = vpop.f32.mrb[19].mxu0  ;;  %v966_v20 = vmax.f32 %v958_v13, 0.0 }
 0x139   :  { %v953_v19 = vadd.f32 %v952_v18, %v904_v61  ;;  %v964_v22 = vmax.f32 %v950_v15, 0.0  ;;  %v1307_v18 = vunpack.c.h.bf16 %v1294_v5 }
 0x13a   :  { %v967_v21 = vmax.f32 %v961_v17, 0.0  ;;  %v1306_v17 = vunpack.c.l.bf16 %v1294_v5 }
 0x13b   :  { %v965_v23 = vmax.f32 %v953_v19, 0.0 }
 0x13c   :  { %v969_v24 = vpack.c.bf16 %v967_v21, %v966_v20 }
 0x13d   :  { %v968_v25 = vpack.c.bf16 %v965_v23, %v964_v22 }
 0x13f   :  { %1217 = vmatmul.mubr.bf16.vlgmr.msra.gmra.mrb[16].mxu1 %v968_v25  ;;  %1270 = vmatmul.mubr.bf16.vlgmr.msra.gmra.mrb[20].mxu0 %v968_v25 }
 0x140   :  { %1695 = vmatpush1.bf16.msra.mxu1 %v2165_v28  ;;  %1226 = vmatprep.mubr.bf16.mxu1 %v1850_v58  ;;  %v1004_v28 = vlaneseq }
 0x141   :  { %1688 = vmatprep.subr.bf16.mxu1 %v2180_v32 }
 0x142   :  { %v1005_v32 = vshrl.u32 %v1004_v28, 7  ;;  %v1310_v28 = vunpack.c.l.bf16 %v1296_v14 }
 0x144   :  { %1696 = vmatpush1.bf16.msra.mxu1 %v2185_v33  ;;  %v1006_v33 = vsub.s32 0, %v1005_v32 }
 0x145   :  { %1689 = vmatprep.subr.bf16.mxu1 %v2202_v37  ;;  %v1002_v37 = vld [vmem:[%s2398_s4] sm:$0xf] }
 0x147   :  { %1227 = vmatmul.mubr.bf16.gmra.mrb[20].mxu1 %v969_v24 }
 0x148   :  { %1697 = vmatpush1.bf16.msra.mxu1 %v2197_v36  ;;  %1279 = vmatprep.mubr.bf16.mxu1 %v1850_v58  ;;  %v1014_v36 = vsub.s32 2, %v1005_v32 }
 0x149   :  { %1690 = vmatprep.subr.bf16.mxu1 %v2212_v39  ;;  %v1010_v39 = vsub.s32 1, %v1005_v32 }
 0x14c   :  { %1698 = vmatpush1.bf16.msra.mxu1 %v2224_v42  ;;  %v1018_v42 = vsub.s32 3, %v1005_v32 }
 0x14d   :  { %1691 = vmatprep.subr.bf16.mxu1 %v2233_v44  ;;  %v1290_v44 = vld [vmem:[%s2399_s5] sm:$0xff] }
 0x14e   :  { %v1298_v58 = vunpack.c.l.bf16 %v1290_v44  ;;  %v1299_v30 = vunpack.c.h.bf16 %v1290_v44 }
 0x150   :  { %1699 = vmatpush1.bf16.msra.mxu1 %v2238_v45  ;;  %v1291_v45 = vld [vmem:[%s2399_s5 + $0x8] sm:$0xff] }
 0x151   :  { %1692 = vmatprep.subr.bf16.mxu1 %v2248_v47  ;;  %v2328_v47 = vrot.slane %v1002_v37, %v1006_v33  ;;  %v1300_v26 = vunpack.c.l.bf16 %v1291_v45  ;;  %v1301_v31 = vunpack.c.h.bf16 %v1291_v45 }
 0x154   :  { %1700 = vmatpush1.bf16.msra.mxu1 %v2257_v49  ;;  %v2330_v49 = vrot.slane %v1002_v37, %v1014_v36 }
 0x155   :  { %1693 = vmatprep.subr.bf16.mxu1 %v2270_v52  ;;  %v2332_v52 = vrot.slane %v1002_v37, %v1010_v39  ;;  %v1311_v39 = vunpack.c.h.bf16 %v1296_v14 }
 0x158   :  { %1701 = vmatpush1.bf16.msra.mxu1 %v2275_v53  ;;  %v2334_v53 = vrot.slane %v1002_v37, %v1018_v42 }
 0x159   :  { %1694 = vmatprep.subr.bf16.mxu1 %v2288_v56  ;;  %v1292_v56 = vld [vmem:[%s2399_s5 + $0x10] sm:$0xff] }
 0x15a   :  { %v1302_v41 = vunpack.c.l.bf16 %v1292_v56  ;;  %v1303_v54 = vunpack.c.h.bf16 %v1292_v56 }
 0x15c   :  { %1702 = vmatpush1.bf16.msra.mxu1 %v2293_v57  ;;  %v1293_v57 = vld [vmem:[%s2399_s5 + $0x18] sm:$0xff] }
 0x15d   :  { %v1304_v43 = vunpack.c.l.bf16 %v1293_v57  ;;  %v1305_v55 = vunpack.c.h.bf16 %v1293_v57 }
 0x15f   :  { %1280 = vmatmul.mubr.bf16.vlgmr.msra.gmra.mrb[24].mxu1 %v969_v24 }
 0x212   :  { %v1218_v27 = vpop.f32.mrb[16].mxu1  ;;  %v1271_v29 = vpop.f32.mrb[20].mxu0 }
 0x213   :  { %v1219_v34 = vadd.f32 %v1218_v27, %v2328_v47  ;;  %v1272_v35 = vadd.f32 %v1271_v29, %v2330_v49  ;;  %v1220_v38 = vpop.f32.mrb[17].mxu1  ;;  %v1273_v40 = vpop.f32.mrb[21].mxu0 }
 0x214   :  { %v1221_v46 = vadd.f32 %v1220_v38, %v2332_v52  ;;  %v1274_v48 = vadd.f32 %v1273_v40, %v2334_v53  ;;  %v1222_v50 = vpop.f32.mrb[18].mxu1  ;;  %v1275_v51 = vpop.f32.mrb[22].mxu0 }
 0x215   :  { %v1314_v59 = vadd.f32 %v1298_v58, %v1219_v34  ;;  %v1316_v60 = vadd.f32 %v1300_v26, %v1272_v35  ;;  %v1223_v61 = vadd.f32 %v1222_v50, %v2328_v47  ;;  %v1276_v62 = vadd.f32 %v1275_v51, %v2330_v49  ;;  %v1224_v63 = vpop.f32.mrb[19].mxu1  ;;  %v1277_v0 = vpop.f32.mrb[23].mxu0  ;;  %v1297_v35 = vld [vmem:[%s2399_s5 + $0x38] sm:$0xff] }
 0x216   :  { %v1315_v1 = vadd.f32 %v1299_v30, %v1221_v46  ;;  %v1317_v2 = vadd.f32 %v1301_v31, %v1274_v48  ;;  %v1225_v3 = vadd.f32 %v1224_v63, %v2332_v52  ;;  %v1278_v4 = vadd.f32 %v1277_v0, %v2334_v53 }
 0x217   :  { %v1330_v6 = vmax.f32 %v1314_v59, 0.0  ;;  %v1332_v7 = vmax.f32 %v1316_v60, 0.0  ;;  %v1318_v8 = vadd.f32 %v1302_v41, %v1223_v61  ;;  %v1320_v9 = vadd.f32 %v1304_v43, %v1276_v62 }
 0x218   :  { %v1331_v10 = vmax.f32 %v1315_v1, 0.0  ;;  %v1333_v11 = vmax.f32 %v1317_v2, 0.0  ;;  %v1319_v12 = vadd.f32 %v1303_v54, %v1225_v3  ;;  %v1321_v13 = vadd.f32 %v1305_v55, %v1278_v4 }
 0x219   :  { %v1334_v15 = vmax.f32 %v1318_v8, 0.0  ;;  %v1336_v16 = vmax.f32 %v1320_v9, 0.0  ;;  %v1312_v48 = vunpack.c.l.bf16 %v1297_v35  ;;  %v1313_v54 = vunpack.c.h.bf16 %v1297_v35 }
 0x21a   :  { %v1537_v19 = vpack.c.bf16 %v1331_v10, %v1330_v6  ;;  %v1538_v20 = vpack.c.bf16 %v1333_v11, %v1332_v7  ;;  %v1335_v21 = vmax.f32 %v1319_v12, 0.0  ;;  %v1337_v22 = vmax.f32 %v1321_v13, 0.0  ;;  %v1228_v23 = vpop.f32.mrb[20].mxu1 }
 0x21b   :  { %v1229_v24 = vadd.f32 %v1228_v23, %v2328_v47  ;;  %v1230_v25 = vpop.f32.mrb[21].mxu1 }
 0x21c   :  { %1394 = vst [vmem:[%s2400_s6] sm:$0xff] %v1537_v19  ;;  %1395 = vst [vmem:[%s2400_s6 + $0x8] sm:$0xff] %v1538_v20  ;;  %v1539_v32 = vpack.c.bf16 %v1335_v21, %v1334_v15  ;;  %v1540_v33 = vpack.c.bf16 %v1337_v22, %v1336_v16  ;;  %v1231_v36 = vadd.f32 %v1230_v25, %v2332_v52  ;;  %v1232_v37 = vpop.f32.mrb[22].mxu1 }
 0x21d   :  { %v1322_v42 = vadd.f32 %v1306_v17, %v1229_v24  ;;  %v1233_v44 = vadd.f32 %v1232_v37, %v2328_v47  ;;  %v1234_v45 = vpop.f32.mrb[23].mxu1 }
 0x21e   :  { %1396 = vst [vmem:[%s2400_s6 + $0x10] sm:$0xff] %v1539_v32  ;;  %1397 = vst [vmem:[%s2400_s6 + $0x18] sm:$0xff] %v1540_v33  ;;  %v1323_v56 = vadd.f32 %v1307_v18, %v1231_v36  ;;  %v1235_v57 = vadd.f32 %v1234_v45, %v2332_v52  ;;  %v1295_v52 = vld [vmem:[%s2399_s5 + $0x28] sm:$0xff] }
 0x21f   :  { %v1338_v58 = vmax.f32 %v1322_v42, 0.0  ;;  %v1326_v26 = vadd.f32 %v1310_v28, %v1233_v44  ;;  %v1308_v38 = vunpack.c.l.bf16 %v1295_v52  ;;  %v1309_v41 = vunpack.c.h.bf16 %v1295_v52 }
 0x220   :  { %v1339_v27 = vmax.f32 %v1323_v56, 0.0  ;;  %v1327_v29 = vadd.f32 %v1311_v39, %v1235_v57 }
 0x221   :  { %v1342_v30 = vmax.f32 %v1326_v26, 0.0 }
 0x222   :  { %v1541_v31 = vpack.c.bf16 %v1339_v27, %v1338_v58  ;;  %v1343_v34 = vmax.f32 %v1327_v29, 0.0 }
 0x224   :  { %1398 = vst [vmem:[%s2400_s6 + $0x20] sm:$0xff] %v1541_v31  ;;  %v1543_v47 = vpack.c.bf16 %v1343_v34, %v1342_v30 }
 0x226   :  { %1400 = vst [vmem:[%s2400_s6 + $0x30] sm:$0xff] %v1543_v47 }
 0x232   :  { %v1281_v40 = vpop.f32.mrb[24].mxu1 }
 0x233   :  { %v1282_v43 = vadd.f32 %v1281_v40, %v2330_v49  ;;  %v1283_v46 = vpop.f32.mrb[25].mxu1 }
 0x234   :  { %v1284_v50 = vadd.f32 %v1283_v46, %v2334_v53  ;;  %v1285_v51 = vpop.f32.mrb[26].mxu1 }
 0x235   :  { %v1324_v55 = vadd.f32 %v1308_v38, %v1282_v43  ;;  %v1286_v59 = vadd.f32 %v1285_v51, %v2330_v49  ;;  %v1287_v60 = vpop.f32.mrb[27].mxu1 }
 0x236   :  { %v1325_v61 = vadd.f32 %v1309_v41, %v1284_v50  ;;  %v1288_v62 = vadd.f32 %v1287_v60, %v2334_v53 }
 0x237   :  { %v1340_v63 = vmax.f32 %v1324_v55, 0.0  ;;  %v1328_v0 = vadd.f32 %v1312_v48, %v1286_v59 }
 0x238   :  { %v1341_v1 = vmax.f32 %v1325_v61, 0.0  ;;  %v1329_v2 = vadd.f32 %v1313_v54, %v1288_v62 }
 0x239   :  { %v1344_v3 = vmax.f32 %v1328_v0, 0.0 }
 0x23a   :  { %v1542_v4 = vpack.c.bf16 %v1341_v1, %v1340_v63  ;;  %v1345_v5 = vmax.f32 %v1329_v2, 0.0 }
 0x23c   :  { %1399 = vst [vmem:[%s2400_s6 + $0x28] sm:$0xff] %v1542_v4  ;;  %v1544_v6 = vpack.c.bf16 %v1345_v5, %v1344_v3 }
 0x23e   :  { %1401 = vst [vmem:[%s2400_s6 + $0x38] sm:$0xff] %v1544_v6 }

// kernel: _lambda_.48
= control target key start
LH: loop header
LB: loop body
LE: loop exit
PB: predicated region body
PF: predicated region fallthrough
CT: control target
= control target key end

     0   :  { %s1475_s12 = smov 0   ;;  %s1477_s13 = smov 0   ;;  %s1765_s0 = inlined_call_operand.vmem [shape: bf16[16,512], index: 0, kind: input, shape index: {}]   ;;  %s1766_s1 = inlined_call_operand.vmem [shape: bf16[512,1024], index: 1, kind: input, shape index: {}]   ;;  %s1767_s2 = inlined_call_operand.vmem [shape: f32[1,1024], index: 2, kind: input, shape index: {}]   ;;  %s1768_s3 = inlined_call_operand.vmem [shape: bf16[16,1024], index: 3, kind: output, shape index: {}]  }
   0x1   :  { %s1479_s14 = smov 0   ;;  %s1481_s15 = smov 0  }
   0x2   :  { %s1483_s16 = smov 0  }
   0x3 LB: > { %s22_s17 = sadd.s32 1, %s1449_s15  ;;  %s1174_s18 = sadd.s32 4294967295, %s1453_s16   ;;  %s1453_s16 = sphi %s1483_s16, %s13_s16   ;;  %s1449_s15 = sphi %s1481_s15, %s1773_s15   ;;  %s1445_s14 = sphi %s1479_s14, %s1772_s14   ;;  %s1441_s13 = sphi %s1477_s13, %s1771_s13   ;;  %s1437_s12 = sphi %s1475_s12, %s1770_s12  }
   0x4   : > { %p23_p0 = scmp.ge.s32.totalorder %s22_s17, 4  ;;  %p65_p1 = scmp.ne.s32.totalorder %s1441_s13, %s1437_s12 }
   0x5   : > { %p66_p2 = scmp.eq.s32.totalorder %s1453_s16, 0  ;;  %p123_p4 = scmp.eq.s32.totalorder %s1174_s18, 3 }
   0x6   : > { %s1775_s17 = smov (%p23_p0, %s22_s17), 0  ;;  %s58_s20 = sadd.s32 1, %s1441_s13 }
   0x7   : > { %p67_p3 = por %p66_p2, %p65_p1  ;;  %s55_s19 = ssub.s32 %s1449_s15, %s1775_s17 }
   0x8   : > { %p56_p5 = scmp.eq.s32.totalorder %s55_s19, 0  ;;  %p1510_p6 = por %p123_p4, %p65_p1 }
   0x9   : > { %p1178_p7 = scmp.ge.s32.totalorder %s1453_s16, 4 }
   0xa   : > { %s1515_s22 = scalar_select %p56_p5, %s1441_s13, %s58_s20  }
   0xb   : > { %155 = sbr.rel (%p1178_p7) target bundleno = 86 (0x56), region = 20 }
  0x12   : > { %158 = sbr.rel (!%p67_p3) target bundleno = 86 (0x56), region = 24  ;;  %s160_s23 = sand.u32 (%p67_p3), 1, %s1441_s13  }
  0x13   : > { %s1261_s24 = sshll.u32 (%p67_p3), %s1449_s15, 3  ;;  %s1179_s25 = sshll.u32 (%p67_p3), %s160_s23, 9 }
  0x14   : > { %s1523_s28 = scalar_lea.vmem (%p67_p3), %s1766_s1, %s1261_s24  ;;  %s1528_s29 = scalar_lea.vmem (%p67_p3), [#allocation2], %s1179_s25 }
  0x15   : > { %v319_v0 = vld [vmem:[%s1523_s28] sm:$0xff] (%p67_p3) }
  0x16   : > { %v321_v1 = vld [vmem:[%s1523_s28 + $0x20] sm:$0xff] (%p67_p3)  ;;  %320 = vst [vmem:[%s1528_s29] sm:$0xff] (%p67_p3), %v319_v0 }
  0x17   : > { %v323_v2 = vld [vmem:[%s1523_s28 + $0x40] sm:$0xff] (%p67_p3)  ;;  %322 = vst [vmem:[%s1528_s29 + $0x8] sm:$0xff] (%p67_p3), %v321_v1 }
  0x18   : > { %324 = vst [vmem:[%s1528_s29 + $0x10] sm:$0xff] (%p67_p3), %v323_v2  ;;  %v325_v3 = vld [vmem:[%s1523_s28 + $0x60] sm:$0xff] (%p67_p3) }
  0x19   : > { %v327_v4 = vld [vmem:[%s1523_s28 + $0x80] sm:$0xff]  ;;  %326 = vst [vmem:[%s1528_s29 + $0x18] sm:$0xff] %v325_v3 }
  0x1a   : > { %v329_v5 = vld [vmem:[%s1523_s28 + $0xa0] sm:$0xff]  ;;  %328 = vst [vmem:[%s1528_s29 + $0x20] sm:$0xff] %v327_v4 }
  0x1b   : > { %330 = vst [vmem:[%s1528_s29 + $0x28] sm:$0xff] %v329_v5  ;;  %v331_v6 = vld [vmem:[%s1523_s28 + $0xc0] sm:$0xff] }
  0x1c   : > { %v333_v7 = vld [vmem:[%s1523_s28 + $0xe0] sm:$0xff]  ;;  %332 = vst [vmem:[%s1528_s29 + $0x30] sm:$0xff] %v331_v6 }
  0x1d   : > { %v335_v8 = vld [vmem:[%s1523_s28 + $0x100] sm:$0xff]  ;;  %334 = vst [vmem:[%s1528_s29 + $0x38] sm:$0xff] %v333_v7 }
  0x1e   : > { %336 = vst [vmem:[%s1528_s29 + $0x40] sm:$0xff] %v335_v8  ;;  %v337_v9 = vld [vmem:[%s1523_s28 + $0x120] sm:$0xff] }
  0x1f   : > { %v339_v10 = vld [vmem:[%s1523_s28 + $0x140] sm:$0xff]  ;;  %338 = vst [vmem:[%s1528_s29 + $0x48] sm:$0xff] %v337_v9 }
  0x20   : > { %v341_v11 = vld [vmem:[%s1523_s28 + $0x160] sm:$0xff]  ;;  %340 = vst [vmem:[%s1528_s29 + $0x50] sm:$0xff] %v339_v10 }
  0x21   : > { %342 = vst [vmem:[%s1528_s29 + $0x58] sm:$0xff] %v341_v11  ;;  %v343_v12 = vld [vmem:[%s1523_s28 + $0x180] sm:$0xff] }
  0x22   : > { %v345_v13 = vld [vmem:[%s1523_s28 + $0x1a0] sm:$0xff]  ;;  %344 = vst [vmem:[%s1528_s29 + $0x60] sm:$0xff] %v343_v12 }
  0x23   : > { %v347_v14 = vld [vmem:[%s1523_s28 + $0x1c0] sm:$0xff]  ;;  %346 = vst [vmem:[%s1528_s29 + $0x68] sm:$0xff] %v345_v13 }
  0x24   : > { %348 = vst [vmem:[%s1528_s29 + $0x70] sm:$0xff] %v347_v14  ;;  %v349_v15 = vld [vmem:[%s1523_s28 + $0x1e0] sm:$0xff] }
  0x25   : > { %v351_v16 = vld [vmem:[%s1523_s28 + $0x200] sm:$0xff]  ;;  %350 = vst [vmem:[%s1528_s29 + $0x78] sm:$0xff] %v349_v15 }
  0x26   : > { %v353_v17 = vld [vmem:[%s1523_s28 + $0x220] sm:$0xff]  ;;  %352 = vst [vmem:[%s1528_s29 + $0x80] sm:$0xff] %v351_v16 }
  0x27   : > { %354 = vst [vmem:[%s1528_s29 + $0x88] sm:$0xff] %v353_v17  ;;  %v355_v18 = vld [vmem:[%s1523_s28 + $0x240] sm:$0xff] }
  0x28   : > { %v357_v19 = vld [vmem:[%s1523_s28 + $0x260] sm:$0xff]  ;;  %356 = vst [vmem:[%s1528_s29 + $0x90] sm:$0xff] %v355_v18 }
  0x29   : > { %v359_v20 = vld [vmem:[%s1523_s28 + $0x280] sm:$0xff]  ;;  %358 = vst [vmem:[%s1528_s29 + $0x98] sm:$0xff] %v357_v19 }
  0x2a   : > { %360 = vst [vmem:[%s1528_s29 + $0xa0] sm:$0xff] %v359_v20  ;;  %v361_v21 = vld [vmem:[%s1523_s28 + $0x2a0] sm:$0xff] }
  0x2b   : > { %v363_v22 = vld [vmem:[%s1523_s28 + $0x2c0] sm:$0xff]  ;;  %362 = vst [vmem:[%s1528_s29 + $0xa8] sm:$0xff] %v361_v21 }
  0x2c   : > { %v365_v23 = vld [vmem:[%s1523_s28 + $0x2e0] sm:$0xff]  ;;  %364 = vst [vmem:[%s1528_s29 + $0xb0] sm:$0xff] %v363_v22 }
  0x2d   : > { %366 = vst [vmem:[%s1528_s29 + $0xb8] sm:$0xff] %v365_v23  ;;  %v367_v24 = vld [vmem:[%s1523_s28 + $0x300] sm:$0xff] }
  0x2e   : > { %v369_v25 = vld [vmem:[%s1523_s28 + $0x320] sm:$0xff]  ;;  %368 = vst [vmem:[%s1528_s29 + $0xc0] sm:$0xff] %v367_v24 }
  0x2f   : > { %v371_v26 = vld [vmem:[%s1523_s28 + $0x340] sm:$0xff]  ;;  %370 = vst [vmem:[%s1528_s29 + $0xc8] sm:$0xff] %v369_v25 }
  0x30   : > { %372 = vst [vmem:[%s1528_s29 + $0xd0] sm:$0xff] %v371_v26  ;;  %v373_v27 = vld [vmem:[%s1523_s28 + $0x360] sm:$0xff] }
  0x31   : > { %v375_v28 = vld [vmem:[%s1523_s28 + $0x380] sm:$0xff]  ;;  %374 = vst [vmem:[%s1528_s29 + $0xd8] sm:$0xff] %v373_v27 }
  0x32   : > { %v377_v29 = vld [vmem:[%s1523_s28 + $0x3a0] sm:$0xff]  ;;  %376 = vst [vmem:[%s1528_s29 + $0xe0] sm:$0xff] %v375_v28 }
  0x33   : > { %378 = vst [vmem:[%s1528_s29 + $0xe8] sm:$0xff] %v377_v29  ;;  %v379_v30 = vld [vmem:[%s1523_s28 + $0x3c0] sm:$0xff] }
  0x34   : > { %v381_v31 = vld [vmem:[%s1523_s28 + $0x3e0] sm:$0xff]  ;;  %380 = vst [vmem:[%s1528_s29 + $0xf0] sm:$0xff] %v379_v30 }
  0x35   : > { %v383_v32 = vld [vmem:[%s1523_s28 + $0x400] sm:$0xff]  ;;  %382 = vst [vmem:[%s1528_s29 + $0xf8] sm:$0xff] %v381_v31 }
  0x36   : > { %384 = vst [vmem:[%s1528_s29 + $0x100] sm:$0xff] %v383_v32  ;;  %v385_v33 = vld [vmem:[%s1523_s28 + $0x420] sm:$0xff] }
  0x37   : > { %v387_v34 = vld [vmem:[%s1523_s28 + $0x440] sm:$0xff]  ;;  %386 = vst [vmem:[%s1528_s29 + $0x108] sm:$0xff] %v385_v33 }
  0x38   : > { %v389_v35 = vld [vmem:[%s1523_s28 + $0x460] sm:$0xff]  ;;  %388 = vst [vmem:[%s1528_s29 + $0x110] sm:$0xff] %v387_v34 }
  0x39   : > { %390 = vst [vmem:[%s1528_s29 + $0x118] sm:$0xff] %v389_v35  ;;  %v391_v36 = vld [vmem:[%s1523_s28 + $0x480] sm:$0xff] }
  0x3a   : > { %v393_v37 = vld [vmem:[%s1523_s28 + $0x4a0] sm:$0xff]  ;;  %392 = vst [vmem:[%s1528_s29 + $0x120] sm:$0xff] %v391_v36 }
  0x3b   : > { %v395_v38 = vld [vmem:[%s1523_s28 + $0x4c0] sm:$0xff]  ;;  %394 = vst [vmem:[%s1528_s29 + $0x128] sm:$0xff] %v393_v37 }
  0x3c   : > { %396 = vst [vmem:[%s1528_s29 + $0x130] sm:$0xff] %v395_v38  ;;  %v397_v39 = vld [vmem:[%s1523_s28 + $0x4e0] sm:$0xff] }
  0x3d   : > { %v399_v40 = vld [vmem:[%s1523_s28 + $0x500] sm:$0xff]  ;;  %398 = vst [vmem:[%s1528_s29 + $0x138] sm:$0xff] %v397_v39 }
  0x3e   : > { %v401_v41 = vld [vmem:[%s1523_s28 + $0x520] sm:$0xff]  ;;  %400 = vst [vmem:[%s1528_s29 + $0x140] sm:$0xff] %v399_v40 }
  0x3f   : > { %402 = vst [vmem:[%s1528_s29 + $0x148] sm:$0xff] %v401_v41  ;;  %v403_v42 = vld [vmem:[%s1523_s28 + $0x540] sm:$0xff] }
  0x40   : > { %v405_v43 = vld [vmem:[%s1523_s28 + $0x560] sm:$0xff]  ;;  %404 = vst [vmem:[%s1528_s29 + $0x150] sm:$0xff] %v403_v42 }
  0x41   : > { %v407_v44 = vld [vmem:[%s1523_s28 + $0x580] sm:$0xff]  ;;  %406 = vst [vmem:[%s1528_s29 + $0x158] sm:$0xff] %v405_v43 }
  0x42   : > { %408 = vst [vmem:[%s1528_s29 + $0x160] sm:$0xff] %v407_v44  ;;  %v409_v45 = vld [vmem:[%s1523_s28 + $0x5a0] sm:$0xff] }
  0x43   : > { %v411_v46 = vld [vmem:[%s1523_s28 + $0x5c0] sm:$0xff]  ;;  %410 = vst [vmem:[%s1528_s29 + $0x168] sm:$0xff] %v409_v45 }
  0x44   : > { %v413_v47 = vld [vmem:[%s1523_s28 + $0x5e0] sm:$0xff]  ;;  %412 = vst [vmem:[%s1528_s29 + $0x170] sm:$0xff] %v411_v46 }
  0x45   : > { %414 = vst [vmem:[%s1528_s29 + $0x178] sm:$0xff] %v413_v47  ;;  %v415_v48 = vld [vmem:[%s1523_s28 + $0x600] sm:$0xff] }
  0x46   : > { %v417_v49 = vld [vmem:[%s1523_s28 + $0x620] sm:$0xff]  ;;  %416 = vst [vmem:[%s1528_s29 + $0x180] sm:$0xff] %v415_v48 }
  0x47   : > { %v419_v50 = vld [vmem:[%s1523_s28 + $0x640] sm:$0xff]  ;;  %418 = vst [vmem:[%s1528_s29 + $0x188] sm:$0xff] %v417_v49 }
  0x48   : > { %420 = vst [vmem:[%s1528_s29 + $0x190] sm:$0xff] %v419_v50  ;;  %v421_v51 = vld [vmem:[%s1523_s28 + $0x660] sm:$0xff] }
  0x49   : > { %v423_v52 = vld [vmem:[%s1523_s28 + $0x680] sm:$0xff]  ;;  %422 = vst [vmem:[%s1528_s29 + $0x198] sm:$0xff] %v421_v51 }
  0x4a   : > { %v425_v53 = vld [vmem:[%s1523_s28 + $0x6a0] sm:$0xff]  ;;  %424 = vst [vmem:[%s1528_s29 + $0x1a0] sm:$0xff] %v423_v52 }
  0x4b   : > { %426 = vst [vmem:[%s1528_s29 + $0x1a8] sm:$0xff] %v425_v53  ;;  %v427_v54 = vld [vmem:[%s1523_s28 + $0x6c0] sm:$0xff] }
  0x4c   : > { %v429_v55 = vld [vmem:[%s1523_s28 + $0x6e0] sm:$0xff]  ;;  %428 = vst [vmem:[%s1528_s29 + $0x1b0] sm:$0xff] %v427_v54 }
  0x4d   : > { %v431_v56 = vld [vmem:[%s1523_s28 + $0x700] sm:$0xff]  ;;  %430 = vst [vmem:[%s1528_s29 + $0x1b8] sm:$0xff] %v429_v55 }
  0x4e   : > { %432 = vst [vmem:[%s1528_s29 + $0x1c0] sm:$0xff] %v431_v56  ;;  %v433_v57 = vld [vmem:[%s1523_s28 + $0x720] sm:$0xff] }
  0x4f   : > { %v435_v58 = vld [vmem:[%s1523_s28 + $0x740] sm:$0xff]  ;;  %434 = vst [vmem:[%s1528_s29 + $0x1c8] sm:$0xff] %v433_v57 }
  0x50   : > { %v437_v59 = vld [vmem:[%s1523_s28 + $0x760] sm:$0xff]  ;;  %436 = vst [vmem:[%s1528_s29 + $0x1d0] sm:$0xff] %v435_v58 }
  0x51   : > { %438 = vst [vmem:[%s1528_s29 + $0x1d8] sm:$0xff] %v437_v59  ;;  %v439_v60 = vld [vmem:[%s1523_s28 + $0x780] sm:$0xff] }
  0x52   : > { %v441_v61 = vld [vmem:[%s1523_s28 + $0x7a0] sm:$0xff]  ;;  %440 = vst [vmem:[%s1528_s29 + $0x1e0] sm:$0xff] %v439_v60 }
  0x53   : > { %v443_v62 = vld [vmem:[%s1523_s28 + $0x7c0] sm:$0xff]  ;;  %442 = vst [vmem:[%s1528_s29 + $0x1e8] sm:$0xff] %v441_v61 }
  0x54   : > { %444 = vst [vmem:[%s1528_s29 + $0x1f0] sm:$0xff] %v443_v62  ;;  %v445_v63 = vld [vmem:[%s1523_s28 + $0x7e0] sm:$0xff] }
  0x55   : > { %446 = vst [vmem:[%s1528_s29 + $0x1f8] sm:$0xff] %v445_v63 }
  0x56 PF: > { %p1182_p8 = scmp.ge.s32.totalorder %s1453_s16, 1  ;;  %p459_p9 = scmp.lt.s32.totalorder %s1453_s16, 5 }
  0x58   : > { %p460_p10 = pnand %p1182_p8, %p459_p9 }
  0x59   : > { %s466_s30 = sand.u32 (!%p460_p10), 1, %s1437_s12   ;;  %v1411_v0 = vld [vmem:[%s1765_s0 + $0x4] ss:$16 sps:$4 sm:$0xff] (!%p460_p10)   ;;  %v1414_v1 = vld [vmem:[%s1765_s0 + $0xc] ss:$16 sps:$4 sm:$0xff] (!%p460_p10)   ;;  %s1185_s20 = sshll.u32 (!%p460_p10), %s1445_s14, 1 }
  0x5a   : > { %463 = sbr.rel (%p460_p10) target bundleno = 387 (0x183), region = 66  ;;  %s1183_s4 = sshll.u32 (!%p460_p10), %s466_s30, 9  ;;  %965 = vmatprep.mubr.bf16.mxu1 (!%p460_p10), %v1411_v0  ;;  %1008 = vmatprep.mubr.bf16.mxu0 (!%p460_p10), %v1414_v1 }
  0x5b   : > { %s1666_s9 = scalar_lea.vmem (!%p460_p10), [#allocation2], %s1183_s4  ;;  %p507_p11 = scmp.lt.s32.totalorder (!%p460_p10), %s1185_s20, 7 }
  0x5c   : > { %v1313_v2 = vld [vmem:[%s1666_s9 + $0x4] ss:$8 sps:$4 sm:$0xff] (!%p460_p10)   ;;  %v1317_v4 = vld [vmem:[%s1666_s9] ss:$8 sps:$4 sm:$0xff] (!%p460_p10)   ;;  %v1319_v6 = vld [vmem:[%s1666_s9 + $0x14] ss:$8 sps:$4 sm:$0xff] (!%p460_p10)  }
  0x5d   : > { %v1315_v3 = vld [vmem:[%s1666_s9 + $0x104] ss:$8 sps:$4 sm:$0xff] (!%p460_p10)   ;;  %933 = vmatprep.subr.bf16.mxu1 (!%p460_p10), %v1313_v2  ;;  %v1318_v5 = vld [vmem:[%s1666_s9 + $0x100] ss:$8 sps:$4 sm:$0xff] (!%p460_p10)   ;;  %v1321_v7 = vld [vmem:[%s1666_s9 + $0x114] ss:$8 sps:$4 sm:$0xff] (!%p460_p10)  }
  0x5e   : > { %976 = vmatprep.subr.bf16.mxu0 (!%p460_p10), %v1315_v3  ;;  %934 = vmatpush1.bf16.msra.mxu1 (!%p460_p10), %v1317_v4  ;;  %v1323_v8 = vld [vmem:[%s1666_s9 + $0x10] ss:$8 sps:$4 sm:$0xff] (!%p460_p10)   ;;  %v1325_v10 = vld [vmem:[%s1666_s9 + $0x24] ss:$8 sps:$4 sm:$0xff] (!%p460_p10)   ;;  %v1329_v12 = vld [vmem:[%s1666_s9 + $0x20] ss:$8 sps:$4 sm:$0xff] (!%p460_p10)   ;;  %v583_v4 = vlaneseq (!%p460_p10) }
  0x5f   : > { %977 = vmatpush1.bf16.msra.mxu0 (!%p460_p10), %v1318_v5  ;;  %935 = vmatprep.subr.bf16.mxu1 (!%p460_p10), %v1319_v6  ;;  %v1324_v9 = vld [vmem:[%s1666_s9 + $0x110] ss:$8 sps:$4 sm:$0xff] (!%p460_p10)   ;;  %v1327_v11 = vld [vmem:[%s1666_s9 + $0x124] ss:$8 sps:$4 sm:$0xff] (!%p460_p10)   ;;  %v1330_v13 = vld [vmem:[%s1666_s9 + $0x120] ss:$8 sps:$4 sm:$0xff] (!%p460_p10)  }
  0x60   : > { %978 = vmatprep.subr.bf16.mxu0 (!%p460_p10), %v1321_v7  ;;  %v1331_v14 = vld [vmem:[%s1666_s9 + $0x34] ss:$8 sps:$4 sm:$0xff] (!%p460_p10)   ;;  %v1335_v16 = vld [vmem:[%s1666_s9 + $0x30] ss:$8 sps:$4 sm:$0xff] (!%p460_p10)   ;;  %v1337_v18 = vld [vmem:[%s1666_s9 + $0x44] ss:$8 sps:$4 sm:$0xff] (!%p460_p10)  }
  0x61   : > { %v1333_v15 = vld [vmem:[%s1666_s9 + $0x134] ss:$8 sps:$4 sm:$0xff]   ;;  %v1336_v17 = vld [vmem:[%s1666_s9 + $0x130] ss:$8 sps:$4 sm:$0xff]   ;;  %v1339_v19 = vld [vmem:[%s1666_s9 + $0x144] ss:$8 sps:$4 sm:$0xff]  }
  0x62   : > { %936 = vmatpush1.bf16.msra.mxu1 %v1323_v8  ;;  %v1341_v20 = vld [vmem:[%s1666_s9 + $0x40] ss:$8 sps:$4 sm:$0xff]   ;;  %v1343_v22 = vld [vmem:[%s1666_s9 + $0x54] ss:$8 sps:$4 sm:$0xff]   ;;  %v1347_v24 = vld [vmem:[%s1666_s9 + $0x50] ss:$8 sps:$4 sm:$0xff]  }
  0x63   : > { %979 = vmatpush1.bf16.msra.mxu0 %v1324_v9  ;;  %937 = vmatprep.subr.bf16.mxu1 %v1325_v10  ;;  %v1342_v21 = vld [vmem:[%s1666_s9 + $0x140] ss:$8 sps:$4 sm:$0xff]   ;;  %v1345_v23 = vld [vmem:[%s1666_s9 + $0x154] ss:$8 sps:$4 sm:$0xff]   ;;  %v1348_v25 = vld [vmem:[%s1666_s9 + $0x150] ss:$8 sps:$4 sm:$0xff]  }
  0x64   : > { %980 = vmatprep.subr.bf16.mxu0 %v1327_v11  ;;  %v1349_v26 = vld [vmem:[%s1666_s9 + $0x64] ss:$8 sps:$4 sm:$0xff]   ;;  %v1353_v28 = vld [vmem:[%s1666_s9 + $0x60] ss:$8 sps:$4 sm:$0xff]   ;;  %v1355_v30 = vld [vmem:[%s1666_s9 + $0x74] ss:$8 sps:$4 sm:$0xff]  }
  0x65   : > { %v1351_v27 = vld [vmem:[%s1666_s9 + $0x164] ss:$8 sps:$4 sm:$0xff]   ;;  %v1354_v29 = vld [vmem:[%s1666_s9 + $0x160] ss:$8 sps:$4 sm:$0xff]   ;;  %v1357_v31 = vld [vmem:[%s1666_s9 + $0x174] ss:$8 sps:$4 sm:$0xff]  }
  0x66   : > { %938 = vmatpush1.bf16.msra.mxu1 %v1329_v12  ;;  %v1359_v32 = vld [vmem:[%s1666_s9 + $0x70] ss:$8 sps:$4 sm:$0xff]   ;;  %v1361_v34 = vld [vmem:[%s1666_s9 + $0x84] ss:$8 sps:$4 sm:$0xff]   ;;  %v1365_v36 = vld [vmem:[%s1666_s9 + $0x80] ss:$8 sps:$4 sm:$0xff]  }
  0x67   : > { %981 = vmatpush1.bf16.msra.mxu0 %v1330_v13  ;;  %939 = vmatprep.subr.bf16.mxu1 %v1331_v14  ;;  %v1360_v33 = vld [vmem:[%s1666_s9 + $0x170] ss:$8 sps:$4 sm:$0xff]   ;;  %v1363_v35 = vld [vmem:[%s1666_s9 + $0x184] ss:$8 sps:$4 sm:$0xff]   ;;  %v1366_v37 = vld [vmem:[%s1666_s9 + $0x180] ss:$8 sps:$4 sm:$0xff]  }
  0x68   : > { %982 = vmatprep.subr.bf16.mxu0 %v1333_v15  ;;  %v1367_v38 = vld [vmem:[%s1666_s9 + $0x94] ss:$8 sps:$4 sm:$0xff]   ;;  %v1371_v40 = vld [vmem:[%s1666_s9 + $0x90] ss:$8 sps:$4 sm:$0xff]   ;;  %v1373_v42 = vld [vmem:[%s1666_s9 + $0xa4] ss:$8 sps:$4 sm:$0xff]  }
  0x69   : > { %v1369_v39 = vld [vmem:[%s1666_s9 + $0x194] ss:$8 sps:$4 sm:$0xff]   ;;  %v1372_v41 = vld [vmem:[%s1666_s9 + $0x190] ss:$8 sps:$4 sm:$0xff]   ;;  %v1375_v43 = vld [vmem:[%s1666_s9 + $0x1a4] ss:$8 sps:$4 sm:$0xff]  }
  0x6a   : > { %940 = vmatpush1.bf16.msra.mxu1 %v1335_v16  ;;  %v1377_v44 = vld [vmem:[%s1666_s9 + $0xa0] ss:$8 sps:$4 sm:$0xff]   ;;  %v1379_v46 = vld [vmem:[%s1666_s9 + $0xb4] ss:$8 sps:$4 sm:$0xff]   ;;  %v1383_v48 = vld [vmem:[%s1666_s9 + $0xb0] ss:$8 sps:$4 sm:$0xff]  }
  0x6b   : > { %983 = vmatpush1.bf16.msra.mxu0 %v1336_v17  ;;  %941 = vmatprep.subr.bf16.mxu1 %v1337_v18  ;;  %v1378_v45 = vld [vmem:[%s1666_s9 + $0x1a0] ss:$8 sps:$4 sm:$0xff]   ;;  %v1381_v47 = vld [vmem:[%s1666_s9 + $0x1b4] ss:$8 sps:$4 sm:$0xff]   ;;  %v1384_v49 = vld [vmem:[%s1666_s9 + $0x1b0] ss:$8 sps:$4 sm:$0xff]  }
  0x6c   : > { %984 = vmatprep.subr.bf16.mxu0 %v1339_v19  ;;  %v1385_v50 = vld [vmem:[%s1666_s9 + $0xc4] ss:$8 sps:$4 sm:$0xff]   ;;  %v1389_v52 = vld [vmem:[%s1666_s9 + $0xc0] ss:$8 sps:$4 sm:$0xff]   ;;  %v1391_v54 = vld [vmem:[%s1666_s9 + $0xd4] ss:$8 sps:$4 sm:$0xff]  }
  0x6d   : > { %v1387_v51 = vld [vmem:[%s1666_s9 + $0x1c4] ss:$8 sps:$4 sm:$0xff]   ;;  %v1390_v53 = vld [vmem:[%s1666_s9 + $0x1c0] ss:$8 sps:$4 sm:$0xff]   ;;  %v1393_v55 = vld [vmem:[%s1666_s9 + $0x1d4] ss:$8 sps:$4 sm:$0xff]  }
  0x6e   : > { %942 = vmatpush1.bf16.msra.mxu1 %v1341_v20  ;;  %v1395_v56 = vld [vmem:[%s1666_s9 + $0xd0] ss:$8 sps:$4 sm:$0xff]   ;;  %v1397_v58 = vld [vmem:[%s1666_s9 + $0xe4] ss:$8 sps:$4 sm:$0xff]   ;;  %v1401_v60 = vld [vmem:[%s1666_s9 + $0xe0] ss:$8 sps:$4 sm:$0xff]  }
  0x6f   : > { %985 = vmatpush1.bf16.msra.mxu0 %v1342_v21  ;;  %943 = vmatprep.subr.bf16.mxu1 %v1343_v22  ;;  %v1396_v57 = vld [vmem:[%s1666_s9 + $0x1d0] ss:$8 sps:$4 sm:$0xff]   ;;  %v1399_v59 = vld [vmem:[%s1666_s9 + $0x1e4] ss:$8 sps:$4 sm:$0xff]   ;;  %v1402_v61 = vld [vmem:[%s1666_s9 + $0x1e0] ss:$8 sps:$4 sm:$0xff]  }
  0x70   : > { %986 = vmatprep.subr.bf16.mxu0 %v1345_v23  ;;  %v1403_v62 = vld [vmem:[%s1666_s9 + $0xf4] ss:$8 sps:$4 sm:$0xff]   ;;  %v1407_v0 = vld [vmem:[%s1666_s9 + $0xf0] ss:$8 sps:$4 sm:$0xff]   ;;  %s1777_s20 = smov (!%p507_p11, %s1185_s20), 7  ;;  %v584_v5 = vshrl.u32 %v583_v4, 7 }
  0x71   : > { %v1405_v63 = vld [vmem:[%s1666_s9 + $0x1f4] ss:$8 sps:$4 sm:$0xff]   ;;  %v1408_v1 = vld [vmem:[%s1666_s9 + $0x1f0] ss:$8 sps:$4 sm:$0xff]   ;;  %s509_s25 = scalar_lea.vmem %s1767_s2, %s1777_s20  ;;  %s1184_s26 = sshll.u32 %s466_s30, 4 }
  0x72   : > { %944 = vmatpush1.bf16.msra.mxu1 %v1347_v24  ;;  %v1409_v2 = vld [vmem:[%s1765_s0] ss:$16 sps:$4 sm:$0xff]   ;;  %v1412_v3 = vld [vmem:[%s1765_s0 + $0x8] ss:$16 sps:$4 sm:$0xff]   ;;  %v585_v6 = vsub.s32 0, %v584_v5  ;;  %v589_v8 = vsub.s32 1, %v584_v5 }
  0x73   : > { %987 = vmatpush1.bf16.msra.mxu0 %v1348_v25  ;;  %945 = vmatprep.subr.bf16.mxu1 %v1349_v26  ;;  %v581_v7 = vld [vmem:[%s509_s25] sm:$0x3]  ;;  %s497_s27 = scalar_lea.vmem [#allocation3], %s1184_s26  ;;  %s1264_s12 = sshll.u32 (%p1510_p6), %s1445_s14, 3 }
  0x74   : > { %988 = vmatprep.subr.bf16.mxu0 %v1351_v27  ;;  %v586_v9 = vrot.slane %v581_v7, %v585_v6  ;;  %v590_v10 = vrot.slane %v581_v7, %v589_v8  ;;  %s1045_s30 = scalar_lea.vmem (%p1510_p6), %s1768_s3, %s1264_s12 }
  0x76   : > { %946 = vmatpush1.bf16.msra.mxu1 %v1353_v28 }
  0x77   : > { %989 = vmatpush1.bf16.msra.mxu0 %v1354_v29  ;;  %947 = vmatprep.subr.bf16.mxu1 %v1355_v30 }
  0x78   : > { %990 = vmatprep.subr.bf16.mxu0 %v1357_v31 }
  0x7a   : > { %948 = vmatpush1.bf16.msra.mxu1 %v1359_v32 }
  0x7b   : > { %991 = vmatpush1.bf16.msra.mxu0 %v1360_v33  ;;  %949 = vmatprep.subr.bf16.mxu1 %v1361_v34 }
  0x7c   : > { %992 = vmatprep.subr.bf16.mxu0 %v1363_v35 }
  0x7e   : > { %950 = vmatpush1.bf16.msra.mxu1 %v1365_v36 }
  0x7f   : > { %993 = vmatpush1.bf16.msra.mxu0 %v1366_v37  ;;  %951 = vmatprep.subr.bf16.mxu1 %v1367_v38 }
  0x80   : > { %994 = vmatprep.subr.bf16.mxu0 %v1369_v39 }
  0x82   : > { %952 = vmatpush1.bf16.msra.mxu1 %v1371_v40 }
  0x83   : > { %995 = vmatpush1.bf16.msra.mxu0 %v1372_v41  ;;  %953 = vmatprep.subr.bf16.mxu1 %v1373_v42 }
  0x84   : > { %996 = vmatprep.subr.bf16.mxu0 %v1375_v43 }
  0x86   : > { %954 = vmatpush1.bf16.msra.mxu1 %v1377_v44 }
  0x87   : > { %997 = vmatpush1.bf16.msra.mxu0 %v1378_v45  ;;  %955 = vmatprep.subr.bf16.mxu1 %v1379_v46 }
  0x88   : > { %998 = vmatprep.subr.bf16.mxu0 %v1381_v47 }
  0x8a   : > { %956 = vmatpush1.bf16.msra.mxu1 %v1383_v48 }
  0x8b   : > { %999 = vmatpush1.bf16.msra.mxu0 %v1384_v49  ;;  %957 = vmatprep.subr.bf16.mxu1 %v1385_v50 }
  0x8c   : > { %1000 = vmatprep.subr.bf16.mxu0 %v1387_v51 }
  0x8e   : > { %958 = vmatpush1.bf16.msra.mxu1 %v1389_v52 }
  0x8f   : > { %1001 = vmatpush1.bf16.msra.mxu0 %v1390_v53  ;;  %959 = vmatprep.subr.bf16.mxu1 %v1391_v54 }
  0x90   : > { %1002 = vmatprep.subr.bf16.mxu0 %v1393_v55 }
  0x92   : > { %960 = vmatpush1.bf16.msra.mxu1 %v1395_v56 }
  0x93   : > { %1003 = vmatpush1.bf16.msra.mxu0 %v1396_v57  ;;  %961 = vmatprep.subr.bf16.mxu1 %v1397_v58 }
  0x94   : > { %1004 = vmatprep.subr.bf16.mxu0 %v1399_v59 }
  0x96   : > { %962 = vmatpush1.bf16.msra.mxu1 %v1401_v60 }
  0x97   : > { %1005 = vmatpush1.bf16.msra.mxu0 %v1402_v61  ;;  %963 = vmatprep.subr.bf16.mxu1 %v1403_v62 }
  0x98   : > { %1006 = vmatprep.subr.bf16.mxu0 %v1405_v63 }
  0x9a   : > { %964 = vmatpush1.bf16.msra.mxu1 %v1407_v0 }
  0x9b   : > { %1007 = vmatpush1.bf16.msra.mxu0 %v1408_v1 }
  0x9d   : > { %966 = vmatmul.mubr.bf16.vlgmr.msra.gmra.mrb[0].mxu1 %v1409_v2 }
  0x9e   : > { %1009 = vmatmul.mubr.bf16.vlgmr.msra.gmra.mrb[0].mxu0 %v1412_v3 }
 0x170   : > { %v967_v11 = vpop.f32.mrb[0].mxu1 }
 0x171   : > { %v1010_v12 = vpop.f32.mrb[0].mxu0  ;;  %v968_v13 = vadd.f32 %v967_v11, %v586_v9  ;;  %v969_v14 = vpop.f32.mrb[1].mxu1 }
 0x172   : > { %v1012_v15 = vpop.f32.mrb[1].mxu0  ;;  %v970_v16 = vadd.f32 %v969_v14, %v590_v10  ;;  %v971_v17 = vpop.f32.mrb[2].mxu1 }
 0x173   : > { %v1014_v18 = vpop.f32.mrb[2].mxu0  ;;  %v1011_v19 = vadd.f32 %v1010_v12, %v968_v13  ;;  %v972_v20 = vadd.f32 %v971_v17, %v586_v9  ;;  %v973_v21 = vpop.f32.mrb[3].mxu1 }
 0x174   : > { %v1016_v22 = vpop.f32.mrb[3].mxu0  ;;  %v1013_v23 = vadd.f32 %v1012_v15, %v970_v16  ;;  %v974_v24 = vadd.f32 %v973_v21, %v590_v10  ;;  %1039 = sbr.rel (!%p1510_p6) target bundleno = 387 (0x183), region = 74 }
 0x175   : > { %v1015_v25 = vadd.f32 %v1014_v18, %v972_v20 }
 0x176   : > { %v1262_v26 = vpack.c.bf16 %v1013_v23, %v1011_v19  ;;  %v1017_v27 = vadd.f32 %v1016_v22, %v974_v24 }
 0x178   : > { %1031 = vst [vmem:[%s497_s27] sm:$0xff] %v1262_v26  ;;  %v1263_v28 = vpack.c.bf16 %v1017_v27, %v1015_v25 }
 0x17a   : > { %1032 = vst [vmem:[%s497_s27 + $0x8] sm:$0xff] %v1263_v28 }
 0x17f   : > { %v1075_v29 = vld [vmem:[%s497_s27] sm:$0xff] }
 0x180   : > { %1076 = vst [vmem:[%s1045_s30] sm:$0xff] %v1075_v29 }
 0x181   : > { %v1077_v30 = vld [vmem:[%s497_s27 + $0x8] sm:$0xff] }
 0x182   : > { %1078 = vst [vmem:[%s1045_s30 + $0x20] sm:$0xff] %v1077_v30 }
 0x183 PF: > { %s13_s16 = sadd.s32 1, %s1453_s16   ;;  %s1770_s12 = smov %s1441_s13 }
 0x184   : > { %p10_p12 = scmp.ge.s32.totalorder %s13_s16, 6   ;;  %s1771_s13 = smov %s1515_s22 }
 0x185   : > { %s1772_s14 = smov %s1449_s15  ;;  %s1773_s15 = smov %s1775_s17 }
 0x186   :  { %12 = sbr.rel (!%p10_p12) target bundleno = 3 (0x3), region = 149 }

// kernel: _lambda_.49
= control target key start
LH: loop header
LB: loop body
LE: loop exit
PB: predicated region body
PF: predicated region fallthrough
CT: control target
= control target key end

     0   :  { %s1374_s12 = smov 0   ;;  %s1376_s13 = smov 0   ;;  %s1645_s0 = inlined_call_operand.vmem [shape: bf16[32,512], index: 0, kind: input, shape index: {}]   ;;  %s1646_s1 = inlined_call_operand.vmem [shape: bf16[512,256], index: 1, kind: input, shape index: {}]   ;;  %s1647_s2 = inlined_call_operand.vmem [shape: f32[1,256], index: 2, kind: input, shape index: {}]   ;;  %s1648_s3 = inlined_call_operand.vmem [shape: bf16[32,256], index: 3, kind: output, shape index: {}]  }
   0x1   :  { %s1378_s14 = smov 0   ;;  %s1380_s15 = smov 0  }
   0x2   :  { %s1382_s16 = smov 0  }
   0x3 LB: > { %s22_s17 = sadd.s32 1, %s1348_s15  ;;  %s1100_s18 = sadd.s32 4294967295, %s1352_s16   ;;  %s1352_s16 = sphi %s1382_s16, %s13_s16   ;;  %s1348_s15 = sphi %s1380_s15, %s1653_s15   ;;  %s1344_s14 = sphi %s1378_s14, %s1652_s14   ;;  %s1340_s13 = sphi %s1376_s13, %s1651_s13   ;;  %s1336_s12 = sphi %s1374_s12, %s1650_s12  }
   0x4   : > { %p23_p0 = scmp.ge.s32.totalorder %s22_s17, 2  ;;  %p65_p1 = scmp.ne.s32.totalorder %s1340_s13, %s1336_s12 }
   0x5   : > { %p66_p2 = scmp.eq.s32.totalorder %s1352_s16, 0  ;;  %p123_p4 = scmp.eq.s32.totalorder %s1100_s18, 1 }
   0x6   : > { %s1655_s17 = smov (%p23_p0, %s22_s17), 0  ;;  %s58_s20 = sadd.s32 1, %s1340_s13 }
   0x7   : > { %p67_p3 = por %p66_p2, %p65_p1  ;;  %s55_s19 = ssub.s32 %s1348_s15, %s1655_s17 }
   0x8   : > { %p56_p5 = scmp.eq.s32.totalorder %s55_s19, 0  ;;  %p1409_p6 = por %p123_p4, %p65_p1 }
   0x9   : > { %p1104_p7 = scmp.ge.s32.totalorder %s1352_s16, 2 }
   0xa   : > { %s1414_s22 = scalar_select %p56_p5, %s1340_s13, %s58_s20  }
   0xb   : > { %155 = sbr.rel (%p1104_p7) target bundleno = 64 (0x40), region = 20 }
  0x12   : > { %158 = sbr.rel (!%p67_p3) target bundleno = 64 (0x40), region = 24  ;;  %s160_s23 = sand.u32 (%p67_p3), 1, %s1340_s13  }
  0x13   : > { %s1106_s24 = sshll.u32 (%p67_p3), %s1348_s15, 2  ;;  %s1105_s25 = sshll.u32 (%p67_p3), %s160_s23, 8 }
  0x14   : > { %s1422_s28 = scalar_lea.vmem (%p67_p3), %s1646_s1, %s1106_s24  ;;  %s1426_s29 = scalar_lea.vmem (%p67_p3), [#allocation2], %s1105_s25 }
  0x15   : > { %v180_v0 = vld [vmem:[%s1422_s28] sm:$0xf] (%p67_p3)  ;;  %v182_v1 = vld [vmem:[%s1422_s28 + $0x8] sm:$0xf] (%p67_p3)  ;;  %v184_v2 = vld [vmem:[%s1422_s28 + $0x10] sm:$0xf] (%p67_p3) }
  0x16   : > { %181 = vst [vmem:[%s1426_s29] sm:$0xf] (%p67_p3), %v180_v0  ;;  %183 = vst [vmem:[%s1426_s29 + $0x4] sm:$0xf] (%p67_p3), %v182_v1  ;;  %v186_v3 = vld [vmem:[%s1422_s28 + $0x18] sm:$0xf] (%p67_p3) }
  0x17   : > { %v188_v4 = vld [vmem:[%s1422_s28 + $0x20] sm:$0xf] (%p67_p3)  ;;  %185 = vst [vmem:[%s1426_s29 + $0x8] sm:$0xf] (%p67_p3), %v184_v2  ;;  %187 = vst [vmem:[%s1426_s29 + $0xc] sm:$0xf] (%p67_p3), %v186_v3 }
  0x18   : > { %189 = vst [vmem:[%s1426_s29 + $0x10] sm:$0xf] (%p67_p3), %v188_v4  ;;  %v190_v5 = vld [vmem:[%s1422_s28 + $0x28] sm:$0xf] (%p67_p3)  ;;  %v192_v6 = vld [vmem:[%s1422_s28 + $0x30] sm:$0xf] (%p67_p3) }
  0x19   : > { %v194_v7 = vld [vmem:[%s1422_s28 + $0x38] sm:$0xf]  ;;  %191 = vst [vmem:[%s1426_s29 + $0x14] sm:$0xf] %v190_v5  ;;  %193 = vst [vmem:[%s1426_s29 + $0x18] sm:$0xf] %v192_v6 }
  0x1a   : > { %195 = vst [vmem:[%s1426_s29 + $0x1c] sm:$0xf] %v194_v7  ;;  %v196_v8 = vld [vmem:[%s1422_s28 + $0x40] sm:$0xf]  ;;  %v198_v9 = vld [vmem:[%s1422_s28 + $0x48] sm:$0xf] }
  0x1b   : > { %v200_v10 = vld [vmem:[%s1422_s28 + $0x50] sm:$0xf]  ;;  %197 = vst [vmem:[%s1426_s29 + $0x20] sm:$0xf] %v196_v8  ;;  %199 = vst [vmem:[%s1426_s29 + $0x24] sm:$0xf] %v198_v9 }
  0x1c   : > { %201 = vst [vmem:[%s1426_s29 + $0x28] sm:$0xf] %v200_v10  ;;  %v202_v11 = vld [vmem:[%s1422_s28 + $0x58] sm:$0xf]  ;;  %v204_v12 = vld [vmem:[%s1422_s28 + $0x60] sm:$0xf] }
  0x1d   : > { %v206_v13 = vld [vmem:[%s1422_s28 + $0x68] sm:$0xf]  ;;  %203 = vst [vmem:[%s1426_s29 + $0x2c] sm:$0xf] %v202_v11  ;;  %205 = vst [vmem:[%s1426_s29 + $0x30] sm:$0xf] %v204_v12 }
  0x1e   : > { %207 = vst [vmem:[%s1426_s29 + $0x34] sm:$0xf] %v206_v13  ;;  %v208_v14 = vld [vmem:[%s1422_s28 + $0x70] sm:$0xf]  ;;  %v210_v15 = vld [vmem:[%s1422_s28 + $0x78] sm:$0xf] }
  0x1f   : > { %v212_v16 = vld [vmem:[%s1422_s28 + $0x80] sm:$0xf]  ;;  %209 = vst [vmem:[%s1426_s29 + $0x38] sm:$0xf] %v208_v14  ;;  %211 = vst [vmem:[%s1426_s29 + $0x3c] sm:$0xf] %v210_v15 }
  0x20   : > { %213 = vst [vmem:[%s1426_s29 + $0x40] sm:$0xf] %v212_v16  ;;  %v214_v17 = vld [vmem:[%s1422_s28 + $0x88] sm:$0xf]  ;;  %v216_v18 = vld [vmem:[%s1422_s28 + $0x90] sm:$0xf] }
  0x21   : > { %v218_v19 = vld [vmem:[%s1422_s28 + $0x98] sm:$0xf]  ;;  %215 = vst [vmem:[%s1426_s29 + $0x44] sm:$0xf] %v214_v17  ;;  %217 = vst [vmem:[%s1426_s29 + $0x48] sm:$0xf] %v216_v18 }
  0x22   : > { %219 = vst [vmem:[%s1426_s29 + $0x4c] sm:$0xf] %v218_v19  ;;  %v220_v20 = vld [vmem:[%s1422_s28 + $0xa0] sm:$0xf]  ;;  %v222_v21 = vld [vmem:[%s1422_s28 + $0xa8] sm:$0xf] }
  0x23   : > { %v224_v22 = vld [vmem:[%s1422_s28 + $0xb0] sm:$0xf]  ;;  %221 = vst [vmem:[%s1426_s29 + $0x50] sm:$0xf] %v220_v20  ;;  %223 = vst [vmem:[%s1426_s29 + $0x54] sm:$0xf] %v222_v21 }
  0x24   : > { %225 = vst [vmem:[%s1426_s29 + $0x58] sm:$0xf] %v224_v22  ;;  %v226_v23 = vld [vmem:[%s1422_s28 + $0xb8] sm:$0xf]  ;;  %v228_v24 = vld [vmem:[%s1422_s28 + $0xc0] sm:$0xf] }
  0x25   : > { %v230_v25 = vld [vmem:[%s1422_s28 + $0xc8] sm:$0xf]  ;;  %227 = vst [vmem:[%s1426_s29 + $0x5c] sm:$0xf] %v226_v23  ;;  %229 = vst [vmem:[%s1426_s29 + $0x60] sm:$0xf] %v228_v24 }
  0x26   : > { %231 = vst [vmem:[%s1426_s29 + $0x64] sm:$0xf] %v230_v25  ;;  %v232_v26 = vld [vmem:[%s1422_s28 + $0xd0] sm:$0xf]  ;;  %v234_v27 = vld [vmem:[%s1422_s28 + $0xd8] sm:$0xf] }
  0x27   : > { %v236_v28 = vld [vmem:[%s1422_s28 + $0xe0] sm:$0xf]  ;;  %233 = vst [vmem:[%s1426_s29 + $0x68] sm:$0xf] %v232_v26  ;;  %235 = vst [vmem:[%s1426_s29 + $0x6c] sm:$0xf] %v234_v27 }
  0x28   : > { %237 = vst [vmem:[%s1426_s29 + $0x70] sm:$0xf] %v236_v28  ;;  %v238_v29 = vld [vmem:[%s1422_s28 + $0xe8] sm:$0xf]  ;;  %v240_v30 = vld [vmem:[%s1422_s28 + $0xf0] sm:$0xf] }
  0x29   : > { %v242_v31 = vld [vmem:[%s1422_s28 + $0xf8] sm:$0xf]  ;;  %239 = vst [vmem:[%s1426_s29 + $0x74] sm:$0xf] %v238_v29  ;;  %241 = vst [vmem:[%s1426_s29 + $0x78] sm:$0xf] %v240_v30 }
  0x2a   : > { %243 = vst [vmem:[%s1426_s29 + $0x7c] sm:$0xf] %v242_v31  ;;  %v244_v32 = vld [vmem:[%s1422_s28 + $0x100] sm:$0xf]  ;;  %v246_v33 = vld [vmem:[%s1422_s28 + $0x108] sm:$0xf] }
  0x2b   : > { %v248_v34 = vld [vmem:[%s1422_s28 + $0x110] sm:$0xf]  ;;  %245 = vst [vmem:[%s1426_s29 + $0x80] sm:$0xf] %v244_v32  ;;  %247 = vst [vmem:[%s1426_s29 + $0x84] sm:$0xf] %v246_v33 }
  0x2c   : > { %249 = vst [vmem:[%s1426_s29 + $0x88] sm:$0xf] %v248_v34  ;;  %v250_v35 = vld [vmem:[%s1422_s28 + $0x118] sm:$0xf]  ;;  %v252_v36 = vld [vmem:[%s1422_s28 + $0x120] sm:$0xf] }
  0x2d   : > { %v254_v37 = vld [vmem:[%s1422_s28 + $0x128] sm:$0xf]  ;;  %251 = vst [vmem:[%s1426_s29 + $0x8c] sm:$0xf] %v250_v35  ;;  %253 = vst [vmem:[%s1426_s29 + $0x90] sm:$0xf] %v252_v36 }
  0x2e   : > { %255 = vst [vmem:[%s1426_s29 + $0x94] sm:$0xf] %v254_v37  ;;  %v256_v38 = vld [vmem:[%s1422_s28 + $0x130] sm:$0xf]  ;;  %v258_v39 = vld [vmem:[%s1422_s28 + $0x138] sm:$0xf] }
  0x2f   : > { %v260_v40 = vld [vmem:[%s1422_s28 + $0x140] sm:$0xf]  ;;  %257 = vst [vmem:[%s1426_s29 + $0x98] sm:$0xf] %v256_v38  ;;  %259 = vst [vmem:[%s1426_s29 + $0x9c] sm:$0xf] %v258_v39 }
  0x30   : > { %261 = vst [vmem:[%s1426_s29 + $0xa0] sm:$0xf] %v260_v40  ;;  %v262_v41 = vld [vmem:[%s1422_s28 + $0x148] sm:$0xf]  ;;  %v264_v42 = vld [vmem:[%s1422_s28 + $0x150] sm:$0xf] }
  0x31   : > { %v266_v43 = vld [vmem:[%s1422_s28 + $0x158] sm:$0xf]  ;;  %263 = vst [vmem:[%s1426_s29 + $0xa4] sm:$0xf] %v262_v41  ;;  %265 = vst [vmem:[%s1426_s29 + $0xa8] sm:$0xf] %v264_v42 }
  0x32   : > { %267 = vst [vmem:[%s1426_s29 + $0xac] sm:$0xf] %v266_v43  ;;  %v268_v44 = vld [vmem:[%s1422_s28 + $0x160] sm:$0xf]  ;;  %v270_v45 = vld [vmem:[%s1422_s28 + $0x168] sm:$0xf] }
  0x33   : > { %v272_v46 = vld [vmem:[%s1422_s28 + $0x170] sm:$0xf]  ;;  %269 = vst [vmem:[%s1426_s29 + $0xb0] sm:$0xf] %v268_v44  ;;  %271 = vst [vmem:[%s1426_s29 + $0xb4] sm:$0xf] %v270_v45 }
  0x34   : > { %273 = vst [vmem:[%s1426_s29 + $0xb8] sm:$0xf] %v272_v46  ;;  %v274_v47 = vld [vmem:[%s1422_s28 + $0x178] sm:$0xf]  ;;  %v276_v48 = vld [vmem:[%s1422_s28 + $0x180] sm:$0xf] }
  0x35   : > { %v278_v49 = vld [vmem:[%s1422_s28 + $0x188] sm:$0xf]  ;;  %275 = vst [vmem:[%s1426_s29 + $0xbc] sm:$0xf] %v274_v47  ;;  %277 = vst [vmem:[%s1426_s29 + $0xc0] sm:$0xf] %v276_v48 }
  0x36   : > { %279 = vst [vmem:[%s1426_s29 + $0xc4] sm:$0xf] %v278_v49  ;;  %v280_v50 = vld [vmem:[%s1422_s28 + $0x190] sm:$0xf]  ;;  %v282_v51 = vld [vmem:[%s1422_s28 + $0x198] sm:$0xf] }
  0x37   : > { %v284_v52 = vld [vmem:[%s1422_s28 + $0x1a0] sm:$0xf]  ;;  %281 = vst [vmem:[%s1426_s29 + $0xc8] sm:$0xf] %v280_v50  ;;  %283 = vst [vmem:[%s1426_s29 + $0xcc] sm:$0xf] %v282_v51 }
  0x38   : > { %285 = vst [vmem:[%s1426_s29 + $0xd0] sm:$0xf] %v284_v52  ;;  %v286_v53 = vld [vmem:[%s1422_s28 + $0x1a8] sm:$0xf]  ;;  %v288_v54 = vld [vmem:[%s1422_s28 + $0x1b0] sm:$0xf] }
  0x39   : > { %v290_v55 = vld [vmem:[%s1422_s28 + $0x1b8] sm:$0xf]  ;;  %287 = vst [vmem:[%s1426_s29 + $0xd4] sm:$0xf] %v286_v53  ;;  %289 = vst [vmem:[%s1426_s29 + $0xd8] sm:$0xf] %v288_v54 }
  0x3a   : > { %291 = vst [vmem:[%s1426_s29 + $0xdc] sm:$0xf] %v290_v55  ;;  %v292_v56 = vld [vmem:[%s1422_s28 + $0x1c0] sm:$0xf]  ;;  %v294_v57 = vld [vmem:[%s1422_s28 + $0x1c8] sm:$0xf] }
  0x3b   : > { %v296_v58 = vld [vmem:[%s1422_s28 + $0x1d0] sm:$0xf]  ;;  %293 = vst [vmem:[%s1426_s29 + $0xe0] sm:$0xf] %v292_v56  ;;  %295 = vst [vmem:[%s1426_s29 + $0xe4] sm:$0xf] %v294_v57 }
  0x3c   : > { %297 = vst [vmem:[%s1426_s29 + $0xe8] sm:$0xf] %v296_v58  ;;  %v298_v59 = vld [vmem:[%s1422_s28 + $0x1d8] sm:$0xf]  ;;  %v300_v60 = vld [vmem:[%s1422_s28 + $0x1e0] sm:$0xf] }
  0x3d   : > { %v302_v61 = vld [vmem:[%s1422_s28 + $0x1e8] sm:$0xf]  ;;  %299 = vst [vmem:[%s1426_s29 + $0xec] sm:$0xf] %v298_v59  ;;  %301 = vst [vmem:[%s1426_s29 + $0xf0] sm:$0xf] %v300_v60 }
  0x3e   : > { %303 = vst [vmem:[%s1426_s29 + $0xf4] sm:$0xf] %v302_v61  ;;  %v304_v62 = vld [vmem:[%s1422_s28 + $0x1f0] sm:$0xf]  ;;  %v306_v63 = vld [vmem:[%s1422_s28 + $0x1f8] sm:$0xf] }
  0x3f   : > { %305 = vst [vmem:[%s1426_s29 + $0xf8] sm:$0xf] %v304_v62  ;;  %307 = vst [vmem:[%s1426_s29 + $0xfc] sm:$0xf] %v306_v63 }
  0x40 PF: > { %p1107_p8 = scmp.ge.s32.totalorder %s1352_s16, 1  ;;  %p463_p9 = scmp.lt.s32.totalorder %s1352_s16, 3 }
  0x42   : > { %p464_p10 = pnand %p1107_p8, %p463_p9 }
  0x43   : > { %s470_s30 = sand.u32 (!%p464_p10), 1, %s1336_s12   ;;  %v1304_v0 = vld [vmem:[%s1645_s0 + $0x4] ss:$16 sps:$4 sm:$0xff] (!%p464_p10)   ;;  %v1307_v1 = vld [vmem:[%s1645_s0 + $0xc] ss:$16 sps:$4 sm:$0xff] (!%p464_p10)   ;;  %p508_p11 = scmp.lt.s32.totalorder (!%p464_p10), %s1344_s14, 1 }
  0x44   : > { %467 = sbr.rel (%p464_p10) target bundleno = 346 (0x15a), region = 69  ;;  %s1108_s4 = sshll.u32 (!%p464_p10), %s470_s30, 8  ;;  %856 = vmatprep.mubr.bf16.mxu0 (!%p464_p10), %v1304_v0  ;;  %905 = vmatprep.mubr.bf16.mxu1 (!%p464_p10), %v1307_v1  ;;  %v1302_v32 = vld [vmem:[%s1645_s0] ss:$16 sps:$4 sm:$0xff] (!%p464_p10)   ;;  %v1305_v34 = vld [vmem:[%s1645_s0 + $0x8] ss:$16 sps:$4 sm:$0xff] (!%p464_p10)  }
  0x45   : > { %s1565_s9 = scalar_lea.vmem (!%p464_p10), [#allocation2], %s1108_s4  ;;  %v1308_v36 = vld [vmem:[%s1645_s0 + $0x24] ss:$16 sps:$4 sm:$0xff] (!%p464_p10)   ;;  %v1310_v37 = vld [vmem:[%s1645_s0 + $0x2c] ss:$16 sps:$4 sm:$0xff] (!%p464_p10)   ;;  %s1109_s8 = sshll.u32 (!%p464_p10), %s470_s30, 4 }
  0x46   : > { %v1270_v2 = vld [vmem:[%s1565_s9 + $0x40] sm:$0xff] (!%p464_p10)   ;;  %v1274_v6 = vld [vmem:[%s1565_s9 + $0x48] sm:$0xff] (!%p464_p10)   ;;  %v1278_v10 = vld [vmem:[%s1565_s9 + $0x50] sm:$0xff] (!%p464_p10)  }
  0x47   : > { %v1271_v3 = vld [vmem:[%s1565_s9 + $0xc0] sm:$0xff] (!%p464_p10)   ;;  %1174 = vmatprep.subr.bf16.mxu0 (!%p464_p10), %v1270_v2  ;;  %v1275_v7 = vld [vmem:[%s1565_s9 + $0xc8] sm:$0xff] (!%p464_p10)   ;;  %v1279_v11 = vld [vmem:[%s1565_s9 + $0xd0] sm:$0xff] (!%p464_p10)  }
  0x48   : > { %v1272_v4 = vld [vmem:[%s1565_s9] sm:$0xff] (!%p464_p10)   ;;  %1202 = vmatprep.subr.bf16.mxu1 (!%p464_p10), %v1271_v3  ;;  %v1276_v8 = vld [vmem:[%s1565_s9 + $0x8] sm:$0xff] (!%p464_p10)   ;;  %v1280_v12 = vld [vmem:[%s1565_s9 + $0x10] sm:$0xff] (!%p464_p10)  }
  0x49   : > { %v1273_v5 = vld [vmem:[%s1565_s9 + $0x80] sm:$0xff] (!%p464_p10)   ;;  %1175 = vmatpush3.bf16.msra.mxu0 (!%p464_p10), %v1272_v4  ;;  %v1277_v9 = vld [vmem:[%s1565_s9 + $0x88] sm:$0xff] (!%p464_p10)   ;;  %v1281_v13 = vld [vmem:[%s1565_s9 + $0x90] sm:$0xff] (!%p464_p10)  }
  0x4a   : > { %1203 = vmatpush3.bf16.msra.mxu1 (!%p464_p10), %v1273_v5  ;;  %1176 = vmatprep.subr.bf16.mxu0 (!%p464_p10), %v1274_v6  ;;  %v1282_v14 = vld [vmem:[%s1565_s9 + $0x58] sm:$0xff] (!%p464_p10)   ;;  %v1286_v18 = vld [vmem:[%s1565_s9 + $0x60] sm:$0xff] (!%p464_p10)   ;;  %v1290_v22 = vld [vmem:[%s1565_s9 + $0x68] sm:$0xff] (!%p464_p10)  }
  0x4b   : > { %1204 = vmatprep.subr.bf16.mxu1 %v1275_v7  ;;  %v1283_v15 = vld [vmem:[%s1565_s9 + $0xd8] sm:$0xff]   ;;  %v1287_v19 = vld [vmem:[%s1565_s9 + $0xe0] sm:$0xff]   ;;  %v1291_v23 = vld [vmem:[%s1565_s9 + $0xe8] sm:$0xff]   ;;  %s509_s4 = scalar_select %p508_p11, %s1344_s14, 1 }
  0x4c   : > { %v1284_v16 = vld [vmem:[%s1565_s9 + $0x18] sm:$0xff]   ;;  %v1288_v20 = vld [vmem:[%s1565_s9 + $0x20] sm:$0xff]   ;;  %v1292_v24 = vld [vmem:[%s1565_s9 + $0x28] sm:$0xff]   ;;  %s1156_s12 = sshll.u32 (%p1409_p6), %s1344_s14, 2 }
  0x4d   : > { %1177 = vmatpush3.bf16.msra.mxu0 %v1276_v8  ;;  %v1285_v17 = vld [vmem:[%s1565_s9 + $0x98] sm:$0xff]   ;;  %v1289_v21 = vld [vmem:[%s1565_s9 + $0xa0] sm:$0xff]   ;;  %v1293_v25 = vld [vmem:[%s1565_s9 + $0xa8] sm:$0xff]   ;;  %s510_s7 = scalar_lea.vmem %s1647_s2, %s509_s4  ;;  %s957_s11 = scalar_lea.vmem (%p1409_p6), %s1648_s3, %s1156_s12 }
  0x4e   : > { %1205 = vmatpush3.bf16.msra.mxu1 %v1277_v9  ;;  %1178 = vmatprep.subr.bf16.mxu0 %v1278_v10  ;;  %v1294_v26 = vld [vmem:[%s1565_s9 + $0x70] sm:$0xff]   ;;  %v1298_v30 = vld [vmem:[%s1565_s9 + $0x78] sm:$0xff]   ;;  %v1110_v42 = vld [vmem:[%s510_s7] ss:$0 sm:$0xff] }
  0x4f   : > { %1206 = vmatprep.subr.bf16.mxu1 %v1279_v11  ;;  %v1295_v27 = vld [vmem:[%s1565_s9 + $0xf0] sm:$0xff]   ;;  %v1299_v31 = vld [vmem:[%s1565_s9 + $0xf8] sm:$0xff]  }
  0x50   : > { %v1296_v28 = vld [vmem:[%s1565_s9 + $0x30] sm:$0xff]   ;;  %v1300_v33 = vld [vmem:[%s1565_s9 + $0x38] sm:$0xff]  }
  0x51   : > { %1179 = vmatpush3.bf16.msra.mxu0 %v1280_v12  ;;  %v1297_v29 = vld [vmem:[%s1565_s9 + $0xb0] sm:$0xff]   ;;  %v1301_v35 = vld [vmem:[%s1565_s9 + $0xb8] sm:$0xff]   ;;  %s500_s9 = scalar_lea.vmem [#allocation3], %s1109_s8 }
  0x52   : > { %1207 = vmatpush3.bf16.msra.mxu1 %v1281_v13  ;;  %1180 = vmatprep.subr.bf16.mxu0 %v1282_v14  ;;  %v1312_v38 = vld [vmem:[%s1645_s0 + $0x20] ss:$16 sps:$4 sm:$0xff]   ;;  %v1313_v39 = vld [vmem:[%s1645_s0 + $0x28] ss:$16 sps:$4 sm:$0xff]  }
  0x53   : > { %1208 = vmatprep.subr.bf16.mxu1 %v1283_v15 }
  0x55   : > { %1181 = vmatpush3.bf16.msra.mxu0 %v1284_v16 }
  0x56   : > { %1209 = vmatpush3.bf16.msra.mxu1 %v1285_v17  ;;  %1182 = vmatprep.subr.bf16.mxu0 %v1286_v18 }
  0x57   : > { %1210 = vmatprep.subr.bf16.mxu1 %v1287_v19 }
  0x59   : > { %1183 = vmatpush3.bf16.msra.mxu0 %v1288_v20 }
  0x5a   : > { %1211 = vmatpush3.bf16.msra.mxu1 %v1289_v21  ;;  %1184 = vmatprep.subr.bf16.mxu0 %v1290_v22 }
  0x5b   : > { %1212 = vmatprep.subr.bf16.mxu1 %v1291_v23 }
  0x5d   : > { %1185 = vmatpush3.bf16.msra.mxu0 %v1292_v24 }
  0x5e   : > { %1213 = vmatpush3.bf16.msra.mxu1 %v1293_v25  ;;  %1186 = vmatprep.subr.bf16.mxu0 %v1294_v26 }
  0x5f   : > { %1214 = vmatprep.subr.bf16.mxu1 %v1295_v27 }
  0x61   : > { %1187 = vmatpush3.bf16.msra.mxu0 %v1296_v28 }
  0x62   : > { %1215 = vmatpush3.bf16.msra.mxu1 %v1297_v29  ;;  %1188 = vmatprep.subr.bf16.mxu0 %v1298_v30 }
  0x63   : > { %1216 = vmatprep.subr.bf16.mxu1 %v1299_v31 }
  0x65   : > { %1189 = vmatpush3.bf16.msra.mxu0 %v1300_v33 }
  0x66   : > { %1217 = vmatpush3.bf16.msra.mxu1 %v1301_v35 }
  0x68   : > { %857 = vmatmul.mubr.bf16.vlgmr.msra.gmra.mrb[0].mxu0 %v1302_v32 }
  0x69   : > { %906 = vmatmul.mubr.bf16.vlgmr.msra.gmra.mrb[0].mxu1 %v1305_v34  ;;  %864 = vmatprep.mubr.bf16.mxu0 %v1308_v36 }
  0x6a   : > { %913 = vmatprep.mubr.bf16.mxu1 %v1310_v37 }
  0x70   : > { %865 = vmatmul.mubr.bf16.gmra.mrb[4].mxu0 %v1312_v38 }
  0x71   : > { %914 = vmatmul.mubr.bf16.gmra.mrb[4].mxu1 %v1313_v39 }
 0x13b   : > { %v1190_v40 = vpop.f32.mrb[0].mxu0 }
 0x13c   : > { %v1218_v41 = vpop.f32.mrb[0].mxu1  ;;  %v1191_v43 = vpop.f32.mrb[1].mxu0 }
 0x13d   : > { %v1192_v44 = vadd.f32 %v1191_v43, %v1190_v40  ;;  %v1219_v45 = vpop.f32.mrb[1].mxu1  ;;  %v1193_v46 = vpop.f32.mrb[2].mxu0 }
 0x13e   : > { %v1220_v47 = vadd.f32 %v1219_v45, %v1218_v41  ;;  %v1221_v48 = vpop.f32.mrb[2].mxu1  ;;  %v1194_v49 = vpop.f32.mrb[3].mxu0 }
 0x13f   : > { %v859_v50 = vadd.f32 %v1192_v44, %v1110_v42  ;;  %v1195_v51 = vadd.f32 %v1194_v49, %v1193_v46  ;;  %v1222_v52 = vpop.f32.mrb[3].mxu1 }
 0x140   : > { %v1223_v53 = vadd.f32 %v1222_v52, %v1221_v48 }
 0x141   : > { %v908_v54 = vadd.f32 %v1220_v47, %v859_v50  ;;  %v862_v55 = vadd.f32 %v1195_v51, %v1110_v42 }
 0x143   : > { %v911_v56 = vadd.f32 %v1223_v53, %v862_v55  ;;  %v1196_v57 = vpop.f32.mrb[4].mxu0  ;;  %v922_v60 = vmax.f32 %v908_v54, 0.0 }
 0x144   : > { %v1224_v58 = vpop.f32.mrb[4].mxu1  ;;  %v1197_v59 = vpop.f32.mrb[5].mxu0 }
 0x145   : > { %v923_v61 = vmax.f32 %v911_v56, 0.0  ;;  %v1198_v62 = vadd.f32 %v1197_v59, %v1196_v57  ;;  %v1225_v63 = vpop.f32.mrb[5].mxu1  ;;  %v1199_v0 = vpop.f32.mrb[6].mxu0 }
 0x146   : > { %v1226_v1 = vadd.f32 %v1225_v63, %v1224_v58  ;;  %v1227_v2 = vpop.f32.mrb[6].mxu1  ;;  %v1200_v3 = vpop.f32.mrb[7].mxu0 }
 0x147   : > { %v1166_v4 = vpack.c.bf16 %v923_v61, %v922_v60  ;;  %v867_v5 = vadd.f32 %v1198_v62, %v1110_v42  ;;  %v1201_v6 = vadd.f32 %v1200_v3, %v1199_v0  ;;  %v1228_v7 = vpop.f32.mrb[7].mxu1 }
 0x148   : > { %v1229_v8 = vadd.f32 %v1228_v7, %v1227_v2 }
 0x149   : > { %1167 = vst [vmem:[%s500_s9] sm:$0xff] %v1166_v4   ;;  %v916_v9 = vadd.f32 %v1226_v1, %v867_v5  ;;  %v870_v10 = vadd.f32 %v1201_v6, %v1110_v42 }
 0x14b   : > { %v919_v11 = vadd.f32 %v1229_v8, %v870_v10  ;;  %v924_v12 = vmax.f32 %v916_v9, 0.0  ;;  %952 = sbr.rel (!%p1409_p6) target bundleno = 346 (0x15a), region = 77 }
 0x14d   : > { %v925_v13 = vmax.f32 %v919_v11, 0.0 }
 0x14f   : > { %v1171_v14 = vpack.c.bf16 %v925_v13, %v924_v12 }
 0x150   : > { %v973_v15 = vld [vmem:[%s500_s9] sm:$0xf] (%p1409_p6)  ;;  %v975_v16 = vld [vmem:[%s500_s9 + $0x4] sm:$0xf] (%p1409_p6) }
 0x151   : > { %1173 = vst [vmem:[%s500_s9 + $0x8] sm:$0xff] %v1171_v14   ;;  %974 = vst [vmem:[%s957_s11] sm:$0xf] (%p1409_p6), %v973_v15 }
 0x152   : > { %976 = vst [vmem:[%s957_s11 + $0x8] sm:$0xf] %v975_v16 }
 0x158   : > { %v977_v17 = vld [vmem:[%s500_s9 + $0x8] sm:$0xf]  ;;  %v979_v18 = vld [vmem:[%s500_s9 + $0xc] sm:$0xf] }
 0x159   : > { %978 = vst [vmem:[%s957_s11 + $0x10] sm:$0xf] %v977_v17  ;;  %980 = vst [vmem:[%s957_s11 + $0x18] sm:$0xf] %v979_v18 }
 0x15a PF: > { %s13_s16 = sadd.s32 1, %s1352_s16   ;;  %s1650_s12 = smov %s1340_s13 }
 0x15b   : > { %p10_p12 = scmp.ge.s32.totalorder %s13_s16, 4   ;;  %s1651_s13 = smov %s1414_s22 }
 0x15c   : > { %s1652_s14 = smov %s1348_s15  ;;  %s1653_s15 = smov %s1655_s17 }
 0x15d   :  { %12 = sbr.rel (!%p10_p12) target bundleno = 3 (0x3), region = 155 }

// kernel: _lambda_.51
= control target key start
LH: loop header
LB: loop body
LE: loop exit
PB: predicated region body
PF: predicated region fallthrough
CT: control target
= control target key end

     0   :  { %s2006_s12 = smov 0   ;;  %s2008_s13 = smov 0   ;;  %s2469_s0 = inlined_call_operand.vmem [shape: bf16[16,1024], index: 0, kind: input, shape index: {}]   ;;  %s2470_s1 = inlined_call_operand.vmem [shape: bf16[1024,256], index: 1, kind: input, shape index: {}]   ;;  %s2471_s2 = inlined_call_operand.vmem [shape: f32[1,256], index: 2, kind: input, shape index: {}]   ;;  %s2472_s3 = inlined_call_operand.vmem [shape: bf16[16,256], index: 3, kind: output, shape index: {}]  }
   0x1   :  { %s2010_s14 = smov 0   ;;  %s2012_s15 = smov 0  }
   0x2   :  { %s2014_s16 = smov 0  }
   0x3 LB: > { %s22_s17 = sadd.s32 1, %s1980_s15  ;;  %s1658_s18 = sadd.s32 4294967295, %s1984_s16   ;;  %s1984_s16 = sphi %s2014_s16, %s13_s16   ;;  %s1980_s15 = sphi %s2012_s15, %s2477_s15   ;;  %s1976_s14 = sphi %s2010_s14, %s2476_s14   ;;  %s1972_s13 = sphi %s2008_s13, %s2475_s13   ;;  %s1968_s12 = sphi %s2006_s12, %s2474_s12  }
   0x4   : > { %p23_p0 = scmp.ge.s32.totalorder %s22_s17, 2  ;;  %p65_p1 = scmp.ne.s32.totalorder %s1972_s13, %s1968_s12 }
   0x5   : > { %p66_p2 = scmp.eq.s32.totalorder %s1984_s16, 0  ;;  %p123_p4 = scmp.eq.s32.totalorder %s1658_s18, 1 }
   0x6   : > { %s2479_s17 = smov (%p23_p0, %s22_s17), 0  ;;  %s58_s20 = sadd.s32 1, %s1972_s13 }
   0x7   : > { %p67_p3 = por %p66_p2, %p65_p1  ;;  %s55_s19 = ssub.s32 %s1980_s15, %s2479_s17 }
   0x8   : > { %p56_p5 = scmp.eq.s32.totalorder %s55_s19, 0  ;;  %p2041_p6 = por %p123_p4, %p65_p1 }
   0x9   : > { %p1662_p7 = scmp.ge.s32.totalorder %s1984_s16, 2 }
   0xa   : > { %s2046_s22 = scalar_select %p56_p5, %s1972_s13, %s58_s20  }
   0xb   : > { %155 = sbr.rel (%p1662_p7) target bundleno = 107 (0x6b), region = 20 }
  0x12   : > { %158 = sbr.rel (!%p67_p3) target bundleno = 107 (0x6b), region = 24  ;;  %s160_s23 = sand.u32 (%p67_p3), 1, %s1972_s13  }
  0x13   : > { %s1664_s24 = sshll.u32 (%p67_p3), %s1980_s15, 2  ;;  %s1663_s25 = sshll.u32 (%p67_p3), %s160_s23, 9 }
  0x14   : > { %s2054_s28 = scalar_lea.vmem (%p67_p3), %s2470_s1, %s1664_s24  ;;  %s2058_s29 = scalar_lea.vmem (%p67_p3), [#allocation2], %s1663_s25 }
  0x15   : > { %v180_v0 = vld [vmem:[%s2054_s28] sm:$0xf] (%p67_p3)  ;;  %v182_v1 = vld [vmem:[%s2054_s28 + $0x8] sm:$0xf] (%p67_p3)  ;;  %v184_v2 = vld [vmem:[%s2054_s28 + $0x10] sm:$0xf] (%p67_p3) }
  0x16   : > { %181 = vst [vmem:[%s2058_s29] sm:$0xf] (%p67_p3), %v180_v0  ;;  %183 = vst [vmem:[%s2058_s29 + $0x4] sm:$0xf] (%p67_p3), %v182_v1  ;;  %v186_v3 = vld [vmem:[%s2054_s28 + $0x18] sm:$0xf] (%p67_p3) }
  0x17   : > { %v188_v4 = vld [vmem:[%s2054_s28 + $0x20] sm:$0xf] (%p67_p3)  ;;  %185 = vst [vmem:[%s2058_s29 + $0x8] sm:$0xf] (%p67_p3), %v184_v2  ;;  %187 = vst [vmem:[%s2058_s29 + $0xc] sm:$0xf] (%p67_p3), %v186_v3 }
  0x18   : > { %189 = vst [vmem:[%s2058_s29 + $0x10] sm:$0xf] (%p67_p3), %v188_v4  ;;  %v190_v5 = vld [vmem:[%s2054_s28 + $0x28] sm:$0xf] (%p67_p3)  ;;  %v192_v6 = vld [vmem:[%s2054_s28 + $0x30] sm:$0xf] (%p67_p3) }
  0x19   : > { %v194_v7 = vld [vmem:[%s2054_s28 + $0x38] sm:$0xf]  ;;  %191 = vst [vmem:[%s2058_s29 + $0x14] sm:$0xf] %v190_v5  ;;  %193 = vst [vmem:[%s2058_s29 + $0x18] sm:$0xf] %v192_v6 }
  0x1a   : > { %195 = vst [vmem:[%s2058_s29 + $0x1c] sm:$0xf] %v194_v7  ;;  %v196_v8 = vld [vmem:[%s2054_s28 + $0x40] sm:$0xf]  ;;  %v198_v9 = vld [vmem:[%s2054_s28 + $0x48] sm:$0xf] }
  0x1b   : > { %v200_v10 = vld [vmem:[%s2054_s28 + $0x50] sm:$0xf]  ;;  %197 = vst [vmem:[%s2058_s29 + $0x20] sm:$0xf] %v196_v8  ;;  %199 = vst [vmem:[%s2058_s29 + $0x24] sm:$0xf] %v198_v9 }
  0x1c   : > { %201 = vst [vmem:[%s2058_s29 + $0x28] sm:$0xf] %v200_v10  ;;  %v202_v11 = vld [vmem:[%s2054_s28 + $0x58] sm:$0xf]  ;;  %v204_v12 = vld [vmem:[%s2054_s28 + $0x60] sm:$0xf] }
  0x1d   : > { %v206_v13 = vld [vmem:[%s2054_s28 + $0x68] sm:$0xf]  ;;  %203 = vst [vmem:[%s2058_s29 + $0x2c] sm:$0xf] %v202_v11  ;;  %205 = vst [vmem:[%s2058_s29 + $0x30] sm:$0xf] %v204_v12 }
  0x1e   : > { %207 = vst [vmem:[%s2058_s29 + $0x34] sm:$0xf] %v206_v13  ;;  %v208_v14 = vld [vmem:[%s2054_s28 + $0x70] sm:$0xf]  ;;  %v210_v15 = vld [vmem:[%s2054_s28 + $0x78] sm:$0xf] }
  0x1f   : > { %v212_v16 = vld [vmem:[%s2054_s28 + $0x80] sm:$0xf]  ;;  %209 = vst [vmem:[%s2058_s29 + $0x38] sm:$0xf] %v208_v14  ;;  %211 = vst [vmem:[%s2058_s29 + $0x3c] sm:$0xf] %v210_v15 }
  0x20   : > { %213 = vst [vmem:[%s2058_s29 + $0x40] sm:$0xf] %v212_v16  ;;  %v214_v17 = vld [vmem:[%s2054_s28 + $0x88] sm:$0xf]  ;;  %v216_v18 = vld [vmem:[%s2054_s28 + $0x90] sm:$0xf] }
  0x21   : > { %v218_v19 = vld [vmem:[%s2054_s28 + $0x98] sm:$0xf]  ;;  %215 = vst [vmem:[%s2058_s29 + $0x44] sm:$0xf] %v214_v17  ;;  %217 = vst [vmem:[%s2058_s29 + $0x48] sm:$0xf] %v216_v18 }
  0x22   : > { %219 = vst [vmem:[%s2058_s29 + $0x4c] sm:$0xf] %v218_v19  ;;  %v220_v20 = vld [vmem:[%s2054_s28 + $0xa0] sm:$0xf]  ;;  %v222_v21 = vld [vmem:[%s2054_s28 + $0xa8] sm:$0xf] }
  0x23   : > { %v224_v22 = vld [vmem:[%s2054_s28 + $0xb0] sm:$0xf]  ;;  %221 = vst [vmem:[%s2058_s29 + $0x50] sm:$0xf] %v220_v20  ;;  %223 = vst [vmem:[%s2058_s29 + $0x54] sm:$0xf] %v222_v21 }
  0x24   : > { %225 = vst [vmem:[%s2058_s29 + $0x58] sm:$0xf] %v224_v22  ;;  %v226_v23 = vld [vmem:[%s2054_s28 + $0xb8] sm:$0xf]  ;;  %v228_v24 = vld [vmem:[%s2054_s28 + $0xc0] sm:$0xf] }
  0x25   : > { %v230_v25 = vld [vmem:[%s2054_s28 + $0xc8] sm:$0xf]  ;;  %227 = vst [vmem:[%s2058_s29 + $0x5c] sm:$0xf] %v226_v23  ;;  %229 = vst [vmem:[%s2058_s29 + $0x60] sm:$0xf] %v228_v24 }
  0x26   : > { %231 = vst [vmem:[%s2058_s29 + $0x64] sm:$0xf] %v230_v25  ;;  %v232_v26 = vld [vmem:[%s2054_s28 + $0xd0] sm:$0xf]  ;;  %v234_v27 = vld [vmem:[%s2054_s28 + $0xd8] sm:$0xf] }
  0x27   : > { %v236_v28 = vld [vmem:[%s2054_s28 + $0xe0] sm:$0xf]  ;;  %233 = vst [vmem:[%s2058_s29 + $0x68] sm:$0xf] %v232_v26  ;;  %235 = vst [vmem:[%s2058_s29 + $0x6c] sm:$0xf] %v234_v27 }
  0x28   : > { %237 = vst [vmem:[%s2058_s29 + $0x70] sm:$0xf] %v236_v28  ;;  %v238_v29 = vld [vmem:[%s2054_s28 + $0xe8] sm:$0xf]  ;;  %v240_v30 = vld [vmem:[%s2054_s28 + $0xf0] sm:$0xf] }
  0x29   : > { %v242_v31 = vld [vmem:[%s2054_s28 + $0xf8] sm:$0xf]  ;;  %239 = vst [vmem:[%s2058_s29 + $0x74] sm:$0xf] %v238_v29  ;;  %241 = vst [vmem:[%s2058_s29 + $0x78] sm:$0xf] %v240_v30 }
  0x2a   : > { %243 = vst [vmem:[%s2058_s29 + $0x7c] sm:$0xf] %v242_v31  ;;  %v244_v32 = vld [vmem:[%s2054_s28 + $0x100] sm:$0xf]  ;;  %v246_v33 = vld [vmem:[%s2054_s28 + $0x108] sm:$0xf] }
  0x2b   : > { %v248_v34 = vld [vmem:[%s2054_s28 + $0x110] sm:$0xf]  ;;  %245 = vst [vmem:[%s2058_s29 + $0x80] sm:$0xf] %v244_v32  ;;  %247 = vst [vmem:[%s2058_s29 + $0x84] sm:$0xf] %v246_v33 }
  0x2c   : > { %249 = vst [vmem:[%s2058_s29 + $0x88] sm:$0xf] %v248_v34  ;;  %v250_v35 = vld [vmem:[%s2054_s28 + $0x118] sm:$0xf]  ;;  %v252_v36 = vld [vmem:[%s2054_s28 + $0x120] sm:$0xf] }
  0x2d   : > { %v254_v37 = vld [vmem:[%s2054_s28 + $0x128] sm:$0xf]  ;;  %251 = vst [vmem:[%s2058_s29 + $0x8c] sm:$0xf] %v250_v35  ;;  %253 = vst [vmem:[%s2058_s29 + $0x90] sm:$0xf] %v252_v36 }
  0x2e   : > { %255 = vst [vmem:[%s2058_s29 + $0x94] sm:$0xf] %v254_v37  ;;  %v256_v38 = vld [vmem:[%s2054_s28 + $0x130] sm:$0xf]  ;;  %v258_v39 = vld [vmem:[%s2054_s28 + $0x138] sm:$0xf] }
  0x2f   : > { %v260_v40 = vld [vmem:[%s2054_s28 + $0x140] sm:$0xf]  ;;  %257 = vst [vmem:[%s2058_s29 + $0x98] sm:$0xf] %v256_v38  ;;  %259 = vst [vmem:[%s2058_s29 + $0x9c] sm:$0xf] %v258_v39 }
  0x30   : > { %261 = vst [vmem:[%s2058_s29 + $0xa0] sm:$0xf] %v260_v40  ;;  %v262_v41 = vld [vmem:[%s2054_s28 + $0x148] sm:$0xf]  ;;  %v264_v42 = vld [vmem:[%s2054_s28 + $0x150] sm:$0xf] }
  0x31   : > { %v266_v43 = vld [vmem:[%s2054_s28 + $0x158] sm:$0xf]  ;;  %263 = vst [vmem:[%s2058_s29 + $0xa4] sm:$0xf] %v262_v41  ;;  %265 = vst [vmem:[%s2058_s29 + $0xa8] sm:$0xf] %v264_v42 }
  0x32   : > { %267 = vst [vmem:[%s2058_s29 + $0xac] sm:$0xf] %v266_v43  ;;  %v268_v44 = vld [vmem:[%s2054_s28 + $0x160] sm:$0xf]  ;;  %v270_v45 = vld [vmem:[%s2054_s28 + $0x168] sm:$0xf] }
  0x33   : > { %v272_v46 = vld [vmem:[%s2054_s28 + $0x170] sm:$0xf]  ;;  %269 = vst [vmem:[%s2058_s29 + $0xb0] sm:$0xf] %v268_v44  ;;  %271 = vst [vmem:[%s2058_s29 + $0xb4] sm:$0xf] %v270_v45 }
  0x34   : > { %273 = vst [vmem:[%s2058_s29 + $0xb8] sm:$0xf] %v272_v46  ;;  %v274_v47 = vld [vmem:[%s2054_s28 + $0x178] sm:$0xf]  ;;  %v276_v48 = vld [vmem:[%s2054_s28 + $0x180] sm:$0xf] }
  0x35   : > { %v278_v49 = vld [vmem:[%s2054_s28 + $0x188] sm:$0xf]  ;;  %275 = vst [vmem:[%s2058_s29 + $0xbc] sm:$0xf] %v274_v47  ;;  %277 = vst [vmem:[%s2058_s29 + $0xc0] sm:$0xf] %v276_v48 }
  0x36   : > { %279 = vst [vmem:[%s2058_s29 + $0xc4] sm:$0xf] %v278_v49  ;;  %v280_v50 = vld [vmem:[%s2054_s28 + $0x190] sm:$0xf]  ;;  %v282_v51 = vld [vmem:[%s2054_s28 + $0x198] sm:$0xf] }
  0x37   : > { %v284_v52 = vld [vmem:[%s2054_s28 + $0x1a0] sm:$0xf]  ;;  %281 = vst [vmem:[%s2058_s29 + $0xc8] sm:$0xf] %v280_v50  ;;  %283 = vst [vmem:[%s2058_s29 + $0xcc] sm:$0xf] %v282_v51 }
  0x38   : > { %285 = vst [vmem:[%s2058_s29 + $0xd0] sm:$0xf] %v284_v52  ;;  %v286_v53 = vld [vmem:[%s2054_s28 + $0x1a8] sm:$0xf]  ;;  %v288_v54 = vld [vmem:[%s2054_s28 + $0x1b0] sm:$0xf] }
  0x39   : > { %v290_v55 = vld [vmem:[%s2054_s28 + $0x1b8] sm:$0xf]  ;;  %287 = vst [vmem:[%s2058_s29 + $0xd4] sm:$0xf] %v286_v53  ;;  %289 = vst [vmem:[%s2058_s29 + $0xd8] sm:$0xf] %v288_v54 }
  0x3a   : > { %291 = vst [vmem:[%s2058_s29 + $0xdc] sm:$0xf] %v290_v55  ;;  %v292_v56 = vld [vmem:[%s2054_s28 + $0x1c0] sm:$0xf]  ;;  %v294_v57 = vld [vmem:[%s2054_s28 + $0x1c8] sm:$0xf] }
  0x3b   : > { %v296_v58 = vld [vmem:[%s2054_s28 + $0x1d0] sm:$0xf]  ;;  %293 = vst [vmem:[%s2058_s29 + $0xe0] sm:$0xf] %v292_v56  ;;  %295 = vst [vmem:[%s2058_s29 + $0xe4] sm:$0xf] %v294_v57 }
  0x3c   : > { %297 = vst [vmem:[%s2058_s29 + $0xe8] sm:$0xf] %v296_v58  ;;  %v298_v59 = vld [vmem:[%s2054_s28 + $0x1d8] sm:$0xf]  ;;  %v300_v60 = vld [vmem:[%s2054_s28 + $0x1e0] sm:$0xf] }
  0x3d   : > { %v302_v61 = vld [vmem:[%s2054_s28 + $0x1e8] sm:$0xf]  ;;  %299 = vst [vmem:[%s2058_s29 + $0xec] sm:$0xf] %v298_v59  ;;  %301 = vst [vmem:[%s2058_s29 + $0xf0] sm:$0xf] %v300_v60 }
  0x3e   : > { %303 = vst [vmem:[%s2058_s29 + $0xf4] sm:$0xf] %v302_v61  ;;  %v304_v62 = vld [vmem:[%s2054_s28 + $0x1f0] sm:$0xf]  ;;  %v306_v63 = vld [vmem:[%s2054_s28 + $0x1f8] sm:$0xf] }
  0x3f   : > { %v308_v0 = vld [vmem:[%s2054_s28 + $0x200] sm:$0xf]  ;;  %305 = vst [vmem:[%s2058_s29 + $0xf8] sm:$0xf] %v304_v62  ;;  %307 = vst [vmem:[%s2058_s29 + $0xfc] sm:$0xf] %v306_v63 }
  0x40   : > { %309 = vst [vmem:[%s2058_s29 + $0x100] sm:$0xf] %v308_v0  ;;  %v310_v1 = vld [vmem:[%s2054_s28 + $0x208] sm:$0xf]  ;;  %v312_v2 = vld [vmem:[%s2054_s28 + $0x210] sm:$0xf] }
  0x41   : > { %v314_v3 = vld [vmem:[%s2054_s28 + $0x218] sm:$0xf]  ;;  %311 = vst [vmem:[%s2058_s29 + $0x104] sm:$0xf] %v310_v1  ;;  %313 = vst [vmem:[%s2058_s29 + $0x108] sm:$0xf] %v312_v2 }
  0x42   : > { %315 = vst [vmem:[%s2058_s29 + $0x10c] sm:$0xf] %v314_v3  ;;  %v316_v4 = vld [vmem:[%s2054_s28 + $0x220] sm:$0xf]  ;;  %v318_v5 = vld [vmem:[%s2054_s28 + $0x228] sm:$0xf] }
  0x43   : > { %v320_v6 = vld [vmem:[%s2054_s28 + $0x230] sm:$0xf]  ;;  %317 = vst [vmem:[%s2058_s29 + $0x110] sm:$0xf] %v316_v4  ;;  %319 = vst [vmem:[%s2058_s29 + $0x114] sm:$0xf] %v318_v5 }
  0x44   : > { %321 = vst [vmem:[%s2058_s29 + $0x118] sm:$0xf] %v320_v6  ;;  %v322_v7 = vld [vmem:[%s2054_s28 + $0x238] sm:$0xf]  ;;  %v324_v8 = vld [vmem:[%s2054_s28 + $0x240] sm:$0xf] }
  0x45   : > { %v326_v9 = vld [vmem:[%s2054_s28 + $0x248] sm:$0xf]  ;;  %323 = vst [vmem:[%s2058_s29 + $0x11c] sm:$0xf] %v322_v7  ;;  %325 = vst [vmem:[%s2058_s29 + $0x120] sm:$0xf] %v324_v8 }
  0x46   : > { %327 = vst [vmem:[%s2058_s29 + $0x124] sm:$0xf] %v326_v9  ;;  %v328_v10 = vld [vmem:[%s2054_s28 + $0x250] sm:$0xf]  ;;  %v330_v11 = vld [vmem:[%s2054_s28 + $0x258] sm:$0xf] }
  0x47   : > { %v332_v12 = vld [vmem:[%s2054_s28 + $0x260] sm:$0xf]  ;;  %329 = vst [vmem:[%s2058_s29 + $0x128] sm:$0xf] %v328_v10  ;;  %331 = vst [vmem:[%s2058_s29 + $0x12c] sm:$0xf] %v330_v11 }
  0x48   : > { %333 = vst [vmem:[%s2058_s29 + $0x130] sm:$0xf] %v332_v12  ;;  %v334_v13 = vld [vmem:[%s2054_s28 + $0x268] sm:$0xf]  ;;  %v336_v14 = vld [vmem:[%s2054_s28 + $0x270] sm:$0xf] }
  0x49   : > { %v338_v15 = vld [vmem:[%s2054_s28 + $0x278] sm:$0xf]  ;;  %335 = vst [vmem:[%s2058_s29 + $0x134] sm:$0xf] %v334_v13  ;;  %337 = vst [vmem:[%s2058_s29 + $0x138] sm:$0xf] %v336_v14 }
  0x4a   : > { %339 = vst [vmem:[%s2058_s29 + $0x13c] sm:$0xf] %v338_v15  ;;  %v340_v16 = vld [vmem:[%s2054_s28 + $0x280] sm:$0xf]  ;;  %v342_v17 = vld [vmem:[%s2054_s28 + $0x288] sm:$0xf] }
  0x4b   : > { %v344_v18 = vld [vmem:[%s2054_s28 + $0x290] sm:$0xf]  ;;  %341 = vst [vmem:[%s2058_s29 + $0x140] sm:$0xf] %v340_v16  ;;  %343 = vst [vmem:[%s2058_s29 + $0x144] sm:$0xf] %v342_v17 }
  0x4c   : > { %345 = vst [vmem:[%s2058_s29 + $0x148] sm:$0xf] %v344_v18  ;;  %v346_v19 = vld [vmem:[%s2054_s28 + $0x298] sm:$0xf]  ;;  %v348_v20 = vld [vmem:[%s2054_s28 + $0x2a0] sm:$0xf] }
  0x4d   : > { %v350_v21 = vld [vmem:[%s2054_s28 + $0x2a8] sm:$0xf]  ;;  %347 = vst [vmem:[%s2058_s29 + $0x14c] sm:$0xf] %v346_v19  ;;  %349 = vst [vmem:[%s2058_s29 + $0x150] sm:$0xf] %v348_v20 }
  0x4e   : > { %351 = vst [vmem:[%s2058_s29 + $0x154] sm:$0xf] %v350_v21  ;;  %v352_v22 = vld [vmem:[%s2054_s28 + $0x2b0] sm:$0xf]  ;;  %v354_v23 = vld [vmem:[%s2054_s28 + $0x2b8] sm:$0xf] }
  0x4f   : > { %v356_v24 = vld [vmem:[%s2054_s28 + $0x2c0] sm:$0xf]  ;;  %353 = vst [vmem:[%s2058_s29 + $0x158] sm:$0xf] %v352_v22  ;;  %355 = vst [vmem:[%s2058_s29 + $0x15c] sm:$0xf] %v354_v23 }
  0x50   : > { %357 = vst [vmem:[%s2058_s29 + $0x160] sm:$0xf] %v356_v24  ;;  %v358_v25 = vld [vmem:[%s2054_s28 + $0x2c8] sm:$0xf]  ;;  %v360_v26 = vld [vmem:[%s2054_s28 + $0x2d0] sm:$0xf] }
  0x51   : > { %v362_v27 = vld [vmem:[%s2054_s28 + $0x2d8] sm:$0xf]  ;;  %359 = vst [vmem:[%s2058_s29 + $0x164] sm:$0xf] %v358_v25  ;;  %361 = vst [vmem:[%s2058_s29 + $0x168] sm:$0xf] %v360_v26 }
  0x52   : > { %363 = vst [vmem:[%s2058_s29 + $0x16c] sm:$0xf] %v362_v27  ;;  %v364_v28 = vld [vmem:[%s2054_s28 + $0x2e0] sm:$0xf]  ;;  %v366_v29 = vld [vmem:[%s2054_s28 + $0x2e8] sm:$0xf] }
  0x53   : > { %v368_v30 = vld [vmem:[%s2054_s28 + $0x2f0] sm:$0xf]  ;;  %365 = vst [vmem:[%s2058_s29 + $0x170] sm:$0xf] %v364_v28  ;;  %367 = vst [vmem:[%s2058_s29 + $0x174] sm:$0xf] %v366_v29 }
  0x54   : > { %369 = vst [vmem:[%s2058_s29 + $0x178] sm:$0xf] %v368_v30  ;;  %v370_v31 = vld [vmem:[%s2054_s28 + $0x2f8] sm:$0xf]  ;;  %v372_v32 = vld [vmem:[%s2054_s28 + $0x300] sm:$0xf] }
  0x55   : > { %v374_v33 = vld [vmem:[%s2054_s28 + $0x308] sm:$0xf]  ;;  %371 = vst [vmem:[%s2058_s29 + $0x17c] sm:$0xf] %v370_v31  ;;  %373 = vst [vmem:[%s2058_s29 + $0x180] sm:$0xf] %v372_v32 }
  0x56   : > { %375 = vst [vmem:[%s2058_s29 + $0x184] sm:$0xf] %v374_v33  ;;  %v376_v34 = vld [vmem:[%s2054_s28 + $0x310] sm:$0xf]  ;;  %v378_v35 = vld [vmem:[%s2054_s28 + $0x318] sm:$0xf] }
  0x57   : > { %v380_v36 = vld [vmem:[%s2054_s28 + $0x320] sm:$0xf]  ;;  %377 = vst [vmem:[%s2058_s29 + $0x188] sm:$0xf] %v376_v34  ;;  %379 = vst [vmem:[%s2058_s29 + $0x18c] sm:$0xf] %v378_v35 }
  0x58   : > { %381 = vst [vmem:[%s2058_s29 + $0x190] sm:$0xf] %v380_v36  ;;  %v382_v37 = vld [vmem:[%s2054_s28 + $0x328] sm:$0xf]  ;;  %v384_v38 = vld [vmem:[%s2054_s28 + $0x330] sm:$0xf] }
  0x59   : > { %v386_v39 = vld [vmem:[%s2054_s28 + $0x338] sm:$0xf]  ;;  %383 = vst [vmem:[%s2058_s29 + $0x194] sm:$0xf] %v382_v37  ;;  %385 = vst [vmem:[%s2058_s29 + $0x198] sm:$0xf] %v384_v38 }
  0x5a   : > { %387 = vst [vmem:[%s2058_s29 + $0x19c] sm:$0xf] %v386_v39  ;;  %v388_v40 = vld [vmem:[%s2054_s28 + $0x340] sm:$0xf]  ;;  %v390_v41 = vld [vmem:[%s2054_s28 + $0x348] sm:$0xf] }
  0x5b   : > { %v392_v42 = vld [vmem:[%s2054_s28 + $0x350] sm:$0xf]  ;;  %389 = vst [vmem:[%s2058_s29 + $0x1a0] sm:$0xf] %v388_v40  ;;  %391 = vst [vmem:[%s2058_s29 + $0x1a4] sm:$0xf] %v390_v41 }
  0x5c   : > { %393 = vst [vmem:[%s2058_s29 + $0x1a8] sm:$0xf] %v392_v42  ;;  %v394_v43 = vld [vmem:[%s2054_s28 + $0x358] sm:$0xf]  ;;  %v396_v44 = vld [vmem:[%s2054_s28 + $0x360] sm:$0xf] }
  0x5d   : > { %v398_v45 = vld [vmem:[%s2054_s28 + $0x368] sm:$0xf]  ;;  %395 = vst [vmem:[%s2058_s29 + $0x1ac] sm:$0xf] %v394_v43  ;;  %397 = vst [vmem:[%s2058_s29 + $0x1b0] sm:$0xf] %v396_v44 }
  0x5e   : > { %399 = vst [vmem:[%s2058_s29 + $0x1b4] sm:$0xf] %v398_v45  ;;  %v400_v46 = vld [vmem:[%s2054_s28 + $0x370] sm:$0xf]  ;;  %v402_v47 = vld [vmem:[%s2054_s28 + $0x378] sm:$0xf] }
  0x5f   : > { %v404_v48 = vld [vmem:[%s2054_s28 + $0x380] sm:$0xf]  ;;  %401 = vst [vmem:[%s2058_s29 + $0x1b8] sm:$0xf] %v400_v46  ;;  %403 = vst [vmem:[%s2058_s29 + $0x1bc] sm:$0xf] %v402_v47 }
  0x60   : > { %405 = vst [vmem:[%s2058_s29 + $0x1c0] sm:$0xf] %v404_v48  ;;  %v406_v49 = vld [vmem:[%s2054_s28 + $0x388] sm:$0xf]  ;;  %v408_v50 = vld [vmem:[%s2054_s28 + $0x390] sm:$0xf] }
  0x61   : > { %v410_v51 = vld [vmem:[%s2054_s28 + $0x398] sm:$0xf]  ;;  %407 = vst [vmem:[%s2058_s29 + $0x1c4] sm:$0xf] %v406_v49  ;;  %409 = vst [vmem:[%s2058_s29 + $0x1c8] sm:$0xf] %v408_v50 }
  0x62   : > { %411 = vst [vmem:[%s2058_s29 + $0x1cc] sm:$0xf] %v410_v51  ;;  %v412_v52 = vld [vmem:[%s2054_s28 + $0x3a0] sm:$0xf]  ;;  %v414_v53 = vld [vmem:[%s2054_s28 + $0x3a8] sm:$0xf] }
  0x63   : > { %v416_v54 = vld [vmem:[%s2054_s28 + $0x3b0] sm:$0xf]  ;;  %413 = vst [vmem:[%s2058_s29 + $0x1d0] sm:$0xf] %v412_v52  ;;  %415 = vst [vmem:[%s2058_s29 + $0x1d4] sm:$0xf] %v414_v53 }
  0x64   : > { %417 = vst [vmem:[%s2058_s29 + $0x1d8] sm:$0xf] %v416_v54  ;;  %v418_v55 = vld [vmem:[%s2054_s28 + $0x3b8] sm:$0xf]  ;;  %v420_v56 = vld [vmem:[%s2054_s28 + $0x3c0] sm:$0xf] }
  0x65   : > { %v422_v57 = vld [vmem:[%s2054_s28 + $0x3c8] sm:$0xf]  ;;  %419 = vst [vmem:[%s2058_s29 + $0x1dc] sm:$0xf] %v418_v55  ;;  %421 = vst [vmem:[%s2058_s29 + $0x1e0] sm:$0xf] %v420_v56 }
  0x66   : > { %423 = vst [vmem:[%s2058_s29 + $0x1e4] sm:$0xf] %v422_v57  ;;  %v424_v58 = vld [vmem:[%s2054_s28 + $0x3d0] sm:$0xf]  ;;  %v426_v59 = vld [vmem:[%s2054_s28 + $0x3d8] sm:$0xf] }
  0x67   : > { %v428_v60 = vld [vmem:[%s2054_s28 + $0x3e0] sm:$0xf]  ;;  %425 = vst [vmem:[%s2058_s29 + $0x1e8] sm:$0xf] %v424_v58  ;;  %427 = vst [vmem:[%s2058_s29 + $0x1ec] sm:$0xf] %v426_v59 }
  0x68   : > { %429 = vst [vmem:[%s2058_s29 + $0x1f0] sm:$0xf] %v428_v60  ;;  %v430_v61 = vld [vmem:[%s2054_s28 + $0x3e8] sm:$0xf]  ;;  %v432_v62 = vld [vmem:[%s2054_s28 + $0x3f0] sm:$0xf] }
  0x69   : > { %v434_v63 = vld [vmem:[%s2054_s28 + $0x3f8] sm:$0xf]  ;;  %431 = vst [vmem:[%s2058_s29 + $0x1f4] sm:$0xf] %v430_v61  ;;  %433 = vst [vmem:[%s2058_s29 + $0x1f8] sm:$0xf] %v432_v62 }
  0x6a   : > { %435 = vst [vmem:[%s2058_s29 + $0x1fc] sm:$0xf] %v434_v63 }
  0x6b PF: > { %p1665_p8 = scmp.ge.s32.totalorder %s1984_s16, 1  ;;  %p719_p9 = scmp.lt.s32.totalorder %s1984_s16, 3 }
  0x6d   : > { %p720_p10 = pnand %p1665_p8, %p719_p9 }
  0x6e   : > { %s726_s30 = sand.u32 (!%p720_p10), 1, %s1968_s12   ;;  %v2320_v0 = vld [vmem:[%s2469_s0] sm:$0xff] (!%p720_p10)  ;;  %v2330_v2 = vld [vmem:[%s2469_s0 + $0x8] sm:$0xff] (!%p720_p10)  ;;  %v2377_v35 = vld [vmem:[%s2469_s0 + $0x10] sm:$0xff] (!%p720_p10)  ;;  %p764_p11 = scmp.lt.s32.totalorder (!%p720_p10), %s1976_s14, 1 }
  0x6f   : > { %723 = sbr.rel (%p720_p10) target bundleno = 413 (0x19d), region = 69  ;;  %v2325_v1 = vld [vmem:[%s2469_s0 + $0x20] sm:$0xff] (!%p720_p10)  ;;  %s1666_s10 = sshll.u32 (!%p720_p10), %s726_s30, 9  ;;  %v2339_v4 = vld [vmem:[%s2469_s0 + $0x28] sm:$0xff] (!%p720_p10)  ;;  %v2382_v36 = vld [vmem:[%s2469_s0 + $0x30] sm:$0xff] (!%p720_p10) }
  0x70   : > { %v1670_v3 = vcombine.high (!%p720_p10), %v2320_v0, %v2325_v1  ;;  %v1672_v5 = vcombine.high (!%p720_p10), %v2330_v2, %v2339_v4  ;;  %s2343_s19 = scalar_lea.vmem (!%p720_p10), [#allocation2], %s1666_s10  ;;  %v2388_v38 = vld [vmem:[%s2469_s0 + $0x18] sm:$0xff] (!%p720_p10)  ;;  %v1669_v42 = vcombine.low (!%p720_p10), %v2320_v0, %v2325_v1  ;;  %v1671_v43 = vcombine.low (!%p720_p10), %v2330_v2, %v2339_v4  ;;  %s1667_s8 = sshll.u32 (!%p720_p10), %s726_s30, 3 }
  0x71   : > { %v1882_v6 = vld [vmem:[%s2343_s19 + $0x40] sm:$0xff] (!%p720_p10)   ;;  %v1886_v10 = vld [vmem:[%s2343_s19 + $0x48] sm:$0xff] (!%p720_p10)   ;;  %v1890_v14 = vld [vmem:[%s2343_s19 + $0x50] sm:$0xff] (!%p720_p10)   ;;  %v1674_v46 = vcombine.high (!%p720_p10), %v2377_v35, %v2382_v36  ;;  %s756_s9 = scalar_lea.vmem (!%p720_p10), [#allocation3], %s1667_s8 }
  0x72   : > { %1368 = vmatprep.mubr.bf16.mxu0 (!%p720_p10), %v1670_v3  ;;  %v1883_v7 = vld [vmem:[%s2343_s19 + $0xc0] sm:$0xff] (!%p720_p10)   ;;  %1409 = vmatprep.mubr.bf16.mxu1 (!%p720_p10), %v1672_v5  ;;  %v1887_v11 = vld [vmem:[%s2343_s19 + $0xc8] sm:$0xff] (!%p720_p10)   ;;  %v1891_v15 = vld [vmem:[%s2343_s19 + $0xd0] sm:$0xff] (!%p720_p10)  }
  0x73   : > { %1754 = vmatprep.subr.bf16.mxu0 (!%p720_p10), %v1882_v6  ;;  %v1884_v8 = vld [vmem:[%s2343_s19] sm:$0xff] (!%p720_p10)   ;;  %1776 = vmatprep.subr.bf16.mxu1 (!%p720_p10), %v1883_v7  ;;  %v1888_v12 = vld [vmem:[%s2343_s19 + $0x8] sm:$0xff] (!%p720_p10)   ;;  %v1892_v16 = vld [vmem:[%s2343_s19 + $0x10] sm:$0xff] (!%p720_p10)  }
  0x74   : > { %v1885_v9 = vld [vmem:[%s2343_s19 + $0x80] sm:$0xff] (!%p720_p10)   ;;  %1755 = vmatpush3.bf16.msra.mxu0 (!%p720_p10), %v1884_v8  ;;  %v1889_v13 = vld [vmem:[%s2343_s19 + $0x88] sm:$0xff] (!%p720_p10)   ;;  %v1893_v17 = vld [vmem:[%s2343_s19 + $0x90] sm:$0xff] (!%p720_p10)  }
  0x75   : > { %1777 = vmatpush3.bf16.msra.mxu1 (!%p720_p10), %v1885_v9  ;;  %1756 = vmatprep.subr.bf16.mxu0 (!%p720_p10), %v1886_v10  ;;  %v1894_v18 = vld [vmem:[%s2343_s19 + $0x58] sm:$0xff] (!%p720_p10)   ;;  %v1898_v22 = vld [vmem:[%s2343_s19 + $0x60] sm:$0xff] (!%p720_p10)   ;;  %v1902_v26 = vld [vmem:[%s2343_s19 + $0x68] sm:$0xff] (!%p720_p10)  }
  0x76   : > { %1778 = vmatprep.subr.bf16.mxu1 %v1887_v11  ;;  %v1895_v19 = vld [vmem:[%s2343_s19 + $0xd8] sm:$0xff]   ;;  %v1899_v23 = vld [vmem:[%s2343_s19 + $0xe0] sm:$0xff]   ;;  %v1903_v27 = vld [vmem:[%s2343_s19 + $0xe8] sm:$0xff]   ;;  %s765_s4 = scalar_select %p764_p11, %s1976_s14, 1 }
  0x77   : > { %v1896_v20 = vld [vmem:[%s2343_s19 + $0x18] sm:$0xff]   ;;  %v1900_v24 = vld [vmem:[%s2343_s19 + $0x20] sm:$0xff]   ;;  %v1904_v28 = vld [vmem:[%s2343_s19 + $0x28] sm:$0xff]   ;;  %s1744_s10 = sshll.u32 (%p2041_p6), %s1976_s14, 2 }
  0x78   : > { %1757 = vmatpush3.bf16.msra.mxu0 %v1888_v12  ;;  %v1897_v21 = vld [vmem:[%s2343_s19 + $0x98] sm:$0xff]   ;;  %v1901_v25 = vld [vmem:[%s2343_s19 + $0xa0] sm:$0xff]   ;;  %v1905_v29 = vld [vmem:[%s2343_s19 + $0xa8] sm:$0xff]   ;;  %s766_s7 = scalar_lea.vmem %s2471_s2, %s765_s4 }
  0x79   : > { %1779 = vmatpush3.bf16.msra.mxu1 %v1889_v13  ;;  %1758 = vmatprep.subr.bf16.mxu0 %v1890_v14  ;;  %v1906_v30 = vld [vmem:[%s2343_s19 + $0x70] sm:$0xff]   ;;  %v1910_v34 = vld [vmem:[%s2343_s19 + $0x78] sm:$0xff]   ;;  %v1914_v44 = vld [vmem:[%s2343_s19 + $0x140] sm:$0xff]   ;;  %v1673_v14 = vcombine.low %v2377_v35, %v2382_v36 }
  0x7a   : > { %1780 = vmatprep.subr.bf16.mxu1 %v1891_v15  ;;  %v1907_v31 = vld [vmem:[%s2343_s19 + $0xf0] sm:$0xff]   ;;  %v1911_v37 = vld [vmem:[%s2343_s19 + $0xf8] sm:$0xff]   ;;  %v1915_v45 = vld [vmem:[%s2343_s19 + $0x1c0] sm:$0xff]  }
  0x7b   : > { %v1908_v32 = vld [vmem:[%s2343_s19 + $0x30] sm:$0xff]   ;;  %v2393_v39 = vld [vmem:[%s2469_s0 + $0x38] sm:$0xff]  ;;  %v1916_v47 = vld [vmem:[%s2343_s19 + $0x100] sm:$0xff]  }
  0x7c   : > { %1759 = vmatpush3.bf16.msra.mxu0 %v1892_v16  ;;  %v1909_v33 = vld [vmem:[%s2343_s19 + $0xb0] sm:$0xff]   ;;  %v1912_v40 = vld [vmem:[%s2343_s19 + $0x38] sm:$0xff]   ;;  %v1676_v48 = vcombine.high %v2388_v38, %v2393_v39  ;;  %v1917_v49 = vld [vmem:[%s2343_s19 + $0x180] sm:$0xff]   ;;  %v1675_v15 = vcombine.low %v2388_v38, %v2393_v39 }
  0x7d   : > { %1781 = vmatpush3.bf16.msra.mxu1 %v1893_v17  ;;  %1760 = vmatprep.subr.bf16.mxu0 %v1894_v18  ;;  %v1913_v41 = vld [vmem:[%s2343_s19 + $0xb8] sm:$0xff]   ;;  %v1918_v50 = vld [vmem:[%s2343_s19 + $0x148] sm:$0xff]   ;;  %v1922_v54 = vld [vmem:[%s2343_s19 + $0x150] sm:$0xff]  }
  0x7e   : > { %1782 = vmatprep.subr.bf16.mxu1 %v1895_v19  ;;  %v1919_v51 = vld [vmem:[%s2343_s19 + $0x1c8] sm:$0xff]   ;;  %v1923_v55 = vld [vmem:[%s2343_s19 + $0x1d0] sm:$0xff]   ;;  %v1926_v58 = vld [vmem:[%s2343_s19 + $0x158] sm:$0xff]  }
  0x7f   : > { %v1920_v52 = vld [vmem:[%s2343_s19 + $0x108] sm:$0xff]   ;;  %v1924_v56 = vld [vmem:[%s2343_s19 + $0x110] sm:$0xff]   ;;  %v1927_v59 = vld [vmem:[%s2343_s19 + $0x1d8] sm:$0xff]  }
  0x80   : > { %1761 = vmatpush3.bf16.msra.mxu0 %v1896_v20  ;;  %v1921_v53 = vld [vmem:[%s2343_s19 + $0x188] sm:$0xff]   ;;  %v1925_v57 = vld [vmem:[%s2343_s19 + $0x190] sm:$0xff]   ;;  %v1928_v60 = vld [vmem:[%s2343_s19 + $0x118] sm:$0xff]  }
  0x81   : > { %1783 = vmatpush3.bf16.msra.mxu1 %v1897_v21  ;;  %1762 = vmatprep.subr.bf16.mxu0 %v1898_v22  ;;  %v1929_v61 = vld [vmem:[%s2343_s19 + $0x198] sm:$0xff]   ;;  %v1930_v62 = vld [vmem:[%s2343_s19 + $0x160] sm:$0xff]   ;;  %v1934_v2 = vld [vmem:[%s2343_s19 + $0x168] sm:$0xff]  }
  0x82   : > { %1784 = vmatprep.subr.bf16.mxu1 %v1899_v23  ;;  %v1931_v63 = vld [vmem:[%s2343_s19 + $0x1e0] sm:$0xff]   ;;  %v1935_v3 = vld [vmem:[%s2343_s19 + $0x1e8] sm:$0xff]   ;;  %v1938_v6 = vld [vmem:[%s2343_s19 + $0x170] sm:$0xff]  }
  0x83   : > { %v1932_v0 = vld [vmem:[%s2343_s19 + $0x120] sm:$0xff]   ;;  %v1936_v4 = vld [vmem:[%s2343_s19 + $0x128] sm:$0xff]   ;;  %v1939_v7 = vld [vmem:[%s2343_s19 + $0x1f0] sm:$0xff]  }
  0x84   : > { %1763 = vmatpush3.bf16.msra.mxu0 %v1900_v24  ;;  %v1933_v1 = vld [vmem:[%s2343_s19 + $0x1a0] sm:$0xff]   ;;  %v1937_v5 = vld [vmem:[%s2343_s19 + $0x1a8] sm:$0xff]   ;;  %v1940_v8 = vld [vmem:[%s2343_s19 + $0x130] sm:$0xff]  }
  0x85   : > { %1785 = vmatpush3.bf16.msra.mxu1 %v1901_v25  ;;  %1764 = vmatprep.subr.bf16.mxu0 %v1902_v26  ;;  %v1941_v9 = vld [vmem:[%s2343_s19 + $0x1b0] sm:$0xff]   ;;  %v1942_v10 = vld [vmem:[%s2343_s19 + $0x178] sm:$0xff]   ;;  %v1668_v18 = vld [vmem:[%s766_s7] ss:$0 sm:$0xff] }
  0x86   : > { %1786 = vmatprep.subr.bf16.mxu1 %v1903_v27  ;;  %v1943_v11 = vld [vmem:[%s2343_s19 + $0x1f8] sm:$0xff]  }
  0x87   : > { %v1944_v12 = vld [vmem:[%s2343_s19 + $0x138] sm:$0xff]  }
  0x88   : > { %1765 = vmatpush3.bf16.msra.mxu0 %v1904_v28  ;;  %v1945_v13 = vld [vmem:[%s2343_s19 + $0x1b8] sm:$0xff]   ;;  %s1523_s19 = scalar_lea.vmem (%p2041_p6), %s2472_s3, %s1744_s10 }
  0x89   : > { %1787 = vmatpush3.bf16.msra.mxu1 %v1905_v29  ;;  %1766 = vmatprep.subr.bf16.mxu0 %v1906_v30 }
  0x8a   : > { %1788 = vmatprep.subr.bf16.mxu1 %v1907_v31 }
  0x8c   : > { %1767 = vmatpush3.bf16.msra.mxu0 %v1908_v32 }
  0x8d   : > { %1789 = vmatpush3.bf16.msra.mxu1 %v1909_v33  ;;  %1768 = vmatprep.subr.bf16.mxu0 %v1910_v34 }
  0x8e   : > { %1790 = vmatprep.subr.bf16.mxu1 %v1911_v37 }
  0x90   : > { %1769 = vmatpush3.bf16.msra.mxu0 %v1912_v40 }
  0x91   : > { %1791 = vmatpush3.bf16.msra.mxu1 %v1913_v41  ;;  %1798 = vmatprep.subr.bf16.mxu0 %v1914_v44 }
  0x92   : > { %1820 = vmatprep.subr.bf16.mxu1 %v1915_v45 }
  0x93   : > { %1369 = vmatmul.mubr.bf16.vlgmr.msra.gmra.mrb[0].mxu0 %v1669_v42 }
  0x94   : > { %1410 = vmatmul.mubr.bf16.vlgmr.msra.gmra.mrb[0].mxu1 %v1671_v43  ;;  %1799 = vmatpush3.bf16.msra.mxu0 %v1916_v47 }
  0x95   : > { %1821 = vmatpush3.bf16.msra.mxu1 %v1917_v49  ;;  %1450 = vmatprep.mubr.bf16.mxu0 %v1674_v46 }
  0x96   : > { %1800 = vmatprep.subr.bf16.mxu0 %v1918_v50  ;;  %1491 = vmatprep.mubr.bf16.mxu1 %v1676_v48 }
  0x97   : > { %1822 = vmatprep.subr.bf16.mxu1 %v1919_v51 }
  0x98   : > { %1801 = vmatpush3.bf16.msra.mxu0 %v1920_v52 }
  0x99   : > { %1823 = vmatpush3.bf16.msra.mxu1 %v1921_v53  ;;  %1802 = vmatprep.subr.bf16.mxu0 %v1922_v54 }
  0x9a   : > { %1824 = vmatprep.subr.bf16.mxu1 %v1923_v55 }
  0x9c   : > { %1803 = vmatpush3.bf16.msra.mxu0 %v1924_v56 }
  0x9d   : > { %1825 = vmatpush3.bf16.msra.mxu1 %v1925_v57  ;;  %1804 = vmatprep.subr.bf16.mxu0 %v1926_v58 }
  0x9e   : > { %1826 = vmatprep.subr.bf16.mxu1 %v1927_v59 }
  0xa0   : > { %1805 = vmatpush3.bf16.msra.mxu0 %v1928_v60 }
  0xa1   : > { %1827 = vmatpush3.bf16.msra.mxu1 %v1929_v61  ;;  %1806 = vmatprep.subr.bf16.mxu0 %v1930_v62 }
  0xa2   : > { %1828 = vmatprep.subr.bf16.mxu1 %v1931_v63 }
  0xa4   : > { %1807 = vmatpush3.bf16.msra.mxu0 %v1932_v0 }
  0xa5   : > { %1829 = vmatpush3.bf16.msra.mxu1 %v1933_v1  ;;  %1808 = vmatprep.subr.bf16.mxu0 %v1934_v2 }
  0xa6   : > { %1830 = vmatprep.subr.bf16.mxu1 %v1935_v3 }
  0xa8   : > { %1809 = vmatpush3.bf16.msra.mxu0 %v1936_v4 }
  0xa9   : > { %1831 = vmatpush3.bf16.msra.mxu1 %v1937_v5  ;;  %1810 = vmatprep.subr.bf16.mxu0 %v1938_v6 }
  0xaa   : > { %1832 = vmatprep.subr.bf16.mxu1 %v1939_v7 }
  0xac   : > { %1811 = vmatpush3.bf16.msra.mxu0 %v1940_v8 }
  0xad   : > { %1833 = vmatpush3.bf16.msra.mxu1 %v1941_v9  ;;  %1812 = vmatprep.subr.bf16.mxu0 %v1942_v10 }
  0xae   : > { %1834 = vmatprep.subr.bf16.mxu1 %v1943_v11 }
  0xb0   : > { %1813 = vmatpush3.bf16.msra.mxu0 %v1944_v12 }
  0xb1   : > { %1835 = vmatpush3.bf16.msra.mxu1 %v1945_v13 }
  0xb3   : > { %1451 = vmatmul.mubr.bf16.vlgmr.msra.gmra.mrb[4].mxu0 %v1673_v14 }
  0xb4   : > { %1492 = vmatmul.mubr.bf16.vlgmr.msra.gmra.mrb[4].mxu1 %v1675_v15 }
 0x166   : > { %v1770_v16 = vpop.f32.mrb[0].mxu0 }
 0x167   : > { %v1792_v17 = vpop.f32.mrb[0].mxu1  ;;  %v1771_v19 = vpop.f32.mrb[1].mxu0 }
 0x168   : > { %v1772_v20 = vadd.f32 %v1771_v19, %v1770_v16  ;;  %v1793_v21 = vpop.f32.mrb[1].mxu1  ;;  %v1773_v22 = vpop.f32.mrb[2].mxu0 }
 0x169   : > { %v1794_v23 = vadd.f32 %v1793_v21, %v1792_v17  ;;  %v1795_v24 = vpop.f32.mrb[2].mxu1  ;;  %v1774_v25 = vpop.f32.mrb[3].mxu0 }
 0x16a   : > { %v1371_v26 = vadd.f32 %v1772_v20, %v1668_v18  ;;  %v1775_v27 = vadd.f32 %v1774_v25, %v1773_v22  ;;  %v1796_v28 = vpop.f32.mrb[3].mxu1 }
 0x16b   : > { %v1797_v29 = vadd.f32 %v1796_v28, %v1795_v24 }
 0x16c   : > { %v1412_v30 = vadd.f32 %v1794_v23, %v1371_v26  ;;  %v1374_v31 = vadd.f32 %v1775_v27, %v1668_v18 }
 0x16e   : > { %v1415_v32 = vadd.f32 %v1797_v29, %v1374_v31 }
 0x186   : > { %v1814_v33 = vpop.f32.mrb[4].mxu0 }
 0x187   : > { %v1836_v34 = vpop.f32.mrb[4].mxu1  ;;  %v1815_v35 = vpop.f32.mrb[5].mxu0 }
 0x188   : > { %v1816_v36 = vadd.f32 %v1815_v35, %v1814_v33  ;;  %v1837_v37 = vpop.f32.mrb[5].mxu1  ;;  %v1817_v38 = vpop.f32.mrb[6].mxu0 }
 0x189   : > { %v1838_v39 = vadd.f32 %v1837_v37, %v1836_v34  ;;  %v1839_v40 = vpop.f32.mrb[6].mxu1  ;;  %v1818_v41 = vpop.f32.mrb[7].mxu0 }
 0x18a   : > { %v1453_v42 = vadd.f32 %v1816_v36, %v1412_v30  ;;  %v1819_v43 = vadd.f32 %v1818_v41, %v1817_v38  ;;  %v1840_v44 = vpop.f32.mrb[7].mxu1 }
 0x18b   : > { %v1841_v45 = vadd.f32 %v1840_v44, %v1839_v40 }
 0x18c   : > { %v1494_v46 = vadd.f32 %v1838_v39, %v1453_v42  ;;  %v1456_v47 = vadd.f32 %v1819_v43, %v1415_v32 }
 0x18e   : > { %v1497_v48 = vadd.f32 %v1841_v45, %v1456_v47  ;;  %v1500_v49 = vmax.f32 %v1494_v46, 0.0  ;;  %1518 = sbr.rel (!%p2041_p6) target bundleno = 413 (0x19d), region = 77 }
 0x190   : > { %v1501_v50 = vmax.f32 %v1497_v48, 0.0 }
 0x192   : > { %v1752_v51 = vpack.c.bf16 %v1501_v50, %v1500_v49 }
 0x194   : > { %1753 = vst [vmem:[%s756_s9] sm:$0xff] %v1752_v51  }
 0x19b   : > { %v1539_v52 = vld [vmem:[%s756_s9] sm:$0xf]  ;;  %v1541_v53 = vld [vmem:[%s756_s9 + $0x4] sm:$0xf] }
 0x19c   : > { %1540 = vst [vmem:[%s1523_s19] sm:$0xf] %v1539_v52  ;;  %1542 = vst [vmem:[%s1523_s19 + $0x8] sm:$0xf] %v1541_v53 }
 0x19d PF: > { %s13_s16 = sadd.s32 1, %s1984_s16   ;;  %s2474_s12 = smov %s1972_s13 }
 0x19e   : > { %p10_p12 = scmp.ge.s32.totalorder %s13_s16, 4   ;;  %s2475_s13 = smov %s2046_s22 }
 0x19f   : > { %s2476_s14 = smov %s1980_s15  ;;  %s2477_s15 = smov %s2479_s17 }
 0x1a0   :  { %12 = sbr.rel (!%p10_p12) target bundleno = 3 (0x3), region = 155 }

// kernel: _lambda_.50
= control target key start
LH: loop header
LB: loop body
LE: loop exit
PB: predicated region body
PF: predicated region fallthrough
CT: control target
= control target key end

     0   :  { %s5738_s1 = inlined_call_operand.vmem [shape: bf16[2304,256], index: 1, kind: input, shape index: {}]   ;;  %s5739_s0 = inlined_call_operand.vmem [shape: bf16[16,2304], index: 0, kind: input, shape index: {}]   ;;  %s5740_s3 = inlined_call_operand.vmem [shape: bf16[256,1024], index: 3, kind: input, shape index: {}]   ;;  %s5741_s2 = inlined_call_operand.vmem [shape: f32[1,256], index: 2, kind: input, shape index: {}]   ;;  %s5742_s4 = inlined_call_operand.vmem [shape: f32[1,1024], index: 4, kind: input, shape index: {}]   ;;  %s5743_s5 = inlined_call_operand.vmem [shape: bf16[16,1024], index: 5, kind: input, shape index: {}]   ;;  %s5744_s6 = inlined_call_operand.vmem [shape: bf16[16,1024], index: 6, kind: output, shape index: {}]  }
   0x1   :  { %v3848_v0 = vld [vmem:[%s5738_s1 + $0x204] ss:$8 sps:$4 sm:$0xff]   ;;  %v3850_v1 = vld [vmem:[%s5738_s1 + $0x200] ss:$8 sps:$4 sm:$0xff]   ;;  %v3851_v2 = vld [vmem:[%s5738_s1 + $0x214] ss:$8 sps:$4 sm:$0xff]  }
   0x2   :  { %1957 = vmatprep.subr.bf16.mxu0 %v3848_v0  ;;  %v3853_v3 = vld [vmem:[%s5738_s1 + $0x210] ss:$8 sps:$4 sm:$0xff]   ;;  %v3854_v4 = vld [vmem:[%s5738_s1 + $0x224] ss:$8 sps:$4 sm:$0xff]   ;;  %v3856_v5 = vld [vmem:[%s5738_s1 + $0x220] ss:$8 sps:$4 sm:$0xff]  }
   0x3   :  { %1958 = vmatpush1.bf16.msra.mxu0 %v3850_v1  ;;  %v3857_v6 = vld [vmem:[%s5738_s1 + $0x234] ss:$8 sps:$4 sm:$0xff]   ;;  %v3859_v7 = vld [vmem:[%s5738_s1 + $0x230] ss:$8 sps:$4 sm:$0xff]   ;;  %v3860_v8 = vld [vmem:[%s5738_s1 + $0x244] ss:$8 sps:$4 sm:$0xff]  }
   0x4   :  { %1959 = vmatprep.subr.bf16.mxu0 %v3851_v2  ;;  %v3862_v9 = vld [vmem:[%s5738_s1 + $0x240] ss:$8 sps:$4 sm:$0xff]   ;;  %v3863_v10 = vld [vmem:[%s5738_s1 + $0x254] ss:$8 sps:$4 sm:$0xff]   ;;  %v3865_v11 = vld [vmem:[%s5738_s1 + $0x250] ss:$8 sps:$4 sm:$0xff]  }
   0x5   :  { %v3866_v12 = vld [vmem:[%s5738_s1 + $0x264] ss:$8 sps:$4 sm:$0xff]   ;;  %v3898_v13 = vld [vmem:[%s5739_s0 + $0x14] ss:$72 sps:$4 sm:$0xff]   ;;  %v3868_v14 = vld [vmem:[%s5738_s1 + $0x260] ss:$8 sps:$4 sm:$0xff]  }
   0x6   :  { %v3869_v15 = vld [vmem:[%s5738_s1 + $0x274] ss:$8 sps:$4 sm:$0xff]   ;;  %1989 = vmatprep.mubr.bf16.mxu0 %v3898_v13  ;;  %v3871_v16 = vld [vmem:[%s5738_s1 + $0x270] ss:$8 sps:$4 sm:$0xff]   ;;  %v3872_v17 = vld [vmem:[%s5738_s1 + $0x284] ss:$8 sps:$4 sm:$0xff]  }
   0x7   :  { %1960 = vmatpush1.bf16.msra.mxu0 %v3853_v3  ;;  %v3874_v18 = vld [vmem:[%s5738_s1 + $0x280] ss:$8 sps:$4 sm:$0xff]   ;;  %v3875_v19 = vld [vmem:[%s5738_s1 + $0x294] ss:$8 sps:$4 sm:$0xff]   ;;  %v3877_v20 = vld [vmem:[%s5738_s1 + $0x290] ss:$8 sps:$4 sm:$0xff]  }
   0x8   :  { %1961 = vmatprep.subr.bf16.mxu0 %v3854_v4  ;;  %v3878_v21 = vld [vmem:[%s5738_s1 + $0x2a4] ss:$8 sps:$4 sm:$0xff]   ;;  %v3880_v22 = vld [vmem:[%s5738_s1 + $0x2a0] ss:$8 sps:$4 sm:$0xff]   ;;  %v3881_v23 = vld [vmem:[%s5738_s1 + $0x2b4] ss:$8 sps:$4 sm:$0xff]  }
   0x9   :  { %v3883_v24 = vld [vmem:[%s5738_s1 + $0x2b0] ss:$8 sps:$4 sm:$0xff]   ;;  %v3884_v25 = vld [vmem:[%s5738_s1 + $0x2c4] ss:$8 sps:$4 sm:$0xff]   ;;  %v3886_v26 = vld [vmem:[%s5738_s1 + $0x2c0] ss:$8 sps:$4 sm:$0xff]  }
   0xa   :  { %v3887_v27 = vld [vmem:[%s5738_s1 + $0x2d4] ss:$8 sps:$4 sm:$0xff]   ;;  %v3889_v28 = vld [vmem:[%s5738_s1 + $0x2d0] ss:$8 sps:$4 sm:$0xff]   ;;  %v3890_v29 = vld [vmem:[%s5738_s1 + $0x2e4] ss:$8 sps:$4 sm:$0xff]  }
   0xb   :  { %1962 = vmatpush1.bf16.msra.mxu0 %v3856_v5  ;;  %v3892_v30 = vld [vmem:[%s5738_s1 + $0x2e0] ss:$8 sps:$4 sm:$0xff]   ;;  %v3893_v31 = vld [vmem:[%s5738_s1 + $0x2f4] ss:$8 sps:$4 sm:$0xff]   ;;  %v3895_v32 = vld [vmem:[%s5738_s1 + $0x2f0] ss:$8 sps:$4 sm:$0xff]  }
   0xc   :  { %1963 = vmatprep.subr.bf16.mxu0 %v3857_v6  ;;  %v3901_v33 = vld [vmem:[%s5738_s1 + $0x304] ss:$8 sps:$4 sm:$0xff]   ;;  %v3896_v34 = vld [vmem:[%s5739_s0 + $0x10] ss:$72 sps:$4 sm:$0xff]   ;;  %v3899_v35 = vld [vmem:[%s5738_s1 + $0x300] ss:$8 sps:$4 sm:$0xff]  }
   0xd   :  { %v3949_v36 = vld [vmem:[%s5739_s0 + $0x1c] ss:$72 sps:$4 sm:$0xff]   ;;  %v3902_v38 = vld [vmem:[%s5738_s1 + $0x310] ss:$8 sps:$4 sm:$0xff]   ;;  %v3905_v40 = vld [vmem:[%s5738_s1 + $0x320] ss:$8 sps:$4 sm:$0xff]  }
   0xe   :  { %v3904_v37 = vld [vmem:[%s5738_s1 + $0x314] ss:$8 sps:$4 sm:$0xff]   ;;  %v3907_v39 = vld [vmem:[%s5738_s1 + $0x324] ss:$8 sps:$4 sm:$0xff]   ;;  %v3908_v42 = vld [vmem:[%s5738_s1 + $0x330] ss:$8 sps:$4 sm:$0xff]  }
   0xf   :  { %1964 = vmatpush1.bf16.msra.mxu0 %v3859_v7  ;;  %v3910_v41 = vld [vmem:[%s5738_s1 + $0x334] ss:$8 sps:$4 sm:$0xff]   ;;  %v3913_v43 = vld [vmem:[%s5738_s1 + $0x344] ss:$8 sps:$4 sm:$0xff]   ;;  %v3911_v44 = vld [vmem:[%s5738_s1 + $0x340] ss:$8 sps:$4 sm:$0xff]  }
  0x10   :  { %1965 = vmatprep.subr.bf16.mxu0 %v3860_v8  ;;  %v3916_v45 = vld [vmem:[%s5738_s1 + $0x354] ss:$8 sps:$4 sm:$0xff]   ;;  %v3914_v46 = vld [vmem:[%s5738_s1 + $0x350] ss:$8 sps:$4 sm:$0xff]   ;;  %v3919_v47 = vld [vmem:[%s5738_s1 + $0x364] ss:$8 sps:$4 sm:$0xff]  }
  0x11   :  { %v3917_v48 = vld [vmem:[%s5738_s1 + $0x360] ss:$8 sps:$4 sm:$0xff]   ;;  %v3922_v49 = vld [vmem:[%s5738_s1 + $0x374] ss:$8 sps:$4 sm:$0xff]   ;;  %v3920_v50 = vld [vmem:[%s5738_s1 + $0x370] ss:$8 sps:$4 sm:$0xff]  }
  0x12   :  { %v3925_v51 = vld [vmem:[%s5738_s1 + $0x384] ss:$8 sps:$4 sm:$0xff]   ;;  %v3923_v52 = vld [vmem:[%s5738_s1 + $0x380] ss:$8 sps:$4 sm:$0xff]   ;;  %v3928_v53 = vld [vmem:[%s5738_s1 + $0x394] ss:$8 sps:$4 sm:$0xff]  }
  0x13   :  { %1966 = vmatpush1.bf16.msra.mxu0 %v3862_v9  ;;  %v3926_v54 = vld [vmem:[%s5738_s1 + $0x390] ss:$8 sps:$4 sm:$0xff]   ;;  %v3931_v55 = vld [vmem:[%s5738_s1 + $0x3a4] ss:$8 sps:$4 sm:$0xff]   ;;  %v3929_v56 = vld [vmem:[%s5738_s1 + $0x3a0] ss:$8 sps:$4 sm:$0xff]  }
  0x14   :  { %1967 = vmatprep.subr.bf16.mxu0 %v3863_v10  ;;  %v3934_v57 = vld [vmem:[%s5738_s1 + $0x3b4] ss:$8 sps:$4 sm:$0xff]   ;;  %v3932_v58 = vld [vmem:[%s5738_s1 + $0x3b0] ss:$8 sps:$4 sm:$0xff]   ;;  %v3937_v59 = vld [vmem:[%s5738_s1 + $0x3c4] ss:$8 sps:$4 sm:$0xff]  }
  0x15   :  { %v3935_v60 = vld [vmem:[%s5738_s1 + $0x3c0] ss:$8 sps:$4 sm:$0xff]   ;;  %v3940_v61 = vld [vmem:[%s5738_s1 + $0x3d4] ss:$8 sps:$4 sm:$0xff]   ;;  %v3938_v62 = vld [vmem:[%s5738_s1 + $0x3d0] ss:$8 sps:$4 sm:$0xff]  }
  0x16   :  { %v3943_v63 = vld [vmem:[%s5738_s1 + $0x3e4] ss:$8 sps:$4 sm:$0xff]   ;;  %v3941_v0 = vld [vmem:[%s5738_s1 + $0x3e0] ss:$8 sps:$4 sm:$0xff]   ;;  %v3946_v1 = vld [vmem:[%s5738_s1 + $0x3f4] ss:$8 sps:$4 sm:$0xff]  }
  0x17   :  { %1968 = vmatpush1.bf16.msra.mxu0 %v3865_v11  ;;  %v3944_v2 = vld [vmem:[%s5738_s1 + $0x3f0] ss:$8 sps:$4 sm:$0xff]   ;;  %v3952_v3 = vld [vmem:[%s5738_s1 + $0x404] ss:$8 sps:$4 sm:$0xff]   ;;  %v4051_v6 = vld [vmem:[%s5738_s1] ss:$8 sps:$4 sm:$0xff]  }
  0x18   :  { %1969 = vmatprep.subr.bf16.mxu0 %v3866_v12  ;;  %v4046_v4 = vld [vmem:[%s5738_s1 + $0x4] ss:$8 sps:$4 sm:$0xff]   ;;  %v3947_v5 = vld [vmem:[%s5739_s0 + $0x18] ss:$72 sps:$4 sm:$0xff]   ;;  %v4052_v9 = vld [vmem:[%s5738_s1 + $0x14] ss:$8 sps:$4 sm:$0xff]  }
  0x19   :  { %1871 = vmatprep.subr.bf16.mxu1 %v4046_v4  ;;  %v3950_v7 = vld [vmem:[%s5738_s1 + $0x400] ss:$8 sps:$4 sm:$0xff]   ;;  %v4000_v8 = vld [vmem:[%s5739_s0 + $0x24] ss:$72 sps:$4 sm:$0xff]   ;;  %v3955_v10 = vld [vmem:[%s5738_s1 + $0x414] ss:$8 sps:$4 sm:$0xff]  }
  0x1a   :  { %1872 = vmatpush1.bf16.msra.mxu1 %v4051_v6  ;;  %v4060_v11 = vld [vmem:[%s5738_s1 + $0x10] ss:$8 sps:$4 sm:$0xff]   ;;  %v3958_v13 = vld [vmem:[%s5738_s1 + $0x424] ss:$8 sps:$4 sm:$0xff]  }
  0x1b   :  { %1970 = vmatpush1.bf16.msra.mxu0 %v3868_v14  ;;  %1873 = vmatprep.subr.bf16.mxu1 %v4052_v9  ;;  %v3953_v12 = vld [vmem:[%s5738_s1 + $0x410] ss:$8 sps:$4 sm:$0xff]   ;;  %v4061_v14 = vld [vmem:[%s5738_s1 + $0x24] ss:$8 sps:$4 sm:$0xff]  }
  0x1c   :  { %1971 = vmatprep.subr.bf16.mxu0 %v3869_v15  ;;  %v4066_v15 = vld [vmem:[%s5738_s1 + $0x20] ss:$8 sps:$4 sm:$0xff]   ;;  %v3995_v4 = vld [vmem:[%s5738_s1 + $0x4f0] ss:$8 sps:$4 sm:$0xff]   ;;  %v4147_v6 = vld [vmem:[%s5739_s0 + $0x4] ss:$72 sps:$4 sm:$0xff]  }
  0x1d   :  { %v4150_v9 = vld [vmem:[%s5738_s1 + $0x104] ss:$8 sps:$4 sm:$0xff]   ;;  %1903 = vmatprep.mubr.bf16.mxu1 %v4147_v6  ;;  %v4050_v6 = vld [vmem:[%s5738_s1 + $0x5f4] ss:$8 sps:$4 sm:$0xff]  }
  0x1e   :  { %1874 = vmatpush1.bf16.msra.mxu1 %v4060_v11  ;;  %v4001_v11 = vld [vmem:[%s5738_s1 + $0x500] ss:$8 sps:$4 sm:$0xff]  }
  0x1f   :  { %1972 = vmatpush1.bf16.msra.mxu0 %v3871_v16  ;;  %1875 = vmatprep.subr.bf16.mxu1 %v4061_v14  ;;  %v3956_v16 = vld [vmem:[%s5738_s1 + $0x420] ss:$8 sps:$4 sm:$0xff]   ;;  %v4006_v14 = vld [vmem:[%s5738_s1 + $0x514] ss:$8 sps:$4 sm:$0xff]  }
  0x20   :  { %1973 = vmatprep.subr.bf16.mxu0 %v3872_v17  ;;  %v3961_v17 = vld [vmem:[%s5738_s1 + $0x434] ss:$8 sps:$4 sm:$0xff]  }
  0x22   :  { %1876 = vmatpush1.bf16.msra.mxu1 %v4066_v15  ;;  %v4154_v15 = vld [vmem:[%s5738_s1 + $0x110] ss:$8 sps:$4 sm:$0xff]  }
  0x23   :  { %1974 = vmatpush1.bf16.msra.mxu0 %v3874_v18  ;;  %v4067_v18 = vld [vmem:[%s5738_s1 + $0x34] ss:$8 sps:$4 sm:$0xff]  }
  0x24   :  { %1975 = vmatprep.subr.bf16.mxu0 %v3875_v19  ;;  %v4072_v19 = vld [vmem:[%s5738_s1 + $0x30] ss:$8 sps:$4 sm:$0xff]   ;;  %1877 = vmatprep.subr.bf16.mxu1 %v4067_v18  ;;  %v4009_v18 = vld [vmem:[%s5738_s1 + $0x524] ss:$8 sps:$4 sm:$0xff]  }
  0x26   :  { %1878 = vmatpush1.bf16.msra.mxu1 %v4072_v19  ;;  %v4163_v19 = vld [vmem:[%s5738_s1 + $0x120] ss:$8 sps:$4 sm:$0xff]  }
  0x27   :  { %1976 = vmatpush1.bf16.msra.mxu0 %v3877_v20  ;;  %v3959_v20 = vld [vmem:[%s5738_s1 + $0x430] ss:$8 sps:$4 sm:$0xff]  }
  0x28   :  { %1977 = vmatprep.subr.bf16.mxu0 %v3878_v21  ;;  %v3964_v21 = vld [vmem:[%s5738_s1 + $0x444] ss:$8 sps:$4 sm:$0xff]  }
  0x2b   :  { %1978 = vmatpush1.bf16.msra.mxu0 %v3880_v22  ;;  %v4073_v22 = vld [vmem:[%s5738_s1 + $0x44] ss:$8 sps:$4 sm:$0xff]  }
  0x2c   :  { %1979 = vmatprep.subr.bf16.mxu0 %v3881_v23  ;;  %v4078_v23 = vld [vmem:[%s5738_s1 + $0x40] ss:$8 sps:$4 sm:$0xff]   ;;  %1879 = vmatprep.subr.bf16.mxu1 %v4073_v22  ;;  %v4012_v22 = vld [vmem:[%s5738_s1 + $0x534] ss:$8 sps:$4 sm:$0xff]  }
  0x2d   :  { %1880 = vmatpush1.bf16.msra.mxu1 %v4078_v23  ;;  %v4169_v23 = vld [vmem:[%s5738_s1 + $0x130] ss:$8 sps:$4 sm:$0xff]  }
  0x2f   :  { %1980 = vmatpush1.bf16.msra.mxu0 %v3883_v24  ;;  %v3962_v24 = vld [vmem:[%s5738_s1 + $0x440] ss:$8 sps:$4 sm:$0xff]  }
  0x30   :  { %1981 = vmatprep.subr.bf16.mxu0 %v3884_v25  ;;  %v3967_v25 = vld [vmem:[%s5738_s1 + $0x454] ss:$8 sps:$4 sm:$0xff]  }
  0x33   :  { %1982 = vmatpush1.bf16.msra.mxu0 %v3886_v26  ;;  %v4079_v26 = vld [vmem:[%s5738_s1 + $0x54] ss:$8 sps:$4 sm:$0xff]  }
  0x34   :  { %1983 = vmatprep.subr.bf16.mxu0 %v3887_v27  ;;  %v4084_v27 = vld [vmem:[%s5738_s1 + $0x50] ss:$8 sps:$4 sm:$0xff]   ;;  %1881 = vmatprep.subr.bf16.mxu1 %v4079_v26  ;;  %v4015_v26 = vld [vmem:[%s5738_s1 + $0x544] ss:$8 sps:$4 sm:$0xff]  }
  0x35   :  { %1882 = vmatpush1.bf16.msra.mxu1 %v4084_v27  ;;  %v4175_v27 = vld [vmem:[%s5738_s1 + $0x140] ss:$8 sps:$4 sm:$0xff]  }
  0x37   :  { %1984 = vmatpush1.bf16.msra.mxu0 %v3889_v28  ;;  %v3965_v28 = vld [vmem:[%s5738_s1 + $0x450] ss:$8 sps:$4 sm:$0xff]  }
  0x38   :  { %1985 = vmatprep.subr.bf16.mxu0 %v3890_v29  ;;  %v3970_v29 = vld [vmem:[%s5738_s1 + $0x464] ss:$8 sps:$4 sm:$0xff]  }
  0x3b   :  { %1986 = vmatpush1.bf16.msra.mxu0 %v3892_v30  ;;  %v4085_v30 = vld [vmem:[%s5738_s1 + $0x64] ss:$8 sps:$4 sm:$0xff]  }
  0x3c   :  { %1987 = vmatprep.subr.bf16.mxu0 %v3893_v31  ;;  %v4090_v31 = vld [vmem:[%s5738_s1 + $0x60] ss:$8 sps:$4 sm:$0xff]   ;;  %1883 = vmatprep.subr.bf16.mxu1 %v4085_v30  ;;  %v4018_v30 = vld [vmem:[%s5738_s1 + $0x554] ss:$8 sps:$4 sm:$0xff]  }
  0x3d   :  { %1884 = vmatpush1.bf16.msra.mxu1 %v4090_v31  ;;  %v4181_v31 = vld [vmem:[%s5738_s1 + $0x150] ss:$8 sps:$4 sm:$0xff]  }
  0x3f   :  { %1988 = vmatpush1.bf16.msra.mxu0 %v3895_v32  ;;  %v3968_v32 = vld [vmem:[%s5738_s1 + $0x460] ss:$8 sps:$4 sm:$0xff]  }
  0x40   :  { %2000 = vmatprep.subr.bf16.mxu0 %v3901_v33  ;;  %v3973_v33 = vld [vmem:[%s5738_s1 + $0x474] ss:$8 sps:$4 sm:$0xff]  }
  0x42   :  { %1990 = vmatmul.mubr.bf16.vlgmr.msra.gmra.mrb[0].mxu0 %v3896_v34  ;;  %v4091_v34 = vld [vmem:[%s5738_s1 + $0x74] ss:$8 sps:$4 sm:$0xff]  }
  0x43   :  { %2001 = vmatpush1.bf16.msra.mxu0 %v3899_v35  ;;  %2032 = vmatprep.mubr.bf16.mxu0 %v3949_v36  ;;  %v4096_v35 = vld [vmem:[%s5738_s1 + $0x70] ss:$8 sps:$4 sm:$0xff]  }
  0x44   :  { %2002 = vmatprep.subr.bf16.mxu0 %v3904_v37  ;;  %1885 = vmatprep.subr.bf16.mxu1 %v4091_v34  ;;  %v3971_v36 = vld [vmem:[%s5738_s1 + $0x470] ss:$8 sps:$4 sm:$0xff]   ;;  %v3976_v37 = vld [vmem:[%s5738_s1 + $0x484] ss:$8 sps:$4 sm:$0xff]  }
  0x45   :  { %1886 = vmatpush1.bf16.msra.mxu1 %v4096_v35  ;;  %v4021_v34 = vld [vmem:[%s5738_s1 + $0x564] ss:$8 sps:$4 sm:$0xff]   ;;  %v4187_v35 = vld [vmem:[%s5738_s1 + $0x160] ss:$8 sps:$4 sm:$0xff]  }
  0x47   :  { %2003 = vmatpush1.bf16.msra.mxu0 %v3902_v38  ;;  %v4097_v38 = vld [vmem:[%s5738_s1 + $0x84] ss:$8 sps:$4 sm:$0xff]  }
  0x48   :  { %2004 = vmatprep.subr.bf16.mxu0 %v3907_v39  ;;  %v4102_v39 = vld [vmem:[%s5738_s1 + $0x80] ss:$8 sps:$4 sm:$0xff]   ;;  %1887 = vmatprep.subr.bf16.mxu1 %v4097_v38  ;;  %v4024_v38 = vld [vmem:[%s5738_s1 + $0x574] ss:$8 sps:$4 sm:$0xff]  }
  0x49   :  { %1888 = vmatpush1.bf16.msra.mxu1 %v4102_v39  ;;  %v4193_v39 = vld [vmem:[%s5738_s1 + $0x170] ss:$8 sps:$4 sm:$0xff]  }
  0x4b   :  { %2005 = vmatpush1.bf16.msra.mxu0 %v3905_v40  ;;  %v3974_v40 = vld [vmem:[%s5738_s1 + $0x480] ss:$8 sps:$4 sm:$0xff]  }
  0x4c   :  { %2006 = vmatprep.subr.bf16.mxu0 %v3910_v41  ;;  %v4103_v41 = vld [vmem:[%s5738_s1 + $0x94] ss:$8 sps:$4 sm:$0xff]  }
  0x4d   :  { %1889 = vmatprep.subr.bf16.mxu1 %v4103_v41  ;;  %v4201_v41 = vld [vmem:[%s5738_s1 + $0x184] ss:$8 sps:$4 sm:$0xff]  }
  0x4f   :  { %2007 = vmatpush1.bf16.msra.mxu0 %v3908_v42  ;;  %v3979_v42 = vld [vmem:[%s5738_s1 + $0x494] ss:$8 sps:$4 sm:$0xff]  }
  0x50   :  { %2008 = vmatprep.subr.bf16.mxu0 %v3913_v43  ;;  %v4108_v43 = vld [vmem:[%s5738_s1 + $0x90] ss:$8 sps:$4 sm:$0xff]  }
  0x51   :  { %1890 = vmatpush1.bf16.msra.mxu1 %v4108_v43  ;;  %v4199_v43 = vld [vmem:[%s5738_s1 + $0x180] ss:$8 sps:$4 sm:$0xff]  }
  0x53   :  { %2009 = vmatpush1.bf16.msra.mxu0 %v3911_v44  ;;  %v3977_v44 = vld [vmem:[%s5738_s1 + $0x490] ss:$8 sps:$4 sm:$0xff]  }
  0x54   :  { %2010 = vmatprep.subr.bf16.mxu0 %v3916_v45  ;;  %v4109_v45 = vld [vmem:[%s5738_s1 + $0xa4] ss:$8 sps:$4 sm:$0xff]  }
  0x55   :  { %1891 = vmatprep.subr.bf16.mxu1 %v4109_v45  ;;  %v4207_v45 = vld [vmem:[%s5738_s1 + $0x194] ss:$8 sps:$4 sm:$0xff]  }
  0x57   :  { %2011 = vmatpush1.bf16.msra.mxu0 %v3914_v46  ;;  %v3982_v46 = vld [vmem:[%s5738_s1 + $0x4a4] ss:$8 sps:$4 sm:$0xff]  }
  0x58   :  { %2012 = vmatprep.subr.bf16.mxu0 %v3919_v47  ;;  %v4114_v47 = vld [vmem:[%s5738_s1 + $0xa0] ss:$8 sps:$4 sm:$0xff]  }
  0x59   :  { %1892 = vmatpush1.bf16.msra.mxu1 %v4114_v47  ;;  %v4205_v47 = vld [vmem:[%s5738_s1 + $0x190] ss:$8 sps:$4 sm:$0xff]  }
  0x5b   :  { %2013 = vmatpush1.bf16.msra.mxu0 %v3917_v48  ;;  %v3980_v48 = vld [vmem:[%s5738_s1 + $0x4a0] ss:$8 sps:$4 sm:$0xff]  }
  0x5c   :  { %2014 = vmatprep.subr.bf16.mxu0 %v3922_v49  ;;  %v4115_v49 = vld [vmem:[%s5738_s1 + $0xb4] ss:$8 sps:$4 sm:$0xff]  }
  0x5d   :  { %1893 = vmatprep.subr.bf16.mxu1 %v4115_v49  ;;  %v4213_v49 = vld [vmem:[%s5738_s1 + $0x1a4] ss:$8 sps:$4 sm:$0xff]  }
  0x5f   :  { %2015 = vmatpush1.bf16.msra.mxu0 %v3920_v50  ;;  %v3985_v50 = vld [vmem:[%s5738_s1 + $0x4b4] ss:$8 sps:$4 sm:$0xff]  }
  0x60   :  { %2016 = vmatprep.subr.bf16.mxu0 %v3925_v51  ;;  %v4120_v51 = vld [vmem:[%s5738_s1 + $0xb0] ss:$8 sps:$4 sm:$0xff]  }
  0x61   :  { %1894 = vmatpush1.bf16.msra.mxu1 %v4120_v51  ;;  %v4211_v51 = vld [vmem:[%s5738_s1 + $0x1a0] ss:$8 sps:$4 sm:$0xff]  }
  0x63   :  { %2017 = vmatpush1.bf16.msra.mxu0 %v3923_v52  ;;  %v3983_v52 = vld [vmem:[%s5738_s1 + $0x4b0] ss:$8 sps:$4 sm:$0xff]  }
  0x64   :  { %2018 = vmatprep.subr.bf16.mxu0 %v3928_v53  ;;  %v4121_v53 = vld [vmem:[%s5738_s1 + $0xc4] ss:$8 sps:$4 sm:$0xff]  }
  0x65   :  { %1895 = vmatprep.subr.bf16.mxu1 %v4121_v53  ;;  %v4219_v53 = vld [vmem:[%s5738_s1 + $0x1b4] ss:$8 sps:$4 sm:$0xff]  }
  0x67   :  { %2019 = vmatpush1.bf16.msra.mxu0 %v3926_v54  ;;  %v3988_v54 = vld [vmem:[%s5738_s1 + $0x4c4] ss:$8 sps:$4 sm:$0xff]  }
  0x68   :  { %2020 = vmatprep.subr.bf16.mxu0 %v3931_v55  ;;  %v4126_v55 = vld [vmem:[%s5738_s1 + $0xc0] ss:$8 sps:$4 sm:$0xff]  }
  0x69   :  { %1896 = vmatpush1.bf16.msra.mxu1 %v4126_v55  ;;  %v4217_v55 = vld [vmem:[%s5738_s1 + $0x1b0] ss:$8 sps:$4 sm:$0xff]  }
  0x6b   :  { %2021 = vmatpush1.bf16.msra.mxu0 %v3929_v56  ;;  %v3986_v56 = vld [vmem:[%s5738_s1 + $0x4c0] ss:$8 sps:$4 sm:$0xff]  }
  0x6c   :  { %2022 = vmatprep.subr.bf16.mxu0 %v3934_v57  ;;  %v4127_v57 = vld [vmem:[%s5738_s1 + $0xd4] ss:$8 sps:$4 sm:$0xff]  }
  0x6d   :  { %1897 = vmatprep.subr.bf16.mxu1 %v4127_v57  ;;  %v4225_v57 = vld [vmem:[%s5738_s1 + $0x1c4] ss:$8 sps:$4 sm:$0xff]  }
  0x6f   :  { %2023 = vmatpush1.bf16.msra.mxu0 %v3932_v58  ;;  %v3991_v58 = vld [vmem:[%s5738_s1 + $0x4d4] ss:$8 sps:$4 sm:$0xff]  }
  0x70   :  { %2024 = vmatprep.subr.bf16.mxu0 %v3937_v59  ;;  %v4132_v59 = vld [vmem:[%s5738_s1 + $0xd0] ss:$8 sps:$4 sm:$0xff]  }
  0x71   :  { %1898 = vmatpush1.bf16.msra.mxu1 %v4132_v59  ;;  %v4223_v59 = vld [vmem:[%s5738_s1 + $0x1c0] ss:$8 sps:$4 sm:$0xff]  }
  0x73   :  { %2025 = vmatpush1.bf16.msra.mxu0 %v3935_v60  ;;  %v3989_v60 = vld [vmem:[%s5738_s1 + $0x4d0] ss:$8 sps:$4 sm:$0xff]  }
  0x74   :  { %2026 = vmatprep.subr.bf16.mxu0 %v3940_v61  ;;  %v4133_v61 = vld [vmem:[%s5738_s1 + $0xe4] ss:$8 sps:$4 sm:$0xff]  }
  0x75   :  { %1899 = vmatprep.subr.bf16.mxu1 %v4133_v61  ;;  %v4231_v61 = vld [vmem:[%s5738_s1 + $0x1d4] ss:$8 sps:$4 sm:$0xff]  }
  0x77   :  { %2027 = vmatpush1.bf16.msra.mxu0 %v3938_v62  ;;  %v3994_v62 = vld [vmem:[%s5738_s1 + $0x4e4] ss:$8 sps:$4 sm:$0xff]  }
  0x78   :  { %2028 = vmatprep.subr.bf16.mxu0 %v3943_v63  ;;  %v4138_v63 = vld [vmem:[%s5738_s1 + $0xe0] ss:$8 sps:$4 sm:$0xff]  }
  0x79   :  { %1900 = vmatpush1.bf16.msra.mxu1 %v4138_v63  ;;  %v4229_v63 = vld [vmem:[%s5738_s1 + $0x1d0] ss:$8 sps:$4 sm:$0xff]  }
  0x7b   :  { %2029 = vmatpush1.bf16.msra.mxu0 %v3941_v0  ;;  %v3992_v0 = vld [vmem:[%s5738_s1 + $0x4e0] ss:$8 sps:$4 sm:$0xff]  }
  0x7c   :  { %2030 = vmatprep.subr.bf16.mxu0 %v3946_v1  ;;  %v4139_v1 = vld [vmem:[%s5738_s1 + $0xf4] ss:$8 sps:$4 sm:$0xff]  }
  0x7d   :  { %1901 = vmatprep.subr.bf16.mxu1 %v4139_v1  ;;  %v4237_v1 = vld [vmem:[%s5738_s1 + $0x1e4] ss:$8 sps:$4 sm:$0xff]  }
  0x7f   :  { %2031 = vmatpush1.bf16.msra.mxu0 %v3944_v2  ;;  %v3997_v2 = vld [vmem:[%s5738_s1 + $0x4f4] ss:$8 sps:$4 sm:$0xff]  }
  0x80   :  { %2043 = vmatprep.subr.bf16.mxu0 %v3952_v3  ;;  %v4144_v3 = vld [vmem:[%s5738_s1 + $0xf0] ss:$8 sps:$4 sm:$0xff]  }
  0x81   :  { %1902 = vmatpush1.bf16.msra.mxu1 %v4144_v3  ;;  %v4235_v3 = vld [vmem:[%s5738_s1 + $0x1e0] ss:$8 sps:$4 sm:$0xff]  }
  0x82   :  { %2033 = vmatmul.mubr.bf16.vlgmr.msra.gmra.mrb[0].mxu0 %v3947_v5  ;;  %v4145_v5 = vld [vmem:[%s5739_s0] ss:$72 sps:$4 sm:$0xff]   ;;  %1914 = vmatprep.subr.bf16.mxu1 %v4150_v9 }
  0x83   :  { %2044 = vmatpush1.bf16.msra.mxu0 %v3950_v7  ;;  %2075 = vmatprep.mubr.bf16.mxu0 %v4000_v8  ;;  %v4148_v7 = vld [vmem:[%s5738_s1 + $0x100] ss:$8 sps:$4 sm:$0xff]   ;;  %v4003_v8 = vld [vmem:[%s5738_s1 + $0x504] ss:$8 sps:$4 sm:$0xff]  }
  0x84   :  { %2045 = vmatprep.subr.bf16.mxu0 %v3955_v10  ;;  %v3998_v10 = vld [vmem:[%s5739_s0 + $0x20] ss:$72 sps:$4 sm:$0xff]   ;;  %1904 = vmatmul.mubr.bf16.vlgmr.msra.gmra.mrb[0].mxu1 %v4145_v5  ;;  %v4243_v5 = vld [vmem:[%s5738_s1 + $0x1f4] ss:$8 sps:$4 sm:$0xff]  }
  0x85   :  { %1915 = vmatpush1.bf16.msra.mxu1 %v4148_v7  ;;  %v4241_v7 = vld [vmem:[%s5738_s1 + $0x1f0] ss:$8 sps:$4 sm:$0xff]  }
  0x86   :  { %v4247_v9 = vld [vmem:[%s5739_s0 + $0x8] ss:$72 sps:$4 sm:$0xff]  }
  0x87   :  { %2046 = vmatpush1.bf16.msra.mxu0 %v3953_v12  ;;  %v4056_v12 = vld [vmem:[%s5739_s0 + $0x2c] ss:$72 sps:$4 sm:$0xff]  }
  0x88   :  { %2047 = vmatprep.subr.bf16.mxu0 %v3958_v13  ;;  %v4156_v13 = vld [vmem:[%s5738_s1 + $0x114] ss:$8 sps:$4 sm:$0xff]  }
  0x89   :  { %1916 = vmatprep.subr.bf16.mxu1 %v4156_v13  ;;  %v4057_v13 = vld [vmem:[%s5738_s1 + $0x600] ss:$8 sps:$4 sm:$0xff]  }
  0x8a   :  { %1917 = vmatpush1.bf16.msra.mxu1 %v4154_v15  ;;  %v4065_v15 = vld [vmem:[%s5738_s1 + $0x614] ss:$8 sps:$4 sm:$0xff]  }
  0x8b   :  { %2048 = vmatpush1.bf16.msra.mxu0 %v3956_v16  ;;  %v4004_v16 = vld [vmem:[%s5738_s1 + $0x510] ss:$8 sps:$4 sm:$0xff]  }
  0x8c   :  { %2049 = vmatprep.subr.bf16.mxu0 %v3961_v17  ;;  %v4165_v17 = vld [vmem:[%s5738_s1 + $0x124] ss:$8 sps:$4 sm:$0xff]  }
  0x8d   :  { %1918 = vmatprep.subr.bf16.mxu1 %v4165_v17  ;;  %v4071_v17 = vld [vmem:[%s5738_s1 + $0x624] ss:$8 sps:$4 sm:$0xff]  }
  0x8e   :  { %1919 = vmatpush1.bf16.msra.mxu1 %v4163_v19  ;;  %v4077_v19 = vld [vmem:[%s5738_s1 + $0x634] ss:$8 sps:$4 sm:$0xff]  }
  0x8f   :  { %2050 = vmatpush1.bf16.msra.mxu0 %v3959_v20  ;;  %v4007_v20 = vld [vmem:[%s5738_s1 + $0x520] ss:$8 sps:$4 sm:$0xff]  }
  0x90   :  { %2051 = vmatprep.subr.bf16.mxu0 %v3964_v21  ;;  %v4171_v21 = vld [vmem:[%s5738_s1 + $0x134] ss:$8 sps:$4 sm:$0xff]  }
  0x91   :  { %1920 = vmatprep.subr.bf16.mxu1 %v4171_v21  ;;  %v4083_v21 = vld [vmem:[%s5738_s1 + $0x644] ss:$8 sps:$4 sm:$0xff]  }
  0x92   :  { %1921 = vmatpush1.bf16.msra.mxu1 %v4169_v23  ;;  %v4089_v23 = vld [vmem:[%s5738_s1 + $0x654] ss:$8 sps:$4 sm:$0xff]  }
  0x93   :  { %2052 = vmatpush1.bf16.msra.mxu0 %v3962_v24  ;;  %v4010_v24 = vld [vmem:[%s5738_s1 + $0x530] ss:$8 sps:$4 sm:$0xff]  }
  0x94   :  { %2053 = vmatprep.subr.bf16.mxu0 %v3967_v25  ;;  %v4177_v25 = vld [vmem:[%s5738_s1 + $0x144] ss:$8 sps:$4 sm:$0xff]  }
  0x95   :  { %1922 = vmatprep.subr.bf16.mxu1 %v4177_v25  ;;  %v4095_v25 = vld [vmem:[%s5738_s1 + $0x664] ss:$8 sps:$4 sm:$0xff]  }
  0x96   :  { %1923 = vmatpush1.bf16.msra.mxu1 %v4175_v27  ;;  %v4101_v27 = vld [vmem:[%s5738_s1 + $0x674] ss:$8 sps:$4 sm:$0xff]  }
  0x97   :  { %2054 = vmatpush1.bf16.msra.mxu0 %v3965_v28  ;;  %v4013_v28 = vld [vmem:[%s5738_s1 + $0x540] ss:$8 sps:$4 sm:$0xff]  }
  0x98   :  { %2055 = vmatprep.subr.bf16.mxu0 %v3970_v29  ;;  %v4183_v29 = vld [vmem:[%s5738_s1 + $0x154] ss:$8 sps:$4 sm:$0xff]  }
  0x99   :  { %1924 = vmatprep.subr.bf16.mxu1 %v4183_v29  ;;  %v4107_v29 = vld [vmem:[%s5738_s1 + $0x684] ss:$8 sps:$4 sm:$0xff]  }
  0x9a   :  { %1925 = vmatpush1.bf16.msra.mxu1 %v4181_v31  ;;  %v4113_v31 = vld [vmem:[%s5738_s1 + $0x694] ss:$8 sps:$4 sm:$0xff]  }
  0x9b   :  { %2056 = vmatpush1.bf16.msra.mxu0 %v3968_v32  ;;  %v4016_v32 = vld [vmem:[%s5738_s1 + $0x550] ss:$8 sps:$4 sm:$0xff]  }
  0x9c   :  { %2057 = vmatprep.subr.bf16.mxu0 %v3973_v33  ;;  %v4189_v33 = vld [vmem:[%s5738_s1 + $0x164] ss:$8 sps:$4 sm:$0xff]  }
  0x9d   :  { %1926 = vmatprep.subr.bf16.mxu1 %v4189_v33  ;;  %v4119_v33 = vld [vmem:[%s5738_s1 + $0x6a4] ss:$8 sps:$4 sm:$0xff]  }
  0x9e   :  { %1927 = vmatpush1.bf16.msra.mxu1 %v4187_v35  ;;  %v4125_v35 = vld [vmem:[%s5738_s1 + $0x6b4] ss:$8 sps:$4 sm:$0xff]  }
  0x9f   :  { %2058 = vmatpush1.bf16.msra.mxu0 %v3971_v36  ;;  %v4019_v36 = vld [vmem:[%s5738_s1 + $0x560] ss:$8 sps:$4 sm:$0xff]  }
  0xa0   :  { %2059 = vmatprep.subr.bf16.mxu0 %v3976_v37  ;;  %v4195_v37 = vld [vmem:[%s5738_s1 + $0x174] ss:$8 sps:$4 sm:$0xff]  }
  0xa1   :  { %1928 = vmatprep.subr.bf16.mxu1 %v4195_v37  ;;  %v4131_v37 = vld [vmem:[%s5738_s1 + $0x6c4] ss:$8 sps:$4 sm:$0xff]  }
  0xa2   :  { %1929 = vmatpush1.bf16.msra.mxu1 %v4193_v39  ;;  %v4137_v39 = vld [vmem:[%s5738_s1 + $0x6d4] ss:$8 sps:$4 sm:$0xff]  }
  0xa3   :  { %2060 = vmatpush1.bf16.msra.mxu0 %v3974_v40  ;;  %v4022_v40 = vld [vmem:[%s5738_s1 + $0x570] ss:$8 sps:$4 sm:$0xff]   ;;  %1930 = vmatprep.subr.bf16.mxu1 %v4201_v41  ;;  %v4143_v41 = vld [vmem:[%s5738_s1 + $0x6e4] ss:$8 sps:$4 sm:$0xff]  }
  0xa4   :  { %2061 = vmatprep.subr.bf16.mxu0 %v3979_v42  ;;  %v4027_v42 = vld [vmem:[%s5738_s1 + $0x584] ss:$8 sps:$4 sm:$0xff]  }
  0xa6   :  { %1931 = vmatpush1.bf16.msra.mxu1 %v4199_v43  ;;  %v4153_v43 = vld [vmem:[%s5738_s1 + $0x6f4] ss:$8 sps:$4 sm:$0xff]  }
  0xa7   :  { %2062 = vmatpush1.bf16.msra.mxu0 %v3977_v44  ;;  %v4025_v44 = vld [vmem:[%s5738_s1 + $0x580] ss:$8 sps:$4 sm:$0xff]   ;;  %1932 = vmatprep.subr.bf16.mxu1 %v4207_v45  ;;  %v4162_v45 = vld [vmem:[%s5738_s1 + $0x704] ss:$8 sps:$4 sm:$0xff]  }
  0xa8   :  { %2063 = vmatprep.subr.bf16.mxu0 %v3982_v46  ;;  %v4030_v46 = vld [vmem:[%s5738_s1 + $0x594] ss:$8 sps:$4 sm:$0xff]  }
  0xaa   :  { %1933 = vmatpush1.bf16.msra.mxu1 %v4205_v47  ;;  %v4160_v47 = vld [vmem:[%s5738_s1 + $0x700] ss:$8 sps:$4 sm:$0xff]  }
  0xab   :  { %2064 = vmatpush1.bf16.msra.mxu0 %v3980_v48  ;;  %v4028_v48 = vld [vmem:[%s5738_s1 + $0x590] ss:$8 sps:$4 sm:$0xff]   ;;  %1934 = vmatprep.subr.bf16.mxu1 %v4213_v49  ;;  %v4168_v49 = vld [vmem:[%s5738_s1 + $0x714] ss:$8 sps:$4 sm:$0xff]  }
  0xac   :  { %2065 = vmatprep.subr.bf16.mxu0 %v3985_v50  ;;  %v4033_v50 = vld [vmem:[%s5738_s1 + $0x5a4] ss:$8 sps:$4 sm:$0xff]  }
  0xae   :  { %1935 = vmatpush1.bf16.msra.mxu1 %v4211_v51  ;;  %v4174_v51 = vld [vmem:[%s5738_s1 + $0x724] ss:$8 sps:$4 sm:$0xff]  }
  0xaf   :  { %2066 = vmatpush1.bf16.msra.mxu0 %v3983_v52  ;;  %v4031_v52 = vld [vmem:[%s5738_s1 + $0x5a0] ss:$8 sps:$4 sm:$0xff]   ;;  %1936 = vmatprep.subr.bf16.mxu1 %v4219_v53  ;;  %v4180_v53 = vld [vmem:[%s5738_s1 + $0x734] ss:$8 sps:$4 sm:$0xff]  }
  0xb0   :  { %2067 = vmatprep.subr.bf16.mxu0 %v3988_v54  ;;  %v4036_v54 = vld [vmem:[%s5738_s1 + $0x5b4] ss:$8 sps:$4 sm:$0xff]  }
  0xb2   :  { %1937 = vmatpush1.bf16.msra.mxu1 %v4217_v55  ;;  %v4186_v55 = vld [vmem:[%s5738_s1 + $0x744] ss:$8 sps:$4 sm:$0xff]  }
  0xb3   :  { %2068 = vmatpush1.bf16.msra.mxu0 %v3986_v56  ;;  %v4034_v56 = vld [vmem:[%s5738_s1 + $0x5b0] ss:$8 sps:$4 sm:$0xff]   ;;  %1938 = vmatprep.subr.bf16.mxu1 %v4225_v57  ;;  %v4192_v57 = vld [vmem:[%s5738_s1 + $0x754] ss:$8 sps:$4 sm:$0xff]  }
  0xb4   :  { %2069 = vmatprep.subr.bf16.mxu0 %v3991_v58  ;;  %v4039_v58 = vld [vmem:[%s5738_s1 + $0x5c4] ss:$8 sps:$4 sm:$0xff]  }
  0xb6   :  { %1939 = vmatpush1.bf16.msra.mxu1 %v4223_v59  ;;  %v4198_v59 = vld [vmem:[%s5738_s1 + $0x764] ss:$8 sps:$4 sm:$0xff]  }
  0xb7   :  { %2070 = vmatpush1.bf16.msra.mxu0 %v3989_v60  ;;  %v4037_v60 = vld [vmem:[%s5738_s1 + $0x5c0] ss:$8 sps:$4 sm:$0xff]   ;;  %1940 = vmatprep.subr.bf16.mxu1 %v4231_v61 }
  0xb8   :  { %2071 = vmatprep.subr.bf16.mxu0 %v3994_v62  ;;  %v4042_v62 = vld [vmem:[%s5738_s1 + $0x5d4] ss:$8 sps:$4 sm:$0xff]   ;;  %v2264_v61 = vld [vmem:[%s5740_s3] sm:$0xff] }
  0xba   :  { %1941 = vmatpush1.bf16.msra.mxu1 %v4229_v63  ;;  %v2272_v63 = vld [vmem:[%s5740_s3 + $0x40] sm:$0xff] }
  0xbb   :  { %2072 = vmatpush1.bf16.msra.mxu0 %v3992_v0  ;;  %v4040_v0 = vld [vmem:[%s5738_s1 + $0x5d0] ss:$8 sps:$4 sm:$0xff]   ;;  %1942 = vmatprep.subr.bf16.mxu1 %v4237_v1 }
  0xbc   :  { %2073 = vmatprep.subr.bf16.mxu0 %v3997_v2  ;;  %v4045_v2 = vld [vmem:[%s5738_s1 + $0x5e4] ss:$8 sps:$4 sm:$0xff]  }
  0xbe   :  { %1943 = vmatpush1.bf16.msra.mxu1 %v4235_v3  ;;  %v2276_v3 = vld [vmem:[%s5740_s3 + $0x60] sm:$0xff] }
  0xbf   :  { %2074 = vmatpush1.bf16.msra.mxu0 %v3995_v4  ;;  %v4043_v4 = vld [vmem:[%s5738_s1 + $0x5e0] ss:$8 sps:$4 sm:$0xff]   ;;  %1944 = vmatprep.subr.bf16.mxu1 %v4243_v5 }
  0xc0   :  { %2086 = vmatprep.subr.bf16.mxu0 %v4003_v8  ;;  %v4048_v8 = vld [vmem:[%s5738_s1 + $0x5f0] ss:$8 sps:$4 sm:$0xff]   ;;  %v2280_v5 = vld [vmem:[%s5740_s3 + $0x80] sm:$0xff] }
  0xc2   :  { %2076 = vmatmul.mubr.bf16.vlgmr.msra.gmra.mrb[0].mxu0 %v3998_v10  ;;  %v4249_v10 = vld [vmem:[%s5739_s0 + $0xc] ss:$72 sps:$4 sm:$0xff]   ;;  %1945 = vmatpush1.bf16.msra.mxu1 %v4241_v7  ;;  %v4202_v7 = vld [vmem:[%s5738_s1 + $0x770] ss:$8 sps:$4 sm:$0xff]  }
  0xc3   :  { %2087 = vmatpush1.bf16.msra.mxu0 %v4001_v11  ;;  %2118 = vmatprep.mubr.bf16.mxu0 %v4056_v12  ;;  %v4059_v11 = vld [vmem:[%s5738_s1 + $0x604] ss:$8 sps:$4 sm:$0xff]   ;;  %v4054_v12 = vld [vmem:[%s5739_s0 + $0x28] ss:$72 sps:$4 sm:$0xff]  }
  0xc4   :  { %2088 = vmatprep.subr.bf16.mxu0 %v4006_v14  ;;  %1946 = vmatprep.mubr.bf16.mxu1 %v4249_v10  ;;  %v4159_v14 = vld [vmem:[%s5739_s0 + $0x34] ss:$72 sps:$4 sm:$0xff]  }
  0xc5   :  { %1947 = vmatmul.mubr.bf16.vlgmr.msra.gmra.mrb[0].mxu1 %v4247_v9  ;;  %v4210_v9 = vld [vmem:[%s5738_s1 + $0x784] ss:$8 sps:$4 sm:$0xff]  }
  0xc7   :  { %2089 = vmatpush1.bf16.msra.mxu0 %v4004_v16  ;;  %v4063_v16 = vld [vmem:[%s5738_s1 + $0x610] ss:$8 sps:$4 sm:$0xff]  }
  0xc8   :  { %2090 = vmatprep.subr.bf16.mxu0 %v4009_v18  ;;  %v4069_v18 = vld [vmem:[%s5738_s1 + $0x620] ss:$8 sps:$4 sm:$0xff]  }
  0xcb   :  { %2091 = vmatpush1.bf16.msra.mxu0 %v4007_v20  ;;  %v4075_v20 = vld [vmem:[%s5738_s1 + $0x630] ss:$8 sps:$4 sm:$0xff]  }
  0xcc   :  { %2092 = vmatprep.subr.bf16.mxu0 %v4012_v22  ;;  %v4081_v22 = vld [vmem:[%s5738_s1 + $0x640] ss:$8 sps:$4 sm:$0xff]  }
  0xcf   :  { %2093 = vmatpush1.bf16.msra.mxu0 %v4010_v24  ;;  %v4087_v24 = vld [vmem:[%s5738_s1 + $0x650] ss:$8 sps:$4 sm:$0xff]  }
  0xd0   :  { %2094 = vmatprep.subr.bf16.mxu0 %v4015_v26  ;;  %v4093_v26 = vld [vmem:[%s5738_s1 + $0x660] ss:$8 sps:$4 sm:$0xff]  }
  0xd3   :  { %2095 = vmatpush1.bf16.msra.mxu0 %v4013_v28  ;;  %v4099_v28 = vld [vmem:[%s5738_s1 + $0x670] ss:$8 sps:$4 sm:$0xff]  }
  0xd4   :  { %2096 = vmatprep.subr.bf16.mxu0 %v4018_v30  ;;  %v4105_v30 = vld [vmem:[%s5738_s1 + $0x680] ss:$8 sps:$4 sm:$0xff]  }
  0xd7   :  { %2097 = vmatpush1.bf16.msra.mxu0 %v4016_v32  ;;  %v4111_v32 = vld [vmem:[%s5738_s1 + $0x690] ss:$8 sps:$4 sm:$0xff]  }
  0xd8   :  { %2098 = vmatprep.subr.bf16.mxu0 %v4021_v34  ;;  %v4117_v34 = vld [vmem:[%s5738_s1 + $0x6a0] ss:$8 sps:$4 sm:$0xff]  }
  0xdb   :  { %2099 = vmatpush1.bf16.msra.mxu0 %v4019_v36  ;;  %v4123_v36 = vld [vmem:[%s5738_s1 + $0x6b0] ss:$8 sps:$4 sm:$0xff]  }
  0xdc   :  { %2100 = vmatprep.subr.bf16.mxu0 %v4024_v38  ;;  %v4129_v38 = vld [vmem:[%s5738_s1 + $0x6c0] ss:$8 sps:$4 sm:$0xff]  }
  0xdf   :  { %2101 = vmatpush1.bf16.msra.mxu0 %v4022_v40  ;;  %v4135_v40 = vld [vmem:[%s5738_s1 + $0x6d0] ss:$8 sps:$4 sm:$0xff]  }
  0xe0   :  { %2102 = vmatprep.subr.bf16.mxu0 %v4027_v42  ;;  %v4141_v42 = vld [vmem:[%s5738_s1 + $0x6e0] ss:$8 sps:$4 sm:$0xff]  }
  0xe3   :  { %2103 = vmatpush1.bf16.msra.mxu0 %v4025_v44  ;;  %v4151_v44 = vld [vmem:[%s5738_s1 + $0x6f0] ss:$8 sps:$4 sm:$0xff]  }
  0xe4   :  { %2104 = vmatprep.subr.bf16.mxu0 %v4030_v46  ;;  %v4157_v46 = vld [vmem:[%s5739_s0 + $0x30] ss:$72 sps:$4 sm:$0xff]  }
  0xe7   :  { %2105 = vmatpush1.bf16.msra.mxu0 %v4028_v48  ;;  %v4255_v48 = vld [vmem:[%s5739_s0 + $0x3c] ss:$72 sps:$4 sm:$0xff]  }
  0xe8   :  { %2106 = vmatprep.subr.bf16.mxu0 %v4033_v50  ;;  %v4166_v50 = vld [vmem:[%s5738_s1 + $0x710] ss:$8 sps:$4 sm:$0xff]  }
  0xeb   :  { %2107 = vmatpush1.bf16.msra.mxu0 %v4031_v52  ;;  %v4172_v52 = vld [vmem:[%s5738_s1 + $0x720] ss:$8 sps:$4 sm:$0xff]  }
  0xec   :  { %2108 = vmatprep.subr.bf16.mxu0 %v4036_v54  ;;  %v4178_v54 = vld [vmem:[%s5738_s1 + $0x730] ss:$8 sps:$4 sm:$0xff]  }
  0xef   :  { %2109 = vmatpush1.bf16.msra.mxu0 %v4034_v56  ;;  %v4184_v56 = vld [vmem:[%s5738_s1 + $0x740] ss:$8 sps:$4 sm:$0xff]  }
  0xf0   :  { %2110 = vmatprep.subr.bf16.mxu0 %v4039_v58  ;;  %v4190_v58 = vld [vmem:[%s5738_s1 + $0x750] ss:$8 sps:$4 sm:$0xff]  }
  0xf3   :  { %2111 = vmatpush1.bf16.msra.mxu0 %v4037_v60  ;;  %v4196_v60 = vld [vmem:[%s5738_s1 + $0x760] ss:$8 sps:$4 sm:$0xff]  }
  0xf4   :  { %2112 = vmatprep.subr.bf16.mxu0 %v4042_v62  ;;  %v2268_v62 = vld [vmem:[%s5740_s3 + $0x20] sm:$0xff] }
  0xf5   :  { %v3668_v1 = vcombine.low %v2264_v61, %v2268_v62 }
  0xf7   :  { %2113 = vmatpush1.bf16.msra.mxu0 %v4040_v0  ;;  %v4204_v0 = vld [vmem:[%s5738_s1 + $0x774] ss:$8 sps:$4 sm:$0xff]  }
  0xf8   :  { %2114 = vmatprep.subr.bf16.mxu0 %v4045_v2  ;;  %v3669_v2 = vcombine.high %v2264_v61, %v2268_v62  ;;  %v2356_v61 = vld [vmem:[%s5740_s3 + $0x2e0] sm:$0xff] }
  0xf9   :  { %v4256_v62 = vld [vmem:[%s5738_s1 + $0x800] ss:$8 sps:$4 sm:$0xff]  }
  0xfa   :  { %3074 = vmatprep.subr.bf16.mxu1 %v3669_v2 }
  0xfb   :  { %2115 = vmatpush1.bf16.msra.mxu0 %v4043_v4  ;;  %v3677_v4 = vcombine.high %v2272_v63, %v2276_v3  ;;  %3075 = vmatpush1.bf16.msra.mxu1 %v3668_v1 }
  0xfc   :  { %2116 = vmatprep.subr.bf16.mxu0 %v4050_v6  ;;  %v2284_v6 = vld [vmem:[%s5740_s3 + $0xa0] sm:$0xff] }
  0xfd   :  { %3076 = vmatprep.subr.bf16.mxu1 %v3677_v4  ;;  %v3685_v10 = vcombine.high %v2280_v5, %v2284_v6  ;;  %v2364_v4 = vld [vmem:[%s5740_s3 + $0x320] sm:$0xff] }
  0xff   :  { %2117 = vmatpush1.bf16.msra.mxu0 %v4048_v8  ;;  %v3676_v8 = vcombine.low %v2272_v63, %v2276_v3  ;;  %v4306_v63 = vld [vmem:[%s5739_s0 + $0x44] ss:$72 sps:$4 sm:$0xff]  }
 0x100   :  { %2129 = vmatprep.subr.bf16.mxu0 %v4059_v11  ;;  %v2288_v11 = vld [vmem:[%s5740_s3 + $0xc0] sm:$0xff] }
 0x101   :  { %3077 = vmatpush1.bf16.msra.mxu1 %v3676_v8  ;;  %v2360_v3 = vld [vmem:[%s5740_s3 + $0x300] sm:$0xff] }
 0x102   :  { %2119 = vmatmul.mubr.bf16.vlgmr.msra.gmra.mrb[0].mxu0 %v4054_v12  ;;  %v2292_v12 = vld [vmem:[%s5740_s3 + $0xe0] sm:$0xff]  ;;  %3078 = vmatprep.subr.bf16.mxu1 %v3685_v10  ;;  %v3765_v8 = vcombine.high %v2360_v3, %v2364_v4 }
 0x103   :  { %2130 = vmatpush1.bf16.msra.mxu0 %v4057_v13  ;;  %2161 = vmatprep.mubr.bf16.mxu0 %v4159_v14  ;;  %v4208_v13 = vld [vmem:[%s5738_s1 + $0x780] ss:$8 sps:$4 sm:$0xff]   ;;  %v3684_v14 = vcombine.low %v2280_v5, %v2284_v6  ;;  %v4259_v5 = vld [vmem:[%s5738_s1 + $0x810] ss:$8 sps:$4 sm:$0xff]   ;;  %v4264_v6 = vld [vmem:[%s5738_s1 + $0x824] ss:$8 sps:$4 sm:$0xff]  }
 0x104   :  { %2131 = vmatprep.subr.bf16.mxu0 %v4065_v15  ;;  %v4216_v15 = vld [vmem:[%s5738_s1 + $0x794] ss:$8 sps:$4 sm:$0xff]   ;;  %v2372_v10 = vld [vmem:[%s5740_s3 + $0x360] sm:$0xff] }
 0x105   :  { %3079 = vmatpush1.bf16.msra.mxu1 %v3684_v14 }
 0x107   :  { %2132 = vmatpush1.bf16.msra.mxu0 %v4063_v16  ;;  %v3693_v16 = vcombine.high %v2288_v11, %v2292_v12 }
 0x108   :  { %2133 = vmatprep.subr.bf16.mxu0 %v4071_v17  ;;  %v2296_v17 = vld [vmem:[%s5740_s3 + $0x100] sm:$0xff] }
 0x109   :  { %3080 = vmatprep.subr.bf16.mxu1 %v3693_v16  ;;  %v4270_v16 = vld [vmem:[%s5738_s1 + $0x844] ss:$8 sps:$4 sm:$0xff]  }
 0x10b   :  { %2134 = vmatpush1.bf16.msra.mxu0 %v4069_v18  ;;  %v2300_v18 = vld [vmem:[%s5740_s3 + $0x120] sm:$0xff] }
 0x10c   :  { %2135 = vmatprep.subr.bf16.mxu0 %v4077_v19  ;;  %v4214_v19 = vld [vmem:[%s5738_s1 + $0x790] ss:$8 sps:$4 sm:$0xff]  }
 0x10f   :  { %2136 = vmatpush1.bf16.msra.mxu0 %v4075_v20  ;;  %v3692_v20 = vcombine.low %v2288_v11, %v2292_v12  ;;  %v4262_v11 = vld [vmem:[%s5738_s1 + $0x820] ss:$8 sps:$4 sm:$0xff]   ;;  %v4267_v12 = vld [vmem:[%s5738_s1 + $0x834] ss:$8 sps:$4 sm:$0xff]  }
 0x110   :  { %2137 = vmatprep.subr.bf16.mxu0 %v4083_v21  ;;  %v4222_v21 = vld [vmem:[%s5738_s1 + $0x7a4] ss:$8 sps:$4 sm:$0xff]  }
 0x111   :  { %3081 = vmatpush1.bf16.msra.mxu1 %v3692_v20  ;;  %v4271_v20 = vld [vmem:[%s5738_s1 + $0x850] ss:$8 sps:$4 sm:$0xff]  }
 0x113   :  { %2138 = vmatpush1.bf16.msra.mxu0 %v4081_v22  ;;  %v3701_v22 = vcombine.high %v2296_v17, %v2300_v18 }
 0x114   :  { %2139 = vmatprep.subr.bf16.mxu0 %v4089_v23  ;;  %v2304_v23 = vld [vmem:[%s5740_s3 + $0x140] sm:$0xff] }
 0x115   :  { %3082 = vmatprep.subr.bf16.mxu1 %v3701_v22  ;;  %v4274_v22 = vld [vmem:[%s5738_s1 + $0x860] ss:$8 sps:$4 sm:$0xff]  }
 0x117   :  { %2140 = vmatpush1.bf16.msra.mxu0 %v4087_v24  ;;  %v2308_v24 = vld [vmem:[%s5740_s3 + $0x160] sm:$0xff] }
 0x118   :  { %2141 = vmatprep.subr.bf16.mxu0 %v4095_v25  ;;  %v4220_v25 = vld [vmem:[%s5738_s1 + $0x7a0] ss:$8 sps:$4 sm:$0xff]  }
 0x11b   :  { %2142 = vmatpush1.bf16.msra.mxu0 %v4093_v26  ;;  %v3700_v26 = vcombine.low %v2296_v17, %v2300_v18  ;;  %v4268_v18 = vld [vmem:[%s5738_s1 + $0x840] ss:$8 sps:$4 sm:$0xff]  }
 0x11c   :  { %2143 = vmatprep.subr.bf16.mxu0 %v4101_v27  ;;  %v4228_v27 = vld [vmem:[%s5738_s1 + $0x7b4] ss:$8 sps:$4 sm:$0xff]  }
 0x11d   :  { %3083 = vmatpush1.bf16.msra.mxu1 %v3700_v26  ;;  %v4280_v26 = vld [vmem:[%s5738_s1 + $0x880] ss:$8 sps:$4 sm:$0xff]  }
 0x11f   :  { %2144 = vmatpush1.bf16.msra.mxu0 %v4099_v28  ;;  %v3709_v28 = vcombine.high %v2304_v23, %v2308_v24 }
 0x120   :  { %2145 = vmatprep.subr.bf16.mxu0 %v4107_v29  ;;  %v2312_v29 = vld [vmem:[%s5740_s3 + $0x180] sm:$0xff] }
 0x121   :  { %3084 = vmatprep.subr.bf16.mxu1 %v3709_v28  ;;  %v4283_v28 = vld [vmem:[%s5738_s1 + $0x890] ss:$8 sps:$4 sm:$0xff]  }
 0x123   :  { %2146 = vmatpush1.bf16.msra.mxu0 %v4105_v30  ;;  %v2316_v30 = vld [vmem:[%s5740_s3 + $0x1a0] sm:$0xff] }
 0x124   :  { %2147 = vmatprep.subr.bf16.mxu0 %v4113_v31  ;;  %v4226_v31 = vld [vmem:[%s5738_s1 + $0x7b0] ss:$8 sps:$4 sm:$0xff]  }
 0x127   :  { %2148 = vmatpush1.bf16.msra.mxu0 %v4111_v32  ;;  %v3708_v32 = vcombine.low %v2304_v23, %v2308_v24  ;;  %v4279_v23 = vld [vmem:[%s5738_s1 + $0x874] ss:$8 sps:$4 sm:$0xff]   ;;  %v4277_v24 = vld [vmem:[%s5738_s1 + $0x870] ss:$8 sps:$4 sm:$0xff]  }
 0x128   :  { %2149 = vmatprep.subr.bf16.mxu0 %v4119_v33  ;;  %v4234_v33 = vld [vmem:[%s5738_s1 + $0x7c4] ss:$8 sps:$4 sm:$0xff]  }
 0x129   :  { %3085 = vmatpush1.bf16.msra.mxu1 %v3708_v32  ;;  %v4289_v32 = vld [vmem:[%s5738_s1 + $0x8b0] ss:$8 sps:$4 sm:$0xff]  }
 0x12b   :  { %2150 = vmatpush1.bf16.msra.mxu0 %v4117_v34  ;;  %v3717_v34 = vcombine.high %v2312_v29, %v2316_v30 }
 0x12c   :  { %2151 = vmatprep.subr.bf16.mxu0 %v4125_v35  ;;  %v2320_v35 = vld [vmem:[%s5740_s3 + $0x1c0] sm:$0xff] }
 0x12d   :  { %3086 = vmatprep.subr.bf16.mxu1 %v3717_v34  ;;  %v4292_v34 = vld [vmem:[%s5738_s1 + $0x8c0] ss:$8 sps:$4 sm:$0xff]  }
 0x12f   :  { %2152 = vmatpush1.bf16.msra.mxu0 %v4123_v36  ;;  %v2324_v36 = vld [vmem:[%s5740_s3 + $0x1e0] sm:$0xff] }
 0x130   :  { %2153 = vmatprep.subr.bf16.mxu0 %v4131_v37  ;;  %v4232_v37 = vld [vmem:[%s5738_s1 + $0x7c0] ss:$8 sps:$4 sm:$0xff]  }
 0x133   :  { %2154 = vmatpush1.bf16.msra.mxu0 %v4129_v38  ;;  %v3716_v38 = vcombine.low %v2312_v29, %v2316_v30  ;;  %v4288_v29 = vld [vmem:[%s5738_s1 + $0x8a4] ss:$8 sps:$4 sm:$0xff]   ;;  %v4286_v30 = vld [vmem:[%s5738_s1 + $0x8a0] ss:$8 sps:$4 sm:$0xff]  }
 0x134   :  { %2155 = vmatprep.subr.bf16.mxu0 %v4137_v39  ;;  %v4240_v39 = vld [vmem:[%s5738_s1 + $0x7d4] ss:$8 sps:$4 sm:$0xff]  }
 0x135   :  { %3087 = vmatpush1.bf16.msra.mxu1 %v3716_v38  ;;  %v4298_v38 = vld [vmem:[%s5738_s1 + $0x8e0] ss:$8 sps:$4 sm:$0xff]  }
 0x137   :  { %2156 = vmatpush1.bf16.msra.mxu0 %v4135_v40  ;;  %v3725_v40 = vcombine.high %v2320_v35, %v2324_v36 }
 0x138   :  { %2157 = vmatprep.subr.bf16.mxu0 %v4143_v41  ;;  %v2328_v41 = vld [vmem:[%s5740_s3 + $0x200] sm:$0xff] }
 0x139   :  { %3088 = vmatprep.subr.bf16.mxu1 %v3725_v40  ;;  %v4301_v40 = vld [vmem:[%s5738_s1 + $0x8f0] ss:$8 sps:$4 sm:$0xff]  }
 0x13b   :  { %2158 = vmatpush1.bf16.msra.mxu0 %v4141_v42  ;;  %v2332_v42 = vld [vmem:[%s5740_s3 + $0x220] sm:$0xff] }
 0x13c   :  { %2159 = vmatprep.subr.bf16.mxu0 %v4153_v43  ;;  %v4238_v43 = vld [vmem:[%s5738_s1 + $0x7d0] ss:$8 sps:$4 sm:$0xff]  }
 0x13f   :  { %2160 = vmatpush1.bf16.msra.mxu0 %v4151_v44  ;;  %v3724_v44 = vcombine.low %v2320_v35, %v2324_v36  ;;  %v4297_v35 = vld [vmem:[%s5738_s1 + $0x8d4] ss:$8 sps:$4 sm:$0xff]   ;;  %v4295_v36 = vld [vmem:[%s5738_s1 + $0x8d0] ss:$8 sps:$4 sm:$0xff]  }
 0x140   :  { %2172 = vmatprep.subr.bf16.mxu0 %v4162_v45  ;;  %v4246_v45 = vld [vmem:[%s5738_s1 + $0x7e4] ss:$8 sps:$4 sm:$0xff]  }
 0x141   :  { %3089 = vmatpush1.bf16.msra.mxu1 %v3724_v44 }
 0x142   :  { %2162 = vmatmul.mubr.bf16.vlgmr.msra.gmra.mrb[0].mxu0 %v4157_v46  ;;  %v3733_v46 = vcombine.high %v2328_v41, %v2332_v42 }
 0x143   :  { %2173 = vmatpush1.bf16.msra.mxu0 %v4160_v47  ;;  %2204 = vmatprep.mubr.bf16.mxu0 %v4255_v48  ;;  %v2336_v47 = vld [vmem:[%s5740_s3 + $0x240] sm:$0xff] }
 0x144   :  { %2174 = vmatprep.subr.bf16.mxu0 %v4168_v49  ;;  %v2340_v48 = vld [vmem:[%s5740_s3 + $0x260] sm:$0xff]  ;;  %3090 = vmatprep.subr.bf16.mxu1 %v3733_v46 }
 0x145   :  { %v4244_v49 = vld [vmem:[%s5738_s1 + $0x7e0] ss:$8 sps:$4 sm:$0xff]  }
 0x146   :  { %v2376_v46 = vld [vmem:[%s5740_s3 + $0x380] sm:$0xff] }
 0x147   :  { %2175 = vmatpush1.bf16.msra.mxu0 %v4166_v50  ;;  %v3732_v50 = vcombine.low %v2328_v41, %v2332_v42  ;;  %v4304_v41 = vld [vmem:[%s5739_s0 + $0x40] ss:$72 sps:$4 sm:$0xff]  }
 0x148   :  { %2176 = vmatprep.subr.bf16.mxu0 %v4174_v51  ;;  %v4252_v51 = vld [vmem:[%s5738_s1 + $0x7f4] ss:$8 sps:$4 sm:$0xff]  }
 0x149   :  { %3091 = vmatpush1.bf16.msra.mxu1 %v3732_v50  ;;  %v2384_v50 = vld [vmem:[%s5740_s3 + $0x3c0] sm:$0xff] }
 0x14b   :  { %2177 = vmatpush1.bf16.msra.mxu0 %v4172_v52  ;;  %v3741_v52 = vcombine.high %v2336_v47, %v2340_v48 }
 0x14c   :  { %2178 = vmatprep.subr.bf16.mxu0 %v4180_v53  ;;  %v2344_v53 = vld [vmem:[%s5740_s3 + $0x280] sm:$0xff] }
 0x14d   :  { %3092 = vmatprep.subr.bf16.mxu1 %v3741_v52 }
 0x14f   :  { %2179 = vmatpush1.bf16.msra.mxu0 %v4178_v54  ;;  %v2348_v54 = vld [vmem:[%s5740_s3 + $0x2a0] sm:$0xff] }
 0x150   :  { %2180 = vmatprep.subr.bf16.mxu0 %v4186_v55  ;;  %v4250_v55 = vld [vmem:[%s5738_s1 + $0x7f0] ss:$8 sps:$4 sm:$0xff]   ;;  %v3748_v1 = vcombine.low %v2344_v53, %v2348_v54 }
 0x153   :  { %2181 = vmatpush1.bf16.msra.mxu0 %v4184_v56  ;;  %v3740_v56 = vcombine.low %v2336_v47, %v2340_v48  ;;  %v2380_v47 = vld [vmem:[%s5740_s3 + $0x3a0] sm:$0xff] }
 0x154   :  { %2182 = vmatprep.subr.bf16.mxu0 %v4192_v57  ;;  %v4258_v57 = vld [vmem:[%s5738_s1 + $0x804] ss:$8 sps:$4 sm:$0xff]   ;;  %v3781_v48 = vcombine.high %v2376_v46, %v2380_v47 }
 0x155   :  { %3093 = vmatpush1.bf16.msra.mxu1 %v3740_v56 }
 0x157   :  { %2183 = vmatpush1.bf16.msra.mxu0 %v4190_v58  ;;  %v3749_v58 = vcombine.high %v2344_v53, %v2348_v54  ;;  %v2265_v54 = vld [vmem:[%s5740_s3 + $0x8] sm:$0xff] }
 0x158   :  { %2184 = vmatprep.subr.bf16.mxu0 %v4198_v59  ;;  %v4253_v59 = vld [vmem:[%s5739_s0 + $0x38] ss:$72 sps:$4 sm:$0xff]  }
 0x159   :  { %3094 = vmatprep.subr.bf16.mxu1 %v3749_v58  ;;  %v331_v58 = vlaneseq }
 0x15a   :  { %3095 = vmatpush1.bf16.msra.mxu1 %v3748_v1 }
 0x15b   :  { %2185 = vmatpush1.bf16.msra.mxu0 %v4196_v60  ;;  %v2352_v60 = vld [vmem:[%s5740_s3 + $0x2c0] sm:$0xff] }
 0x15c   :  { %2186 = vmatprep.subr.bf16.mxu0 %v4204_v0  ;;  %v4261_v0 = vld [vmem:[%s5738_s1 + $0x814] ss:$8 sps:$4 sm:$0xff]   ;;  %v3757_v2 = vcombine.high %v2352_v60, %v2356_v61 }
 0x15e   :  { %3096 = vmatprep.subr.bf16.mxu1 %v3757_v2 }
 0x15f   :  { %2187 = vmatpush1.bf16.msra.mxu0 %v4202_v7  ;;  %v3756_v7 = vcombine.low %v2352_v60, %v2356_v61  ;;  %v329_v61 = vld [vmem:[%s5741_s2] sm:$0x3] }
 0x160   :  { %2188 = vmatprep.subr.bf16.mxu0 %v4210_v9  ;;  %v2368_v9 = vld [vmem:[%s5740_s3 + $0x340] sm:$0xff] }
 0x161   :  { %3097 = vmatpush1.bf16.msra.mxu1 %v3756_v7  ;;  %v3773_v14 = vcombine.high %v2368_v9, %v2372_v10  ;;  %v3772_v17 = vcombine.low %v2368_v9, %v2372_v10 }
 0x162   :  { %3098 = vmatprep.subr.bf16.mxu1 %v3765_v8 }
 0x163   :  { %2189 = vmatpush1.bf16.msra.mxu0 %v4208_v13  ;;  %v3764_v13 = vcombine.low %v2360_v3, %v2364_v4 }
 0x164   :  { %2190 = vmatprep.subr.bf16.mxu0 %v4216_v15  ;;  %v4265_v15 = vld [vmem:[%s5738_s1 + $0x830] ss:$8 sps:$4 sm:$0xff]  }
 0x165   :  { %3099 = vmatpush1.bf16.msra.mxu1 %v3764_v13 }
 0x166   :  { %3100 = vmatprep.subr.bf16.mxu1 %v3773_v14 }
 0x167   :  { %2191 = vmatpush1.bf16.msra.mxu0 %v4214_v19  ;;  %v4273_v19 = vld [vmem:[%s5738_s1 + $0x854] ss:$8 sps:$4 sm:$0xff]  }
 0x168   :  { %2192 = vmatprep.subr.bf16.mxu0 %v4222_v21  ;;  %v4276_v21 = vld [vmem:[%s5738_s1 + $0x864] ss:$8 sps:$4 sm:$0xff]  }
 0x169   :  { %3101 = vmatpush1.bf16.msra.mxu1 %v3772_v17  ;;  %v2273_v17 = vld [vmem:[%s5740_s3 + $0x48] sm:$0xff] }
 0x16a   :  { %3102 = vmatprep.subr.bf16.mxu1 %v3781_v48 }
 0x16b   :  { %2193 = vmatpush1.bf16.msra.mxu0 %v4220_v25  ;;  %v4282_v25 = vld [vmem:[%s5738_s1 + $0x884] ss:$8 sps:$4 sm:$0xff]  }
 0x16c   :  { %2194 = vmatprep.subr.bf16.mxu0 %v4228_v27  ;;  %v4285_v27 = vld [vmem:[%s5738_s1 + $0x894] ss:$8 sps:$4 sm:$0xff]  }
 0x16f   :  { %2195 = vmatpush1.bf16.msra.mxu0 %v4226_v31  ;;  %v4291_v31 = vld [vmem:[%s5738_s1 + $0x8b4] ss:$8 sps:$4 sm:$0xff]  }
 0x170   :  { %2196 = vmatprep.subr.bf16.mxu0 %v4234_v33  ;;  %v4294_v33 = vld [vmem:[%s5738_s1 + $0x8c4] ss:$8 sps:$4 sm:$0xff]  }
 0x173   :  { %2197 = vmatpush1.bf16.msra.mxu0 %v4232_v37  ;;  %v4300_v37 = vld [vmem:[%s5738_s1 + $0x8e4] ss:$8 sps:$4 sm:$0xff]  }
 0x174   :  { %2198 = vmatprep.subr.bf16.mxu0 %v4240_v39  ;;  %v4303_v39 = vld [vmem:[%s5738_s1 + $0x8f4] ss:$8 sps:$4 sm:$0xff]  }
 0x177   :  { %2199 = vmatpush1.bf16.msra.mxu0 %v4238_v43 }
 0x178   :  { %2200 = vmatprep.subr.bf16.mxu0 %v4246_v45 }
 0x17b   :  { %2201 = vmatpush1.bf16.msra.mxu0 %v4244_v49  ;;  %v3780_v49 = vcombine.low %v2376_v46, %v2380_v47  ;;  %v2329_v46 = vld [vmem:[%s5740_s3 + $0x208] sm:$0xff] }
 0x17c   :  { %2202 = vmatprep.subr.bf16.mxu0 %v4252_v51  ;;  %v2388_v51 = vld [vmem:[%s5740_s3 + $0x3e0] sm:$0xff]  ;;  %v2333_v47 = vld [vmem:[%s5740_s3 + $0x228] sm:$0xff] }
 0x17d   :  { %3103 = vmatpush1.bf16.msra.mxu1 %v3780_v49  ;;  %v3789_v52 = vcombine.high %v2384_v50, %v2388_v51  ;;  %v3788_v53 = vcombine.low %v2384_v50, %v2388_v51  ;;  %v3735_v49 = vcombine.high %v2329_v46, %v2333_v47  ;;  %v2337_v50 = vld [vmem:[%s5740_s3 + $0x248] sm:$0xff] }
 0x17e   :  { %v2341_v51 = vld [vmem:[%s5740_s3 + $0x268] sm:$0xff] }
 0x17f   :  { %2203 = vmatpush1.bf16.msra.mxu0 %v4250_v55  ;;  %3104 = vmatprep.subr.bf16.mxu1 %v3789_v52  ;;  %v2269_v55 = vld [vmem:[%s5740_s3 + $0x28] sm:$0xff]  ;;  %v3734_v52 = vcombine.low %v2329_v46, %v2333_v47  ;;  %v2322_v47 = vld [vmem:[%s5740_s3 + $0x1d0] sm:$0xff] }
 0x180   :  { %2215 = vmatprep.subr.bf16.mxu0 %v4258_v57  ;;  %v3671_v56 = vcombine.high %v2265_v54, %v2269_v55  ;;  %v3670_v57 = vcombine.low %v2265_v54, %v2269_v55  ;;  %v2345_v54 = vld [vmem:[%s5740_s3 + $0x288] sm:$0xff] }
 0x181   :  { %3105 = vmatpush1.bf16.msra.mxu1 %v3788_v53  ;;  %v3743_v53 = vcombine.high %v2337_v50, %v2341_v51  ;;  %v2349_v55 = vld [vmem:[%s5740_s3 + $0x2a8] sm:$0xff] }
 0x182   :  { %2205 = vmatmul.mubr.bf16.vlgmr.msra.gmra.mrb[0].mxu0 %v4253_v59  ;;  %3117 = vmatprep.subr.bf16.mxu1 %v3671_v56  ;;  %v5362_v59 = vshrl.u32 %v331_v58, 7  ;;  %v3742_v56 = vcombine.low %v2337_v50, %v2341_v51  ;;  %v2353_v58 = vld [vmem:[%s5740_s3 + $0x2c8] sm:$0xff]  ;;  %v2330_v51 = vld [vmem:[%s5740_s3 + $0x210] sm:$0xff] }
 0x183   :  { %2216 = vmatpush1.bf16.msra.mxu0 %v4256_v62  ;;  %2247 = vmatprep.mubr.bf16.mxu0 %v4306_v63 }
 0x184   :  { %2217 = vmatprep.subr.bf16.mxu0 %v4261_v0  ;;  %v333_v60 = vsub.s32 0, %v5362_v59  ;;  %v337_v62 = vsub.s32 1, %v5362_v59 }
 0x186   :  { %v334_v63 = vrot.slane %v329_v61, %v333_v60  ;;  %v338_v0 = vrot.slane %v329_v61, %v337_v62  ;;  %v2357_v61 = vld [vmem:[%s5740_s3 + $0x2e8] sm:$0xff] }
 0x187   :  { %2218 = vmatpush1.bf16.msra.mxu0 %v4259_v5 }
 0x188   :  { %2219 = vmatprep.subr.bf16.mxu0 %v4264_v6 }
 0x18b   :  { %2220 = vmatpush1.bf16.msra.mxu0 %v4262_v11 }
 0x18c   :  { %2221 = vmatprep.subr.bf16.mxu0 %v4267_v12 }
 0x18f   :  { %2222 = vmatpush1.bf16.msra.mxu0 %v4265_v15 }
 0x190   :  { %2223 = vmatprep.subr.bf16.mxu0 %v4270_v16 }
 0x193   :  { %2224 = vmatpush1.bf16.msra.mxu0 %v4268_v18  ;;  %v2277_v18 = vld [vmem:[%s5740_s3 + $0x68] sm:$0xff] }
 0x194   :  { %2225 = vmatprep.subr.bf16.mxu0 %v4273_v19 }
 0x197   :  { %2226 = vmatpush1.bf16.msra.mxu0 %v4271_v20 }
 0x198   :  { %2227 = vmatprep.subr.bf16.mxu0 %v4276_v21  ;;  %v1948_v42 = vpop.f32.mrb[0].mxu1  ;;  %v3679_v21 = vcombine.high %v2273_v17, %v2277_v18 }
 0x199   :  { %v1950_v43 = vpop.f32.mrb[1].mxu1  ;;  %v3812_v1 = vadd.f32 %v1948_v42, %v334_v63  ;;  %v2321_v42 = vld [vmem:[%s5740_s3 + $0x1c8] sm:$0xff] }
 0x19a   :  { %v1952_v44 = vpop.f32.mrb[2].mxu1  ;;  %v3814_v2 = vadd.f32 %v1950_v43, %v338_v0  ;;  %v2325_v43 = vld [vmem:[%s5740_s3 + $0x1e8] sm:$0xff] }
 0x19b   :  { %2228 = vmatpush1.bf16.msra.mxu0 %v4274_v22  ;;  %v1954_v45 = vpop.f32.mrb[3].mxu1  ;;  %v3816_v4 = vadd.f32 %v1952_v44, %v334_v63  ;;  %v2281_v22 = vld [vmem:[%s5740_s3 + $0x88] sm:$0xff]  ;;  %v3726_v48 = vcombine.low %v2321_v42, %v2325_v43  ;;  %v3750_v63 = vcombine.low %v2345_v54, %v2349_v55 }
 0x19c   :  { %2229 = vmatprep.subr.bf16.mxu0 %v4279_v23  ;;  %v3818_v7 = vadd.f32 %v1954_v45, %v338_v0  ;;  %v2285_v23 = vld [vmem:[%s5740_s3 + $0xa8] sm:$0xff]  ;;  %v3727_v45 = vcombine.high %v2321_v42, %v2325_v43  ;;  %v3759_v0 = vcombine.high %v2353_v58, %v2357_v61  ;;  %v2314_v43 = vld [vmem:[%s5740_s3 + $0x190] sm:$0xff] }
 0x19f   :  { %2230 = vmatpush1.bf16.msra.mxu0 %v4277_v24  ;;  %v3678_v24 = vcombine.low %v2273_v17, %v2277_v18  ;;  %v2266_v17 = vld [vmem:[%s5740_s3 + $0x10] sm:$0xff] }
 0x1a0   :  { %2231 = vmatprep.subr.bf16.mxu0 %v4282_v25  ;;  %v3687_v25 = vcombine.high %v2281_v22, %v2285_v23  ;;  %v2270_v18 = vld [vmem:[%s5740_s3 + $0x30] sm:$0xff] }
 0x1a3   :  { %2232 = vmatpush1.bf16.msra.mxu0 %v4280_v26  ;;  %v2289_v26 = vld [vmem:[%s5740_s3 + $0xc8] sm:$0xff] }
 0x1a4   :  { %2233 = vmatprep.subr.bf16.mxu0 %v4285_v27  ;;  %v2293_v27 = vld [vmem:[%s5740_s3 + $0xe8] sm:$0xff] }
 0x1a7   :  { %2234 = vmatpush1.bf16.msra.mxu0 %v4283_v28  ;;  %v3686_v28 = vcombine.low %v2281_v22, %v2285_v23  ;;  %v3673_v22 = vcombine.high %v2266_v17, %v2270_v18  ;;  %v2274_v23 = vld [vmem:[%s5740_s3 + $0x50] sm:$0xff] }
 0x1a8   :  { %2235 = vmatprep.subr.bf16.mxu0 %v4288_v29  ;;  %v3695_v29 = vcombine.high %v2289_v26, %v2293_v27 }
 0x1ab   :  { %2236 = vmatpush1.bf16.msra.mxu0 %v4286_v30  ;;  %v2297_v30 = vld [vmem:[%s5740_s3 + $0x108] sm:$0xff] }
 0x1ac   :  { %2237 = vmatprep.subr.bf16.mxu0 %v4291_v31  ;;  %v2301_v31 = vld [vmem:[%s5740_s3 + $0x128] sm:$0xff] }
 0x1af   :  { %2238 = vmatpush1.bf16.msra.mxu0 %v4289_v32  ;;  %v3694_v32 = vcombine.low %v2289_v26, %v2293_v27  ;;  %v2282_v27 = vld [vmem:[%s5740_s3 + $0x90] sm:$0xff] }
 0x1b0   :  { %2239 = vmatprep.subr.bf16.mxu0 %v4294_v33  ;;  %v3703_v33 = vcombine.high %v2297_v30, %v2301_v31 }
 0x1b3   :  { %2240 = vmatpush1.bf16.msra.mxu0 %v4292_v34  ;;  %v2305_v34 = vld [vmem:[%s5740_s3 + $0x148] sm:$0xff] }
 0x1b4   :  { %2241 = vmatprep.subr.bf16.mxu0 %v4297_v35  ;;  %v2309_v35 = vld [vmem:[%s5740_s3 + $0x168] sm:$0xff] }
 0x1b7   :  { %2242 = vmatpush1.bf16.msra.mxu0 %v4295_v36  ;;  %v3702_v36 = vcombine.low %v2297_v30, %v2301_v31  ;;  %v2290_v31 = vld [vmem:[%s5740_s3 + $0xd0] sm:$0xff] }
 0x1b8   :  { %2243 = vmatprep.subr.bf16.mxu0 %v4300_v37  ;;  %v3711_v37 = vcombine.high %v2305_v34, %v2309_v35 }
 0x1bb   :  { %2244 = vmatpush1.bf16.msra.mxu0 %v4298_v38  ;;  %v2313_v38 = vld [vmem:[%s5740_s3 + $0x188] sm:$0xff] }
 0x1bc   :  { %2245 = vmatprep.subr.bf16.mxu0 %v4303_v39  ;;  %v2317_v39 = vld [vmem:[%s5740_s3 + $0x1a8] sm:$0xff] }
 0x1bd   :  { %v3718_v44 = vcombine.low %v2313_v38, %v2317_v39 }
 0x1bf   :  { %2246 = vmatpush1.bf16.msra.mxu0 %v4301_v40  ;;  %v3710_v40 = vcombine.low %v2305_v34, %v2309_v35  ;;  %v2298_v35 = vld [vmem:[%s5740_s3 + $0x110] sm:$0xff] }
 0x1c2   :  { %2248 = vmatmul.mubr.bf16.vlgmr.msra.gmra.mrb[0].mxu0 %v4304_v41  ;;  %v3719_v41 = vcombine.high %v2313_v38, %v2317_v39  ;;  %v2306_v39 = vld [vmem:[%s5740_s3 + $0x150] sm:$0xff] }
 0x295   :  { %v2249_v3 = vpop.f32.mrb[0].mxu0 }
 0x296   :  { %v3813_v5 = vadd.f32 %v3812_v1, %v2249_v3  ;;  %v2251_v6 = vpop.f32.mrb[1].mxu0  ;;  %v2361_v1 = vld [vmem:[%s5740_s3 + $0x308] sm:$0xff]  ;;  %v3758_v3 = vcombine.low %v2353_v58, %v2357_v61  ;;  %v2346_v61 = vld [vmem:[%s5740_s3 + $0x290] sm:$0xff] }
 0x297   :  { %v3815_v8 = vadd.f32 %v3814_v2, %v2251_v6  ;;  %v2253_v9 = vpop.f32.mrb[2].mxu0  ;;  %v2365_v2 = vld [vmem:[%s5740_s3 + $0x328] sm:$0xff] }
 0x298   :  { %v3817_v10 = vadd.f32 %v3816_v4, %v2253_v9  ;;  %v2255_v11 = vpop.f32.mrb[3].mxu0  ;;  %v2258_v13 = vmax.f32 %v3813_v5, 0.0  ;;  %v3767_v4 = vcombine.high %v2361_v1, %v2365_v2  ;;  %v2369_v5 = vld [vmem:[%s5740_s3 + $0x348] sm:$0xff] }
 0x299   :  { %v3819_v12 = vadd.f32 %v3818_v7, %v2255_v11  ;;  %v2259_v15 = vmax.f32 %v3815_v8, 0.0  ;;  %v2373_v6 = vld [vmem:[%s5740_s3 + $0x368] sm:$0xff]  ;;  %v3766_v7 = vcombine.low %v2361_v1, %v2365_v2  ;;  %v2354_v2 = vld [vmem:[%s5740_s3 + $0x2d0] sm:$0xff] }
 0x29a   :  { %v2260_v14 = vmax.f32 %v3817_v10, 0.0  ;;  %v3775_v8 = vcombine.high %v2369_v5, %v2373_v6  ;;  %v2377_v9 = vld [vmem:[%s5740_s3 + $0x388] sm:$0xff]  ;;  %v3774_v11 = vcombine.low %v2369_v5, %v2373_v6  ;;  %v2362_v6 = vld [vmem:[%s5740_s3 + $0x310] sm:$0xff] }
 0x29b   :  { %v2261_v16 = vmax.f32 %v3819_v12, 0.0  ;;  %v2381_v10 = vld [vmem:[%s5740_s3 + $0x3a8] sm:$0xff] }
 0x29c   :  { %v5379_v19 = vpack.c.bf16 %v2260_v14, %v2258_v13  ;;  %v3783_v12 = vcombine.high %v2377_v9, %v2381_v10  ;;  %v2385_v13 = vld [vmem:[%s5740_s3 + $0x3c8] sm:$0xff] }
 0x29d   :  { %v5381_v20 = vpack.c.bf16 %v2261_v16, %v2259_v15  ;;  %v2389_v14 = vld [vmem:[%s5740_s3 + $0x3e8] sm:$0xff]  ;;  %v3782_v15 = vcombine.low %v2377_v9, %v2381_v10  ;;  %v2370_v10 = vld [vmem:[%s5740_s3 + $0x350] sm:$0xff] }
 0x29e   :  { %v3791_v16 = vcombine.high %v2385_v13, %v2389_v14 }
 0x29f   :  { %3106 = vmatprep.mubr.bf16.mxu1 %v5381_v20 }
 0x2a0   :  { %3107 = vmatmul.mubr.bf16.vlgmr.msra.gmra.mrb[4].mxu1 %v5379_v19 }
 0x2a1   :  { %3118 = vmatpush1.bf16.msra.mxu1 %v3670_v57  ;;  %3149 = vmatprep.mubr.bf16.mxu1 %v5381_v20  ;;  %v3751_v57 = vcombine.high %v2345_v54, %v2349_v55  ;;  %v2338_v55 = vld [vmem:[%s5740_s3 + $0x250] sm:$0xff] }
 0x2a2   :  { %3119 = vmatprep.subr.bf16.mxu1 %v3679_v21  ;;  %v3790_v21 = vcombine.low %v2385_v13, %v2389_v14  ;;  %v2378_v14 = vld [vmem:[%s5740_s3 + $0x390] sm:$0xff] }
 0x2a5   :  { %3120 = vmatpush1.bf16.msra.mxu1 %v3678_v24  ;;  %v2278_v24 = vld [vmem:[%s5740_s3 + $0x70] sm:$0xff] }
 0x2a6   :  { %3121 = vmatprep.subr.bf16.mxu1 %v3687_v25  ;;  %v3672_v25 = vcombine.low %v2266_v17, %v2270_v18  ;;  %v3681_v26 = vcombine.high %v2274_v23, %v2278_v24  ;;  %v2386_v18 = vld [vmem:[%s5740_s3 + $0x3d0] sm:$0xff] }
 0x2a9   :  { %3122 = vmatpush1.bf16.msra.mxu1 %v3686_v28  ;;  %v2286_v28 = vld [vmem:[%s5740_s3 + $0xb0] sm:$0xff] }
 0x2aa   :  { %3123 = vmatprep.subr.bf16.mxu1 %v3695_v29  ;;  %v3680_v29 = vcombine.low %v2274_v23, %v2278_v24  ;;  %v3689_v30 = vcombine.high %v2282_v27, %v2286_v28  ;;  %v2267_v24 = vld [vmem:[%s5740_s3 + $0x18] sm:$0xff] }
 0x2ad   :  { %3124 = vmatpush1.bf16.msra.mxu1 %v3694_v32  ;;  %v2294_v32 = vld [vmem:[%s5740_s3 + $0xf0] sm:$0xff] }
 0x2ae   :  { %3125 = vmatprep.subr.bf16.mxu1 %v3703_v33  ;;  %v3688_v33 = vcombine.low %v2282_v27, %v2286_v28  ;;  %v3697_v34 = vcombine.high %v2290_v31, %v2294_v32  ;;  %v2275_v28 = vld [vmem:[%s5740_s3 + $0x58] sm:$0xff] }
 0x2b1   :  { %3126 = vmatpush1.bf16.msra.mxu1 %v3702_v36  ;;  %v2302_v36 = vld [vmem:[%s5740_s3 + $0x130] sm:$0xff] }
 0x2b2   :  { %3127 = vmatprep.subr.bf16.mxu1 %v3711_v37  ;;  %v3696_v37 = vcombine.low %v2290_v31, %v2294_v32  ;;  %v3705_v38 = vcombine.high %v2298_v35, %v2302_v36  ;;  %v2283_v32 = vld [vmem:[%s5740_s3 + $0x98] sm:$0xff] }
 0x2b5   :  { %3128 = vmatpush1.bf16.msra.mxu1 %v3710_v40  ;;  %v2310_v40 = vld [vmem:[%s5740_s3 + $0x170] sm:$0xff] }
 0x2b6   :  { %3129 = vmatprep.subr.bf16.mxu1 %v3719_v41  ;;  %v3704_v41 = vcombine.low %v2298_v35, %v2302_v36  ;;  %v3713_v42 = vcombine.high %v2306_v39, %v2310_v40  ;;  %v2291_v36 = vld [vmem:[%s5740_s3 + $0xd8] sm:$0xff] }
 0x2b9   :  { %3130 = vmatpush1.bf16.msra.mxu1 %v3718_v44  ;;  %v2318_v44 = vld [vmem:[%s5740_s3 + $0x1b0] sm:$0xff] }
 0x2ba   :  { %3131 = vmatprep.subr.bf16.mxu1 %v3727_v45  ;;  %v3712_v45 = vcombine.low %v2306_v39, %v2310_v40  ;;  %v3721_v46 = vcombine.high %v2314_v43, %v2318_v44  ;;  %v2299_v40 = vld [vmem:[%s5740_s3 + $0x118] sm:$0xff] }
 0x2bd   :  { %3132 = vmatpush1.bf16.msra.mxu1 %v3726_v48  ;;  %v2326_v48 = vld [vmem:[%s5740_s3 + $0x1f0] sm:$0xff] }
 0x2be   :  { %3133 = vmatprep.subr.bf16.mxu1 %v3735_v49  ;;  %v3720_v49 = vcombine.low %v2314_v43, %v2318_v44  ;;  %v3729_v50 = vcombine.high %v2322_v47, %v2326_v48  ;;  %v2307_v43 = vld [vmem:[%s5740_s3 + $0x158] sm:$0xff] }
 0x2bf   :  { %v2311_v44 = vld [vmem:[%s5740_s3 + $0x178] sm:$0xff] }
 0x2c1   :  { %3134 = vmatpush1.bf16.msra.mxu1 %v3734_v52  ;;  %v2334_v52 = vld [vmem:[%s5740_s3 + $0x230] sm:$0xff] }
 0x2c2   :  { %3135 = vmatprep.subr.bf16.mxu1 %v3743_v53  ;;  %v3728_v53 = vcombine.low %v2322_v47, %v2326_v48  ;;  %v3737_v54 = vcombine.high %v2330_v51, %v2334_v52  ;;  %v2315_v47 = vld [vmem:[%s5740_s3 + $0x198] sm:$0xff] }
 0x2c3   :  { %v2319_v48 = vld [vmem:[%s5740_s3 + $0x1b8] sm:$0xff] }
 0x2c5   :  { %3136 = vmatpush1.bf16.msra.mxu1 %v3742_v56  ;;  %v2342_v56 = vld [vmem:[%s5740_s3 + $0x270] sm:$0xff] }
 0x2c6   :  { %3137 = vmatprep.subr.bf16.mxu1 %v3751_v57  ;;  %v3736_v57 = vcombine.low %v2330_v51, %v2334_v52  ;;  %v3745_v58 = vcombine.high %v2338_v55, %v2342_v56  ;;  %v2323_v51 = vld [vmem:[%s5740_s3 + $0x1d8] sm:$0xff] }
 0x2c7   :  { %v2327_v52 = vld [vmem:[%s5740_s3 + $0x1f8] sm:$0xff] }
 0x2c9   :  { %3138 = vmatpush1.bf16.msra.mxu1 %v3750_v63  ;;  %v2350_v63 = vld [vmem:[%s5740_s3 + $0x2b0] sm:$0xff] }
 0x2ca   :  { %3139 = vmatprep.subr.bf16.mxu1 %v3759_v0  ;;  %v3744_v0 = vcombine.low %v2338_v55, %v2342_v56  ;;  %v3753_v1 = vcombine.high %v2346_v61, %v2350_v63  ;;  %v2331_v55 = vld [vmem:[%s5740_s3 + $0x218] sm:$0xff] }
 0x2cb   :  { %v2335_v56 = vld [vmem:[%s5740_s3 + $0x238] sm:$0xff] }
 0x2cd   :  { %3140 = vmatpush1.bf16.msra.mxu1 %v3758_v3  ;;  %v2358_v3 = vld [vmem:[%s5740_s3 + $0x2f0] sm:$0xff] }
 0x2ce   :  { %3141 = vmatprep.subr.bf16.mxu1 %v3767_v4  ;;  %v3752_v4 = vcombine.low %v2346_v61, %v2350_v63  ;;  %v3761_v5 = vcombine.high %v2354_v2, %v2358_v3  ;;  %v2339_v61 = vld [vmem:[%s5740_s3 + $0x258] sm:$0xff] }
 0x2cf   :  { %v2343_v63 = vld [vmem:[%s5740_s3 + $0x278] sm:$0xff] }
 0x2d1   :  { %3142 = vmatpush1.bf16.msra.mxu1 %v3766_v7  ;;  %v2366_v7 = vld [vmem:[%s5740_s3 + $0x330] sm:$0xff] }
 0x2d2   :  { %3143 = vmatprep.subr.bf16.mxu1 %v3775_v8  ;;  %v3760_v8 = vcombine.low %v2354_v2, %v2358_v3  ;;  %v3769_v9 = vcombine.high %v2362_v6, %v2366_v7  ;;  %v2347_v2 = vld [vmem:[%s5740_s3 + $0x298] sm:$0xff] }
 0x2d3   :  { %v2351_v3 = vld [vmem:[%s5740_s3 + $0x2b8] sm:$0xff] }
 0x2d5   :  { %3144 = vmatpush1.bf16.msra.mxu1 %v3774_v11  ;;  %v2374_v11 = vld [vmem:[%s5740_s3 + $0x370] sm:$0xff] }
 0x2d6   :  { %3145 = vmatprep.subr.bf16.mxu1 %v3783_v12  ;;  %v3768_v12 = vcombine.low %v2362_v6, %v2366_v7  ;;  %v3777_v13 = vcombine.high %v2370_v10, %v2374_v11  ;;  %v2355_v6 = vld [vmem:[%s5740_s3 + $0x2d8] sm:$0xff] }
 0x2d7   :  { %v2359_v7 = vld [vmem:[%s5740_s3 + $0x2f8] sm:$0xff] }
 0x2d9   :  { %3146 = vmatpush1.bf16.msra.mxu1 %v3782_v15  ;;  %v2382_v15 = vld [vmem:[%s5740_s3 + $0x3b0] sm:$0xff] }
 0x2da   :  { %3147 = vmatprep.subr.bf16.mxu1 %v3791_v16  ;;  %v3776_v16 = vcombine.low %v2370_v10, %v2374_v11  ;;  %v3785_v17 = vcombine.high %v2378_v14, %v2382_v15  ;;  %v2363_v10 = vld [vmem:[%s5740_s3 + $0x318] sm:$0xff] }
 0x2db   :  { %v2367_v11 = vld [vmem:[%s5740_s3 + $0x338] sm:$0xff] }
 0x2dd   :  { %3148 = vmatpush1.bf16.msra.mxu1 %v3790_v21  ;;  %v2390_v21 = vld [vmem:[%s5740_s3 + $0x3f0] sm:$0xff] }
 0x2de   :  { %3160 = vmatprep.subr.bf16.mxu1 %v3673_v22  ;;  %v3784_v22 = vcombine.low %v2378_v14, %v2382_v15  ;;  %v3793_v23 = vcombine.high %v2386_v18, %v2390_v21  ;;  %v2371_v14 = vld [vmem:[%s5740_s3 + $0x358] sm:$0xff] }
 0x2df   :  { %v2375_v15 = vld [vmem:[%s5740_s3 + $0x378] sm:$0xff] }
 0x2e0   :  { %3150 = vmatmul.mubr.bf16.vlgmr.msra.gmra.mrb[8].mxu1 %v5379_v19 }
 0x2e1   :  { %3161 = vmatpush1.bf16.msra.mxu1 %v3672_v25  ;;  %3192 = vmatprep.mubr.bf16.mxu1 %v5381_v20  ;;  %v2271_v25 = vld [vmem:[%s5740_s3 + $0x38] sm:$0xff] }
 0x2e2   :  { %3162 = vmatprep.subr.bf16.mxu1 %v3681_v26  ;;  %v3792_v26 = vcombine.low %v2386_v18, %v2390_v21  ;;  %v3675_v27 = vcombine.high %v2267_v24, %v2271_v25  ;;  %v2379_v18 = vld [vmem:[%s5740_s3 + $0x398] sm:$0xff] }
 0x2e3   :  { %v2383_v21 = vld [vmem:[%s5740_s3 + $0x3b8] sm:$0xff] }
 0x2e5   :  { %3163 = vmatpush1.bf16.msra.mxu1 %v3680_v29  ;;  %v2279_v29 = vld [vmem:[%s5740_s3 + $0x78] sm:$0xff] }
 0x2e6   :  { %3164 = vmatprep.subr.bf16.mxu1 %v3689_v30  ;;  %v3674_v30 = vcombine.low %v2267_v24, %v2271_v25  ;;  %v3683_v31 = vcombine.high %v2275_v28, %v2279_v29  ;;  %v2387_v24 = vld [vmem:[%s5740_s3 + $0x3d8] sm:$0xff] }
 0x2e7   :  { %v2391_v25 = vld [vmem:[%s5740_s3 + $0x3f8] sm:$0xff] }
 0x2e9   :  { %3165 = vmatpush1.bf16.msra.mxu1 %v3688_v33  ;;  %v2287_v33 = vld [vmem:[%s5740_s3 + $0xb8] sm:$0xff] }
 0x2ea   :  { %3166 = vmatprep.subr.bf16.mxu1 %v3697_v34  ;;  %v3682_v34 = vcombine.low %v2275_v28, %v2279_v29  ;;  %v3691_v35 = vcombine.high %v2283_v32, %v2287_v33  ;;  %v3794_v28 = vcombine.low %v2387_v24, %v2391_v25  ;;  %v5670_v29 = vld [vmem:[%s5742_s4] sm:$0xff] }
 0x2ed   :  { %3167 = vmatpush1.bf16.msra.mxu1 %v3696_v37  ;;  %v2295_v37 = vld [vmem:[%s5740_s3 + $0xf8] sm:$0xff] }
 0x2ee   :  { %3168 = vmatprep.subr.bf16.mxu1 %v3705_v38  ;;  %v3690_v38 = vcombine.low %v2283_v32, %v2287_v33  ;;  %v3699_v39 = vcombine.high %v2291_v36, %v2295_v37  ;;  %v2401_v32 = vrot.slane %v5670_v29, %v337_v62 }
 0x2f1   :  { %3169 = vmatpush1.bf16.msra.mxu1 %v3704_v41  ;;  %v3698_v41 = vcombine.low %v2291_v36, %v2295_v37 }
 0x2f2   :  { %3170 = vmatprep.subr.bf16.mxu1 %v3713_v42 }
 0x2f5   :  { %3171 = vmatpush1.bf16.msra.mxu1 %v3712_v45 }
 0x2f6   :  { %3172 = vmatprep.subr.bf16.mxu1 %v3721_v46  ;;  %v3715_v46 = vcombine.high %v2307_v43, %v2311_v44 }
 0x2f9   :  { %3173 = vmatpush1.bf16.msra.mxu1 %v3720_v49  ;;  %v3714_v49 = vcombine.low %v2307_v43, %v2311_v44 }
 0x2fa   :  { %3174 = vmatprep.subr.bf16.mxu1 %v3729_v50  ;;  %v3723_v50 = vcombine.high %v2315_v47, %v2319_v48 }
 0x2fd   :  { %3175 = vmatpush1.bf16.msra.mxu1 %v3728_v53  ;;  %v3722_v53 = vcombine.low %v2315_v47, %v2319_v48 }
 0x2fe   :  { %3176 = vmatprep.subr.bf16.mxu1 %v3737_v54  ;;  %v3731_v54 = vcombine.high %v2323_v51, %v2327_v52 }
 0x301   :  { %3177 = vmatpush1.bf16.msra.mxu1 %v3736_v57  ;;  %v3730_v57 = vcombine.low %v2323_v51, %v2327_v52  ;;  %v2404_v52 = vsub.s32 2, %v5362_v59 }
 0x302   :  { %3178 = vmatprep.subr.bf16.mxu1 %v3745_v58  ;;  %v3739_v58 = vcombine.high %v2331_v55, %v2335_v56 }
 0x305   :  { %3179 = vmatpush1.bf16.msra.mxu1 %v3744_v0  ;;  %v3738_v0 = vcombine.low %v2331_v55, %v2335_v56  ;;  %v2405_v55 = vrot.slane %v5670_v29, %v2404_v52 }
 0x306   :  { %3180 = vmatprep.subr.bf16.mxu1 %v3753_v1  ;;  %v3747_v1 = vcombine.high %v2339_v61, %v2343_v63 }
 0x309   :  { %3181 = vmatpush1.bf16.msra.mxu1 %v3752_v4  ;;  %v3746_v4 = vcombine.low %v2339_v61, %v2343_v63 }
 0x30a   :  { %3182 = vmatprep.subr.bf16.mxu1 %v3761_v5  ;;  %v3755_v5 = vcombine.high %v2347_v2, %v2351_v3 }
 0x30d   :  { %3183 = vmatpush1.bf16.msra.mxu1 %v3760_v8  ;;  %v3754_v8 = vcombine.low %v2347_v2, %v2351_v3 }
 0x30e   :  { %3184 = vmatprep.subr.bf16.mxu1 %v3769_v9  ;;  %v3763_v9 = vcombine.high %v2355_v6, %v2359_v7 }
 0x311   :  { %3185 = vmatpush1.bf16.msra.mxu1 %v3768_v12  ;;  %v3762_v12 = vcombine.low %v2355_v6, %v2359_v7 }
 0x312   :  { %3186 = vmatprep.subr.bf16.mxu1 %v3777_v13  ;;  %v3771_v13 = vcombine.high %v2363_v10, %v2367_v11 }
 0x315   :  { %3187 = vmatpush1.bf16.msra.mxu1 %v3776_v16  ;;  %v3770_v16 = vcombine.low %v2363_v10, %v2367_v11 }
 0x316   :  { %3188 = vmatprep.subr.bf16.mxu1 %v3785_v17  ;;  %v3779_v17 = vcombine.high %v2371_v14, %v2375_v15 }
 0x319   :  { %3189 = vmatpush1.bf16.msra.mxu1 %v3784_v22  ;;  %v3778_v22 = vcombine.low %v2371_v14, %v2375_v15 }
 0x31a   :  { %3190 = vmatprep.subr.bf16.mxu1 %v3793_v23  ;;  %v3787_v23 = vcombine.high %v2379_v18, %v2383_v21 }
 0x31d   :  { %3191 = vmatpush1.bf16.msra.mxu1 %v3792_v26  ;;  %v3786_v26 = vcombine.low %v2379_v18, %v2383_v21  ;;  %v2412_v21 = vsub.s32 4, %v5362_v59 }
 0x31e   :  { %3203 = vmatprep.subr.bf16.mxu1 %v3675_v27  ;;  %v3795_v27 = vcombine.high %v2387_v24, %v2391_v25 }
 0x31f   :  { %v2413_v24 = vrot.slane %v5670_v29, %v2412_v21 }
 0x320   :  { %3193 = vmatmul.mubr.bf16.vlgmr.msra.gmra.mrb[12].mxu1 %v5379_v19 }
 0x321   :  { %3204 = vmatpush1.bf16.msra.mxu1 %v3674_v30  ;;  %3235 = vmatprep.mubr.bf16.mxu1 %v5381_v20  ;;  %v2303_v20 = vld [vmem:[%s5740_s3 + $0x138] sm:$0xff]  ;;  %v3246_v30 = vld [vmem:[%s5743_s5] sm:$0xff] }
 0x322   :  { %3205 = vmatprep.subr.bf16.mxu1 %v3683_v31  ;;  %v3707_v42 = vcombine.high %v2299_v40, %v2303_v20  ;;  %v3706_v45 = vcombine.low %v2299_v40, %v2303_v20  ;;  %v2397_v31 = vrot.slane %v5670_v29, %v333_v60  ;;  %v3254_v33 = vunpack.c.l.bf16 %v3246_v30 }
 0x325   :  { %3206 = vmatpush1.bf16.msra.mxu1 %v3682_v34 }
 0x326   :  { %3207 = vmatprep.subr.bf16.mxu1 %v3691_v35  ;;  %v3255_v35 = vunpack.c.h.bf16 %v3246_v30 }
 0x329   :  { %3208 = vmatpush1.bf16.msra.mxu1 %v3690_v38 }
 0x32a   :  { %3209 = vmatprep.subr.bf16.mxu1 %v3699_v39 }
 0x32d   :  { %3210 = vmatpush1.bf16.msra.mxu1 %v3698_v41 }
 0x32e   :  { %3211 = vmatprep.subr.bf16.mxu1 %v3707_v42 }
 0x331   :  { %3212 = vmatpush1.bf16.msra.mxu1 %v3706_v45 }
 0x332   :  { %3213 = vmatprep.subr.bf16.mxu1 %v3715_v46 }
 0x335   :  { %3214 = vmatpush1.bf16.msra.mxu1 %v3714_v49 }
 0x336   :  { %3215 = vmatprep.subr.bf16.mxu1 %v3723_v50 }
 0x339   :  { %3216 = vmatpush1.bf16.msra.mxu1 %v3722_v53  ;;  %v2408_v53 = vsub.s32 3, %v5362_v59 }
 0x33a   :  { %3217 = vmatprep.subr.bf16.mxu1 %v3731_v54  ;;  %v3247_v54 = vld [vmem:[%s5743_s5 + $0x8] sm:$0xff] }
 0x33b   :  { %v2409_v56 = vrot.slane %v5670_v29, %v2408_v53  ;;  %v3257_v63 = vunpack.c.h.bf16 %v3247_v54 }
 0x33d   :  { %3218 = vmatpush1.bf16.msra.mxu1 %v3730_v57  ;;  %v3251_v57 = vld [vmem:[%s5743_s5 + $0x28] sm:$0xff] }
 0x33e   :  { %3219 = vmatprep.subr.bf16.mxu1 %v3739_v58  ;;  %v3256_v58 = vunpack.c.l.bf16 %v3247_v54  ;;  %v3264_v2 = vunpack.c.l.bf16 %v3251_v57 }
 0x341   :  { %3220 = vmatpush1.bf16.msra.mxu1 %v3738_v0 }
 0x342   :  { %3221 = vmatprep.subr.bf16.mxu1 %v3747_v1 }
 0x345   :  { %3222 = vmatpush1.bf16.msra.mxu1 %v3746_v4 }
 0x346   :  { %3223 = vmatprep.subr.bf16.mxu1 %v3755_v5  ;;  %v3265_v5 = vunpack.c.h.bf16 %v3251_v57 }
 0x349   :  { %3224 = vmatpush1.bf16.msra.mxu1 %v3754_v8 }
 0x34a   :  { %3225 = vmatprep.subr.bf16.mxu1 %v3763_v9 }
 0x34d   :  { %3226 = vmatpush1.bf16.msra.mxu1 %v3762_v12 }
 0x34e   :  { %3227 = vmatprep.subr.bf16.mxu1 %v3771_v13 }
 0x351   :  { %3228 = vmatpush1.bf16.msra.mxu1 %v3770_v16 }
 0x352   :  { %3229 = vmatprep.subr.bf16.mxu1 %v3779_v17 }
 0x355   :  { %3230 = vmatpush1.bf16.msra.mxu1 %v3778_v22  ;;  %v2416_v22 = vsub.s32 5, %v5362_v59 }
 0x356   :  { %3231 = vmatprep.subr.bf16.mxu1 %v3787_v23  ;;  %v3248_v23 = vld [vmem:[%s5743_s5 + $0x10] sm:$0xff] }
 0x357   :  { %v2417_v25 = vrot.slane %v5670_v29, %v2416_v22  ;;  %v3259_v30 = vunpack.c.h.bf16 %v3248_v23 }
 0x359   :  { %3232 = vmatpush1.bf16.msra.mxu1 %v3786_v26  ;;  %v3252_v26 = vld [vmem:[%s5743_s5 + $0x30] sm:$0xff] }
 0x35a   :  { %3233 = vmatprep.subr.bf16.mxu1 %v3795_v27  ;;  %v3258_v27 = vunpack.c.l.bf16 %v3248_v23 }
 0x35d   :  { %3234 = vmatpush1.bf16.msra.mxu1 %v3794_v28 }
 0x360   :  { %3236 = vmatmul.mubr.bf16.vlgmr.msra.gmra.mrb[16].mxu1 %v5379_v19  ;;  %v3250_v19 = vld [vmem:[%s5743_s5 + $0x20] sm:$0xff] }
 0x361   :  { %v3262_v38 = vunpack.c.l.bf16 %v3250_v19  ;;  %v3263_v20 = vunpack.c.h.bf16 %v3250_v19  ;;  %v3266_v19 = vunpack.c.l.bf16 %v3252_v26 }
 0x373   :  { %v3108_v34 = vpop.f32.mrb[4].mxu1 }
 0x374   :  { %v3109_v36 = vadd.f32 %v3108_v34, %v2397_v31  ;;  %v3110_v37 = vpop.f32.mrb[5].mxu1 }
 0x375   :  { %v3111_v39 = vadd.f32 %v3110_v37, %v2401_v32  ;;  %v3112_v40 = vpop.f32.mrb[6].mxu1 }
 0x376   :  { %v3270_v41 = vadd.f32 %v3254_v33, %v3109_v36  ;;  %v3113_v42 = vadd.f32 %v3112_v40, %v2397_v31  ;;  %v3114_v60 = vpop.f32.mrb[7].mxu1 }
 0x377   :  { %v3271_v43 = vadd.f32 %v3255_v35, %v3111_v39  ;;  %v3115_v44 = vadd.f32 %v3114_v60, %v2401_v32  ;;  %v3267_v35 = vunpack.c.h.bf16 %v3252_v26 }
 0x378   :  { %v3286_v45 = vmax.f32 %v3270_v41, 0.0  ;;  %v3278_v62 = vadd.f32 %v3262_v38, %v3113_v42 }
 0x379   :  { %v3287_v46 = vmax.f32 %v3271_v43, 0.0  ;;  %v3279_v47 = vadd.f32 %v3263_v20, %v3115_v44 }
 0x37a   :  { %v3294_v48 = vmax.f32 %v3278_v62, 0.0 }
 0x37b   :  { %v3804_v49 = vpack.c.bf16 %v3287_v46, %v3286_v45  ;;  %v3295_v50 = vmax.f32 %v3279_v47, 0.0  ;;  %v2420_v46 = vsub.s32 6, %v5362_v59  ;;  %v2424_v47 = vsub.s32 7, %v5362_v59 }
 0x37d   :  { %3350 = vst [vmem:[%s5744_s6] sm:$0xff] %v3804_v49  ;;  %v3808_v51 = vpack.c.bf16 %v3295_v50, %v3294_v48  ;;  %v3249_v48 = vld [vmem:[%s5743_s5 + $0x18] sm:$0xff]  ;;  %v2421_v49 = vrot.slane %v5670_v29, %v2420_v46  ;;  %v2425_v50 = vrot.slane %v5670_v29, %v2424_v47 }
 0x37e   :  { %v3260_v52 = vunpack.c.l.bf16 %v3249_v48  ;;  %v3261_v54 = vunpack.c.h.bf16 %v3249_v48 }
 0x37f   :  { %3354 = vst [vmem:[%s5744_s6 + $0x20] sm:$0xff] %v3808_v51  ;;  %v3253_v51 = vld [vmem:[%s5743_s5 + $0x38] sm:$0xff] }
 0x380   :  { %v3268_v57 = vunpack.c.l.bf16 %v3253_v51 }
 0x3b3   :  { %v3151_v61 = vpop.f32.mrb[8].mxu1 }
 0x3b4   :  { %v3152_v0 = vadd.f32 %v3151_v61, %v2405_v55  ;;  %v3153_v1 = vpop.f32.mrb[9].mxu1  ;;  %v3269_v61 = vunpack.c.h.bf16 %v3253_v51 }
 0x3b5   :  { %v3154_v3 = vadd.f32 %v3153_v1, %v2409_v56  ;;  %v3155_v4 = vpop.f32.mrb[10].mxu1 }
 0x3b6   :  { %v3272_v6 = vadd.f32 %v3256_v58, %v3152_v0  ;;  %v3156_v7 = vadd.f32 %v3155_v4, %v2405_v55  ;;  %v3157_v8 = vpop.f32.mrb[11].mxu1 }
 0x3b7   :  { %v3273_v9 = vadd.f32 %v3257_v63, %v3154_v3  ;;  %v3158_v10 = vadd.f32 %v3157_v8, %v2409_v56 }
 0x3b8   :  { %v3288_v11 = vmax.f32 %v3272_v6, 0.0  ;;  %v3280_v12 = vadd.f32 %v3264_v2, %v3156_v7 }
 0x3b9   :  { %v3289_v13 = vmax.f32 %v3273_v9, 0.0  ;;  %v3281_v14 = vadd.f32 %v3265_v5, %v3158_v10 }
 0x3ba   :  { %v3296_v15 = vmax.f32 %v3280_v12, 0.0 }
 0x3bb   :  { %v3805_v16 = vpack.c.bf16 %v3289_v13, %v3288_v11  ;;  %v3297_v17 = vmax.f32 %v3281_v14, 0.0 }
 0x3bd   :  { %3351 = vst [vmem:[%s5744_s6 + $0x8] sm:$0xff] %v3805_v16  ;;  %v3809_v18 = vpack.c.bf16 %v3297_v17, %v3296_v15 }
 0x3bf   :  { %3355 = vst [vmem:[%s5744_s6 + $0x28] sm:$0xff] %v3809_v18 }
 0x3f3   :  { %v3194_v28 = vpop.f32.mrb[12].mxu1 }
 0x3f4   :  { %v3195_v31 = vadd.f32 %v3194_v28, %v2413_v24  ;;  %v3196_v32 = vpop.f32.mrb[13].mxu1 }
 0x3f5   :  { %v3197_v33 = vadd.f32 %v3196_v32, %v2417_v25  ;;  %v3198_v34 = vpop.f32.mrb[14].mxu1 }
 0x3f6   :  { %v3274_v36 = vadd.f32 %v3258_v27, %v3195_v31  ;;  %v3199_v37 = vadd.f32 %v3198_v34, %v2413_v24  ;;  %v3200_v38 = vpop.f32.mrb[15].mxu1 }
 0x3f7   :  { %v3275_v39 = vadd.f32 %v3259_v30, %v3197_v33  ;;  %v3201_v40 = vadd.f32 %v3200_v38, %v2417_v25 }
 0x3f8   :  { %v3290_v20 = vmax.f32 %v3274_v36, 0.0  ;;  %v3282_v41 = vadd.f32 %v3266_v19, %v3199_v37 }
 0x3f9   :  { %v3291_v42 = vmax.f32 %v3275_v39, 0.0  ;;  %v3283_v60 = vadd.f32 %v3267_v35, %v3201_v40 }
 0x3fa   :  { %v3298_v43 = vmax.f32 %v3282_v41, 0.0 }
 0x3fb   :  { %v3806_v44 = vpack.c.bf16 %v3291_v42, %v3290_v20  ;;  %v3299_v45 = vmax.f32 %v3283_v60, 0.0 }
 0x3fd   :  { %3352 = vst [vmem:[%s5744_s6 + $0x10] sm:$0xff] %v3806_v44  ;;  %v3810_v62 = vpack.c.bf16 %v3299_v45, %v3298_v43 }
 0x3ff   :  { %3356 = vst [vmem:[%s5744_s6 + $0x30] sm:$0xff] %v3810_v62 }
 0x433   :  { %v3237_v53 = vpop.f32.mrb[16].mxu1 }
 0x434   :  { %v3238_v55 = vadd.f32 %v3237_v53, %v2421_v49  ;;  %v3239_v56 = vpop.f32.mrb[17].mxu1 }
 0x435   :  { %v3240_v58 = vadd.f32 %v3239_v56, %v2425_v50  ;;  %v3241_v59 = vpop.f32.mrb[18].mxu1 }
 0x436   :  { %v3276_v63 = vadd.f32 %v3260_v52, %v3238_v55  ;;  %v3242_v0 = vadd.f32 %v3241_v59, %v2421_v49  ;;  %v3243_v1 = vpop.f32.mrb[19].mxu1 }
 0x437   :  { %v3277_v2 = vadd.f32 %v3261_v54, %v3240_v58  ;;  %v3244_v3 = vadd.f32 %v3243_v1, %v2425_v50 }
 0x438   :  { %v3292_v4 = vmax.f32 %v3276_v63, 0.0  ;;  %v3284_v29 = vadd.f32 %v3268_v57, %v3242_v0 }
 0x439   :  { %v3293_v5 = vmax.f32 %v3277_v2, 0.0  ;;  %v3285_v6 = vadd.f32 %v3269_v61, %v3244_v3 }
 0x43a   :  { %v3300_v7 = vmax.f32 %v3284_v29, 0.0 }
 0x43b   :  { %v3807_v8 = vpack.c.bf16 %v3293_v5, %v3292_v4  ;;  %v3301_v9 = vmax.f32 %v3285_v6, 0.0 }
 0x43d   :  { %3353 = vst [vmem:[%s5744_s6 + $0x18] sm:$0xff] %v3807_v8  ;;  %v3811_v10 = vpack.c.bf16 %v3301_v9, %v3300_v7 }
 0x43f   :  { %3357 = vst [vmem:[%s5744_s6 + $0x38] sm:$0xff] %v3811_v10 }

// kernel: _lambda_.61
= control target key start
LH: loop header
LB: loop body
LE: loop exit
PB: predicated region body
PF: predicated region fallthrough
CT: control target
= control target key end

     0   :  { %6 = vsyncpa [#allocation3], 0  ;;  %vm45_vm0 = vcmask 1043456   ;;  %vm263_vm1 = vcmask 1041409   ;;  %vm265_vm2 = vcmask 1043459   ;;  %vm267_vm3 = vcmask 1045509   ;;  %s407_s0 = inlined_call_operand.vmem [shape: bf16[2,4,1024], index: 0, kind: input, shape index: {}]   ;;  %s408_s1 = inlined_call_operand.hbm [shape: f32[2,1024], index: 1, kind: output, shape index: {}]  }
   0x1   :  { %v9_v0 = vld [vmem:[%s407_s0] sm:$0xff]  ;;  %v10_v1 = vld [vmem:[%s407_s0 + $0x8] sm:$0xff]  ;;  %v11_v2 = vld [vmem:[%s407_s0 + $0x10] sm:$0xff]  ;;  %vm269_vm4 = vcmask 1047559  }
   0x2   :  { %v12_v3 = vld [vmem:[%s407_s0 + $0x18] sm:$0xff]  ;;  %v13_v4 = vunpack.c.l.bf16 %v9_v0  ;;  %v14_v5 = vunpack.c.h.bf16 %v9_v0  ;;  %v15_v6 = vunpack.c.l.bf16 %v10_v1  ;;  %v16_v7 = vunpack.c.h.bf16 %v10_v1  ;;  %s323_s0 = smov [#allocation2]  }
   0x3   :  { %v346_v8 = vunpack.c.l.bf16 %v11_v2  ;;  %v348_v9 = vunpack.c.h.bf16 %v11_v2  ;;  %v350_v14 = vunpack.c.l.bf16 %v12_v3  ;;  %v352_v15 = vunpack.c.h.bf16 %v12_v3  ;;  %s288_s14 = sshll.u32 %s323_s0, 4  ;;  %s289_s14 = int_to_ptr.vmem [resolvable:$true] %s288_s14 }
   0x4   :  { %v29_v10 = vcombine.high %v13_v4, %v13_v4  ;;  %v30_v11 = vcombine.high %v14_v5, %v14_v5  ;;  %v31_v12 = vcombine.high %v15_v6, %v15_v6  ;;  %v32_v13 = vcombine.high %v16_v7, %v16_v7  ;;  %s298_s15 = scalar_lea.vmem %s289_s14, 256  ;;  %p303_p1 = scmp.lt.s32.totalorder %s289_s14, %s289_s14 }
   0x5   :  { %v33_v16 = vcombine.high %v346_v8, %v346_v8  ;;  %v34_v17 = vcombine.high %v348_v9, %v348_v9  ;;  %v46_v18 = vsel %vm45_vm0, %v13_v4, 0.0  ;;  %v60_v20 = vsel %vm45_vm0, %v14_v5, 0.0  ;;  %p299_p0 = scmp.ne.s32.totalorder %s289_s14, %s298_s15  ;;  %p304_p2 = scmp.lt.s32.totalorder %s298_s15, %s298_s15 }
   0x6   :  { %v53_v19 = vsel %vm45_vm0, %v29_v10, 0.0  ;;  %v67_v21 = vsel %vm45_vm0, %v30_v11, 0.0  ;;  %v47_v22 = vrot.slane %v46_v18, 4  ;;  %v61_v24 = vrot.slane %v60_v20, 4 }
   0x7   :  { %v54_v23 = vrot.slane %v53_v19, 4  ;;  %v68_v25 = vrot.slane %v67_v21, 4  ;;  %v74_v26 = vsel %vm45_vm0, %v15_v6, 0.0  ;;  %v81_v27 = vsel %vm45_vm0, %v31_v12, 0.0  ;;  %p305_p3 = por %p304_p2, %p303_p1 }
   0x8   :  { %v88_v28 = vsel %vm45_vm0, %v16_v7, 0.0  ;;  %v95_v29 = vsel %vm45_vm0, %v32_v13, 0.0  ;;  %v48_v30 = vadd.f32 %v47_v22, %v46_v18  ;;  %v62_v32 = vadd.f32 %v61_v24, %v60_v20 }
   0x9   :  { %v55_v31 = vadd.f32 %v54_v23, %v53_v19  ;;  %v69_v33 = vadd.f32 %v68_v25, %v67_v21  ;;  %v75_v34 = vrot.slane %v74_v26, 4  ;;  %v82_v35 = vrot.slane %v81_v27, 4  ;;  %p306_p4 = pnand %p305_p3, %p299_p0 }
   0xa   :  { %v89_v36 = vrot.slane %v88_v28, 4  ;;  %v96_v37 = vrot.slane %v95_v29, 4  ;;  %v49_v38 = vrot.slane %v48_v30, 2  ;;  %v63_v40 = vrot.slane %v62_v32, 2 }
   0xb   :  { %v56_v39 = vrot.slane %v55_v31, 2  ;;  %v70_v41 = vrot.slane %v69_v33, 2  ;;  %v76_v42 = vadd.f32 %v75_v34, %v74_v26  ;;  %v83_v43 = vadd.f32 %v82_v35, %v81_v27 }
   0xc   :  { %v90_v44 = vadd.f32 %v89_v36, %v88_v28  ;;  %v97_v45 = vadd.f32 %v96_v37, %v95_v29  ;;  %v50_v46 = vadd.f32 %v49_v38, %v48_v30  ;;  %v64_v48 = vadd.f32 %v63_v40, %v62_v32 }
   0xd   :  { %v57_v47 = vadd.f32 %v56_v39, %v55_v31  ;;  %v71_v49 = vadd.f32 %v70_v41, %v69_v33  ;;  %v77_v50 = vrot.slane %v76_v42, 2  ;;  %v84_v51 = vrot.slane %v83_v43, 2 }
   0xe   :  { %v91_v52 = vrot.slane %v90_v44, 2  ;;  %v98_v53 = vrot.slane %v97_v45, 2  ;;  %v51_v54 = vrot.slane %v50_v46, 1  ;;  %v65_v56 = vrot.slane %v64_v48, 1 }
   0xf   :  { %v58_v55 = vrot.slane %v57_v47, 1  ;;  %v72_v57 = vrot.slane %v71_v49, 1  ;;  %v78_v58 = vadd.f32 %v77_v50, %v76_v42  ;;  %v85_v59 = vadd.f32 %v84_v51, %v83_v43 }
  0x10   :  { %v92_v60 = vadd.f32 %v91_v52, %v90_v44  ;;  %v99_v61 = vadd.f32 %v98_v53, %v97_v45  ;;  %v35_v62 = vcombine.high %v350_v14, %v350_v14  ;;  %v36_v63 = vcombine.high %v352_v15, %v352_v15 }
  0x11   :  { %v370_v0 = vadd.f32 %v51_v54, %v50_v46  ;;  %v195_v1 = vlaneseq  ;;  %v372_v2 = vadd.f32 %v58_v55, %v57_v47  ;;  %v374_v3 = vadd.f32 %v65_v56, %v64_v48 }
  0x12   :  { %v376_v4 = vadd.f32 %v72_v57, %v71_v49  ;;  %v79_v5 = vrot.slane %v78_v58, 1  ;;  %v102_v6 = vsel %vm45_vm0, %v346_v8, 0.0  ;;  %v109_v7 = vsel %vm45_vm0, %v33_v16, 0.0 }
  0x13   :  { %v116_v10 = vsel %vm45_vm0, %v348_v9, 0.0  ;;  %v123_v11 = vsel %vm45_vm0, %v34_v17, 0.0  ;;  %v86_v13 = vrot.slane %v85_v59, 1  ;;  %v93_v18 = vrot.slane %v92_v60, 1 }
  0x14   :  { %v80_v12 = vadd.f32 %v79_v5, %v78_v58  ;;  %v100_v19 = vrot.slane %v99_v61, 1  ;;  %v103_v20 = vrot.slane %v102_v6, 4  ;;  %v110_v21 = vrot.slane %v109_v7, 4 }
  0x15   :  { %v117_v22 = vrot.slane %v116_v10, 4  ;;  %v124_v23 = vrot.slane %v123_v11, 4  ;;  %v130_v24 = vsel %vm45_vm0, %v350_v14, 0.0  ;;  %v137_v8 = vsel %vm45_vm0, %v35_v62, 0.0 }
  0x16   :  { %v144_v16 = vsel %vm45_vm0, %v352_v15, 0.0  ;;  %v151_v9 = vsel %vm45_vm0, %v36_v63, 0.0  ;;  %v104_v25 = vadd.f32 %v103_v20, %v102_v6  ;;  %v111_v17 = vadd.f32 %v110_v21, %v109_v7 }
  0x17   :  { %v118_v26 = vadd.f32 %v117_v22, %v116_v10  ;;  %v125_v27 = vadd.f32 %v124_v23, %v123_v11  ;;  %v131_v28 = vrot.slane %v130_v24, 4  ;;  %v138_v29 = vrot.slane %v137_v8, 4 }
  0x18   :  { %v145_v30 = vrot.slane %v144_v16, 4  ;;  %v152_v31 = vrot.slane %v151_v9, 4  ;;  %v105_v32 = vrot.slane %v104_v25, 2  ;;  %v112_v33 = vrot.slane %v111_v17, 2 }
  0x19   :  { %v119_v34 = vrot.slane %v118_v26, 2  ;;  %v126_v35 = vrot.slane %v125_v27, 2  ;;  %v132_v14 = vadd.f32 %v131_v28, %v130_v24  ;;  %v139_v36 = vadd.f32 %v138_v29, %v137_v8 }
  0x1a   :  { %v146_v37 = vadd.f32 %v145_v30, %v144_v16  ;;  %v153_v38 = vadd.f32 %v152_v31, %v151_v9  ;;  %v106_v39 = vadd.f32 %v105_v32, %v104_v25  ;;  %v113_v15 = vadd.f32 %v112_v33, %v111_v17 }
  0x1b   :  { %v120_v40 = vadd.f32 %v119_v34, %v118_v26  ;;  %v127_v41 = vadd.f32 %v126_v35, %v125_v27  ;;  %v133_v42 = vrot.slane %v132_v14, 2  ;;  %v140_v43 = vrot.slane %v139_v36, 2 }
  0x1c   :  { %v147_v44 = vrot.slane %v146_v37, 2  ;;  %v154_v45 = vrot.slane %v153_v38, 2  ;;  %v107_v46 = vrot.slane %v106_v39, 1  ;;  %v114_v47 = vrot.slane %v113_v15, 1 }
  0x1d   :  { %v121_v48 = vrot.slane %v120_v40, 1  ;;  %v128_v49 = vrot.slane %v127_v41, 1  ;;  %v134_v50 = vadd.f32 %v133_v42, %v132_v14  ;;  %v141_v51 = vadd.f32 %v140_v43, %v139_v36 }
  0x1e   :  { %v148_v52 = vadd.f32 %v147_v44, %v146_v37  ;;  %v155_v53 = vadd.f32 %v154_v45, %v153_v38  ;;  %v87_v54 = vadd.f32 %v86_v13, %v85_v59  ;;  %v94_v55 = vadd.f32 %v93_v18, %v92_v60 }
  0x1f   :  { %v101_v56 = vadd.f32 %v100_v19, %v99_v61  ;;  %v108_v57 = vadd.f32 %v107_v46, %v106_v39  ;;  %v135_v58 = vrot.slane %v134_v50, 1  ;;  %v142_v62 = vrot.slane %v141_v51, 1 }
  0x20   :  { %v149_v63 = vrot.slane %v148_v52, 1  ;;  %v156_v5 = vrot.slane %v155_v53, 1  ;;  %v115_v6 = vadd.f32 %v114_v47, %v113_v15  ;;  %v122_v7 = vadd.f32 %v121_v48, %v120_v40 }
  0x21   :  { %v129_v10 = vadd.f32 %v128_v49, %v127_v41  ;;  %v158_v11 = vmul.f32 0.25, %v370_v0  ;;  %v136_v20 = vadd.f32 %v135_v58, %v134_v50  ;;  %v143_v21 = vadd.f32 %v142_v62, %v141_v51 }
  0x22   :  { %v150_v22 = vadd.f32 %v149_v63, %v148_v52  ;;  %v157_v23 = vadd.f32 %v156_v5, %v155_v53  ;;  %v159_v24 = vmul.f32 0.25, %v372_v2  ;;  %v160_v59 = vmul.f32 0.25, %v374_v3 }
  0x23   :  { %v161_v60 = vmul.f32 0.25, %v376_v4  ;;  %v162_v61 = vmul.f32 0.25, %v80_v12  ;;  %v163_v13 = vmul.f32 0.25, %v87_v54  ;;  %v164_v18 = vmul.f32 0.25, %v94_v55 }
  0x24   :  { %v165_v19 = vmul.f32 0.25, %v101_v56  ;;  %v166_v8 = vmul.f32 0.25, %v108_v57  ;;  %v167_v16 = vmul.f32 0.25, %v115_v6  ;;  %v168_v9 = vmul.f32 0.25, %v122_v7 }
  0x25   :  { %v169_v25 = vmul.f32 0.25, %v129_v10  ;;  %v170_v17 = vmul.f32 0.25, %v136_v20  ;;  %v171_v0 = vmul.f32 0.25, %v143_v21  ;;  %v172_v26 = vmul.f32 0.25, %v150_v22 }
  0x26   :  { %v173_v27 = vmul.f32 0.25, %v157_v23  ;;  %v322_v28 = vmov 1983009808   ;;  %v196_v2 = vshrl.u32 %v195_v1, 7  ;;  %v190_v30 = vcombine.low %v158_v11, %v159_v24 }
  0x27   :  { %v193_v29 = vunpack.c.l.s4 %v322_v28  ;;  %v191_v3 = vcombine.low %v160_v59, %v161_v60  ;;  %v207_v4 = vcombine.low %v162_v61, %v163_v13  ;;  %v208_v12 = vcombine.low %v164_v18, %v165_v19 }
  0x28   :  { %v224_v32 = vcombine.low %v166_v8, %v167_v16  ;;  %v225_v33 = vcombine.low %v168_v9, %v169_v25  ;;  %v241_v34 = vcombine.low %v170_v17, %v171_v0  ;;  %v242_v35 = vcombine.low %v172_v26, %v173_v27 }
  0x29   :  { %v194_v31 = vunpack.c.0.s8 %v193_v29 }
  0x2b   :  { %v197_v14 = vsub.s32 %v194_v31, %v196_v2 }
  0x2d   :  { %v198_v36 = vrot.slane %v190_v30, %v197_v14  ;;  %v205_v37 = vrot.slane %v191_v3, %v197_v14  ;;  %v215_v38 = vrot.slane %v207_v4, %v197_v14  ;;  %v222_v39 = vrot.slane %v208_v12, %v197_v14 }
  0x2e   :  { %v232_v15 = vrot.slane %v224_v32, %v197_v14  ;;  %v239_v40 = vrot.slane %v225_v33, %v197_v14  ;;  %v249_v41 = vrot.slane %v241_v34, %v197_v14  ;;  %v256_v42 = vrot.slane %v242_v35, %v197_v14 }
  0x2f   :  { %v206_v43 = vcombine.low %v198_v36, %v205_v37  ;;  %v223_v1 = vcombine.low %v215_v38, %v222_v39 }
  0x30   :  { %v240_v44 = vcombine.low %v232_v15, %v239_v40  ;;  %v257_v45 = vcombine.low %v249_v41, %v256_v42 }
  0x32   :  { %v262_v46 = vrot.slane %v240_v44, 7  ;;  %v273_v47 = vrot.slane %v257_v45, 7 }
  0x34   :  { %v264_v48 = vsel %vm263_vm1, %v262_v46, %v206_v43  ;;  %v274_v49 = vsel %vm263_vm1, %v273_v47, %v223_v1 }
  0x35   :  { %v266_v50 = vsel %vm265_vm2, %v262_v46, %v264_v48  ;;  %v275_v51 = vsel %vm265_vm2, %v273_v47, %v274_v49 }
  0x36   :  { %v268_v52 = vsel %vm267_vm3, %v262_v46, %v266_v50  ;;  %v276_v53 = vsel %vm267_vm3, %v273_v47, %v275_v51 }
  0x37   :  { %v270_v54 = vsel %vm269_vm4, %v262_v46, %v268_v52  ;;  %v277_v55 = vsel %vm269_vm4, %v273_v47, %v276_v53 }
  0x38   :  { %280 = vst [vmem:[#allocation2] sm:$0xff] %v270_v54  ;;  %281 = vst [vmem:[#allocation2 + $0x8] sm:$0xff] %v277_v55 }
  0x39   :  { %309 = shalt.err (!%p306_p4)
}
  0x3a   :  { %s310_s18 = scalar_lea.hbm %s408_s1, 256 }
  0x3b   :  { %p311_p5 = scmp.ne.s32.totalorder %s408_s1, %s310_s18  ;;  %p314_p6 = scmp.lt.u32.totalorder %s310_s18, %s408_s1 }
  0x3d   :  { %p316_p7 = pnand %p314_p6, %p311_p5 }
  0x3f   :  { %319 = shalt.err (!%p316_p7)
}
  0x40   :  { %291 = dma.vmem_to_hbm [thread:$0]  %s289_s14, 256, %s408_s1, [#allocation3]  }
  0x41   :  { %320 = dma.done.wait [#allocation3], 256  }
  0x42   :  { %321 = vsyncadd [#allocation3], 4294967040 }
  0x43   :  { %295 = vsyncpa [#allocation3], 1 }

</bundles_post_ra>
